<compile_context>
chip_gen: v5e
topology: v5e:2x2
jax: 0.10.0
libtpu: 0.0.40
codegen_flags: <defaults>
</compile_context>

<pallas_src>
from functools import partial

import jax
import jax.numpy as jnp
from jax import lax
from jax.experimental import pallas as pl
from jax.experimental.pallas import tpu as pltpu


# ----------------------------------------------------------------------------
# Fused Bottleneck kernel (one batch-block of whole images per grid step)
# ----------------------------------------------------------------------------
def _bottleneck_kernel(x_ref, w1_ref, s1_ref, b1_ref,
                       w2_ref, s2_ref, b2_ref,
                       w3_ref, s3_ref, b3_ref,
                       o_ref, *, H, W, compute_dtype):
    """Fused 1x1 -> 3x3 -> 1x1 bottleneck with folded BN, residual and ReLU.

    x_ref : (Mtot, Cin)  Mtot = b_blk*H*W flattened pixels (whole images only)
    w1    : (Cin, width)    w2 : (9*width, width)    w3 : (width, Cexp)
    s*/b* : (1, C) folded BN scale / bias (f32), fully VMEM-resident
    o_ref : (Mtot, Cexp)
    """
    M = H * W
    Mtot = x_ref.shape[0]
    x = x_ref[...]                                   # (Mtot, Cin) io dtype

    # ---- conv1 (1x1) + bn1 + relu -------------------------------------------
    y1 = jnp.dot(x.astype(compute_dtype), w1_ref[...],
                 preferred_element_type=jnp.float32)
    y1 = jnp.maximum(y1 * s1_ref[...] + b1_ref[...], 0.0)   # (Mtot, width) f32

    # ---- conv2 (3x3, stride 1, pad 1) + bn2 + relu ---------------------------
    # Each tap (dh, dw) is a constant shift of the flattened pixels by
    # (dh-1)*W + (dw-1): an XLU sublane rotate (pltpu.roll) plus a hoisted
    # iota mask that zeroes out-of-image source pixels (also across the image
    # boundaries inside a batch block, since masks use the per-image index).
    # The 9 taps are concatenated on the lane axis -> ONE matmul with K=9*width.
    r = lax.broadcasted_iota(jnp.int32, (Mtot, 1), 0)        # flattened pixel id
    r_img = r % M                                            # id within its image
    col = r % W                                              # column within row
    row_top = r_img >= W                                     # row h-1 exists
    row_bot = r_img < M - W                                  # row h+1 exists
    col_l = col != 0                                         # col w-1 exists
    col_r = col != W - 1                                     # col w+1 exists

    taps = []
    for dh in range(3):
        for dw in range(3):
            s = (dh - 1) * W + (dw - 1)
            tap = y1 if s == 0 else pltpu.roll(y1, (-s) % Mtot, axis=0)
            mask = None
            if dh == 0:
                mask = row_top
            elif dh == 2:
                mask = row_bot
            if dw == 0:
                mask = col_l if mask is None else jnp.logical_and(mask, col_l)
            elif dw == 2:
                mask = col_r if mask is None else jnp.logical_and(mask, col_r)
            if mask is not None:
                tap = jnp.where(mask, tap, 0.0)
            taps.append(tap)
    tap_cat = jnp.concatenate(taps, axis=-1).astype(compute_dtype)  # (Mtot, 9*width)
    y2 = jnp.dot(tap_cat, w2_ref[...], preferred_element_type=jnp.float32)
    y2 = jnp.maximum(y2 * s2_ref[...] + b2_ref[...], 0.0)    # (Mtot, width) f32

    # ---- conv3 (1x1) + bn3 + residual add + relu -----------------------------
    y3 = jnp.dot(y2.astype(compute_dtype), w3_ref[...],
                 preferred_element_type=jnp.float32)
    y3 = y3 * s3_ref[...] + b3_ref[...] + x.astype(jnp.float32)   # residual in f32
    o_ref[...] = jnp.maximum(y3, 0.0).astype(o_ref.dtype)


# ----------------------------------------------------------------------------
# Wrappers
# ----------------------------------------------------------------------------
def _pick_batch_block(N, M, per_step_bytes, *, target_pixels=512,
                      budget=24 * 2**20):
    """Smallest divisor of N giving >= target pixels per step within budget."""
    divisors = [d for d in range(1, N + 1) if N % d == 0]
    # a non-full leading block dim must stay a multiple of 8 (sublane tiling)
    ok = [d for d in divisors if d == N or (d * M) % 8 == 0]
    b_blk = ok[0]
    for d in ok:
        if d > 1 and per_step_bytes(d) > budget:
            break
        b_blk = d
        if d * M >= target_pixels:
            break
    return b_blk


def bottleneck_forward_nhwc(x_nhwc, params, *, compute_dtype=jnp.bfloat16):
    """Preferred entry point: NHWC in / NHWC out, zero layout passes."""
    (w1, s1, b1), (w2, s2, b2), (w3, s3, b3) = params
    N, H, W, Cin = x_nhwc.shape
    width = w1.shape[1]
    cexp = w3.shape[1]
    assert Cin == cexp, "no-downsample Bottleneck requires inplanes == planes*4"
    M = H * W
    cdt = compute_dtype
    cdt_bytes = jnp.dtype(cdt).itemsize
    # Activations cross the pallas_call boundary in the compute dtype on the
    # bf16 fast path (halves HBM read of x and writeback of out); f32 path
    # keeps f32 I/O for exact validation.
    io_dtype = jnp.bfloat16 if jnp.dtype(cdt) == jnp.dtype(jnp.bfloat16) \
        else x_nhwc.dtype
    io_bytes = jnp.dtype(io_dtype).itemsize

    def per_step_bytes(b):
        mtot = b * M
        return (mtot * (Cin + cexp) * io_bytes * 2          # in/out double-buffered
                + mtot * width * 4 * 2                      # y1, y2 (f32)
                + mtot * 9 * width * (4 + cdt_bytes)        # taps f32 + concat
                + mtot * cexp * 4)                          # y3 (f32)

    b_blk = _pick_batch_block(N, M, per_step_bytes)
    mtot = b_blk * M
    grid = (N // b_blk,)

    weight_bytes = ((Cin * width + 9 * width * width + width * cexp) * cdt_bytes
                    + 6 * max(width, cexp) * 4)
    est = per_step_bytes(b_blk) + weight_bytes
    try:
        vmem_cap = pltpu.get_tpu_info().vmem_capacity_bytes
    except Exception:
        vmem_cap = 64 * 2**20
    vmem_limit = int(min(max(est, 32 * 2**20), int(0.85 * vmem_cap)))

    flops = 2 * N * M * (Cin * width + 9 * width * width + width * cexp)
    bytes_accessed = int(N * M * (Cin + cexp) * io_bytes + weight_bytes)
    cost = pl.CostEstimate(flops=int(flops), transcendentals=0,
                           bytes_accessed=bytes_accessed)

    x2 = x_nhwc.reshape(N * M, Cin).astype(io_dtype)     # contiguous -> free
    w2r = w2.reshape(9 * width, width)                   # K-concatenated weights

    # Grid-invariant operands: whole-array VMEM residency, no block pipeline
    # (avoids double-buffering weights that are fetched once).
    resident = pl.BlockSpec(memory_space=pltpu.MemorySpace.VMEM)

    out = pl.pallas_call(
        partial(_bottleneck_kernel, H=H, W=W, compute_dtype=cdt),
        out_shape=jax.ShapeDtypeStruct((N * M, cexp), io_dtype),
        grid=grid,
        in_specs=[
            pl.BlockSpec((mtot, Cin), lambda n: (n, 0)),
            resident, resident, resident,      # w1, s1, b1
            resident, resident, resident,      # w2, s2, b2
            resident, resident, resident,      # w3, s3, b3
        ],
        out_specs=pl.BlockSpec((mtot, cexp), lambda n: (n, 0)),
        compiler_params=pltpu.CompilerParams(
            dimension_semantics=("parallel",),
            vmem_limit_bytes=vmem_limit),
        cost_estimate=cost,
    )(x2,
      w1.astype(cdt), s1.reshape(1, -1), b1.reshape(1, -1),
      w2r.astype(cdt), s2.reshape(1, -1), b2.reshape(1, -1),
      w3.astype(cdt), s3.reshape(1, -1), b3.reshape(1, -1))
    return out.reshape(N, H, W, cexp)


def bottleneck_forward(x_nchw, params, *, compute_dtype=jnp.bfloat16):
    """PyTorch-layout wrapper (NCHW in / NCHW out)."""
    x = jnp.transpose(x_nchw, (0, 2, 3, 1))        # NCHW -> NHWC (boundary only)
    out = bottleneck_forward_nhwc(x, params, compute_dtype=compute_dtype)
    return jnp.transpose(out, (0, 3, 1, 2)).astype(x_nchw.dtype)


# ----------------------------------------------------------------------------
# Reference (plain JAX) for validation
# ----------------------------------------------------------------------------
def bottleneck_reference(x_nchw, params):
    (w1, s1, b1), (w2, s2, b2), (w3, s3, b3) = params

    def bn(y, s, b):
        return y * s[None, :, None, None] + b[None, :, None, None]

    def conv(x, w_hwio, pad):
        return lax.conv_general_dilated(
            x, w_hwio, window_strides=(1, 1), padding=pad,
            dimension_numbers=("NCHW", "HWIO", "NCHW"))

    w1_hwio = w1[None, None]                               # (1,1,Cin,width)
    w2_hwio = w2.reshape(3, 3, w2.shape[1], w2.shape[2])   # (3,3,width,width)
    w3_hwio = w3[None, None]                               # (1,1,width,Cexp)

    out = jax.nn.relu(bn(conv(x_nchw, w1_hwio, "VALID"), s1, b1))
    out = jax.nn.relu(bn(conv(out, w2_hwio, "SAME"), s2, b2))
    out = bn(conv(out, w3_hwio, "VALID"), s3, b3)
    return jax.nn.relu(out + x_nchw)


# ----------------------------------------------------------------------------
# Parameter init (deterministic, matches module __init__ shapes)
# ----------------------------------------------------------------------------
def init_params(key, inplanes, planes, base_width=64, groups=1):
    expansion = 4
    width = int(planes * (base_width / 64.0)) * groups
    cexp = planes * expansion
    eps = 1e-5
    keys = jax.random.split(key, 9)

    def bn_fold(kg, kb, c):
        gamma = jax.random.normal(kg, (c,), jnp.float32) * 0.1 + 1.0
        beta = jax.random.normal(kb, (c,), jnp.float32) * 0.1
        running_mean = jnp.zeros((c,), jnp.float32)
        running_var = jnp.ones((c,), jnp.float32)
        scale = gamma / jnp.sqrt(running_var + eps)
        bias = beta - running_mean * scale
        return scale, bias

    # weights stored channels-last: 1x1 -> (Cin, Cout); 3x3 -> (9, Cin, Cout)
    w1 = jax.random.normal(keys[0], (inplanes, width), jnp.float32) * 0.1
    w2 = jax.random.normal(keys[1], (9, width, width), jnp.float32) * 0.1
    w3 = jax.random.normal(keys[2], (width, cexp), jnp.float32) * 0.1
    s1, b1 = bn_fold(keys[3], keys[4], width)
    s2, b2 = bn_fold(keys[5], keys[6], width)
    s3, b3 = bn_fold(keys[7], keys[8], cexp)
    return ((w1, s1, b1), (w2, s2, b2), (w3, s3, b3))


# ----------------------------------------------------------------------------
if __name__ == "__main__":
    key = jax.random.PRNGKey(0)
    k_x, k_p = jax.random.split(key)

    N, planes, H, W = 2, 4, 16, 16
    inplanes = planes * 4  # identity add requires inplanes == planes*expansion

    x = jax.random.normal(k_x, (N, inplanes, H, W), jnp.float32)
    params = init_params(k_p, inplanes, planes)

    ref = bottleneck_reference(x, params)

    # Exactness check: f32 compute + f32 I/O vs the XLA reference.
    out_f32 = jax.block_until_ready(
        bottleneck_forward(x, params, compute_dtype=jnp.float32))
    assert out_f32.shape == (N, inplanes, H, W)
    assert jnp.allclose(out_f32, ref, atol=1e-4, rtol=1e-4), "f32 mismatch"

    # Fast path: bf16 MXU inputs AND bf16 activation I/O, f32 accumulation +
    # f32 BN/residual epilogue.
    out_bf16 = jax.block_until_ready(bottleneck_forward(x, params))
    assert out_bf16.shape == (N, inplanes, H, W)
    assert jnp.allclose(out_bf16, ref, atol=5e-2, rtol=5e-2), "bf16 mismatch"

    print("KERNEL_OK")
</pallas_src>

<mosaic_0001>
module attributes {stable_mosaic.version = 11 : i64} {
  func.func @_bottleneck_kernel(%arg0: i32, %arg1: memref<512x16xf32, #tpu.memory_space<vmem>>, %arg2: memref<16x4xf32, #tpu.memory_space<vmem>>, %arg3: memref<1x4xf32, #tpu.memory_space<vmem>>, %arg4: memref<1x4xf32, #tpu.memory_space<vmem>>, %arg5: memref<36x4xf32, #tpu.memory_space<vmem>>, %arg6: memref<1x4xf32, #tpu.memory_space<vmem>>, %arg7: memref<1x4xf32, #tpu.memory_space<vmem>>, %arg8: memref<4x16xf32, #tpu.memory_space<vmem>>, %arg9: memref<1x16xf32, #tpu.memory_space<vmem>>, %arg10: memref<1x16xf32, #tpu.memory_space<vmem>>, %arg11: memref<512x16xf32, #tpu.memory_space<vmem>>) attributes {dimension_semantics = [#tpu.dimension_semantics<parallel>], iteration_bounds = array<i64: 1>, scalar_prefetch = 0 : i64, scratch_operands = 0 : i64, tpu.core_type = #tpu.core_type<tc>, window_params = [{transform_indices = @transform_0, window_bounds = array<i64: 512, 16>}, {pipeline_mode = #tpu.pipeline_mode<synchronous>, transform_indices = @transform_1, window_bounds = array<i64: 16, 4>}, {pipeline_mode = #tpu.pipeline_mode<synchronous>, transform_indices = @transform_2, window_bounds = array<i64: 1, 4>}, {pipeline_mode = #tpu.pipeline_mode<synchronous>, transform_indices = @transform_3, window_bounds = array<i64: 1, 4>}, {pipeline_mode = #tpu.pipeline_mode<synchronous>, transform_indices = @transform_4, window_bounds = array<i64: 36, 4>}, {pipeline_mode = #tpu.pipeline_mode<synchronous>, transform_indices = @transform_5, window_bounds = array<i64: 1, 4>}, {pipeline_mode = #tpu.pipeline_mode<synchronous>, transform_indices = @transform_6, window_bounds = array<i64: 1, 4>}, {pipeline_mode = #tpu.pipeline_mode<synchronous>, transform_indices = @transform_7, window_bounds = array<i64: 4, 16>}, {pipeline_mode = #tpu.pipeline_mode<synchronous>, transform_indices = @transform_8, window_bounds = array<i64: 1, 16>}, {pipeline_mode = #tpu.pipeline_mode<synchronous>, transform_indices = @transform_9, window_bounds = array<i64: 1, 16>}, {transform_indices = @transform_10, window_bounds = array<i64: 512, 16>}]} {
    %c0 = arith.constant 0 : index
    %c0_0 = arith.constant 0 : index
    %0 = vector.load %arg1[%c0, %c0_0] : memref<512x16xf32, #tpu.memory_space<vmem>>, vector<512x16xf32>
    %c0_1 = arith.constant 0 : index
    %c0_2 = arith.constant 0 : index
    %1 = vector.load %arg2[%c0_1, %c0_2] : memref<16x4xf32, #tpu.memory_space<vmem>>, vector<16x4xf32>
    %cst = arith.constant dense<0.000000e+00> : vector<512x4xf32>
    %2 = tpu.matmul %0, %1, %cst {dimension_numbers = #tpu.dot_dimension_numbers<[1], [0], [0], [1], [0, 0, 1, 1], [], []>} : vector<512x16xf32>, vector<16x4xf32>, vector<512x4xf32> -> vector<512x4xf32>
    %c0_3 = arith.constant 0 : index
    %c0_4 = arith.constant 0 : index
    %3 = vector.load %arg3[%c0_3, %c0_4] : memref<1x4xf32, #tpu.memory_space<vmem>>, vector<1x4xf32>
    %4 = vector.broadcast %3 : vector<1x4xf32> to vector<512x4xf32>
    %5 = arith.mulf %2, %4 : vector<512x4xf32>
    %c0_5 = arith.constant 0 : index
    %c0_6 = arith.constant 0 : index
    %6 = vector.load %arg4[%c0_5, %c0_6] : memref<1x4xf32, #tpu.memory_space<vmem>>, vector<1x4xf32>
    %7 = vector.broadcast %6 : vector<1x4xf32> to vector<512x4xf32>
    %8 = arith.addf %5, %7 : vector<512x4xf32>
    %cst_7 = arith.constant 0.000000e+00 : f32
    %9 = vector.broadcast %cst_7 : f32 to vector<512x4xf32>
    %10 = arith.maximumf %8, %9 : vector<512x4xf32>
    %11 = tpu.iota {dimensions = array<i32: 0>} : vector<512x1xi32>
    %c256_i32 = arith.constant 256 : i32
    %c0_i32 = arith.constant 0 : i32
    %12 = arith.cmpi eq, %c256_i32, %c0_i32 : i32
    %c1_i32 = arith.constant 1 : i32
    %13 = arith.select %12, %c1_i32, %c256_i32 : i32
    %14 = vector.broadcast %13 : i32 to vector<512x1xi32>
    %15 = arith.remsi %11, %14 : vector<512x1xi32>
    %c0_i32_8 = arith.constant 0 : i32
    %16 = vector.broadcast %c0_i32_8 : i32 to vector<512x1xi32>
    %17 = arith.cmpi ne, %15, %16 : vector<512x1xi32>
    %c0_i32_9 = arith.constant 0 : i32
    %18 = vector.broadcast %c0_i32_9 : i32 to vector<512x1xi32>
    %19 = arith.cmpi slt, %15, %18 : vector<512x1xi32>
    %c0_i32_10 = arith.constant 0 : i32
    %20 = arith.cmpi slt, %13, %c0_i32_10 : i32
    %21 = vector.broadcast %20 : i1 to vector<512x1xi1>
    %22 = vector.broadcast %21 : vector<512x1xi1> to vector<512x1xi1>
    %23 = arith.xori %19, %22 : vector<512x1xi1>
    %24 = arith.andi %23, %17 : vector<512x1xi1>
    %25 = vector.broadcast %13 : i32 to vector<512x1xi32>
    %26 = arith.addi %15, %25 : vector<512x1xi32>
    %27 = arith.select %24, %26, %15 : vector<512x1xi1>, vector<512x1xi32>
    %c16_i32 = arith.constant 16 : i32
    %c0_i32_11 = arith.constant 0 : i32
    %28 = arith.cmpi eq, %c16_i32, %c0_i32_11 : i32
    %c1_i32_12 = arith.constant 1 : i32
    %29 = arith.select %28, %c1_i32_12, %c16_i32 : i32
    %30 = vector.broadcast %29 : i32 to vector<512x1xi32>
    %31 = arith.remsi %11, %30 : vector<512x1xi32>
    %c0_i32_13 = arith.constant 0 : i32
    %32 = vector.broadcast %c0_i32_13 : i32 to vector<512x1xi32>
    %33 = arith.cmpi ne, %31, %32 : vector<512x1xi32>
    %c0_i32_14 = arith.constant 0 : i32
    %34 = vector.broadcast %c0_i32_14 : i32 to vector<512x1xi32>
    %35 = arith.cmpi slt, %31, %34 : vector<512x1xi32>
    %c0_i32_15 = arith.constant 0 : i32
    %36 = arith.cmpi slt, %29, %c0_i32_15 : i32
    %37 = vector.broadcast %36 : i1 to vector<512x1xi1>
    %38 = vector.broadcast %37 : vector<512x1xi1> to vector<512x1xi1>
    %39 = arith.xori %35, %38 : vector<512x1xi1>
    %40 = arith.andi %39, %33 : vector<512x1xi1>
    %41 = vector.broadcast %29 : i32 to vector<512x1xi32>
    %42 = arith.addi %31, %41 : vector<512x1xi32>
    %43 = arith.select %40, %42, %31 : vector<512x1xi1>, vector<512x1xi32>
    %c16_i32_16 = arith.constant 16 : i32
    %44 = vector.broadcast %c16_i32_16 : i32 to vector<512x1xi32>
    %45 = arith.cmpi sge, %27, %44 : vector<512x1xi32>
    %c240_i32 = arith.constant 240 : i32
    %46 = vector.broadcast %c240_i32 : i32 to vector<512x1xi32>
    %47 = arith.cmpi slt, %27, %46 : vector<512x1xi32>
    %c0_i32_17 = arith.constant 0 : i32
    %48 = vector.broadcast %c0_i32_17 : i32 to vector<512x1xi32>
    %49 = arith.cmpi ne, %43, %48 : vector<512x1xi32>
    %c15_i32 = arith.constant 15 : i32
    %50 = vector.broadcast %c15_i32 : i32 to vector<512x1xi32>
    %51 = arith.cmpi ne, %43, %50 : vector<512x1xi32>
    %c17_i32 = arith.constant 17 : i32
    %52 = tpu.dynamic_rotate %10 by %c17_i32 dim 0 : vector<512x4xf32>, i32 -> vector<512x4xf32>
    %53 = arith.andi %45, %49 : vector<512x1xi1>
    %cst_18 = arith.constant 0.000000e+00 : f32
    %54 = vector.shape_cast %53 : vector<512x1xi1> to vector<512x1xi1>
    %55 = vector.broadcast %54 : vector<512x1xi1> to vector<512x4xi1>
    %56 = vector.broadcast %cst_18 : f32 to vector<512x4xf32>
    %57 = arith.select %55, %52, %56 : vector<512x4xi1>, vector<512x4xf32>
    %c16_i32_19 = arith.constant 16 : i32
    %58 = tpu.dynamic_rotate %10 by %c16_i32_19 dim 0 : vector<512x4xf32>, i32 -> vector<512x4xf32>
    %cst_20 = arith.constant 0.000000e+00 : f32
    %59 = vector.shape_cast %45 : vector<512x1xi1> to vector<512x1xi1>
    %60 = vector.broadcast %59 : vector<512x1xi1> to vector<512x4xi1>
    %61 = vector.broadcast %cst_20 : f32 to vector<512x4xf32>
    %62 = arith.select %60, %58, %61 : vector<512x4xi1>, vector<512x4xf32>
    %c15_i32_21 = arith.constant 15 : i32
    %63 = tpu.dynamic_rotate %10 by %c15_i32_21 dim 0 : vector<512x4xf32>, i32 -> vector<512x4xf32>
    %64 = arith.andi %45, %51 : vector<512x1xi1>
    %cst_22 = arith.constant 0.000000e+00 : f32
    %65 = vector.shape_cast %64 : vector<512x1xi1> to vector<512x1xi1>
    %66 = vector.broadcast %65 : vector<512x1xi1> to vector<512x4xi1>
    %67 = vector.broadcast %cst_22 : f32 to vector<512x4xf32>
    %68 = arith.select %66, %63, %67 : vector<512x4xi1>, vector<512x4xf32>
    %c1_i32_23 = arith.constant 1 : i32
    %69 = tpu.dynamic_rotate %10 by %c1_i32_23 dim 0 : vector<512x4xf32>, i32 -> vector<512x4xf32>
    %cst_24 = arith.constant 0.000000e+00 : f32
    %70 = vector.shape_cast %49 : vector<512x1xi1> to vector<512x1xi1>
    %71 = vector.broadcast %70 : vector<512x1xi1> to vector<512x4xi1>
    %72 = vector.broadcast %cst_24 : f32 to vector<512x4xf32>
    %73 = arith.select %71, %69, %72 : vector<512x4xi1>, vector<512x4xf32>
    %c511_i32 = arith.constant 511 : i32
    %74 = tpu.dynamic_rotate %10 by %c511_i32 dim 0 : vector<512x4xf32>, i32 -> vector<512x4xf32>
    %cst_25 = arith.constant 0.000000e+00 : f32
    %75 = vector.shape_cast %51 : vector<512x1xi1> to vector<512x1xi1>
    %76 = vector.broadcast %75 : vector<512x1xi1> to vector<512x4xi1>
    %77 = vector.broadcast %cst_25 : f32 to vector<512x4xf32>
    %78 = arith.select %76, %74, %77 : vector<512x4xi1>, vector<512x4xf32>
    %c497_i32 = arith.constant 497 : i32
    %79 = tpu.dynamic_rotate %10 by %c497_i32 dim 0 : vector<512x4xf32>, i32 -> vector<512x4xf32>
    %80 = arith.andi %47, %49 : vector<512x1xi1>
    %cst_26 = arith.constant 0.000000e+00 : f32
    %81 = vector.shape_cast %80 : vector<512x1xi1> to vector<512x1xi1>
    %82 = vector.broadcast %81 : vector<512x1xi1> to vector<512x4xi1>
    %83 = vector.broadcast %cst_26 : f32 to vector<512x4xf32>
    %84 = arith.select %82, %79, %83 : vector<512x4xi1>, vector<512x4xf32>
    %c496_i32 = arith.constant 496 : i32
    %85 = tpu.dynamic_rotate %10 by %c496_i32 dim 0 : vector<512x4xf32>, i32 -> vector<512x4xf32>
    %cst_27 = arith.constant 0.000000e+00 : f32
    %86 = vector.shape_cast %47 : vector<512x1xi1> to vector<512x1xi1>
    %87 = vector.broadcast %86 : vector<512x1xi1> to vector<512x4xi1>
    %88 = vector.broadcast %cst_27 : f32 to vector<512x4xf32>
    %89 = arith.select %87, %85, %88 : vector<512x4xi1>, vector<512x4xf32>
    %c495_i32 = arith.constant 495 : i32
    %90 = tpu.dynamic_rotate %10 by %c495_i32 dim 0 : vector<512x4xf32>, i32 -> vector<512x4xf32>
    %91 = arith.andi %47, %51 : vector<512x1xi1>
    %cst_28 = arith.constant 0.000000e+00 : f32
    %92 = vector.shape_cast %91 : vector<512x1xi1> to vector<512x1xi1>
    %93 = vector.broadcast %92 : vector<512x1xi1> to vector<512x4xi1>
    %94 = vector.broadcast %cst_28 : f32 to vector<512x4xf32>
    %95 = arith.select %93, %90, %94 : vector<512x4xi1>, vector<512x4xf32>
    %96 = tpu.concatenate %57, %62, %68, %73, %10, %78, %84, %89, %95 in 1 : vector<512x4xf32>, vector<512x4xf32>, vector<512x4xf32>, vector<512x4xf32>, vector<512x4xf32>, vector<512x4xf32>, vector<512x4xf32>, vector<512x4xf32>, vector<512x4xf32> -> vector<512x36xf32>
    %c0_29 = arith.constant 0 : index
    %c0_30 = arith.constant 0 : index
    %97 = vector.load %arg5[%c0_29, %c0_30] : memref<36x4xf32, #tpu.memory_space<vmem>>, vector<36x4xf32>
    %cst_31 = arith.constant dense<0.000000e+00> : vector<512x4xf32>
    %98 = tpu.matmul %96, %97, %cst_31 {dimension_numbers = #tpu.dot_dimension_numbers<[1], [0], [0], [1], [0, 0, 1, 1], [], []>} : vector<512x36xf32>, vector<36x4xf32>, vector<512x4xf32> -> vector<512x4xf32>
    %c0_32 = arith.constant 0 : index
    %c0_33 = arith.constant 0 : index
    %99 = vector.load %arg6[%c0_32, %c0_33] : memref<1x4xf32, #tpu.memory_space<vmem>>, vector<1x4xf32>
    %100 = vector.broadcast %99 : vector<1x4xf32> to vector<512x4xf32>
    %101 = arith.mulf %98, %100 : vector<512x4xf32>
    %c0_34 = arith.constant 0 : index
    %c0_35 = arith.constant 0 : index
    %102 = vector.load %arg7[%c0_34, %c0_35] : memref<1x4xf32, #tpu.memory_space<vmem>>, vector<1x4xf32>
    %103 = vector.broadcast %102 : vector<1x4xf32> to vector<512x4xf32>
    %104 = arith.addf %101, %103 : vector<512x4xf32>
    %cst_36 = arith.constant 0.000000e+00 : f32
    %105 = vector.broadcast %cst_36 : f32 to vector<512x4xf32>
    %106 = arith.maximumf %104, %105 : vector<512x4xf32>
    %c0_37 = arith.constant 0 : index
    %c0_38 = arith.constant 0 : index
    %107 = vector.load %arg8[%c0_37, %c0_38] : memref<4x16xf32, #tpu.memory_space<vmem>>, vector<4x16xf32>
    %cst_39 = arith.constant dense<0.000000e+00> : vector<512x16xf32>
    %108 = tpu.matmul %106, %107, %cst_39 {dimension_numbers = #tpu.dot_dimension_numbers<[1], [0], [0], [1], [0, 0, 1, 1], [], []>} : vector<512x4xf32>, vector<4x16xf32>, vector<512x16xf32> -> vector<512x16xf32>
    %c0_40 = arith.constant 0 : index
    %c0_41 = arith.constant 0 : index
    %109 = vector.load %arg9[%c0_40, %c0_41] : memref<1x16xf32, #tpu.memory_space<vmem>>, vector<1x16xf32>
    %110 = vector.broadcast %109 : vector<1x16xf32> to vector<512x16xf32>
    %111 = arith.mulf %108, %110 : vector<512x16xf32>
    %c0_42 = arith.constant 0 : index
    %c0_43 = arith.constant 0 : index
    %112 = vector.load %arg10[%c0_42, %c0_43] : memref<1x16xf32, #tpu.memory_space<vmem>>, vector<1x16xf32>
    %113 = vector.broadcast %112 : vector<1x16xf32> to vector<512x16xf32>
    %114 = arith.addf %111, %113 : vector<512x16xf32>
    %115 = arith.addf %114, %0 : vector<512x16xf32>
    %cst_44 = arith.constant 0.000000e+00 : f32
    %116 = vector.broadcast %cst_44 : f32 to vector<512x16xf32>
    %117 = arith.maximumf %115, %116 : vector<512x16xf32>
    %c0_45 = arith.constant 0 : index
    %c0_46 = arith.constant 0 : index
    %118 = vector.load %arg11[%c0_45, %c0_46] : memref<512x16xf32, #tpu.memory_space<vmem>>, vector<512x16xf32>
    tpu.vector_store %arg11[%c0_45, %c0_46], %117 {strides = array<i32>} : memref<512x16xf32, #tpu.memory_space<vmem>>, vector<512x16xf32>,
    return
  }
  func.func @transform_0(%arg0: i32) -> (i32, i32) {
    %c0_i32 = arith.constant 0 : i32
    %c0_i32_0 = arith.constant 0 : i32
    return %arg0, %c0_i32 : i32, i32
  }
  func.func @transform_1(%arg0: i32) -> (i32, i32) {
    %c0_i32 = arith.constant 0 : i32
    %c0_i32_0 = arith.constant 0 : i32
    %c0_i32_1 = arith.constant 0 : i32
    return %c0_i32, %c0_i32_0 : i32, i32
  }
  func.func @transform_2(%arg0: i32) -> (i32, i32) {
    %c0_i32 = arith.constant 0 : i32
    %c0_i32_0 = arith.constant 0 : i32
    %c0_i32_1 = arith.constant 0 : i32
    return %c0_i32, %c0_i32_0 : i32, i32
  }
  func.func @transform_3(%arg0: i32) -> (i32, i32) {
    %c0_i32 = arith.constant 0 : i32
    %c0_i32_0 = arith.constant 0 : i32
    %c0_i32_1 = arith.constant 0 : i32
    return %c0_i32, %c0_i32_0 : i32, i32
  }
  func.func @transform_4(%arg0: i32) -> (i32, i32) {
    %c0_i32 = arith.constant 0 : i32
    %c0_i32_0 = arith.constant 0 : i32
    %c0_i32_1 = arith.constant 0 : i32
    return %c0_i32, %c0_i32_0 : i32, i32
  }
  func.func @transform_5(%arg0: i32) -> (i32, i32) {
    %c0_i32 = arith.constant 0 : i32
    %c0_i32_0 = arith.constant 0 : i32
    %c0_i32_1 = arith.constant 0 : i32
    return %c0_i32, %c0_i32_0 : i32, i32
  }
  func.func @transform_6(%arg0: i32) -> (i32, i32) {
    %c0_i32 = arith.constant 0 : i32
    %c0_i32_0 = arith.constant 0 : i32
    %c0_i32_1 = arith.constant 0 : i32
    return %c0_i32, %c0_i32_0 : i32, i32
  }
  func.func @transform_7(%arg0: i32) -> (i32, i32) {
    %c0_i32 = arith.constant 0 : i32
    %c0_i32_0 = arith.constant 0 : i32
    %c0_i32_1 = arith.constant 0 : i32
    return %c0_i32, %c0_i32_0 : i32, i32
  }
  func.func @transform_8(%arg0: i32) -> (i32, i32) {
    %c0_i32 = arith.constant 0 : i32
    %c0_i32_0 = arith.constant 0 : i32
    %c0_i32_1 = arith.constant 0 : i32
    return %c0_i32, %c0_i32_0 : i32, i32
  }
  func.func @transform_9(%arg0: i32) -> (i32, i32) {
    %c0_i32 = arith.constant 0 : i32
    %c0_i32_0 = arith.constant 0 : i32
    %c0_i32_1 = arith.constant 0 : i32
    return %c0_i32, %c0_i32_0 : i32, i32
  }
  func.func @transform_10(%arg0: i32) -> (i32, i32) {
    %c0_i32 = arith.constant 0 : i32
    %c0_i32_0 = arith.constant 0 : i32
    return %arg0, %c0_i32 : i32, i32
  }
}

</mosaic_0001>

<bundles_post_ra>
// kernel: tpu_custom_call.1
= control target key start
LH: loop header
LB: loop body
LE: loop exit
PB: predicated region body
PF: predicated region fallthrough
CT: control target
= control target key end

     0   :  { %vm15169_vm0 = vcmask 130048   ;;  %v15140_v24 = vmov 0.0   ;;  %s8859_s19 = smov 4   ;;  %s8860_s23 = smov 8   ;;  %v703_v42 = vlaneseq  ;;  %s15128_s1 = inlined_call_operand.vmem [shape: f32[16,4], index: 1, kind: input, shape index: {}]   ;;  %s15129_s0 = inlined_call_operand.vmem [shape: f32[512,16], index: 0, kind: input, shape index: {}]   ;;  %s15130_s2 = inlined_call_operand.vmem [shape: f32[1,4], index: 2, kind: input, shape index: {}]   ;;  %s15131_s3 = inlined_call_operand.vmem [shape: f32[1,4], index: 3, kind: input, shape index: {}]   ;;  %s15132_s4 = inlined_call_operand.vmem [shape: f32[36,4], index: 4, kind: input, shape index: {}]   ;;  %s15133_s5 = inlined_call_operand.vmem [shape: f32[1,4], index: 5, kind: input, shape index: {}]   ;;  %s15134_s6 = inlined_call_operand.vmem [shape: f32[1,4], index: 6, kind: input, shape index: {}]   ;;  %s15135_s7 = inlined_call_operand.vmem [shape: f32[4,16], index: 7, kind: input, shape index: {}]   ;;  %s15136_s8 = inlined_call_operand.vmem [shape: f32[1,16], index: 8, kind: input, shape index: {}]   ;;  %s15137_s9 = inlined_call_operand.vmem [shape: f32[1,16], index: 9, kind: input, shape index: {}]   ;;  %s15138_s10 = inlined_call_operand.vmem [shape: f32[512,16], index: 10, kind: output, shape index: {}]  }
   0x1   :  { %v100_v0 = vld [vmem:[%s15128_s1 + $0x8] sm:$0xff]  ;;  %v99_v1 = vld [vmem:[%s15128_s1] sm:$0xff]  ;;  %v85_v5 = vld [vmem:[%s15129_s0 + $0x190] sm:$0xff]  ;;  %8737 = vrot.lane.b32.xlu0 %v15140_v24, %s8859_s19  ;;  %s8861_s25 = smov 16   ;;  %s8862_s30 = smov 12  }
   0x2   :  { %308 = vmatpush.msra.mxu0 %v100_v0  ;;  %8719 = vmatpush.msra.mxu3 %v100_v0  ;;  %v35_v2 = vld [vmem:[%s15129_s0] sm:$0xff]  ;;  %v84_v3 = vld [vmem:[%s15129_s0 + $0x188] sm:$0xff]  ;;  %v37_v6 = vld [vmem:[%s15129_s0 + $0x10] sm:$0xff]  ;;  %v9088_v48 = vshrl.u32 %v703_v42, 7 }
   0x3   :  { %v36_v4 = vld [vmem:[%s15129_s0 + $0x8] sm:$0xff]  ;;  %v86_v7 = vld [vmem:[%s15129_s0 + $0x198] sm:$0xff]  ;;  %v87_v9 = vld [vmem:[%s15129_s0 + $0x1a0] sm:$0xff]  ;;  %8747 = vrot.lane.b32.xlu2 %v15140_v24, %s8860_s23 }
   0x4   :  { %309 = vmatpush.msra.mxu0 %v99_v1  ;;  %8720 = vmatpush.msra.mxu3 %v99_v1  ;;  %v38_v8 = vld [vmem:[%s15129_s0 + $0x18] sm:$0xff]  ;;  %v39_v10 = vld [vmem:[%s15129_s0 + $0x20] sm:$0xff]  ;;  %v88_v11 = vld [vmem:[%s15129_s0 + $0x1a8] sm:$0xff]  ;;  %15744 = vst [vmem:[#allocation3_spill] sm:$0xff] %v9088_v48  ;;  %v756_v52 = vadd.s32 416, %v9088_v48  ;;  %vm15183_vm1 = vcmp.lt.s32.totalorder %v9088_v48, 1 }
   0x5   :  { %8525 = vmatmul.msk.f32.vlgmr.msra.gmra.mxu0 %vm15169_vm0, %v35_v2  ;;  %8574 = vmatmul.msk.f32.vlgmr.msra.gmra.mxu3 %vm15169_vm0, %v84_v3  ;;  %v40_v12 = vld [vmem:[%s15129_s0 + $0x28] sm:$0xff]  ;;  %v89_v13 = vld [vmem:[%s15129_s0 + $0x1b0] sm:$0xff]  ;;  %v90_v15 = vld [vmem:[%s15129_s0 + $0x1b8] sm:$0xff]  ;;  %v708_v59 = vadd.s32 32, %v9088_v48  ;;  %vm15154_vm2 = vcmp.lt.s32.totalorder %v9088_v48, 7  ;;  %v755_v3 = vadd.s32 408, %v9088_v48 }
   0x6   :  { %v41_v14 = vld [vmem:[%s15129_s0 + $0x30] sm:$0xff]  ;;  %v42_v16 = vld [vmem:[%s15129_s0 + $0x38] sm:$0xff]  ;;  %v91_v17 = vld [vmem:[%s15129_s0 + $0x1c0] sm:$0xff]  ;;  %8742 = vrot.lane.b32.xlu1 %v15140_v24, %s8859_s19  ;;  %v1904_v63 = vand.u32 15, %v756_v52 }
   0x7   :  { %v43_v18 = vld [vmem:[%s15129_s0 + $0x40] sm:$0xff]  ;;  %v92_v19 = vld [vmem:[%s15129_s0 + $0x1c8] sm:$0xff]  ;;  %v93_v21 = vld [vmem:[%s15129_s0 + $0x1d0] sm:$0xff] }
   0x8   :  { %v44_v20 = vld [vmem:[%s15129_s0 + $0x48] sm:$0xff]  ;;  %v45_v22 = vld [vmem:[%s15129_s0 + $0x50] sm:$0xff]  ;;  %v94_v23 = vld [vmem:[%s15129_s0 + $0x1d8] sm:$0xff]  ;;  %vm9133_vm3 = vcmp.ne.s32.totalorder %v1904_v63, 0 }
   0x9   :  { %v46_v25 = vld [vmem:[%s15129_s0 + $0x58] sm:$0xff]  ;;  %v95_v26 = vld [vmem:[%s15129_s0 + $0x1e0] sm:$0xff]  ;;  %8752 = vrot.lane.b32.xlu0 %v15140_v24, %s8860_s23  ;;  %v96_v28 = vld [vmem:[%s15129_s0 + $0x1e8] sm:$0xff]  ;;  %v15799_v24 = vmov 0 }
   0xa   :  { %v47_v27 = vld [vmem:[%s15129_s0 + $0x60] sm:$0xff]  ;;  %v48_v29 = vld [vmem:[%s15129_s0 + $0x68] sm:$0xff]  ;;  %v97_v30 = vld [vmem:[%s15129_s0 + $0x1f0] sm:$0xff] }
   0xb   :  { %v49_v31 = vld [vmem:[%s15129_s0 + $0x70] sm:$0xff]  ;;  %v98_v32 = vld [vmem:[%s15129_s0 + $0x1f8] sm:$0xff]  ;;  %v9063_v34 = vld [vmem:[%s15130_s2] ss:$0 sm:$0xff] }
   0xc   :  { %v50_v33 = vld [vmem:[%s15129_s0 + $0x78] sm:$0xff]  ;;  %v9068_v35 = vld [vmem:[%s15131_s3] ss:$0 sm:$0xff]  ;;  %v52_v45 = vld [vmem:[%s15129_s0 + $0x88] sm:$0xff] }
   0xd   :  { %8526 = vmatmul.msk.f32.gmra.mxu0 %vm15169_vm0, %v36_v4  ;;  %8575 = vmatmul.msk.f32.gmra.mxu3 %vm15169_vm0, %v85_v5  ;;  %v51_v37 = vld [vmem:[%s15129_s0 + $0x80] sm:$0xff]  ;;  %v53_v58 = vld [vmem:[%s15129_s0 + $0x90] sm:$0xff]  ;;  %v1568_v5 = vand.u32 15, %v708_v59  ;;  %v15768_v59 = vmov 0 }
   0xe   :  { %v55_v42 = vld [vmem:[%s15129_s0 + $0xa0] sm:$0xff] }
   0xf   :  { %vm9160_vm4 = vcmp.ne.s32.totalorder %v1568_v5, 0 }
  0x15   :  { %8527 = vmatmul.msk.f32.gmra.mxu0 %vm15169_vm0, %v37_v6  ;;  %8576 = vmatmul.msk.f32.gmra.mxu3 %vm15169_vm0, %v86_v7 }
  0x1d   :  { %8528 = vmatmul.msk.f32.gmra.mxu0 %vm15169_vm0, %v38_v8  ;;  %8577 = vmatmul.msk.f32.gmra.mxu3 %vm15169_vm0, %v87_v9  ;;  %v15749_v9 = vmov 0 }
  0x1e   :  { %v15750_v9 = vsel %vm9133_vm3, 4294967295, %v15749_v9 }
  0x1f   :  { %15751 = vst [vmem:[#allocation8_spill] sm:$0xff] %v15750_v9  ;;  %v759_v9 = vadd.s32 440, %v9088_v48 }
  0x25   :  { %8529 = vmatmul.msk.f32.gmra.mxu0 %vm15169_vm0, %v39_v10  ;;  %8578 = vmatmul.msk.f32.gmra.mxu3 %vm15169_vm0, %v88_v11 }
  0x2d   :  { %8530 = vmatmul.msk.f32.gmra.mxu0 %vm15169_vm0, %v40_v12  ;;  %8579 = vmatmul.msk.f32.gmra.mxu3 %vm15169_vm0, %v89_v13  ;;  %v1897_v12 = vand.u32 15, %v755_v3 }
  0x2f   :  { %vm9179_vm5 = vcmp.ne.s32.totalorder %v1897_v12, 15 }
  0x35   :  { %8531 = vmatmul.msk.f32.gmra.mxu0 %vm15169_vm0, %v41_v14  ;;  %8580 = vmatmul.msk.f32.gmra.mxu3 %vm15169_vm0, %v90_v15 }
  0x3d   :  { %8532 = vmatmul.msk.f32.gmra.mxu0 %vm15169_vm0, %v42_v16  ;;  %8581 = vmatmul.msk.f32.gmra.mxu3 %vm15169_vm0, %v91_v17  ;;  %v54_v16 = vld [vmem:[%s15129_s0 + $0x98] sm:$0xff] }
  0x45   :  { %8533 = vmatmul.msk.f32.gmra.mxu0 %vm15169_vm0, %v43_v18  ;;  %8582 = vmatmul.msk.f32.gmra.mxu3 %vm15169_vm0, %v92_v19  ;;  %v15754_v18 = vmov 0 }
  0x46   :  { %v15755_v18 = vsel %vm9160_vm4, 4294967295, %v15754_v18 }
  0x47   :  { %15756 = vst [vmem:[#allocation11_spill] sm:$0xff] %v15755_v18 }
  0x4d   :  { %8534 = vmatmul.msk.f32.gmra.mxu0 %vm15169_vm0, %v44_v20  ;;  %8583 = vmatmul.msk.f32.gmra.mxu3 %vm15169_vm0, %v93_v21 }
  0x55   :  { %8535 = vmatmul.msk.f32.gmra.mxu0 %vm15169_vm0, %v45_v22  ;;  %8584 = vmatmul.msk.f32.gmra.mxu3 %vm15169_vm0, %v94_v23 }
  0x5d   :  { %8536 = vmatmul.msk.f32.gmra.mxu0 %vm15169_vm0, %v46_v25  ;;  %8585 = vmatmul.msk.f32.gmra.mxu3 %vm15169_vm0, %v95_v26  ;;  %v15758_v25 = vmov 0 }
  0x5e   :  { %v15759_v25 = vsel %vm9179_vm5, 4294967295, %v15758_v25 }
  0x5f   :  { %15760 = vst [vmem:[#allocation13_spill] sm:$0xff] %v15759_v25 }
  0x65   :  { %8537 = vmatmul.msk.f32.gmra.mxu0 %vm15169_vm0, %v47_v27  ;;  %8586 = vmatmul.msk.f32.gmra.mxu3 %vm15169_vm0, %v96_v28  ;;  %v754_v27 = vadd.s32 400, %v9088_v48 }
  0x6d   :  { %8538 = vmatmul.msk.f32.gmra.mxu0 %vm15169_vm0, %v48_v29  ;;  %8587 = vmatmul.msk.f32.gmra.mxu3 %vm15169_vm0, %v97_v30  ;;  %v758_v30 = vadd.s32 432, %v9088_v48 }
  0x75   :  { %8539 = vmatmul.msk.f32.gmra.mxu0 %vm15169_vm0, %v49_v31  ;;  %8588 = vmatmul.msk.f32.gmra.mxu3 %vm15169_vm0, %v98_v32 }
  0x7d   :  { %8540 = vmatmul.msk.f32.gmra.mxu0 %vm15169_vm0, %v50_v33 }
  0x82   :  { %v311_v36 = vpop.f32.mrf.mxu0 }
  0x83   :  { %v507_v38 = vmul.f32 %v9063_v34, %v311_v36  ;;  %v707_v36 = vadd.s32 24, %v9088_v48 }
  0x85   :  { %v575_v39 = vadd.f32 %v9068_v35, %v507_v38  ;;  %8541 = vmatmul.msk.f32.gmra.mxu0 %vm15169_vm0, %v51_v37  ;;  %v1890_v38 = vand.u32 15, %v754_v27  ;;  %v1561_v52 = vand.u32 15, %v707_v36  ;;  %v15776_v36 = vmov 0 }
  0x87   :  { %v9076_v40 = vmax.f32 %v575_v39, 0.0  ;;  %vm9224_vm6 = vcmp.ne.s32.totalorder %v1890_v38, 0  ;;  %vm9243_vm8 = vcmp.ne.s32.totalorder %v1561_v52, 15 }
  0x88   :  { %v458_v41 = vpop.f32.mrf.mxu3 }
  0x89   :  { %15743 = vst [vmem:[#allocation2_spill] sm:$0xff] %v9076_v40  ;;  %v556_v43 = vmul.f32 %v9063_v34, %v458_v41  ;;  %4678 = vrot.lane.b32.xlu0 %v9076_v40, %s8859_s19  ;;  %5442 = vrot.lane.b32.xlu2 %v9076_v40, %s8861_s25  ;;  %v15144_v55 = vrot.slane %v9076_v40, 7  ;;  %v15139_v4 = vrot.slane %v9076_v40, 1 }
  0x8a   :  { %v314_v44 = vpop.f32.mrf.mxu0 }
  0x8b   :  { %v624_v46 = vadd.f32 %v9068_v35, %v556_v43  ;;  %v508_v47 = vmul.f32 %v9063_v34, %v314_v44  ;;  %v1918_v43 = vand.u32 15, %v758_v30  ;;  %v710_v44 = vadd.s32 48, %v9088_v48 }
  0x8d   :  { %v9090_v49 = vmax.f32 %v624_v46, 0.0  ;;  %v576_v50 = vadd.f32 %v9068_v35, %v508_v47  ;;  %8542 = vmatmul.msk.f32.gmra.mxu0 %vm15169_vm0, %v52_v45  ;;  %v705_v45 = vadd.s32 8, %v9088_v48  ;;  %vm9229_vm7 = vcmp.ne.s32.totalorder %v1918_v43, 0 }
  0x8e   :  { %v15769_v59 = vsel %vm9229_vm7, 4294967295, %v15768_v59  ;;  %v15782_v43 = vmov 0 }
  0x8f   :  { %15745 = vst [vmem:[#allocation4_spill] sm:$0xff] %v9090_v49  ;;  %v9094_v51 = vmax.f32 %v576_v50, 0.0  ;;  %4776 = vrot.lane.b32.xlu1 %v9090_v49, %s8859_s19  ;;  %v15142_v7 = vrot.slane %v9090_v49, 7  ;;  %v15143_v22 = vrot.slane %v9090_v49, 1 }
  0x90   :  { %v461_v53 = vpop.f32.mrf.mxu3  ;;  %15770 = vst [vmem:[#allocation19_spill] sm:$0xff] %v15769_v59 }
  0x91   :  { %v557_v54 = vmul.f32 %v9063_v34, %v461_v53  ;;  %5444 = vrot.lane.b32.xlu0 %v9094_v51, %s8861_s25  ;;  %v2561_v56 = vrot.slane %v9094_v51, 7  ;;  %v3138_v0 = vrot.slane %v9094_v51, 1  ;;  %v706_v53 = vadd.s32 16, %v9088_v48 }
  0x92   :  { %v317_v57 = vpop.f32.mrf.mxu0 }
  0x93   :  { %v625_v60 = vadd.f32 %v9068_v35, %v557_v54  ;;  %v509_v61 = vmul.f32 %v9063_v34, %v317_v57  ;;  %v9115_v62 = vsel %vm15183_vm1, %v15144_v55, %v2561_v56  ;;  %v9143_v11 = vsel %vm15154_vm2, %v15139_v4, %v3138_v0 }
  0x94   :  { %15746 = vst [vmem:[#allocation5_spill] sm:$0xff] %v9115_v62  ;;  %5188 = vrot.lane.b32.xlu2 %v9115_v62, %s8862_s30  ;;  %v15765_v57 = vmov 0  ;;  %v709_v4 = vadd.s32 40, %v9088_v48  ;;  %v15809_v55 = vmov 0 }
  0x95   :  { %v9120_v1 = vmax.f32 %v625_v60, 0.0  ;;  %v577_v2 = vadd.f32 %v9068_v35, %v509_v61  ;;  %8543 = vmatmul.msk.f32.gmra.mxu0 %vm15169_vm0, %v53_v58  ;;  %15752 = vst [vmem:[#allocation9_spill] sm:$0xff] %v9143_v11  ;;  %v15766_v57 = vsel %vm9224_vm6, 4294967295, %v15765_v57  ;;  %v1582_v60 = vand.u32 15, %v710_v44 }
  0x96   :  { %15767 = vst [vmem:[#allocation18_spill] sm:$0xff] %v15766_v57  ;;  %v1547_v61 = vand.u32 15, %v705_v45 }
  0x97   :  { %15747 = vst [vmem:[#allocation6_spill] sm:$0xff] %v9120_v1  ;;  %v9127_v6 = vmax.f32 %v577_v2, 0.0  ;;  %4680 = vrot.lane.b32.xlu1 %v9094_v51, %s8859_s19  ;;  %v2610_v8 = vrot.slane %v9120_v1, 7  ;;  %v3187_v13 = vrot.slane %v9120_v1, 1  ;;  %vm9264_vm9 = vcmp.ne.s32.totalorder %v1582_v60, 0 }
  0x98   :  { %v464_v10 = vpop.f32.mrf.mxu3  ;;  %v15777_v36 = vsel %vm9264_vm9, 4294967295, %v15776_v36  ;;  %vm9289_vm10 = vcmp.ne.s32.totalorder %v1547_v61, 15 }
  0x99   :  { %15748 = vst [vmem:[#allocation7_spill] sm:$0xff] %v9127_v6  ;;  %4934 = vrot.lane.b32.xlu0 %v9143_v11, %s8860_s23  ;;  %v9154_v14 = vsel %vm15183_vm1, %v15142_v7, %v2610_v8  ;;  %v2562_v17 = vrot.slane %v9127_v6, 7  ;;  %v558_v20 = vmul.f32 %v9063_v34, %v464_v10  ;;  %v9189_v26 = vsel %vm15154_vm2, %v15143_v22, %v3187_v13 }
  0x9a   :  { %15753 = vst [vmem:[#allocation10_spill] sm:$0xff] %v9154_v14  ;;  %v320_v15 = vpop.f32.mrf.mxu0  ;;  %v3509_v33 = vsel %vm9179_vm5, %v9189_v26, 0.0  ;;  %v3139_v58 = vrot.slane %v9127_v6, 1  ;;  %v3700_v12 = vsel %vm9224_vm6, %v9154_v14, 0.0  ;;  %v15783_v43 = vsel %vm9289_vm10, 4294967295, %v15782_v43 }
  0x9b   :  { %v510_v21 = vmul.f32 %v9063_v34, %v320_v15  ;;  %v9176_v23 = vsel %vm15183_vm1, %v2561_v56, %v2562_v17  ;;  %15761 = vst [vmem:[#allocation14_spill] sm:$0xff] %v9189_v26  ;;  %v626_v31 = vadd.f32 %v9068_v35, %v558_v20  ;;  %v15772_v15 = vmov 0 }
  0x9c   :  { %4778 = vrot.lane.b32.xlu2 %v9120_v1, %s8859_s19  ;;  %15757 = vst [vmem:[#allocation12_spill] sm:$0xff] %v9176_v23  ;;  %v15773_v15 = vsel %vm9243_vm8, 4294967295, %v15772_v15  ;;  %v9275_v38 = vsel %vm15154_vm2, %v3138_v0, %v3139_v58  ;;  %v15828_v26 = vmov 0  ;;  %v15836_v14 = vmov 0 }
  0x9d   :  { %8544 = vmatmul.msk.f32.gmra.mxu0 %vm15169_vm0, %v54_v16  ;;  %v578_v29 = vadd.f32 %v9068_v35, %v510_v21  ;;  %v9213_v46 = vmax.f32 %v626_v31, 0.0  ;;  %15774 = vst [vmem:[#allocation21_spill] sm:$0xff] %v15773_v15  ;;  %v1554_v16 = vand.u32 15, %v706_v53  ;;  %v56_v31 = vld [vmem:[%s15129_s0 + $0xa8] sm:$0xff]  ;;  %v3461_v52 = vsel %vm9243_vm8, %v9275_v38, 0.0 }
  0x9e   :  { %15778 = vst [vmem:[#allocation23_spill] sm:$0xff] %v15777_v36  ;;  %vm15843_vm6 = vcmask 130048  }
  0x9f   :  { %4682 = vrot.lane.b32.xlu1 %v9127_v6, %s8859_s19  ;;  %v9206_v39 = vmax.f32 %v578_v29, 0.0  ;;  %15763 = vst [vmem:[#allocation16_spill] sm:$0xff] %v9213_v46  ;;  %v2611_v2 = vrot.slane %v9213_v46, 7  ;;  %v3188_v21 = vrot.slane %v9213_v46, 1  ;;  %vm9311_vm11 = vcmp.ne.s32.totalorder %v1554_v16, 0 }
  0xa0   :  { %v467_v32 = vpop.f32.mrf.mxu3  ;;  %15779 = vst [vmem:[#allocation24_spill] sm:$0xff] %v9275_v38  ;;  %v3652_v61 = vsel %vm9311_vm11, %v9176_v23, 0.0 }
  0xa1   :  { %v559_v37 = vmul.f32 %v9063_v34, %v467_v32  ;;  %5032 = vrot.lane.b32.xlu0 %v3509_v33, %s8860_s23  ;;  %15762 = vst [vmem:[#allocation15_spill] sm:$0xff] %v9206_v39  ;;  %v3140_v20 = vrot.slane %v9206_v39, 1  ;;  %v2563_v32 = vrot.slane %v9206_v39, 7 }
  0xa2   :  { %v323_v41 = vpop.f32.mrf.mxu0  ;;  %15784 = vst [vmem:[#allocation27_spill] sm:$0xff] %v15783_v43 }
  0xa3   :  { %v627_v47 = vadd.f32 %v9068_v35, %v559_v37  ;;  %v511_v50 = vmul.f32 %v9063_v34, %v323_v41 }
  0xa4   :  { %4684 = vrot.lane.b32.xlu2 %v9206_v39, %s8859_s19 }
  0xa5   :  { %v9220_v54 = vmax.f32 %v627_v47, 0.0  ;;  %v579_v56 = vadd.f32 %v9068_v35, %v511_v50  ;;  %8545 = vmatmul.msk.f32.gmra.mxu0 %vm15169_vm0, %v55_v42  ;;  %v15786_v47 = vmov 0 }
  0xa6   :  { %v15787_v47 = vsel %vm9311_vm11, 4294967295, %v15786_v47 }
  0xa7   :  { %15764 = vst [vmem:[#allocation17_spill] sm:$0xff] %v9220_v54  ;;  %v9233_v63 = vmax.f32 %v579_v56, 0.0  ;;  %5446 = vrot.lane.b32.xlu1 %v9127_v6, %s8861_s25  ;;  %v3189_v3 = vrot.slane %v9220_v54, 1  ;;  %v15151_v5 = vrot.slane %v9220_v54, 7 }
  0xa8   :  { %v470_v10 = vpop.f32.mrf.mxu3  ;;  %15788 = vst [vmem:[#allocation29_spill] sm:$0xff] %v15787_v47 }
  0xa9   :  { %15771 = vst [vmem:[#allocation20_spill] sm:$0xff] %v9233_v63  ;;  %5286 = vrot.lane.b32.xlu0 %v3700_v12, %s8862_s30  ;;  %v3141_v27 = vrot.slane %v9233_v63, 1  ;;  %v9257_v29 = vsel %vm15183_vm1, %v2611_v2, %v15151_v5  ;;  %v15149_v33 = vrot.slane %v9233_v63, 7  ;;  %v9287_v42 = vsel %vm15154_vm2, %v3188_v21, %v3189_v3 }
  0xaa   :  { %15775 = vst [vmem:[#allocation22_spill] sm:$0xff] %v9257_v29  ;;  %v326_v30 = vpop.f32.mrf.mxu0  ;;  %v560_v56 = vmul.f32 %v9063_v34, %v470_v10  ;;  %v9338_v10 = vsel %vm15154_vm2, %v3139_v58, %v3140_v20  ;;  %v9354_v58 = vsel %vm15154_vm2, %v3187_v13, %v3188_v21 }
  0xab   :  { %v9281_v41 = vsel %vm15154_vm2, %v3140_v20, %v3141_v27  ;;  %15781 = vst [vmem:[#allocation26_spill] sm:$0xff] %v9287_v42  ;;  %v9301_v51 = vsel %vm15183_vm1, %v2563_v32, %v15149_v33  ;;  %v512_v45 = vmul.f32 %v9063_v34, %v326_v30  ;;  %v711_v33 = vadd.s32 56, %v9088_v48 }
  0xac   :  { %15780 = vst [vmem:[#allocation25_spill] sm:$0xff] %v9281_v41  ;;  %5448 = vrot.lane.b32.xlu2 %v9206_v39, %s8861_s25  ;;  %v628_v37 = vadd.f32 %v9068_v35, %v560_v56  ;;  %v1575_v56 = vand.u32 15, %v709_v4  ;;  %v58_v4 = vld [vmem:[%s15129_s0 + $0xb8] sm:$0xff] }
  0xad   :  { %15785 = vst [vmem:[#allocation28_spill] sm:$0xff] %v9301_v51  ;;  %8546 = vmatmul.msk.f32.gmra.mxu0 %vm15169_vm0, %v56_v31  ;;  %v580_v12 = vadd.f32 %v9068_v35, %v512_v45  ;;  %v57_v31 = vld [vmem:[%s15129_s0 + $0xb0] sm:$0xff] }
  0xae   :  { %15789 = vst [vmem:[#allocation30_spill] sm:$0xff] %v9338_v10  ;;  %vm9374_vm12 = vcmp.ne.s32.totalorder %v1575_v56, 15 }
  0xaf   :  { %4936 = vrot.lane.b32.xlu1 %v3461_v52, %s8860_s23  ;;  %15791 = vst [vmem:[#allocation32_spill] sm:$0xff] %v9354_v58 }
  0xb0   :  { %v473_v60 = vpop.f32.mrf.mxu3 }
  0xb1   :  { %v561_v16 = vmul.f32 %v9063_v34, %v473_v60  ;;  %5190 = vrot.lane.b32.xlu0 %v3652_v61, %s8862_s30  ;;  %v712_v60 = vadd.s32 64, %v9088_v48  ;;  %v9346_v61 = vmax.f32 %v580_v12, 0.0 }
  0xb2   :  { %v329_v30 = vpop.f32.mrf.mxu0 }
  0xb3   :  { %v513_v52 = vmul.f32 %v9063_v34, %v329_v30  ;;  %v629_v45 = vadd.f32 %v9068_v35, %v561_v16  ;;  %15790 = vst [vmem:[#allocation31_spill] sm:$0xff] %v9346_v61  ;;  %v1596_v16 = vand.u32 15, %v712_v60  ;;  %v9360_v30 = vmax.f32 %v628_v37, 0.0 }
  0xb4   :  { %4938 = vrot.lane.b32.xlu2 %v9338_v10, %s8860_s23  ;;  %v760_v37 = vadd.s32 448, %v9088_v48  ;;  %v3142_v60 = vrot.slane %v9346_v61, 1 }
  0xb5   :  { %v581_v19 = vadd.f32 %v9068_v35, %v513_v52  ;;  %8547 = vmatmul.msk.f32.gmra.mxu0 %vm15169_vm0, %v57_v31  ;;  %15793 = vst [vmem:[#allocation34_spill] sm:$0xff] %v9360_v30  ;;  %v9362_v12 = vmax.f32 %v629_v45, 0.0  ;;  %v757_v52 = vadd.s32 424, %v9088_v48  ;;  %v15150_v31 = vrot.slane %v9346_v61, 7 }
  0xb6   :  { %v15795_v45 = vmov 0  ;;  %vm9387_vm13 = vcmp.ne.s32.totalorder %v1596_v16, 0  ;;  %v2613_v50 = vrot.slane %v9360_v30, 7  ;;  %v3190_v0 = vrot.slane %v9360_v30, 1 }
  0xb7   :  { %v9356_v20 = vmax.f32 %v581_v19, 0.0  ;;  %5034 = vrot.lane.b32.xlu1 %v9354_v58, %s8860_s23  ;;  %15794 = vst [vmem:[#allocation35_spill] sm:$0xff] %v9362_v12  ;;  %v15796_v45 = vsel %vm9374_vm12, 4294967295, %v15795_v45  ;;  %v15800_v24 = vsel %vm9387_vm13, 4294967295, %v15799_v24  ;;  %v1911_v56 = vand.u32 15, %v757_v52 }
  0xb8   :  { %15797 = vst [vmem:[#allocation36_spill] sm:$0xff] %v15796_v45  ;;  %v15147_v28 = vrot.slane %v9362_v12, 1  ;;  %v15146_v44 = vrot.slane %v9362_v12, 7  ;;  %v1932_v7 = vand.u32 15, %v760_v37  ;;  %v9410_v52 = vsel %vm15183_vm1, %v2610_v8, %v2611_v2 }
  0xb9   :  { %15792 = vst [vmem:[#allocation33_spill] sm:$0xff] %v9356_v20  ;;  %4780 = vrot.lane.b32.xlu0 %v9213_v46, %s8859_s19  ;;  %v15148_v13 = vrot.slane %v9356_v20, 1  ;;  %v15145_v19 = vrot.slane %v9356_v20, 7  ;;  %v15806_v2 = vmov 0  ;;  %vm9436_vm15 = vcmp.ne.s32.totalorder %v1911_v56, 15  ;;  %v59_v56 = vld [vmem:[%s15129_s0 + $0xc0] sm:$0xff] }
  0xba   :  { %v332_v21 = vpop.f32.mrf.mxu0  ;;  %15801 = vst [vmem:[#allocation38_spill] sm:$0xff] %v15800_v24  ;;  %v9419_v22 = vsel %vm15183_vm1, %v2613_v50, %v15146_v44  ;;  %v9430_v8 = vsel %vm15154_vm2, %v3190_v0, %v15147_v28  ;;  %vm9432_vm14 = vcmp.ne.s32.totalorder %v1932_v7, 0  ;;  %v15810_v55 = vsel %vm9436_vm15, 4294967295, %v15809_v55  ;;  %v476_v7 = vpop.f32.mrf.mxu3  ;;  %v61_v28 = vld [vmem:[%s15129_s0 + $0xd0] sm:$0xff] }
  0xbb   :  { %v9385_v53 = vsel %vm15183_vm1, %v15150_v31, %v15145_v19  ;;  %v9402_v16 = vsel %vm15154_vm2, %v3142_v60, %v15148_v13  ;;  %15803 = vst [vmem:[#allocation40_spill] sm:$0xff] %v9410_v52  ;;  %v15807_v2 = vsel %vm9432_vm14, 4294967295, %v15806_v2  ;;  %v3511_v19 = vsel %vm9436_vm15, %v9287_v42, 0.0 }
  0xbc   :  { %15798 = vst [vmem:[#allocation37_spill] sm:$0xff] %v9385_v53  ;;  %4686 = vrot.lane.b32.xlu2 %v9233_v63, %s8859_s19  ;;  %v9476_v37 = vsel %vm15183_vm1, %v2562_v17, %v2563_v32  ;;  %v9494_v17 = vsel %vm15154_vm2, %v3189_v3, %v3190_v0  ;;  %v514_v3 = vmul.f32 %v9063_v34, %v332_v21  ;;  %v15815_v21 = vrot.slane %v9220_v54, 7 }
  0xbd   :  { %8548 = vmatmul.msk.f32.gmra.mxu0 %vm15169_vm0, %v58_v4  ;;  %15802 = vst [vmem:[#allocation39_spill] sm:$0xff] %v9402_v16  ;;  %v3463_v4 = vsel %vm9374_vm12, %v9281_v41, 0.0  ;;  %v9517_v5 = vsel %vm15154_vm2, %v3141_v27, %v3142_v60  ;;  %v1589_v27 = vand.u32 15, %v711_v33  ;;  %v15852_v18 = vrot.slane %v9356_v20, 1 }
  0xbe   :  { %15804 = vst [vmem:[#allocation41_spill] sm:$0xff] %v9419_v22  ;;  %vm15866_vm15 = vcmp.lt.s32.totalorder %v9088_v48, 1 }
  0xbf   :  { %5288 = vrot.lane.b32.xlu1 %v9410_v52, %s8862_s30  ;;  %15805 = vst [vmem:[#allocation42_spill] sm:$0xff] %v9430_v8  ;;  %vm9550_vm2 = vcmp.ne.s32.totalorder %v1589_v27, 15  ;;  %v15826_v27 = vrot.slane %v9233_v63, 7 }
  0xc0   :  { %15808 = vst [vmem:[#allocation43_spill] sm:$0xff] %v15807_v2 }
  0xc1   :  { %15811 = vst [vmem:[#allocation44_spill] sm:$0xff] %v15810_v55  ;;  %4940 = vrot.lane.b32.xlu0 %v3463_v4, %s8860_s23 }
  0xc2   :  { %v335_v44 = vpop.f32.mrf.mxu0  ;;  %15812 = vst [vmem:[#allocation45_spill] sm:$0xff] %v9476_v37  ;;  %v479_v13 = vpop.f32.mrf.mxu3 }
  0xc3   :  { %15813 = vst [vmem:[#allocation46_spill] sm:$0xff] %v9494_v17  ;;  %v515_v0 = vmul.f32 %v9063_v34, %v335_v44  ;;  %v563_v31 = vmul.f32 %v9063_v34, %v479_v13  ;;  %v582_v44 = vadd.f32 %v9068_v35, %v514_v3 }
  0xc4   :  { %5036 = vrot.lane.b32.xlu2 %v3511_v19, %s8860_s23  ;;  %v60_v19 = vld [vmem:[%s15129_s0 + $0xc8] sm:$0xff]  ;;  %15814 = vst [vmem:[#allocation47_spill] sm:$0xff] %v9517_v5 }
  0xc5   :  { %8549 = vmatmul.msk.f32.gmra.mxu0 %vm15169_vm0, %v59_v56  ;;  %v3702_v56 = vsel %vm9133_vm3, %v9257_v29, 0.0  ;;  %v583_v13 = vadd.f32 %v9068_v35, %v515_v0  ;;  %v631_v60 = vadd.f32 %v9068_v35, %v563_v31  ;;  %v9545_v3 = vmax.f32 %v582_v44, 0.0 }
  0xc6   :  { %v15821_v31 = vmov 0  ;;  %v714_v0 = vadd.s32 80, %v9088_v48 }
  0xc7   :  { %5192 = vrot.lane.b32.xlu1 %v9476_v37, %s8862_s30  ;;  %15819 = vst [vmem:[#allocation51_spill] sm:$0xff] %v9545_v3  ;;  %v9547_v33 = vmax.f32 %v583_v13, 0.0  ;;  %v15822_v31 = vsel %vm9550_vm2, 4294967295, %v15821_v31  ;;  %v9555_v25 = vmax.f32 %v631_v60, 0.0  ;;  %v762_v13 = vadd.s32 464, %v9088_v48 }
  0xc8   :  { %15823 = vst [vmem:[#allocation53_spill] sm:$0xff] %v15822_v31  ;;  %v3465_v60 = vsel %vm9550_vm2, %v9402_v16, 0.0  ;;  %v1610_v52 = vand.u32 15, %v714_v0 }
  0xc9   :  { %4688 = vrot.lane.b32.xlu0 %v9346_v61, %s8859_s19  ;;  %15820 = vst [vmem:[#allocation52_spill] sm:$0xff] %v9547_v33  ;;  %v15182_v57 = vrot.slane %v9555_v25, 7  ;;  %v1946_v42 = vand.u32 15, %v762_v13  ;;  %v15833_v29 = vrot.slane %v9547_v33, 7  ;;  %v15844_v0 = vrot.slane %v9547_v33, 1 }
  0xca   :  { %v338_v4 = vpop.f32.mrf.mxu0  ;;  %15824 = vst [vmem:[#allocation54_spill] sm:$0xff] %v9555_v25  ;;  %vm9612_vm5 = vcmp.ne.s32.totalorder %v1610_v52, 0  ;;  %v15900_v24 = vrot.slane %v9547_v33, 1 }
  0xcb   :  { %vm9605_vm3 = vcmp.ne.s32.totalorder %v1946_v42, 0  ;;  %v15848_v42 = vrot.slane %v9555_v25, 1 }
  0xcc   :  { %5290 = vrot.lane.b32.xlu2 %v3702_v56, %s8862_s30  ;;  %v562_v56 = vmul.f32 %v9063_v34, %v476_v7  ;;  %v15837_v14 = vsel %vm9605_vm3, 4294967295, %v15836_v14 }
  0xcd   :  { %8550 = vmatmul.msk.f32.gmra.mxu0 %vm15169_vm0, %v60_v19  ;;  %v3654_v19 = vsel %vm9160_vm4, %v9301_v51, 0.0  ;;  %15838 = vst [vmem:[#allocation59_spill] sm:$0xff] %v15837_v14  ;;  %vm16027_vm4 = vcmask 130048  }
  0xce   :  { %v630_v7 = vadd.f32 %v9068_v35, %v562_v56  ;;  %v9536_v56 = vpop.permute.xlu2 %8747 }
  0xcf   :  { %4782 = vrot.lane.b32.xlu1 %v9220_v54, %s8859_s19  ;;  %15817 = vst [vmem:[#allocation49_spill] sm:$0xff] %v9536_v56  ;;  %v16401_v54 = vmov 0 }
  0xd1   :  { %5038 = vrot.lane.b32.xlu0 %v9494_v17, %s8860_s23  ;;  %v15825_v17 = vrot.slane %v9346_v61, 7 }
  0xd2   :  { %v341_v32 = vpop.f32.mrf.mxu0 }
  0xd4   :  { %5194 = vrot.lane.b32.xlu2 %v3654_v19, %s8862_s30  ;;  %v62_v19 = vld [vmem:[%s15129_s0 + $0xd8] sm:$0xff] }
  0xd5   :  { %8551 = vmatmul.msk.f32.gmra.mxu0 %vm15169_vm0, %v61_v28  ;;  %v9526_v28 = vsel %vm15183_vm1, %v15815_v21, %v2613_v50  ;;  %v9539_v50 = vmax.f32 %v630_v7, 0.0  ;;  %v482_v7 = vpop.f32.mrf.mxu3 }
  0xd6   :  { %15816 = vst [vmem:[#allocation48_spill] sm:$0xff] %v9526_v28 }
  0xd7   :  { %4942 = vrot.lane.b32.xlu1 %v9517_v5, %s8860_s23  ;;  %15818 = vst [vmem:[#allocation50_spill] sm:$0xff] %v9539_v50  ;;  %v15831_v44 = vrot.slane %v9539_v50, 7 }
  0xd9   :  { %5292 = vrot.lane.b32.xlu0 %v9526_v28, %s8862_s30  ;;  %v1925_v28 = vand.u32 15, %v759_v9  ;;  %v3144_v9 = vrot.slane %v9545_v3, 1  ;;  %v9593_v13 = vsel %vm15183_vm1, %v15831_v44, %v15182_v57  ;;  %v3192_v57 = vrot.slane %v9539_v50, 1 }
  0xda   :  { %v9541_v21 = vpop.f32.mrf.mxu0  ;;  %15832 = vst [vmem:[#allocation57_spill] sm:$0xff] %v9593_v13 }
  0xdc   :  { %4784 = vrot.lane.b32.xlu2 %v9360_v30, %s8859_s19 }
  0xdd   :  { %8552 = vmatmul.msk.f32.gmra.mxu0 %vm15169_vm0, %v62_v19  ;;  %v9567_v19 = vsel %vm15183_vm1, %v15826_v27, %v15825_v17  ;;  %v516_v17 = vmul.f32 %v9063_v34, %v338_v4  ;;  %v63_v27 = vld [vmem:[%s15129_s0 + $0xe0] sm:$0xff]  ;;  %vm9582_vm0 = vcmp.ne.s32.totalorder %v1925_v28, 15  ;;  %v517_v4 = vmul.f32 %v9063_v34, %v341_v32  ;;  %v485_v56 = vpop.f32.mrf.mxu3 }
  0xde   :  { %15827 = vst [vmem:[#allocation55_spill] sm:$0xff] %v9567_v19  ;;  %v15829_v26 = vsel %vm9582_vm0, 4294967295, %v15828_v26  ;;  %v15834_v28 = vrot.slane %v9545_v3, 7  ;;  %v15840_v32 = vmov 0  ;;  %v3513_v52 = vsel %vm9582_vm0, %v9430_v8, 0.0 }
  0xdf   :  { %4690 = vrot.lane.b32.xlu1 %v9356_v20, %s8859_s19  ;;  %15830 = vst [vmem:[#allocation56_spill] sm:$0xff] %v15829_v26  ;;  %v15841_v32 = vsel %vm9612_vm5, 4294967295, %v15840_v32  ;;  %v585_v62 = vadd.f32 %v9068_v35, %v517_v4  ;;  %v64_v4 = vld [vmem:[%s15129_s0 + $0xe8] sm:$0xff] }
  0xe0   :  { %v9603_v58 = vsel %vm15183_vm1, %v15834_v28, %v15833_v29  ;;  %15842 = vst [vmem:[#allocation61_spill] sm:$0xff] %v15841_v32  ;;  %vm15845_vm1 = vcmp.lt.s32.totalorder %v9088_v48, 7  ;;  %v584_v28 = vadd.f32 %v9068_v35, %v516_v17 }
  0xe1   :  { %5196 = vrot.lane.b32.xlu0 %v9567_v19, %s8862_s30  ;;  %15835 = vst [vmem:[#allocation58_spill] sm:$0xff] %v9603_v58  ;;  %v9622_v29 = vsel %vm15845_vm1, %v3144_v9, %v15844_v0  ;;  %v9638_v0 = vpop.permute.xlu0 %8737 }
  0xe2   :  { %15846 = vst [vmem:[#allocation62_spill] sm:$0xff] %v9622_v29 }
  0xe3   :  { %v9610_v44 = vpop.permute.xlu2 %5442  ;;  %15847 = vst [vmem:[#allocation63_spill] sm:$0xff] %v9638_v0  ;;  %v3704_v0 = vsel %vm9229_vm7, %v9419_v22, 0.0 }
  0xe4   :  { %4944 = vrot.lane.b32.xlu2 %v3465_v60, %s8860_s23  ;;  %15839 = vst [vmem:[#allocation60_spill] sm:$0xff] %v9610_v44  ;;  %v9627_v60 = vpop.f32.mrf.mxu0  ;;  %v9644_v44 = vsel %vm15845_vm1, %v3192_v57, %v15848_v42  ;;  %v564_v42 = vmul.f32 %v9063_v34, %v482_v7  ;;  %v9672_v7 = vmax.f32 %v584_v28, 0.0 }
  0xe5   :  { %8553 = vmatmul.msk.f32.gmra.mxu0 %vm15843_vm6, %v63_v27  ;;  %15849 = vst [vmem:[#allocation64_spill] sm:$0xff] %v9644_v44  ;;  %v565_v27 = vmul.f32 %v9063_v34, %v485_v56  ;;  %v9674_v56 = vmax.f32 %v585_v62, 0.0 }
  0xe6   :  { %15850 = vst [vmem:[#allocation65_spill] sm:$0xff] %v9672_v7  ;;  %v632_v55 = vadd.f32 %v9068_v35, %v564_v42  ;;  %v9693_v42 = vsel %vm15845_vm1, %v15852_v18, %v3144_v9  ;;  %v65_v18 = vld [vmem:[%s15129_s0 + $0xf0] sm:$0xff]  ;;  %v15865_v22 = vrot.slane %v9672_v7, 7 }
  0xe7   :  { %5040 = vrot.lane.b32.xlu1 %v3513_v52, %s8860_s23  ;;  %v713_v52 = vadd.s32 72, %v9088_v48  ;;  %v633_v8 = vadd.f32 %v9068_v35, %v565_v27  ;;  %15853 = vst [vmem:[#allocation67_spill] sm:$0xff] %v9693_v42  ;;  %v15205_v27 = vrot.slane %v9672_v7, 1 }
  0xe8   :  { %v9698_v19 = vmax.f32 %v632_v55, 0.0 }
  0xe9   :  { %4786 = vrot.lane.b32.xlu0 %v9362_v12, %s8859_s19  ;;  %v1603_v28 = vand.u32 15, %v713_v52  ;;  %v9700_v59 = vmax.f32 %v633_v8, 0.0  ;;  %v15859_v8 = vrot.slane %v9362_v12, 1  ;;  %v761_v52 = vadd.s32 456, %v9088_v48 }
  0xea   :  { %15854 = vst [vmem:[#allocation68_spill] sm:$0xff] %v9698_v19 }
  0xeb   :  { %15855 = vst [vmem:[#allocation69_spill] sm:$0xff] %v9700_v59  ;;  %v9722_v9 = vsel %vm15845_vm1, %v15859_v8, %v3192_v57  ;;  %vm9725_vm7 = vcmp.ne.s32.totalorder %v1603_v28, 15  ;;  %v3656_v28 = vsel %vm9264_vm9, %v9385_v53, 0.0  ;;  %v1939_v8 = vand.u32 15, %v761_v52 }
  0xec   :  { %4692 = vrot.lane.b32.xlu2 %v9545_v3, %s8859_s19  ;;  %v9687_v62 = vpop.f32.mrf.mxu0  ;;  %15860 = vst [vmem:[#allocation72_spill] sm:$0xff] %v9722_v9  ;;  %v15874_v57 = vrot.slane %v9698_v19, 7 }
  0xed   :  { %8554 = vmatmul.msk.f32.gmra.mxu0 %vm15843_vm6, %v64_v4  ;;  %v15204_v4 = vrot.slane %v9674_v56, 1  ;;  %vm15857_vm6 = vmmov %vm15845_vm1 }
  0xee   :  { %v9681_v17 = vpop.permute.xlu2 %5188 }
  0xef   :  { %15851 = vst [vmem:[#allocation66_spill] sm:$0xff] %v9681_v17  ;;  %5294 = vrot.lane.b32.xlu1 %v3704_v0, %s8862_s30  ;;  %v9704_v0 = vpop.permute.xlu0 %8752  ;;  %v9716_v55 = vsel %vm15857_vm6, %v15205_v27, %v15204_v4  ;;  %v15861_v17 = vmov 0  ;;  %vm15868_vm6 = vcmask 130048   ;;  %v15210_v27 = vrot.slane %v9700_v59, 1 }
  0xf0   :  { %15856 = vst [vmem:[#allocation70_spill] sm:$0xff] %v9704_v0  ;;  %v15862_v17 = vsel %vm9725_vm7, 4294967295, %v15861_v17  ;;  %v15864_v0 = vrot.slane %v9674_v56, 7 }
  0xf1   :  { %4946 = vrot.lane.b32.xlu0 %v9693_v42, %s8860_s23  ;;  %15858 = vst [vmem:[#allocation71_spill] sm:$0xff] %v9716_v55 }
  0xf2   :  { %15863 = vst [vmem:[#allocation73_spill] sm:$0xff] %v15862_v17  ;;  %v9735_v4 = vsel %vm15866_vm15, %v15865_v22, %v15864_v0  ;;  %v15213_v0 = vrot.slane %v9700_v59, 7  ;;  %vm15872_vm15 = vmmov %vm15845_vm1  ;;  %vm15875_vm1 = vcmp.lt.s32.totalorder %v9088_v48, 1 }
  0xf3   :  { %15867 = vst [vmem:[#allocation74_spill] sm:$0xff] %v9735_v4 }
  0xf4   :  { %5042 = vrot.lane.b32.xlu2 %v9722_v9, %s8860_s23  ;;  %v9759_v9 = vpop.permute.xlu1 %8742  ;;  %v9779_v52 = vpop.f32.mrf.mxu0 }
  0xf5   :  { %8555 = vmatmul.msk.f32.gmra.mxu0 %vm15868_vm6, %v65_v18  ;;  %15870 = vst [vmem:[#allocation76_spill] sm:$0xff] %v9759_v9  ;;  %v9775_v18 = vsel %vm15875_vm1, %v15874_v57, %v15213_v0  ;;  %vm15880_vm6 = vmmov %vm15875_vm1  ;;  %v15882_v57 = vmov 0  ;;  %vm15885_vm1 = vcmask 130048   ;;  %v15890_v0 = vrot.slane %v9356_v20, 7 }
  0xf6   :  { %v9748_v39 = vpop.permute.xlu2 %4778  ;;  %15876 = vst [vmem:[#allocation78_spill] sm:$0xff] %v9775_v18 }
  0xf7   :  { %15869 = vst [vmem:[#allocation75_spill] sm:$0xff] %v9748_v39  ;;  %5198 = vrot.lane.b32.xlu1 %v3656_v28, %s8862_s30  ;;  %v15871_v39 = vrot.slane %v9698_v19, 1  ;;  %v66_v28 = vld [vmem:[%s15129_s0 + $0xf8] sm:$0xff] }
  0xf9   :  { %v9767_v22 = vsel %vm15872_vm15, %v15871_v39, %v15210_v27  ;;  %4694 = vrot.lane.b32.xlu0 %v9547_v33, %s8859_s19  ;;  %v15878_v39 = vrot.slane %v9539_v50, 7  ;;  %v15879_v27 = vrot.slane %v9362_v12, 7  ;;  %vm9794_vm15 = vcmp.ne.s32.totalorder %v1939_v8, 15 }
  0xfa   :  { %15873 = vst [vmem:[#allocation77_spill] sm:$0xff] %v9767_v22  ;;  %v15883_v57 = vsel %vm9794_vm15, 4294967295, %v15882_v57 }
  0xfb   :  { %v9784_v9 = vpop.permute.xlu0 %4678  ;;  %v9792_v36 = vsel %vm15880_vm6, %v15879_v27, %v15878_v39  ;;  %15884 = vst [vmem:[#allocation81_spill] sm:$0xff] %v15883_v57  ;;  %v3515_v27 = vsel %vm9794_vm15, %v9644_v44, 0.0  ;;  %v67_v39 = vld [vmem:[%s15129_s0 + $0x100] sm:$0xff]  ;;  %v3467_v44 = vsel %vm9725_vm7, %v9622_v29, 0.0  ;;  %v15924_v29 = vrot.slane %v9698_v19, 7 }
  0xfc   :  { %15877 = vst [vmem:[#allocation79_spill] sm:$0xff] %v9784_v9  ;;  %5296 = vrot.lane.b32.xlu2 %v9792_v36, %s8862_s30  ;;  %v9830_v26 = vpop.f32.mrf.mxu0 }
  0xfd   :  { %15881 = vst [vmem:[#allocation80_spill] sm:$0xff] %v9792_v36  ;;  %8556 = vmatmul.msk.f32.gmra.mxu0 %vm15885_vm1, %v66_v28  ;;  %v15889_v28 = vrot.slane %v9545_v3, 7  ;;  %v519_v36 = vmul.f32 %v9063_v34, %v9627_v60 }
  0xfe   :  { %v9807_v53 = vpop.permute.xlu2 %4684 }
  0xff   :  { %15886 = vst [vmem:[#allocation82_spill] sm:$0xff] %v9807_v53  ;;  %4788 = vrot.lane.b32.xlu1 %v9539_v50, %s8859_s19  ;;  %v9828_v57 = vsel %vm15880_vm6, %v15890_v0, %v15889_v28  ;;  %v3706_v0 = vsel %vm9432_vm14, %v9593_v13, 0.0  ;;  %v518_v28 = vmul.f32 %v9063_v34, %v9541_v21  ;;  %v587_v21 = vadd.f32 %v9068_v35, %v519_v36  ;;  %vm15895_vm6 = vmmov %vm15885_vm1 }
 0x100   :  { %15891 = vst [vmem:[#allocation85_spill] sm:$0xff] %v9828_v57  ;;  %vm15926_vm14 = vcmp.lt.s32.totalorder %v9088_v48, 1 }
 0x101   :  { %v9814_v8 = vpop.permute.xlu1 %4776  ;;  %5044 = vrot.lane.b32.xlu0 %v3515_v27, %s8860_s23  ;;  %v488_v27 = vpop.f32.mrf.mxu3  ;;  %v9874_v36 = vmax.f32 %v587_v21, 0.0  ;;  %v718_v21 = vadd.s32 112, %v9088_v48  ;;  %vm15928_vm0 = vmmov %vm15926_vm14 }
 0x102   :  { %15887 = vst [vmem:[#allocation83_spill] sm:$0xff] %v9814_v8 }
 0x103   :  { %v9820_v9 = vpop.permute.xlu0 %5444  ;;  %v1638_v47 = vand.u32 15, %v718_v21 }
 0x104   :  { %15888 = vst [vmem:[#allocation84_spill] sm:$0xff] %v9820_v9  ;;  %5200 = vrot.lane.b32.xlu2 %v9828_v57, %s8862_s30  ;;  %v9861_v60 = vpop.f32.mrf.mxu0 }
 0x105   :  { %8557 = vmatmul.msk.f32.gmra.mxu0 %vm15885_vm1, %v67_v39  ;;  %v68_v39 = vld [vmem:[%s15129_s0 + $0x108] sm:$0xff]  ;;  %vm15901_vm1 = vcmp.lt.s32.totalorder %v9088_v48, 7  ;;  %vm9938_vm15 = vcmp.ne.s32.totalorder %v1638_v47, 0  ;;  %v15920_v47 = vmov 0 }
 0x106   :  { %v9835_v8 = vpop.permute.xlu2 %5448 }
 0x107   :  { %15892 = vst [vmem:[#allocation86_spill] sm:$0xff] %v9835_v8  ;;  %4948 = vrot.lane.b32.xlu1 %v3467_v44, %s8860_s23  ;;  %v586_v44 = vadd.f32 %v9068_v35, %v518_v28  ;;  %v3658_v28 = vsel %vm9387_vm13, %v9603_v58, 0.0  ;;  %vm15942_vm13 = vcmp.lt.s32.totalorder %v9088_v48, 1 }
 0x109   :  { %v9848_v53 = vpop.permute.xlu1 %4680  ;;  %5298 = vrot.lane.b32.xlu0 %v3706_v0, %s8862_s30  ;;  %v566_v0 = vmul.f32 %v9063_v34, %v488_v27  ;;  %v491_v13 = vpop.f32.mrf.mxu3  ;;  %v69_v27 = vld [vmem:[%s15129_s0 + $0x110] sm:$0xff] }
 0x10a   :  { %15893 = vst [vmem:[#allocation87_spill] sm:$0xff] %v9848_v53  ;;  %v567_v53 = vmul.f32 %v9063_v34, %v491_v13  ;;  %v15899_v13 = vrot.slane %v9672_v7, 1 }
 0x10b   :  { %v9854_v8 = vpop.permute.xlu0 %4934 }
 0x10c   :  { %15894 = vst [vmem:[#allocation88_spill] sm:$0xff] %v9854_v8  ;;  %4790 = vrot.lane.b32.xlu2 %v9555_v25, %s8859_s19  ;;  %v9872_v8 = vmax.f32 %v586_v44, 0.0  ;;  %v9891_v44 = vsel %vm15901_vm1, %v15900_v24, %v15899_v13  ;;  %v15904_v24 = vrot.slane %v9698_v19, 1  ;;  %v15905_v13 = vrot.slane %v9555_v25, 1 }
 0x10d   :  { %8558 = vmatmul.msk.f32.gmra.mxu0 %vm15895_vm6, %v68_v39  ;;  %15902 = vst [vmem:[#allocation92_spill] sm:$0xff] %v9891_v44 }
 0x10e   :  { %v9863_v2 = vpop.permute.xlu2 %4938 }
 0x10f   :  { %15896 = vst [vmem:[#allocation89_spill] sm:$0xff] %v9863_v2  ;;  %4696 = vrot.lane.b32.xlu1 %v9672_v7, %s8859_s19  ;;  %v634_v2 = vadd.f32 %v9068_v35, %v566_v0  ;;  %v715_v0 = vadd.s32 88, %v9088_v48 }
 0x111   :  { %v9876_v39 = vpop.permute.xlu1 %4682  ;;  %5202 = vrot.lane.b32.xlu0 %v3658_v28, %s8862_s30  ;;  %v635_v28 = vadd.f32 %v9068_v35, %v567_v53  ;;  %v9910_v53 = vsel %vm15901_vm1, %v15905_v13, %v15904_v24  ;;  %v9913_v51 = vmax.f32 %v634_v2, 0.0  ;;  %v9927_v24 = vpop.f32.mrf.mxu0  ;;  %v763_v13 = vadd.s32 472, %v9088_v48 }
 0x112   :  { %15897 = vst [vmem:[#allocation90_spill] sm:$0xff] %v9876_v39  ;;  %v15242_v39 = vrot.slane %v9874_v36, 1  ;;  %v15911_v2 = vrot.slane %v9874_v36, 7 }
 0x113   :  { %v9883_v9 = vpop.permute.xlu0 %5032  ;;  %15906 = vst [vmem:[#allocation94_spill] sm:$0xff] %v9910_v53 }
 0x114   :  { %15898 = vst [vmem:[#allocation91_spill] sm:$0xff] %v9883_v9  ;;  %4950 = vrot.lane.b32.xlu2 %v9891_v44, %s8860_s23  ;;  %v15243_v9 = vrot.slane %v9872_v8, 1 }
 0x115   :  { %8559 = vmatmul.msk.f32.gmra.mxu0 %vm15895_vm6, %v69_v27  ;;  %v15245_v27 = vrot.slane %v9872_v8, 7  ;;  %15907 = vst [vmem:[#allocation95_spill] sm:$0xff] %v9913_v51  ;;  %vm15908_vm6 = vmmov %vm15901_vm1  ;;  %vm15912_vm1 = vcmp.lt.s32.totalorder %v9088_v48, 1 }
 0x116   :  { %v9902_v57 = vpop.permute.xlu2 %4686  ;;  %v9923_v58 = vsel %vm15908_vm6, %v15243_v9, %v15242_v39  ;;  %v2619_v9 = vrot.slane %v9913_v51, 7  ;;  %vm15919_vm6 = vcmask 130048  }
 0x117   :  { %15903 = vst [vmem:[#allocation93_spill] sm:$0xff] %v9902_v57  ;;  %5046 = vrot.lane.b32.xlu1 %v9910_v53, %s8860_s23  ;;  %v9925_v57 = vmax.f32 %v635_v28, 0.0  ;;  %v9936_v21 = vsel %vm15912_vm1, %v15245_v27, %v15911_v2  ;;  %v15914_v53 = vmov 0  ;;  %v1617_v28 = vand.u32 15, %v715_v0  ;;  %v70_v2 = vld [vmem:[%s15129_s0 + $0x118] sm:$0xff] }
 0x118   :  { %15909 = vst [vmem:[#allocation96_spill] sm:$0xff] %v9923_v58  ;;  %v15915_v53 = vsel %vm9938_vm15, 4294967295, %v15914_v53  ;;  %v766_v27 = vadd.s32 496, %v9088_v48  ;;  %v1953_v0 = vand.u32 15, %v763_v13 }
 0x119   :  { %15910 = vst [vmem:[#allocation97_spill] sm:$0xff] %v9925_v57  ;;  %v9942_v39 = vpop.permute.xlu1 %5446  ;;  %4792 = vrot.lane.b32.xlu0 %v9698_v19, %s8859_s19  ;;  %v15256_v6 = vrot.slane %v9925_v57, 7  ;;  %vm9966_vm1 = vcmp.ne.s32.totalorder %v1617_v28, 15  ;;  %v15930_v28 = vmov 0 }
 0x11a   :  { %15913 = vst [vmem:[#allocation98_spill] sm:$0xff] %v9936_v21  ;;  %v1974_v37 = vand.u32 15, %v766_v27  ;;  %v15921_v47 = vsel %vm9966_vm1, 4294967295, %v15920_v47 }
 0x11b   :  { %15916 = vst [vmem:[#allocation99_spill] sm:$0xff] %v15915_v53  ;;  %v9984_v27 = vsel %vm15928_vm0, %v2619_v9, %v15256_v6  ;;  %vm15938_vm0 = vcmask 130048  }
 0x11c   :  { %15917 = vst [vmem:[#allocation100_spill] sm:$0xff] %v9942_v39  ;;  %v9959_v39 = vpop.permute.xlu0 %5286  ;;  %4698 = vrot.lane.b32.xlu2 %v9674_v56, %s8859_s19 }
 0x11d   :  { %15918 = vst [vmem:[#allocation101_spill] sm:$0xff] %v9959_v39  ;;  %8560 = vmatmul.msk.f32.gmra.mxu0 %vm15919_vm6, %v70_v2  ;;  %v15925_v39 = vrot.slane %v9555_v25, 7  ;;  %vm9986_vm6 = vcmp.ne.s32.totalorder %v1974_v37, 0  ;;  %v10005_v37 = vpop.f32.mrf.mxu0 }
 0x11e   :  { %15922 = vst [vmem:[#allocation102_spill] sm:$0xff] %v15921_v47  ;;  %v9970_v23 = vpop.permute.xlu2 %5036  ;;  %v15931_v28 = vsel %vm9986_vm6, 4294967295, %v15930_v28  ;;  %v15941_v47 = vrot.slane %v9547_v33, 7 }
 0x11f   :  { %15923 = vst [vmem:[#allocation103_spill] sm:$0xff] %v9970_v23  ;;  %v9978_v13 = vsel %vm15926_vm14, %v15925_v39, %v15924_v29  ;;  %v3469_v29 = vsel %vm9966_vm1, %v9716_v55, 0.0  ;;  %vm9998_vm14 = vcmp.ne.s32.totalorder %v1953_v0, 15  ;;  %v15933_v39 = vmov 0  ;;  %v71_v23 = vld [vmem:[%s15129_s0 + $0x120] sm:$0xff] }
 0x120   :  { %15927 = vst [vmem:[#allocation104_spill] sm:$0xff] %v9978_v13  ;;  %5300 = vrot.lane.b32.xlu1 %v9978_v13, %s8862_s30  ;;  %v15934_v39 = vsel %vm9998_vm14, 4294967295, %v15933_v39  ;;  %v3517_v2 = vsel %vm9998_vm14, %v9767_v22, 0.0  ;;  %vm15966_vm14 = vcmp.lt.s32.totalorder %v9088_v48, 1 }
 0x121   :  { %15929 = vst [vmem:[#allocation105_spill] sm:$0xff] %v9984_v27  ;;  %v10002_v6 = vpop.permute.xlu1 %4936  ;;  %4952 = vrot.lane.b32.xlu0 %v3469_v29, %s8860_s23 }
 0x122   :  { %15932 = vst [vmem:[#allocation106_spill] sm:$0xff] %v15931_v28 }
 0x123   :  { %15935 = vst [vmem:[#allocation107_spill] sm:$0xff] %v15934_v39 }
 0x124   :  { %15936 = vst [vmem:[#allocation108_spill] sm:$0xff] %v10002_v6  ;;  %v10010_v13 = vpop.permute.xlu0 %5190  ;;  %5048 = vrot.lane.b32.xlu2 %v3517_v2, %s8860_s23  ;;  %v15940_v6 = vrot.slane %v9672_v7, 7  ;;  %v15269_v2 = vrot.slane %v9913_v51, 1 }
 0x125   :  { %15937 = vst [vmem:[#allocation109_spill] sm:$0xff] %v10010_v13  ;;  %8561 = vmatmul.msk.f32.gmra.mxu0 %vm15938_vm0, %v71_v23  ;;  %v72_v23 = vld [vmem:[%s15129_s0 + $0x128] sm:$0xff] }
 0x126   :  { %v10020_v29 = vpop.permute.xlu2 %5290  ;;  %v10028_v13 = vsel %vm15942_vm13, %v15941_v47, %v15940_v6  ;;  %v3708_v6 = vsel %vm9605_vm3, %v9775_v18, 0.0  ;;  %v10045_v47 = vpop.f32.mrf.mxu0  ;;  %vm15946_vm13 = vmmov %vm15938_vm0  ;;  %vm15949_vm0 = vcmp.lt.s32.totalorder %v9088_v48, 7  ;;  %v15954_v18 = vrot.slane %v9872_v8, 1 }
 0x127   :  { %15939 = vst [vmem:[#allocation110_spill] sm:$0xff] %v10020_v29  ;;  %vm15984_vm3 = vcmask 130048  }
 0x128   :  { %15943 = vst [vmem:[#allocation111_spill] sm:$0xff] %v10028_v13  ;;  %5204 = vrot.lane.b32.xlu1 %v10028_v13, %s8862_s30 }
 0x129   :  { %v10032_v39 = vpop.permute.xlu1 %5034  ;;  %4700 = vrot.lane.b32.xlu0 %v9872_v8, %s8859_s19 }
 0x12a   :  { %15944 = vst [vmem:[#allocation112_spill] sm:$0xff] %v10032_v39  ;;  %v15948_v39 = vrot.slane %v9700_v59, 1 }
 0x12c   :  { %v10040_v0 = vpop.permute.xlu0 %4780  ;;  %5302 = vrot.lane.b32.xlu2 %v3708_v6, %s8862_s30  ;;  %v10057_v22 = vsel %vm15949_vm0, %v15948_v39, %v15269_v2  ;;  %v73_v6 = vld [vmem:[%s15129_s0 + $0x130] sm:$0xff]  ;;  %v3660_v2 = vsel %vm9612_vm5, %v9735_v4, 0.0 }
 0x12d   :  { %15945 = vst [vmem:[#allocation113_spill] sm:$0xff] %v10040_v0  ;;  %8562 = vmatmul.msk.f32.gmra.mxu0 %vm15946_vm13, %v72_v23  ;;  %v520_v0 = vmul.f32 %v9063_v34, %v9687_v62  ;;  %v521_v23 = vmul.f32 %v9063_v34, %v9779_v52 }
 0x12e   :  { %v10049_v29 = vpop.permute.xlu2 %5194  ;;  %15950 = vst [vmem:[#allocation115_spill] sm:$0xff] %v10057_v22 }
 0x12f   :  { %15947 = vst [vmem:[#allocation114_spill] sm:$0xff] %v10049_v29  ;;  %v588_v62 = vadd.f32 %v9068_v35, %v520_v0  ;;  %v717_v0 = vadd.s32 104, %v9088_v48 }
 0x130   :  { %4794 = vrot.lane.b32.xlu1 %v9700_v59, %s8859_s19 }
 0x131   :  { %v10063_v14 = vpop.permute.xlu1 %5288  ;;  %5050 = vrot.lane.b32.xlu0 %v10057_v22, %s8860_s23  ;;  %v589_v22 = vadd.f32 %v9068_v35, %v521_v23  ;;  %v15957_v35 = vrot.slane %v9700_v59, 7  ;;  %v1631_v32 = vand.u32 15, %v717_v0 }
 0x132   :  { %15951 = vst [vmem:[#allocation116_spill] sm:$0xff] %v10063_v14  ;;  %v10081_v14 = vpop.f32.mrf.mxu0 }
 0x134   :  { %v10072_v39 = vpop.permute.xlu0 %4940  ;;  %5206 = vrot.lane.b32.xlu2 %v3660_v2, %s8862_s30  ;;  %v10096_v2 = vmax.f32 %v588_v62, 0.0  ;;  %v720_v62 = vadd.s32 128, %v9088_v48 }
 0x135   :  { %15952 = vst [vmem:[#allocation117_spill] sm:$0xff] %v10072_v39  ;;  %8563 = vmatmul.msk.f32.gmra.mxu0 %vm15946_vm13, %v73_v6  ;;  %v15955_v39 = vrot.slane %v9674_v56, 1  ;;  %vm15958_vm13 = vcmp.lt.s32.totalorder %v9088_v48, 1 }
 0x136   :  { %v10083_v52 = vpop.permute.xlu2 %4784  ;;  %v10102_v23 = vsel %vm15958_vm13, %v15957_v35, %v2619_v9  ;;  %v15285_v9 = vrot.slane %v10096_v2, 1  ;;  %v15289_v35 = vrot.slane %v10096_v2, 7  ;;  %v1652_v4 = vand.u32 15, %v720_v62 }
 0x137   :  { %15953 = vst [vmem:[#allocation118_spill] sm:$0xff] %v10083_v52  ;;  %v10091_v29 = vsel %vm15949_vm0, %v15955_v39, %v15954_v18  ;;  %v10108_v18 = vmax.f32 %v589_v22, 0.0  ;;  %v74_v39 = vld [vmem:[%s15129_s0 + $0x138] sm:$0xff]  ;;  %vm15962_vm0 = vcmask 130048   ;;  %vm15964_vm13 = vcmp.lt.s32.totalorder %v9088_v48, 7 }
 0x138   :  { %15956 = vst [vmem:[#allocation119_spill] sm:$0xff] %v10091_v29  ;;  %4954 = vrot.lane.b32.xlu1 %v10091_v29, %s8860_s23  ;;  %v15968_v62 = vmov 0  ;;  %v15972_v29 = vrot.slane %v9674_v56, 7 }
 0x139   :  { %15959 = vst [vmem:[#allocation120_spill] sm:$0xff] %v10102_v23  ;;  %v10104_v6 = vpop.permute.xlu1 %5192  ;;  %5304 = vrot.lane.b32.xlu0 %v10102_v23, %s8862_s30  ;;  %v15284_v23 = vrot.slane %v10108_v18, 1  ;;  %v15288_v22 = vrot.slane %v10108_v18, 7 }
 0x13a   :  { %15960 = vst [vmem:[#allocation121_spill] sm:$0xff] %v10104_v6  ;;  %v765_v6 = vadd.s32 488, %v9088_v48 }
 0x13b   :  { %v10132_v0 = vsel %vm15964_vm13, %v15285_v9, %v15284_v23  ;;  %v10149_v23 = vpop.f32.mrf.mxu0  ;;  %v15971_v9 = vrot.slane %v9872_v8, 7  ;;  %vm15973_vm13 = vmmov %vm15966_vm14 }
 0x13c   :  { %v10114_v52 = vpop.permute.xlu0 %4688  ;;  %4796 = vrot.lane.b32.xlu2 %v9913_v51, %s8859_s19  ;;  %15965 = vst [vmem:[#allocation124_spill] sm:$0xff] %v10132_v0 }
 0x13d   :  { %15961 = vst [vmem:[#allocation122_spill] sm:$0xff] %v10114_v52  ;;  %8564 = vmatmul.msk.f32.gmra.mxu0 %vm15962_vm0, %v74_v39  ;;  %v10140_v39 = vsel %vm15966_vm14, %v15289_v35, %v15288_v22  ;;  %v494_v52 = vpop.f32.mrf.mxu3  ;;  %vm10144_vm0 = vcmp.ne.s32.totalorder %v1631_v32, 15  ;;  %v10157_v22 = vsel %vm15973_vm13, %v15972_v29, %v15971_v9  ;;  %vm10159_vm14 = vcmp.ne.s32.totalorder %v1652_v4, 0  ;;  %v75_v4 = vld [vmem:[%s15129_s0 + $0x140] sm:$0xff] }
 0x13e   :  { %v10124_v13 = vpop.permute.xlu2 %4944  ;;  %15967 = vst [vmem:[#allocation125_spill] sm:$0xff] %v10140_v39  ;;  %v15969_v62 = vsel %vm10144_vm0, 4294967295, %v15968_v62  ;;  %v15975_v35 = vmov 0  ;;  %v568_v29 = vmul.f32 %v9063_v34, %v494_v52  ;;  %v522_v9 = vmul.f32 %v9063_v34, %v9830_v26  ;;  %v10195_v52 = vld [vmem:[%s15130_s2] ss:$0 sm:$0xff] }
 0x13f   :  { %15963 = vst [vmem:[#allocation123_spill] sm:$0xff] %v10124_v13  ;;  %v15976_v35 = vsel %vm10159_vm14, 4294967295, %v15975_v35  ;;  %v1967_v13 = vand.u32 15, %v765_v6  ;;  %v15980_v6 = vrot.slane %v9925_v57, 1  ;;  %vm15982_vm13 = vcmp.lt.s32.totalorder %v9088_v48, 7 }
 0x140   :  { %4702 = vrot.lane.b32.xlu1 %v9874_v36, %s8859_s19  ;;  %15970 = vst [vmem:[#allocation126_spill] sm:$0xff] %v15969_v62  ;;  %v523_v34 = vmul.f32 %v10195_v52, %v9861_v60  ;;  %v15985_v26 = vmov 0  ;;  %v10214_v60 = vld [vmem:[%s15131_s3] ss:$0 sm:$0xff] }
 0x141   :  { %15974 = vst [vmem:[#allocation127_spill] sm:$0xff] %v10157_v22  ;;  %v10166_v31 = vpop.permute.xlu1 %4782  ;;  %5208 = vrot.lane.b32.xlu0 %v10157_v22, %s8862_s30  ;;  %v15981_v22 = vrot.slane %v9913_v51, 1  ;;  %vm10201_vm5 = vcmp.ne.s32.totalorder %v1967_v13, 15  ;;  %v590_v13 = vadd.f32 %v10214_v60, %v522_v9 }
 0x142   :  { %15977 = vst [vmem:[#allocation128_spill] sm:$0xff] %v15976_v35  ;;  %v15986_v26 = vsel %vm10201_vm5, 4294967295, %v15985_v26  ;;  %v16072_v35 = vmov 0 }
 0x143   :  { %15978 = vst [vmem:[#allocation129_spill] sm:$0xff] %v10166_v31  ;;  %v3471_v31 = vsel %vm10144_vm0, %v9923_v58, 0.0  ;;  %v10190_v44 = vsel %vm15982_vm13, %v15981_v22, %v15980_v6 }
 0x144   :  { %v10179_v32 = vpop.permute.xlu0 %5038  ;;  %15983 = vst [vmem:[#allocation131_spill] sm:$0xff] %v10190_v44  ;;  %4956 = vrot.lane.b32.xlu2 %v3471_v31, %s8860_s23  ;;  %v3519_v6 = vsel %vm10201_vm5, %v10190_v44, 0.0  ;;  %v636_v31 = vadd.f32 %v10214_v60, %v568_v29  ;;  %v76_v29 = vld [vmem:[%s15129_s0 + $0x148] sm:$0xff]  ;;  %vm16002_vm5 = vcmp.lt.s32.totalorder %v9088_v48, 1 }
 0x145   :  { %15979 = vst [vmem:[#allocation130_spill] sm:$0xff] %v10179_v32  ;;  %8565 = vmatmul.msk.f32.gmra.mxu0 %vm15984_vm3, %v75_v4  ;;  %v764_v32 = vadd.s32 480, %v9088_v48  ;;  %v591_v4 = vadd.f32 %v10214_v60, %v523_v34  ;;  %v497_v58 = vpop.f32.mrf.mxu3 }
 0x146   :  { %15987 = vst [vmem:[#allocation132_spill] sm:$0xff] %v15986_v26  ;;  %v10206_v22 = vpop.permute.xlu2 %4692  ;;  %v569_v44 = vmul.f32 %v10195_v52, %v497_v58  ;;  %v10230_v9 = vmax.f32 %v636_v31, 0.0  ;;  %v15992_v58 = vmov 0 }
 0x147   :  { %15988 = vst [vmem:[#allocation133_spill] sm:$0xff] %v10206_v22  ;;  %v1960_v26 = vand.u32 15, %v764_v32  ;;  %v10225_v22 = vpop.f32.mrf.mxu0  ;;  %v10237_v17 = vmax.f32 %v591_v4, 0.0  ;;  %v716_v32 = vadd.s32 96, %v9088_v48 }
 0x148   :  { %5052 = vrot.lane.b32.xlu1 %v3519_v6, %s8860_s23  ;;  %15990 = vst [vmem:[#allocation135_spill] sm:$0xff] %v10230_v9  ;;  %v10232_v6 = vmax.f32 %v590_v13, 0.0  ;;  %v637_v31 = vadd.f32 %v10214_v60, %v569_v44  ;;  %v3198_v44 = vrot.slane %v10230_v9, 1 }
 0x149   :  { %v10220_v55 = vpop.permute.xlu1 %4942  ;;  %4798 = vrot.lane.b32.xlu0 %v9925_v57, %s8859_s19  ;;  %vm10242_vm13 = vcmp.ne.s32.totalorder %v1960_v26, 0  ;;  %v15997_v26 = vrot.slane %v9874_v36, 1  ;;  %v15334_v45 = vrot.slane %v10237_v17, 7  ;;  %v1624_v43 = vand.u32 15, %v716_v32 }
 0x14a   :  { %15989 = vst [vmem:[#allocation134_spill] sm:$0xff] %v10220_v55  ;;  %v719_v55 = vadd.s32 120, %v9088_v48  ;;  %v15993_v58 = vsel %vm10242_vm13, 4294967295, %v15992_v58  ;;  %v3710_v4 = vsel %vm10242_vm13, %v9984_v27, 0.0  ;;  %v15335_v27 = vrot.slane %v10232_v6, 7 }
 0x14b   :  { %15994 = vst [vmem:[#allocation137_spill] sm:$0xff] %v15993_v58  ;;  %v15330_v58 = vrot.slane %v10237_v17, 1  ;;  %v10291_v32 = vmax.f32 %v637_v31, 0.0  ;;  %v78_v31 = vld [vmem:[%s15129_s0 + $0x158] sm:$0xff]  ;;  %v16044_v28 = vrot.slane %v10232_v6, 1 }
 0x14c   :  { %v10234_v34 = vpop.permute.xlu0 %5292  ;;  %4704 = vrot.lane.b32.xlu2 %v10096_v2, %s8859_s19  ;;  %v1645_v16 = vand.u32 15, %v719_v55 }
 0x14d   :  { %15991 = vst [vmem:[#allocation136_spill] sm:$0xff] %v10234_v34  ;;  %8566 = vmatmul.msk.f32.gmra.mxu0 %vm15984_vm3, %v76_v29  ;;  %v722_v34 = vadd.s32 144, %v9088_v48  ;;  %v15996_v29 = vrot.slane %v10096_v2, 1  ;;  %vm15998_vm3 = vcmp.lt.s32.totalorder %v9088_v48, 7 }
 0x14e   :  { %v10248_v13 = vpop.permute.xlu2 %5042  ;;  %16004 = vst [vmem:[#allocation143_spill] sm:$0xff] %v10291_v32  ;;  %vm16007_vm13 = vmmov %vm15998_vm3 }
 0x14f   :  { %15995 = vst [vmem:[#allocation138_spill] sm:$0xff] %v10248_v13  ;;  %v10261_v5 = vsel %vm15998_vm3, %v15997_v26, %v15996_v29  ;;  %v15333_v13 = vrot.slane %v10232_v6, 1  ;;  %v77_v29 = vld [vmem:[%s15129_s0 + $0x150] sm:$0xff] }
 0x150   :  { %5306 = vrot.lane.b32.xlu1 %v3710_v4, %s8862_s30  ;;  %15999 = vst [vmem:[#allocation139_spill] sm:$0xff] %v10261_v5  ;;  %v1666_v4 = vand.u32 15, %v722_v34  ;;  %v10289_v34 = vsel %vm16002_vm5, %v15335_v27, %v15334_v45  ;;  %v10309_v45 = vpop.f32.mrf.mxu0  ;;  %vm16015_vm5 = vcmask 130048   ;;  %v767_v27 = vadd.s32 504, %v9088_v48 }
 0x151   :  { %v10268_v42 = vpop.permute.xlu1 %4690  ;;  %4958 = vrot.lane.b32.xlu0 %v10261_v5, %s8860_s23  ;;  %v10281_v55 = vsel %vm15998_vm3, %v15333_v13, %v15330_v58  ;;  %16003 = vst [vmem:[#allocation142_spill] sm:$0xff] %v10289_v34  ;;  %vm10301_vm3 = vcmp.ne.s32.totalorder %v1645_v16, 15  ;;  %v16009_v58 = vmov 0  ;;  %v16012_v13 = vmov 0 }
 0x152   :  { %16000 = vst [vmem:[#allocation140_spill] sm:$0xff] %v10268_v42  ;;  %v16006_v42 = vrot.slane %v9925_v57, 1  ;;  %v16010_v58 = vsel %vm10301_vm3, 4294967295, %v16009_v58  ;;  %vm10305_vm9 = vcmp.ne.s32.totalorder %v1666_v4, 0  ;;  %v16016_v4 = vmov 0 }
 0x153   :  { %16001 = vst [vmem:[#allocation141_spill] sm:$0xff] %v10281_v55  ;;  %v16013_v13 = vsel %vm10305_vm9, 4294967295, %v16012_v13 }
 0x154   :  { %v10293_v26 = vpop.permute.xlu0 %5196  ;;  %v10299_v5 = vsel %vm16007_vm13, %v16006_v42, %v3198_v44  ;;  %16011 = vst [vmem:[#allocation146_spill] sm:$0xff] %v16010_v58  ;;  %vm10323_vm13 = vcmp.ne.s32.totalorder %v1624_v43, 0  ;;  %v15350_v43 = vrot.slane %v10291_v32, 1 }
 0x155   :  { %16005 = vst [vmem:[#allocation144_spill] sm:$0xff] %v10293_v26  ;;  %5054 = vrot.lane.b32.xlu2 %v10299_v5, %s8860_s23  ;;  %8567 = vmatmul.msk.f32.gmra.mxu0 %vm16015_vm5, %v77_v29  ;;  %v16017_v4 = vsel %vm10323_vm13, 4294967295, %v16016_v4  ;;  %v3662_v16 = vsel %vm10323_vm13, %v9936_v21, 0.0  ;;  %v2621_v29 = vrot.slane %v10230_v9, 7  ;;  %v1981_v26 = vand.u32 15, %v767_v27 }
 0x156   :  { %16008 = vst [vmem:[#allocation145_spill] sm:$0xff] %v10299_v5  ;;  %v10331_v5 = vpop.permute.xlu2 %5296  ;;  %vm16023_vm5 = vcmp.lt.s32.totalorder %v9088_v48, 1  ;;  %vm16025_vm13 = vcmp.lt.s32.totalorder %v9088_v48, 7  ;;  %v524_v27 = vmul.f32 %v10195_v52, %v9927_v24 }
 0x157   :  { %16014 = vst [vmem:[#allocation147_spill] sm:$0xff] %v16013_v13  ;;  %vm10367_vm11 = vcmp.ne.s32.totalorder %v1981_v26, 15  ;;  %v2622_v26 = vrot.slane %v10291_v32, 7 }
 0x158   :  { %16018 = vst [vmem:[#allocation148_spill] sm:$0xff] %v16017_v4  ;;  %5210 = vrot.lane.b32.xlu1 %v3662_v16, %s8862_s30  ;;  %v16022_v4 = vrot.slane %v9925_v57, 7  ;;  %v10371_v21 = vpop.f32.mrf.mxu0  ;;  %v592_v24 = vadd.f32 %v10214_v60, %v524_v27 }
 0x159   :  { %16019 = vst [vmem:[#allocation149_spill] sm:$0xff] %v10331_v5  ;;  %v10339_v42 = vpop.permute.xlu1 %5040  ;;  %4706 = vrot.lane.b32.xlu0 %v10108_v18, %s8859_s19 }
 0x15a   :  { %16020 = vst [vmem:[#allocation150_spill] sm:$0xff] %v10339_v42  ;;  %v10352_v16 = vsel %vm16023_vm5, %v16022_v4, %v2621_v29  ;;  %v10358_v42 = vsel %vm16025_vm13, %v3198_v44, %v15350_v43  ;;  %v16028_v4 = vmov 0  ;;  %v79_v43 = vld [vmem:[%s15129_s0 + $0x160] sm:$0xff]  ;;  %vm16038_vm13 = vcmask 130048  }
 0x15b   :  { %16024 = vst [vmem:[#allocation152_spill] sm:$0xff] %v10352_v16  ;;  %v16029_v4 = vsel %vm10367_vm11, 4294967295, %v16028_v4  ;;  %v3521_v44 = vsel %vm10367_vm11, %v10358_v42, 0.0 }
 0x15c   :  { %v10346_v5 = vpop.permute.xlu0 %4786  ;;  %16026 = vst [vmem:[#allocation153_spill] sm:$0xff] %v10358_v42  ;;  %v16035_v42 = vrot.slane %v9874_v36, 7 }
 0x15d   :  { %16021 = vst [vmem:[#allocation151_spill] sm:$0xff] %v10346_v5  ;;  %5308 = vrot.lane.b32.xlu2 %v10352_v16, %s8862_s30  ;;  %v525_v5 = vmul.f32 %v10195_v52, %v10005_v37  ;;  %8568 = vmatmul.msk.f32.gmra.mxu0 %vm16027_vm4, %v78_v31  ;;  %vm16036_vm4 = vmmov %vm16023_vm5 }
 0x15e   :  { %16030 = vst [vmem:[#allocation154_spill] sm:$0xff] %v16029_v4  ;;  %v10373_v62 = vpop.permute.xlu2 %5200  ;;  %v16034_v4 = vrot.slane %v10096_v2, 7  ;;  %vm16039_vm5 = vmmov %vm16036_vm4 }
 0x15f   :  { %16031 = vst [vmem:[#allocation155_spill] sm:$0xff] %v10373_v62  ;;  %v593_v37 = vadd.f32 %v10214_v60, %v525_v5  ;;  %v500_v5 = vpop.f32.mrf.mxu3  ;;  %v721_v62 = vadd.s32 136, %v9088_v48 }
 0x160   :  { %4800 = vrot.lane.b32.xlu1 %v10230_v9, %s8859_s19  ;;  %v10397_v27 = vsel %vm16036_vm4, %v16035_v42, %v16034_v4  ;;  %v3473_v42 = vsel %vm10301_vm3, %v10132_v0, 0.0  ;;  %v570_v4 = vmul.f32 %v10195_v52, %v500_v5  ;;  %v724_v0 = vadd.s32 160, %v9088_v48  ;;  %v80_v5 = vld [vmem:[%s15129_s0 + $0x168] sm:$0xff] }
 0x161   :  { %v10382_v31 = vpop.permute.xlu1 %5294  ;;  %5056 = vrot.lane.b32.xlu0 %v3521_v44, %s8860_s23  ;;  %16037 = vst [vmem:[#allocation158_spill] sm:$0xff] %v10397_v27  ;;  %v10401_v44 = vmax.f32 %v592_v24, 0.0  ;;  %v10418_v24 = vpop.f32.mrf.mxu0  ;;  %vm16046_vm4 = vcmp.lt.s32.totalorder %v9088_v48, 7 }
 0x162   :  { %16032 = vst [vmem:[#allocation156_spill] sm:$0xff] %v10382_v31  ;;  %v10403_v31 = vmax.f32 %v593_v37, 0.0  ;;  %v1659_v37 = vand.u32 15, %v721_v62 }
 0x163   :  { %v15367_v62 = vrot.slane %v10401_v44, 7 }
 0x164   :  { %v10389_v16 = vpop.permute.xlu0 %4946  ;;  %v16051_v10 = vrot.slane %v10403_v31, 1  ;;  %v16116_v32 = vrot.slane %v10403_v31, 1 }
 0x165   :  { %16033 = vst [vmem:[#allocation157_spill] sm:$0xff] %v10389_v16  ;;  %5212 = vrot.lane.b32.xlu2 %v10397_v27, %s8862_s30  ;;  %8569 = vmatmul.msk.f32.gmra.mxu0 %vm16038_vm13, %v79_v43  ;;  %v10408_v16 = vsel %vm16039_vm5, %v2621_v29, %v2622_v26  ;;  %v1680_v27 = vand.u32 15, %v724_v0  ;;  %vm10448_vm5 = vcmp.ne.s32.totalorder %v1659_v37, 15  ;;  %v527_v37 = vmul.f32 %v10195_v52, %v10081_v14 }
 0x166   :  { %16040 = vst [vmem:[#allocation159_spill] sm:$0xff] %v10408_v16  ;;  %v10411_v38 = vpop.permute.xlu2 %4790  ;;  %v3712_v43 = vsel %vm9986_vm6, %v10408_v16, 0.0  ;;  %v16045_v16 = vrot.slane %v10108_v18, 1  ;;  %vm16054_vm6 = vcmp.lt.s32.totalorder %v9088_v48, 1  ;;  %v3664_v14 = vsel %vm9938_vm15, %v10140_v39, 0.0 }
 0x167   :  { %16041 = vst [vmem:[#allocation160_spill] sm:$0xff] %v10411_v38  ;;  %v15366_v38 = vrot.slane %v10403_v31, 7  ;;  %vm16082_vm15 = vcmp.lt.s32.totalorder %v9088_v48, 7 }
 0x168   :  { %4960 = vrot.lane.b32.xlu1 %v3473_v42, %s8860_s23 }
 0x169   :  { %v10423_v29 = vpop.permute.xlu1 %5198  ;;  %5310 = vrot.lane.b32.xlu0 %v3712_v43, %s8862_s30  ;;  %v10440_v43 = vsel %vm16046_vm4, %v16045_v16, %v16044_v28  ;;  %v16052_v28 = vrot.slane %v10401_v44, 1  ;;  %v10466_v0 = vsel %vm16054_vm6, %v15367_v62, %v15366_v38  ;;  %vm16063_vm6 = vcmask 130048  }
 0x16a   :  { %16042 = vst [vmem:[#allocation161_spill] sm:$0xff] %v10423_v29  ;;  %v638_v29 = vadd.f32 %v10214_v60, %v570_v4  ;;  %v16056_v4 = vmov 0 }
 0x16b   :  { %16047 = vst [vmem:[#allocation163_spill] sm:$0xff] %v10440_v43  ;;  %v10458_v16 = vsel %vm16046_vm4, %v16052_v28, %v16051_v10  ;;  %v526_v28 = vmul.f32 %v10195_v52, %v10045_v47  ;;  %vm16065_vm4 = vcmp.lt.s32.totalorder %v9088_v48, 1 }
 0x16c   :  { %v10432_v42 = vpop.permute.xlu0 %4694  ;;  %16053 = vst [vmem:[#allocation165_spill] sm:$0xff] %v10458_v16  ;;  %v10487_v38 = vmax.f32 %v638_v29, 0.0  ;;  %v81_v29 = vld [vmem:[%s15129_s0 + $0x170] sm:$0xff] }
 0x16d   :  { %16043 = vst [vmem:[#allocation162_spill] sm:$0xff] %v10432_v42  ;;  %4962 = vrot.lane.b32.xlu2 %v10440_v43, %s8860_s23  ;;  %8570 = vmatmul.msk.f32.gmra.mxu0 %vm16038_vm13, %v80_v5  ;;  %v16048_v42 = vmov 0  ;;  %vm10468_vm13 = vcmp.ne.s32.totalorder %v1680_v27, 0  ;;  %v10501_v27 = vpop.f32.mrf.mxu0  ;;  %v594_v47 = vadd.f32 %v10214_v60, %v526_v28  ;;  %v1540_v28 = vand.u32 15, %v9088_v48 }
 0x16e   :  { %v16049_v42 = vsel %vm10448_vm5, 4294967295, %v16048_v42  ;;  %16055 = vst [vmem:[#allocation166_spill] sm:$0xff] %v10466_v0  ;;  %v16057_v4 = vsel %vm10468_vm13, 4294967295, %v16056_v4  ;;  %v10474_v5 = vpop.permute.xlu2 %4950  ;;  %v2623_v39 = vrot.slane %v10487_v38, 7 }
 0x16f   :  { %16050 = vst [vmem:[#allocation164_spill] sm:$0xff] %v16049_v42 }
 0x170   :  { %16058 = vst [vmem:[#allocation167_spill] sm:$0xff] %v16057_v4  ;;  %4708 = vrot.lane.b32.xlu1 %v10232_v6, %s8859_s19 }
 0x171   :  { %16059 = vst [vmem:[#allocation168_spill] sm:$0xff] %v10474_v5  ;;  %v10497_v62 = vpop.permute.xlu1 %4788  ;;  %5214 = vrot.lane.b32.xlu0 %v3664_v14, %s8862_s30  ;;  %v595_v5 = vadd.f32 %v10214_v60, %v527_v37  ;;  %v723_v14 = vadd.s32 152, %v9088_v48 }
 0x172   :  { %16060 = vst [vmem:[#allocation169_spill] sm:$0xff] %v10487_v38 }
 0x173   :  { %16061 = vst [vmem:[#allocation170_spill] sm:$0xff] %v10497_v62  ;;  %v10514_v37 = vmax.f32 %v595_v5, 0.0  ;;  %v10520_v62 = vsel %vm16065_vm4, %v2622_v26, %v2623_v39  ;;  %v1673_v5 = vand.u32 15, %v723_v14  ;;  %v16068_v26 = vrot.slane %v9076_v40, 7 }
 0x174   :  { %v10506_v53 = vpop.permute.xlu0 %5044  ;;  %16066 = vst [vmem:[#allocation173_spill] sm:$0xff] %v10520_v62 }
 0x175   :  { %16062 = vst [vmem:[#allocation171_spill] sm:$0xff] %v10506_v53  ;;  %4710 = vrot.lane.b32.xlu2 %v10237_v17, %s8859_s19  ;;  %8571 = vmatmul.msk.f32.gmra.mxu0 %vm16063_vm6, %v81_v29  ;;  %v3475_v53 = vsel %vm10448_vm5, %v10281_v55, 0.0  ;;  %v10528_v29 = vmax.f32 %v594_v47, 0.0  ;;  %vm16069_vm6 = vmmov %vm16065_vm4  ;;  %v3666_v55 = vsel %vm10159_vm14, %v10289_v34, 0.0  ;;  %v82_v47 = vld [vmem:[%s15129_s0 + $0x178] sm:$0xff]  ;;  %v15387_v58 = vrot.slane %v10514_v37, 7 }
 0x176   :  { %v10516_v10 = vpop.permute.xlu2 %4698  ;;  %vm10555_vm4 = vcmp.ne.s32.totalorder %v1540_v28, 0  ;;  %vm10562_vm11 = vcmp.ne.s32.totalorder %v1673_v5, 15  ;;  %vm16079_vm14 = vcmp.lt.s32.totalorder %v9088_v48, 1 }
 0x177   :  { %16064 = vst [vmem:[#allocation172_spill] sm:$0xff] %v10516_v10  ;;  %v726_v10 = vadd.s32 176, %v9088_v48  ;;  %v3156_v14 = vrot.slane %v10528_v29, 1  ;;  %v15388_v40 = vrot.slane %v10528_v29, 7  ;;  %v16073_v35 = vsel %vm10555_vm4, 4294967295, %v16072_v35 }
 0x178   :  { %5312 = vrot.lane.b32.xlu1 %v10520_v62, %s8862_s30  ;;  %v10538_v62 = vsel %vm16069_vm6, %v2623_v39, %v16068_v26  ;;  %v10552_v26 = vpop.f32.mrf.mxu0  ;;  %16074 = vst [vmem:[#allocation177_spill] sm:$0xff] %v16073_v35  ;;  %vm16075_vm6 = vcmask 130048   ;;  %v16092_v35 = vrot.slane %v10232_v6, 7 }
 0x179   :  { %v10530_v43 = vpop.permute.xlu1 %4948  ;;  %4964 = vrot.lane.b32.xlu0 %v3475_v53, %s8860_s23  ;;  %16070 = vst [vmem:[#allocation175_spill] sm:$0xff] %v10538_v62  ;;  %v1694_v39 = vand.u32 15, %v726_v10  ;;  %v16081_v10 = vrot.slane %v10514_v37, 1  ;;  %v3650_v5 = vsel %vm10555_vm4, %v10538_v62, 0.0  ;;  %vm16107_vm4 = vcmp.lt.s32.totalorder %v9088_v48, 1 }
 0x17a   :  { %16067 = vst [vmem:[#allocation174_spill] sm:$0xff] %v10530_v43  ;;  %v529_v43 = vmul.f32 %v10195_v52, %v10225_v22 }
 0x17b   :  { %v10578_v28 = vsel %vm16082_vm15, %v3156_v14, %v16081_v10  ;;  %vm16090_vm15 = vcmask 130048  }
 0x17c   :  { %v10547_v53 = vpop.permute.xlu0 %5298  ;;  %16083 = vst [vmem:[#allocation180_spill] sm:$0xff] %v10578_v28  ;;  %v597_v62 = vadd.f32 %v10214_v60, %v529_v43 }
 0x17d   :  { %16071 = vst [vmem:[#allocation176_spill] sm:$0xff] %v10547_v53  ;;  %5218 = vrot.lane.b32.xlu2 %v3666_v55, %s8862_s30  ;;  %8572 = vmatmul.msk.f32.gmra.mxu0 %vm16075_vm6, %v82_v47  ;;  %v16076_v53 = vmov 0  ;;  %v10572_v55 = vsel %vm16079_vm14, %v15388_v40, %v15387_v58  ;;  %vm10585_vm6 = vcmp.ne.s32.totalorder %v1694_v39, 0  ;;  %v16085_v47 = vmov 0 }
 0x17e   :  { %v16077_v53 = vsel %vm10562_vm11, 4294967295, %v16076_v53  ;;  %16080 = vst [vmem:[#allocation179_spill] sm:$0xff] %v10572_v55  ;;  %v10580_v22 = vpop.permute.xlu2 %5048  ;;  %v16086_v47 = vsel %vm10585_vm6, 4294967295, %v16085_v47  ;;  %v528_v40 = vmul.f32 %v10195_v52, %v10149_v23  ;;  %v3477_v23 = vsel %vm10562_vm11, %v10458_v16, 0.0 }
 0x17f   :  { %16078 = vst [vmem:[#allocation178_spill] sm:$0xff] %v16077_v53  ;;  %v10619_v43 = vmax.f32 %v597_v62, 0.0  ;;  %v16093_v16 = vrot.slane %v10108_v18, 7  ;;  %v16095_v62 = vrot.slane %v10401_v44, 7 }
 0x180   :  { %16084 = vst [vmem:[#allocation181_spill] sm:$0xff] %v10580_v22  ;;  %5186 = vrot.lane.b32.xlu1 %v3650_v5, %s8862_s30  ;;  %v83_v5 = vld [vmem:[%s15129_s0 + $0x180] sm:$0xff]  ;;  %v596_v10 = vadd.f32 %v10214_v60, %v528_v40  ;;  %v725_v22 = vadd.s32 168, %v9088_v48 }
 0x181   :  { %16087 = vst [vmem:[#allocation182_spill] sm:$0xff] %v16086_v47  ;;  %v10605_v58 = vpop.permute.xlu1 %4696  ;;  %4712 = vrot.lane.b32.xlu0 %v10401_v44, %s8859_s19  ;;  %v10633_v40 = vsel %vm16079_vm14, %v16093_v16, %v16092_v35  ;;  %v15408_v16 = vrot.slane %v10619_v43, 1 }
 0x182   :  { %16088 = vst [vmem:[#allocation183_spill] sm:$0xff] %v10605_v58  ;;  %v10623_v58 = vpop.f32.mrf.mxu0  ;;  %v1687_v35 = vand.u32 15, %v725_v22  ;;  %v16101_v22 = vmov 0 }
 0x183   :  { %16094 = vst [vmem:[#allocation186_spill] sm:$0xff] %v10633_v40 }
 0x184   :  { %v10616_v39 = vpop.permute.xlu0 %5202 }
 0x185   :  { %16089 = vst [vmem:[#allocation184_spill] sm:$0xff] %v10616_v39  ;;  %4968 = vrot.lane.b32.xlu2 %v3477_v23, %s8860_s23  ;;  %8573 = vmatmul.msk.f32.gmra.mxu0 %vm16090_vm15, %v83_v5  ;;  %v10635_v39 = vmax.f32 %v596_v10, 0.0  ;;  %v16096_v23 = vrot.slane %v10237_v17, 7  ;;  %vm16097_vm15 = vmmov %vm16079_vm14  ;;  %vm10664_vm14 = vcmp.ne.s32.totalorder %v1687_v35, 15 }
 0x186   :  { %v10625_v34 = vpop.permute.xlu2 %5302  ;;  %v16102_v22 = vsel %vm10664_vm14, 4294967295, %v16101_v22 }
 0x187   :  { %16091 = vst [vmem:[#allocation185_spill] sm:$0xff] %v10625_v34  ;;  %v10645_v5 = vsel %vm16097_vm15, %v16096_v23, %v16095_v62  ;;  %v3158_v41 = vrot.slane %v10635_v39, 1  ;;  %v15413_v15 = vrot.slane %v10635_v39, 7  ;;  %v530_v23 = vmul.f32 %v10195_v52, %v10309_v45 }
 0x188   :  { %5216 = vrot.lane.b32.xlu1 %v10633_v40, %s8862_s30  ;;  %16098 = vst [vmem:[#allocation187_spill] sm:$0xff] %v10645_v5  ;;  %v728_v40 = vadd.s32 192, %v9088_v48  ;;  %vm16104_vm15 = vcmp.lt.s32.totalorder %v9088_v48, 7 }
 0x189   :  { %v10647_v34 = vpop.permute.xlu1 %5046  ;;  %5220 = vrot.lane.b32.xlu0 %v10645_v5, %s8862_s30  ;;  %16103 = vst [vmem:[#allocation190_spill] sm:$0xff] %v16102_v22  ;;  %v10672_v10 = vsel %vm16104_vm15, %v3158_v41, %v15408_v16  ;;  %v16114_v5 = vrot.slane %v10237_v17, 1  ;;  %vm16117_vm0 = vmmov %vm16104_vm15 }
 0x18a   :  { %16099 = vst [vmem:[#allocation188_spill] sm:$0xff] %v10647_v34  ;;  %v1708_v62 = vand.u32 15, %v728_v40  ;;  %v531_v34 = vmul.f32 %v10195_v52, %v10371_v21  ;;  %v16106_v40 = vrot.slane %v10619_v43, 7  ;;  %v16109_v21 = vmov 0 }
 0x18b   :  { %16105 = vst [vmem:[#allocation191_spill] sm:$0xff] %v10672_v10 }
 0x18c   :  { %v10654_v42 = vpop.permute.xlu0 %4792  ;;  %v10680_v45 = vsel %vm16107_vm4, %v15413_v15, %v16106_v40  ;;  %vm10682_vm5 = vcmp.ne.s32.totalorder %v1708_v62, 0  ;;  %v10700_v40 = vsel %vm16117_vm0, %v16116_v32, %v3156_v14  ;;  %v16120_v62 = vrot.slane %v10528_v29, 7  ;;  %vm16122_vm0 = vmmov %vm16107_vm4 }
 0x18d   :  { %16100 = vst [vmem:[#allocation189_spill] sm:$0xff] %v10654_v42  ;;  %4716 = vrot.lane.b32.xlu2 %v10528_v29, %s8859_s19  ;;  %v16110_v21 = vsel %vm10682_vm5, 4294967295, %v16109_v21  ;;  %v16113_v42 = vrot.slane %v10401_v44, 1  ;;  %v16121_v15 = vrot.slane %v10403_v31, 7  ;;  %vm16128_vm4 = vmmov %vm16104_vm15 }
 0x18e   :  { %16108 = vst [vmem:[#allocation192_spill] sm:$0xff] %v10680_v45  ;;  %v10686_v35 = vpop.permute.xlu2 %5206 }
 0x18f   :  { %16111 = vst [vmem:[#allocation193_spill] sm:$0xff] %v16110_v21  ;;  %v10694_v16 = vsel %vm16104_vm15, %v16114_v5, %v16113_v42  ;;  %v10713_v5 = vpop.f32.mrf.mxu0  ;;  %v598_v42 = vadd.f32 %v10214_v60, %v530_v23  ;;  %vm16131_vm15 = vmmov %vm16122_vm0  ;;  %v16225_v21 = vmov 0 }
 0x190   :  { %16112 = vst [vmem:[#allocation194_spill] sm:$0xff] %v10686_v35  ;;  %4966 = vrot.lane.b32.xlu1 %v10694_v16, %s8860_s23  ;;  %v10728_v35 = vsel %vm16122_vm0, %v16121_v15, %v16120_v62 }
 0x191   :  { %16115 = vst [vmem:[#allocation195_spill] sm:$0xff] %v10694_v16  ;;  %4970 = vrot.lane.b32.xlu0 %v10700_v40, %s8860_s23  ;;  %v599_v16 = vadd.f32 %v10214_v60, %v531_v34  ;;  %v10736_v32 = vmax.f32 %v598_v42, 0.0  ;;  %v16127_v34 = vrot.slane %v10514_v37, 1 }
 0x192   :  { %16118 = vst [vmem:[#allocation196_spill] sm:$0xff] %v10700_v40  ;;  %v10718_v14 = vpop.permute.xlu1 %5300  ;;  %v727_v40 = vadd.s32 184, %v9088_v48 }
 0x193   :  { %16119 = vst [vmem:[#allocation197_spill] sm:$0xff] %v10718_v14  ;;  %v10738_v14 = vmax.f32 %v599_v16, 0.0  ;;  %v10753_v23 = vsel %vm16128_vm4, %v16127_v34, %v3158_v41  ;;  %v730_v16 = vadd.s32 208, %v9088_v48  ;;  %v533_v41 = vmul.f32 %v10195_v52, %v10501_v27 }
 0x194   :  { %16123 = vst [vmem:[#allocation198_spill] sm:$0xff] %v10728_v35  ;;  %v10732_v38 = vpop.permute.xlu0 %4952  ;;  %v1701_v42 = vand.u32 15, %v727_v40  ;;  %v16133_v34 = vmov 0  ;;  %v16137_v27 = vmov 0 }
 0x195   :  { %16124 = vst [vmem:[#allocation199_spill] sm:$0xff] %v10732_v38  ;;  %5224 = vrot.lane.b32.xlu2 %v10728_v35, %s8862_s30  ;;  %v15429_v38 = vrot.slane %v10738_v14, 1  ;;  %v15427_v11 = vrot.slane %v10738_v14, 7  ;;  %v1722_v51 = vand.u32 15, %v730_v16  ;;  %v3668_v16 = vsel %vm10305_vm9, %v10466_v0, 0.0 }
 0x196   :  { %v10740_v53 = vpop.permute.xlu2 %4796  ;;  %16129 = vst [vmem:[#allocation202_spill] sm:$0xff] %v10753_v23  ;;  %vm10785_vm4 = vcmp.ne.s32.totalorder %v1701_v42, 15  ;;  %v601_v42 = vadd.f32 %v10214_v60, %v533_v41  ;;  %v729_v41 = vadd.s32 200, %v9088_v48 }
 0x197   :  { %16125 = vst [vmem:[#allocation200_spill] sm:$0xff] %v10740_v53  ;;  %v10756_v62 = vpop.f32.mrf.mxu0  ;;  %vm10776_vm0 = vcmp.ne.s32.totalorder %v1722_v51, 0  ;;  %v16138_v27 = vsel %vm10785_vm4, 4294967295, %v16137_v27 }
 0x198   :  { %4714 = vrot.lane.b32.xlu1 %v10403_v31, %s8859_s19  ;;  %v16134_v34 = vsel %vm10776_vm0, 4294967295, %v16133_v34  ;;  %16139 = vst [vmem:[#allocation207_spill] sm:$0xff] %v16138_v27 }
 0x199   :  { %4718 = vrot.lane.b32.xlu0 %v10514_v37, %s8859_s19  ;;  %16135 = vst [vmem:[#allocation205_spill] sm:$0xff] %v16134_v34 }
 0x19a   :  { %v10745_v15 = vpop.permute.xlu1 %5204 }
 0x19b   :  { %16126 = vst [vmem:[#allocation201_spill] sm:$0xff] %v10745_v15  ;;  %v15428_v15 = vrot.slane %v10736_v32, 7 }
 0x19c   :  { %v10760_v35 = vpop.permute.xlu0 %4700 }
 0x19d   :  { %16130 = vst [vmem:[#allocation203_spill] sm:$0xff] %v10760_v35  ;;  %4974 = vrot.lane.b32.xlu2 %v10753_v23, %s8860_s23  ;;  %v10774_v40 = vsel %vm16131_vm15, %v15428_v15, %v15427_v11  ;;  %v16140_v35 = vrot.slane %v10736_v32, 1  ;;  %vm16141_vm15 = vcmp.lt.s32.totalorder %v9088_v48, 7  ;;  %v3670_v15 = vsel %vm10468_vm13, %v10572_v55, 0.0 }
 0x19e   :  { %16132 = vst [vmem:[#allocation204_spill] sm:$0xff] %v10774_v40  ;;  %v10780_v53 = vpop.permute.xlu2 %4956  ;;  %v532_v11 = vmul.f32 %v10195_v52, %v10418_v24  ;;  %v10826_v55 = vmax.f32 %v601_v42, 0.0  ;;  %v3479_v24 = vsel %vm10664_vm14, %v10578_v28, 0.0  ;;  %v732_v42 = vadd.s32 224, %v9088_v48 }
 0x19f   :  { %16136 = vst [vmem:[#allocation206_spill] sm:$0xff] %v10780_v53  ;;  %v10795_v51 = vsel %vm16141_vm15, %v16140_v35, %v15429_v38  ;;  %v10821_v4 = vpop.f32.mrf.mxu0  ;;  %vm16150_vm15 = vcmp.lt.s32.totalorder %v9088_v48, 1  ;;  %v16166_v23 = vrot.slane %v10514_v37, 7 }
 0x1a0   :  { %16142 = vst [vmem:[#allocation208_spill] sm:$0xff] %v10795_v51  ;;  %5222 = vrot.lane.b32.xlu1 %v3668_v16, %s8862_s30  ;;  %v600_v53 = vadd.f32 %v10214_v60, %v532_v11  ;;  %v3672_v11 = vsel %vm10585_vm6, %v10680_v45, 0.0  ;;  %v15449_v13 = vrot.slane %v10826_v55, 1  ;;  %vm16152_vm6 = vcmp.lt.s32.totalorder %v9088_v48, 7 }
 0x1a1   :  { %5226 = vrot.lane.b32.xlu0 %v3670_v15, %s8862_s30  ;;  %16145 = vst [vmem:[#allocation211_spill] sm:$0xff] %v10826_v55  ;;  %v3481_v15 = vsel %vm10785_vm4, %v10672_v10, 0.0  ;;  %vm16183_vm4 = vcmp.lt.s32.totalorder %v9088_v48, 7 }
 0x1a2   :  { %v10815_v16 = vpop.permute.xlu1 %4794  ;;  %vm16186_vm11 = vmmov %vm16183_vm4 }
 0x1a3   :  { %16143 = vst [vmem:[#allocation209_spill] sm:$0xff] %v10815_v16 }
 0x1a4   :  { %v10819_v38 = vpop.permute.xlu0 %5050 }
 0x1a5   :  { %16144 = vst [vmem:[#allocation210_spill] sm:$0xff] %v10819_v38  ;;  %4722 = vrot.lane.b32.xlu2 %v10619_v43, %s8859_s19  ;;  %v10838_v38 = vmax.f32 %v600_v53, 0.0 }
 0x1a6   :  { %v10828_v35 = vpop.permute.xlu2 %4704 }
 0x1a7   :  { %16146 = vst [vmem:[#allocation212_spill] sm:$0xff] %v10828_v35  ;;  %v1715_v35 = vand.u32 15, %v729_v41  ;;  %v3162_v28 = vrot.slane %v10838_v38, 1  ;;  %v2585_v53 = vrot.slane %v10838_v38, 7  ;;  %v10868_v47 = vpop.f32.mrf.mxu0 }
 0x1a8   :  { %4972 = vrot.lane.b32.xlu1 %v3479_v24, %s8860_s23  ;;  %16147 = vst [vmem:[#allocation213_spill] sm:$0xff] %v10838_v38  ;;  %v15448_v24 = vrot.slane %v10826_v55, 7 }
 0x1a9   :  { %4976 = vrot.lane.b32.xlu0 %v3481_v15, %s8860_s23  ;;  %v10864_v41 = vsel %vm16152_vm6, %v3162_v28, %v15449_v13  ;;  %vm10872_vm13 = vcmp.ne.s32.totalorder %v1715_v35, 15  ;;  %vm16167_vm6 = vmmov %vm16150_vm15 }
 0x1aa   :  { %v10840_v16 = vpop.permute.xlu1 %4954  ;;  %v10858_v15 = vsel %vm16150_vm15, %v2585_v53, %v15448_v24  ;;  %16153 = vst [vmem:[#allocation217_spill] sm:$0xff] %v10864_v41  ;;  %v16158_v24 = vmov 0  ;;  %v3483_v13 = vsel %vm10872_vm13, %v10795_v51, 0.0  ;;  %vm16172_vm15 = vmmov %vm16167_vm6 }
 0x1ab   :  { %16148 = vst [vmem:[#allocation214_spill] sm:$0xff] %v10840_v16  ;;  %v1736_v16 = vand.u32 15, %v732_v42 }
 0x1ac   :  { %v10848_v0 = vpop.permute.xlu0 %5304  ;;  %16151 = vst [vmem:[#allocation216_spill] sm:$0xff] %v10858_v15 }
 0x1ad   :  { %16149 = vst [vmem:[#allocation215_spill] sm:$0xff] %v10848_v0  ;;  %5230 = vrot.lane.b32.xlu2 %v3672_v11, %s8862_s30  ;;  %v535_v0 = vmul.f32 %v10195_v52, %v10623_v58  ;;  %v16155_v11 = vmov 0  ;;  %vm10876_vm9 = vcmp.ne.s32.totalorder %v1736_v16, 0  ;;  %v534_v16 = vmul.f32 %v10195_v52, %v10552_v26 }
 0x1ae   :  { %v16156_v11 = vsel %vm10872_vm13, 4294967295, %v16155_v11  ;;  %v16159_v24 = vsel %vm10876_vm9, 4294967295, %v16158_v24 }
 0x1af   :  { %v10870_v42 = vpop.permute.xlu2 %5054  ;;  %16157 = vst [vmem:[#allocation219_spill] sm:$0xff] %v16156_v11  ;;  %v603_v58 = vadd.f32 %v10214_v60, %v535_v0  ;;  %v602_v35 = vadd.f32 %v10214_v60, %v534_v16  ;;  %v731_v0 = vadd.s32 216, %v9088_v48 }
 0x1b0   :  { %16154 = vst [vmem:[#allocation218_spill] sm:$0xff] %v10870_v42  ;;  %4720 = vrot.lane.b32.xlu1 %v10635_v39, %s8859_s19 }
 0x1b1   :  { %16160 = vst [vmem:[#allocation220_spill] sm:$0xff] %v16159_v24  ;;  %4724 = vrot.lane.b32.xlu0 %v10736_v32, %s8859_s19  ;;  %v10908_v26 = vmax.f32 %v603_v58, 0.0  ;;  %v10923_v16 = vmax.f32 %v602_v35, 0.0  ;;  %v16170_v58 = vrot.slane %v10736_v32, 7  ;;  %v1729_v22 = vand.u32 15, %v731_v0 }
 0x1b2   :  { %v10896_v45 = vpop.permute.xlu1 %4702  ;;  %v16177_v0 = vmov 0 }
 0x1b3   :  { %16161 = vst [vmem:[#allocation221_spill] sm:$0xff] %v10896_v45  ;;  %v16165_v45 = vrot.slane %v10635_v39, 7  ;;  %v15475_v57 = vrot.slane %v10923_v16, 7 }
 0x1b4   :  { %v10904_v27 = vpop.permute.xlu0 %5208  ;;  %16163 = vst [vmem:[#allocation223_spill] sm:$0xff] %v10908_v26 }
 0x1b5   :  { %16162 = vst [vmem:[#allocation222_spill] sm:$0xff] %v10904_v27  ;;  %4980 = vrot.lane.b32.xlu2 %v3483_v13, %s8860_s23  ;;  %v10918_v10 = vsel %vm16167_vm6, %v16166_v23, %v16165_v45  ;;  %v10925_v13 = vpop.f32.mrf.mxu0  ;;  %v15474_v45 = vrot.slane %v10908_v26, 7  ;;  %v734_v23 = vadd.s32 240, %v9088_v48 }
 0x1b6   :  { %16168 = vst [vmem:[#allocation225_spill] sm:$0xff] %v10918_v10 }
 0x1b7   :  { %v10910_v42 = vpop.permute.xlu2 %5308  ;;  %16169 = vst [vmem:[#allocation226_spill] sm:$0xff] %v10923_v16  ;;  %v1750_v9 = vand.u32 15, %v734_v23  ;;  %v10956_v35 = vsel %vm16167_vm6, %v15475_v57, %v15474_v45  ;;  %vm16189_vm6 = vmmov %vm16183_vm4 }
 0x1b8   :  { %16164 = vst [vmem:[#allocation224_spill] sm:$0xff] %v10910_v42  ;;  %5228 = vrot.lane.b32.xlu1 %v10918_v10, %s8862_s30  ;;  %v16171_v42 = vrot.slane %v10619_v43, 7 }
 0x1b9   :  { %16176 = vst [vmem:[#allocation230_spill] sm:$0xff] %v10956_v35 }
 0x1ba   :  { %v10933_v27 = vsel %vm16172_vm15, %v16171_v42, %v16170_v58  ;;  %v10935_v51 = vpop.permute.xlu1 %5052  ;;  %v3164_v42 = vrot.slane %v10923_v16, 1  ;;  %v537_v58 = vmul.f32 %v10195_v52, %v10756_v62  ;;  %vm10958_vm15 = vcmp.ne.s32.totalorder %v1750_v9, 0 }
 0x1bb   :  { %16173 = vst [vmem:[#allocation227_spill] sm:$0xff] %v10933_v27  ;;  %5232 = vrot.lane.b32.xlu0 %v10933_v27, %s8862_s30  ;;  %v16178_v0 = vsel %vm10958_vm15, 4294967295, %v16177_v0  ;;  %v16185_v27 = vrot.slane %v10738_v14, 1  ;;  %v16188_v9 = vrot.slane %v10908_v26, 1 }
 0x1bc   :  { %16174 = vst [vmem:[#allocation228_spill] sm:$0xff] %v10935_v51  ;;  %v10942_v10 = vpop.permute.xlu0 %4798  ;;  %v16182_v51 = vrot.slane %v10619_v43, 1 }
 0x1bd   :  { %16175 = vst [vmem:[#allocation229_spill] sm:$0xff] %v10942_v10  ;;  %4728 = vrot.lane.b32.xlu2 %v10838_v38, %s8859_s19  ;;  %v16181_v10 = vrot.slane %v10736_v32, 1  ;;  %v10976_v45 = vsel %vm16186_vm11, %v16185_v27, %v3162_v28  ;;  %v10982_v57 = vsel %vm16189_vm6, %v3164_v42, %v16188_v9  ;;  %vm16196_vm11 = vcmp.lt.s32.totalorder %v9088_v48, 1 }
 0x1be   :  { %16179 = vst [vmem:[#allocation231_spill] sm:$0xff] %v16178_v0  ;;  %v605_v28 = vadd.f32 %v10214_v60, %v537_v58 }
 0x1bf   :  { %v10962_v23 = vpop.permute.xlu2 %5212  ;;  %v10970_v62 = vsel %vm16183_vm4, %v16182_v51, %v16181_v10  ;;  %16187 = vst [vmem:[#allocation234_spill] sm:$0xff] %v10976_v45  ;;  %v536_v10 = vmul.f32 %v10195_v52, %v10713_v5  ;;  %vm10991_vm4 = vcmp.ne.s32.totalorder %v1729_v22, 15  ;;  %v16191_v51 = vmov 0 }
 0x1c0   :  { %16180 = vst [vmem:[#allocation232_spill] sm:$0xff] %v10962_v23  ;;  %4978 = vrot.lane.b32.xlu1 %v10970_v62, %s8860_s23  ;;  %v16192_v51 = vsel %vm10991_vm4, 4294967295, %v16191_v51  ;;  %v16195_v22 = vrot.slane %v10738_v14, 7  ;;  %v11022_v9 = vmax.f32 %v605_v28, 0.0 }
 0x1c1   :  { %16184 = vst [vmem:[#allocation233_spill] sm:$0xff] %v10970_v62  ;;  %v11015_v62 = vpop.f32.mrf.mxu0  ;;  %v604_v27 = vadd.f32 %v10214_v60, %v536_v10  ;;  %v16203_v10 = vrot.slane %v10826_v55, 1 }
 0x1c2   :  { %16190 = vst [vmem:[#allocation235_spill] sm:$0xff] %v10982_v57  ;;  %v11004_v5 = vpop.permute.xlu1 %5306  ;;  %v11012_v23 = vsel %vm16196_vm11, %v16195_v22, %v2585_v53  ;;  %v733_v53 = vadd.s32 232, %v9088_v48  ;;  %v3674_v22 = vsel %vm10682_vm5, %v10774_v40, 0.0 }
 0x1c3   :  { %16193 = vst [vmem:[#allocation236_spill] sm:$0xff] %v16192_v51  ;;  %4982 = vrot.lane.b32.xlu0 %v10976_v45, %s8860_s23  ;;  %v11026_v45 = vmax.f32 %v604_v27, 0.0  ;;  %v11039_v28 = vsel %vm16189_vm6, %v16203_v10, %v3164_v42  ;;  %v738_v51 = vadd.s32 272, %v9088_v48 }
 0x1c4   :  { %16194 = vst [vmem:[#allocation237_spill] sm:$0xff] %v11004_v5  ;;  %v11018_v11 = vpop.permute.xlu0 %4958 }
 0x1c5   :  { %16197 = vst [vmem:[#allocation238_spill] sm:$0xff] %v11012_v23  ;;  %5236 = vrot.lane.b32.xlu2 %v11012_v23, %s8862_s30  ;;  %v15488_v23 = vrot.slane %v11022_v9, 7  ;;  %v16238_v24 = vrot.slane %v11026_v45, 7 }
 0x1c6   :  { %16198 = vst [vmem:[#allocation239_spill] sm:$0xff] %v11018_v11  ;;  %v15489_v11 = vrot.slane %v11026_v45, 7 }
 0x1c7   :  { %16199 = vst [vmem:[#allocation240_spill] sm:$0xff] %v11022_v9  ;;  %v11024_v5 = vpop.permute.xlu2 %4962 }
 0x1c8   :  { %16200 = vst [vmem:[#allocation241_spill] sm:$0xff] %v11024_v5  ;;  %4726 = vrot.lane.b32.xlu1 %v10738_v14, %s8859_s19  ;;  %v1743_v5 = vand.u32 15, %v733_v53  ;;  %v11057_v42 = vsel %vm16196_vm11, %v15489_v11, %v15488_v23  ;;  %v538_v53 = vmul.f32 %v10195_v52, %v10821_v4  ;;  %v539_v23 = vmul.f32 %v10195_v52, %v10868_v47 }
 0x1c9   :  { %16201 = vst [vmem:[#allocation242_spill] sm:$0xff] %v11026_v45  ;;  %v11046_v25 = vpop.f32.mrf.mxu0  ;;  %v16210_v4 = vmov 0  ;;  %v3485_v47 = vsel %vm10991_vm4, %v10864_v41, 0.0 }
 0x1ca   :  { %v11031_v58 = vpop.permute.xlu1 %5210  ;;  %16204 = vst [vmem:[#allocation244_spill] sm:$0xff] %v11039_v28  ;;  %vm11077_vm11 = vcmp.ne.s32.totalorder %v1743_v5, 15  ;;  %v607_v11 = vadd.f32 %v10214_v60, %v539_v23 }
 0x1cb   :  { %16202 = vst [vmem:[#allocation243_spill] sm:$0xff] %v11031_v58  ;;  %4730 = vrot.lane.b32.xlu0 %v10826_v55, %s8859_s19  ;;  %v15490_v58 = vrot.slane %v11026_v45, 1  ;;  %v16211_v4 = vsel %vm11077_vm11, 4294967295, %v16210_v4 }
 0x1cc   :  { %v11042_v27 = vpop.permute.xlu0 %4706  ;;  %16206 = vst [vmem:[#allocation246_spill] sm:$0xff] %v11057_v42  ;;  %v11113_v23 = vmax.f32 %v607_v11, 0.0 }
 0x1cd   :  { %16205 = vst [vmem:[#allocation245_spill] sm:$0xff] %v11042_v27  ;;  %4986 = vrot.lane.b32.xlu2 %v11039_v28, %s8860_s23  ;;  %v16208_v27 = vrot.slane %v11022_v9, 1 }
 0x1ce   :  { %16212 = vst [vmem:[#allocation249_spill] sm:$0xff] %v16211_v4  ;;  %v15507_v11 = vrot.slane %v11113_v23, 7  ;;  %v736_v4 = vadd.s32 256, %v9088_v48 }
 0x1cf   :  { %v11061_v10 = vpop.permute.xlu2 %4710  ;;  %v11072_v28 = vsel %vm16189_vm6, %v15490_v58, %v16208_v27  ;;  %v3676_v27 = vsel %vm10776_vm0, %v10858_v15, 0.0  ;;  %vm16219_vm6 = vcmp.lt.s32.totalorder %v9088_v48, 1  ;;  %vm16229_vm0 = vcmp.lt.s32.totalorder %v9088_v48, 7 }
 0x1d0   :  { %16207 = vst [vmem:[#allocation247_spill] sm:$0xff] %v11061_v10  ;;  %5234 = vrot.lane.b32.xlu1 %v3674_v22, %s8862_s30  ;;  %v606_v22 = vadd.f32 %v10214_v60, %v538_v53  ;;  %v735_v53 = vadd.s32 248, %v9088_v48 }
 0x1d1   :  { %16209 = vst [vmem:[#allocation248_spill] sm:$0xff] %v11072_v28  ;;  %v419_v10 = vpop.f32.mrf.mxu0 }
 0x1d2   :  { %v11093_v5 = vpop.permute.xlu1 %4800  ;;  %v1757_v15 = vand.u32 15, %v735_v53 }
 0x1d3   :  { %16213 = vst [vmem:[#allocation250_spill] sm:$0xff] %v11093_v5  ;;  %5238 = vrot.lane.b32.xlu0 %v3676_v27, %s8862_s30  ;;  %v3487_v27 = vsel %vm11077_vm11, %v10982_v57, 0.0  ;;  %v11111_v5 = vmax.f32 %v606_v22, 0.0 }
 0x1d4   :  { %v11098_v58 = vpop.permute.xlu0 %5056 }
 0x1d5   :  { %16214 = vst [vmem:[#allocation251_spill] sm:$0xff] %v11098_v58  ;;  %4734 = vrot.lane.b32.xlu2 %v10908_v26, %s8859_s19  ;;  %v15508_v22 = vrot.slane %v11111_v5, 7 }
 0x1d6   :  { %16216 = vst [vmem:[#allocation253_spill] sm:$0xff] %v11111_v5 }
 0x1d7   :  { %v11102_v34 = vpop.permute.xlu2 %5218  ;;  %v11136_v53 = vsel %vm16219_vm6, %v15508_v22, %v15507_v11  ;;  %v540_v11 = vmul.f32 %v10195_v52, %v10925_v13  ;;  %v541_v13 = vmul.f32 %v10195_v52, %v11015_v62  ;;  %v16235_v62 = vrot.slane %v10826_v55, 7 }
 0x1d8   :  { %16215 = vst [vmem:[#allocation252_spill] sm:$0xff] %v11102_v34  ;;  %4984 = vrot.lane.b32.xlu1 %v3485_v47, %s8860_s23  ;;  %v3678_v34 = vsel %vm10876_vm9, %v10956_v35, 0.0  ;;  %v1778_v47 = vand.u32 15, %v738_v51  ;;  %vm11140_vm9 = vcmp.ne.s32.totalorder %v1757_v15, 15 }
 0x1d9   :  { %16220 = vst [vmem:[#allocation256_spill] sm:$0xff] %v11136_v53  ;;  %v608_v15 = vadd.f32 %v10214_v60, %v540_v11 }
 0x1da   :  { %v11116_v58 = vpop.permute.xlu1 %4960  ;;  %vm11144_vm4 = vcmp.ne.s32.totalorder %v1778_v47, 0  ;;  %v609_v47 = vadd.f32 %v10214_v60, %v541_v13  ;;  %v16239_v13 = vrot.slane %v10908_v26, 7 }
 0x1db   :  { %16217 = vst [vmem:[#allocation254_spill] sm:$0xff] %v11116_v58  ;;  %4988 = vrot.lane.b32.xlu0 %v3487_v27, %s8860_s23  ;;  %v15509_v27 = vrot.slane %v11111_v5, 1  ;;  %v16222_v58 = vmov 0  ;;  %v16226_v21 = vsel %vm11144_vm4, 4294967295, %v16225_v21  ;;  %v11194_v11 = vmax.f32 %v608_v15, 0.0 }
 0x1dc   :  { %v11123_v57 = vpop.permute.xlu0 %5310  ;;  %v16223_v58 = vsel %vm11140_vm9, 4294967295, %v16222_v58  ;;  %16227 = vst [vmem:[#allocation259_spill] sm:$0xff] %v16226_v21  ;;  %v740_v15 = vadd.s32 288, %v9088_v48 }
 0x1dd   :  { %16218 = vst [vmem:[#allocation255_spill] sm:$0xff] %v11123_v57  ;;  %5242 = vrot.lane.b32.xlu2 %v3678_v34, %s8862_s30  ;;  %v16228_v34 = vrot.slane %v11113_v23, 1 }
 0x1de   :  { %16224 = vst [vmem:[#allocation258_spill] sm:$0xff] %v16223_v58 }
 0x1df   :  { %v11138_v57 = vpop.permute.xlu2 %4968  ;;  %v11154_v51 = vsel %vm16229_vm0, %v15509_v27, %v16228_v34  ;;  %v11169_v34 = vpop.f32.mrf.mxu0  ;;  %vm16236_vm0 = vmmov %vm16219_vm6 }
 0x1e0   :  { %16221 = vst [vmem:[#allocation257_spill] sm:$0xff] %v11138_v57  ;;  %4732 = vrot.lane.b32.xlu1 %v10923_v16, %s8859_s19  ;;  %vm16240_vm6 = vmmov %vm16236_vm0 }
 0x1e1   :  { %16230 = vst [vmem:[#allocation260_spill] sm:$0xff] %v11154_v51  ;;  %v16234_v51 = vrot.slane %v10923_v16, 7 }
 0x1e2   :  { %v11173_v27 = vpop.permute.xlu1 %4708 }
 0x1e3   :  { %16231 = vst [vmem:[#allocation261_spill] sm:$0xff] %v11173_v27  ;;  %4736 = vrot.lane.b32.xlu0 %v11026_v45, %s8859_s19  ;;  %v11191_v27 = vsel %vm16236_vm0, %v16235_v62, %v16234_v51  ;;  %v3489_v51 = vsel %vm11140_vm9, %v11072_v28, 0.0 }
 0x1e4   :  { %v11178_v57 = vpop.permute.xlu0 %5214  ;;  %16237 = vst [vmem:[#allocation264_spill] sm:$0xff] %v11191_v27 }
 0x1e5   :  { %16232 = vst [vmem:[#allocation262_spill] sm:$0xff] %v11178_v57  ;;  %5454 = vrot.lane.b32.xlu2 %v9356_v20, %s8861_s25  ;;  %v11206_v57 = vmax.f32 %v609_v47, 0.0 }
 0x1e7   :  { %v11183_v22 = vpop.permute.xlu2 %4716  ;;  %16242 = vst [vmem:[#allocation266_spill] sm:$0xff] %v11206_v57  ;;  %v425_v62 = vpop.f32.mrf.mxu0  ;;  %v15528_v47 = vrot.slane %v11206_v57, 7 }
 0x1e8   :  { %16233 = vst [vmem:[#allocation263_spill] sm:$0xff] %v11183_v22  ;;  %5240 = vrot.lane.b32.xlu1 %v11191_v27, %s8862_s30  ;;  %v11204_v22 = vsel %vm16240_vm6, %v16239_v13, %v16238_v24  ;;  %v1764_v27 = vand.u32 15, %v736_v4  ;;  %v15529_v24 = vrot.slane %v11194_v11, 7  ;;  %v1792_v13 = vand.u32 15, %v740_v15 }
 0x1e9   :  { %16241 = vst [vmem:[#allocation265_spill] sm:$0xff] %v11204_v22  ;;  %v16247_v4 = vrot.slane %v11026_v45, 1  ;;  %vm16249_vm6 = vcmp.lt.s32.totalorder %v9088_v48, 7  ;;  %v16254_v15 = vmov 0  ;;  %v545_v0 = vmul.f32 %v10195_v52, %v425_v62 }
 0x1ea   :  { %v11208_v35 = vpop.permute.xlu1 %5312  ;;  %vm11239_vm9 = vcmp.ne.s32.totalorder %v1764_v27, 0  ;;  %vm11243_vm11 = vcmp.ne.s32.totalorder %v1792_v13, 0  ;;  %v542_v27 = vmul.f32 %v10195_v52, %v11046_v25  ;;  %v3171_v62 = vrot.slane %v11206_v57, 1 }
 0x1eb   :  { %16243 = vst [vmem:[#allocation267_spill] sm:$0xff] %v11208_v35  ;;  %5244 = vrot.lane.b32.xlu0 %v11204_v22, %s8862_s30  ;;  %v11227_v35 = vsel %vm16236_vm0, %v15529_v24, %v15528_v47  ;;  %v16255_v15 = vsel %vm11243_vm11, 4294967295, %v16254_v15  ;;  %v543_v47 = vmul.f32 %v10195_v52, %v419_v10 }
 0x1ec   :  { %v11216_v41 = vpop.permute.xlu0 %4964  ;;  %16245 = vst [vmem:[#allocation269_spill] sm:$0xff] %v11227_v35 }
 0x1ed   :  { %16244 = vst [vmem:[#allocation268_spill] sm:$0xff] %v11216_v41  ;;  %4992 = vrot.lane.b32.xlu2 %v3489_v51, %s8860_s23  ;;  %v16248_v41 = vrot.slane %v10908_v26, 1  ;;  %v16251_v51 = vmov 0  ;;  %v611_v10 = vadd.f32 %v10214_v60, %v543_v47  ;;  %v739_v47 = vadd.s32 280, %v9088_v48 }
 0x1ee   :  { %v16252_v51 = vsel %vm11239_vm9, 4294967295, %v16251_v51  ;;  %16256 = vst [vmem:[#allocation273_spill] sm:$0xff] %v16255_v15 }
 0x1ef   :  { %v11229_v58 = vpop.permute.xlu2 %5224  ;;  %v11237_v22 = vsel %vm16249_vm6, %v16248_v41, %v16247_v4  ;;  %16253 = vst [vmem:[#allocation272_spill] sm:$0xff] %v16252_v51  ;;  %v11266_v28 = vpop.f32.mrf.mxu0  ;;  %v11272_v41 = vmax.f32 %v611_v10, 0.0  ;;  %v16265_v10 = vrot.slane %v11022_v9, 7  ;;  %vm16267_vm6 = vmmov %vm16236_vm0 }
 0x1f0   :  { %16246 = vst [vmem:[#allocation270_spill] sm:$0xff] %v11229_v58  ;;  %4990 = vrot.lane.b32.xlu1 %v11237_v22, %s8860_s23  ;;  %v610_v58 = vadd.f32 %v10214_v60, %v542_v27  ;;  %v742_v27 = vadd.s32 304, %v9088_v48 }
 0x1f1   :  { %16250 = vst [vmem:[#allocation271_spill] sm:$0xff] %v11237_v22 }
 0x1f2   :  { %v11258_v13 = vpop.permute.xlu1 %5186  ;;  %16260 = vst [vmem:[#allocation277_spill] sm:$0xff] %v11272_v41  ;;  %v11276_v25 = vmax.f32 %v610_v58, 0.0 }
 0x1f3   :  { %16257 = vst [vmem:[#allocation274_spill] sm:$0xff] %v11258_v13  ;;  %5450 = vrot.lane.b32.xlu0 %v9233_v63, %s8861_s25  ;;  %v3680_v13 = vsel %vm10958_vm15, %v11057_v42, 0.0 }
 0x1f4   :  { %v11263_v4 = vpop.permute.xlu0 %4712  ;;  %16261 = vst [vmem:[#allocation278_spill] sm:$0xff] %v11276_v25  ;;  %v15543_v58 = vrot.slane %v11276_v25, 7 }
 0x1f5   :  { %16258 = vst [vmem:[#allocation275_spill] sm:$0xff] %v11263_v4  ;;  %5460 = vrot.lane.b32.xlu2 %v9672_v7, %s8861_s25  ;;  %v1785_v7 = vand.u32 15, %v739_v47  ;;  %v16270_v47 = vrot.slane %v11272_v41, 1 }
 0x1f7   :  { %v11270_v24 = vpop.permute.xlu2 %4974 }
 0x1f8   :  { %16259 = vst [vmem:[#allocation276_spill] sm:$0xff] %v11270_v24  ;;  %5452 = vrot.lane.b32.xlu1 %v9346_v61, %s8861_s25  ;;  %v16264_v24 = vrot.slane %v11111_v5, 7 }
 0x1fa   :  { %v11279_v22 = vpop.permute.xlu1 %5216  ;;  %v11292_v40 = vsel %vm16236_vm0, %v16265_v10, %v16264_v24  ;;  %v431_v10 = vpop.f32.mrf.mxu0  ;;  %vm16271_vm0 = vcmp.lt.s32.totalorder %v9088_v48, 7 }
 0x1fb   :  { %16262 = vst [vmem:[#allocation279_spill] sm:$0xff] %v11279_v22  ;;  %5456 = vrot.lane.b32.xlu0 %v9545_v3, %s8861_s25  ;;  %v15542_v22 = vrot.slane %v11272_v41, 7  ;;  %v1806_v3 = vand.u32 15, %v742_v27 }
 0x1fc   :  { %v11284_v4 = vpop.permute.xlu0 %5220  ;;  %16266 = vst [vmem:[#allocation281_spill] sm:$0xff] %v11292_v40 }
 0x1fd   :  { %16263 = vst [vmem:[#allocation280_spill] sm:$0xff] %v11284_v4  ;;  %5248 = vrot.lane.b32.xlu2 %v11292_v40, %s8862_s30  ;;  %v3172_v4 = vrot.slane %v11276_v25, 1  ;;  %v11306_v24 = vsel %vm16267_vm6, %v15543_v58, %v15542_v22  ;;  %vm11319_vm13 = vcmp.ne.s32.totalorder %v1806_v3, 0  ;;  %v16273_v40 = vmov 0 }
 0x1fe   :  { %16268 = vst [vmem:[#allocation282_spill] sm:$0xff] %v11306_v24  ;;  %v16274_v40 = vsel %vm11319_vm13, 4294967295, %v16273_v40  ;;  %v544_v22 = vmul.f32 %v10195_v52, %v11169_v34  ;;  %vm11333_vm6 = vcmp.ne.s32.totalorder %v1785_v7, 15  ;;  %v16276_v3 = vmov 0 }
 0x1ff   :  { %v11308_v20 = vpop.permute.xlu2 %4722  ;;  %v11317_v27 = vsel %vm16271_vm0, %v3172_v4, %v16270_v47  ;;  %16275 = vst [vmem:[#allocation285_spill] sm:$0xff] %v16274_v40  ;;  %v3682_v47 = vsel %vm11239_vm9, %v11136_v53, 0.0  ;;  %v16277_v3 = vsel %vm11333_vm6, 4294967295, %v16276_v3  ;;  %v613_v58 = vadd.f32 %v10214_v60, %v545_v0 }
 0x200   :  { %16269 = vst [vmem:[#allocation283_spill] sm:$0xff] %v11308_v20  ;;  %5246 = vrot.lane.b32.xlu1 %v3680_v13, %s8862_s30  ;;  %v612_v13 = vadd.f32 %v10214_v60, %v544_v22  ;;  %v741_v60 = vadd.s32 296, %v9088_v48  ;;  %vm16294_vm9 = vcmp.lt.s32.totalorder %v9088_v48, 7 }
 0x201   :  { %16272 = vst [vmem:[#allocation284_spill] sm:$0xff] %v11317_v27  ;;  %v11364_v22 = vmax.f32 %v613_v58, 0.0  ;;  %vm16296_vm5 = vmmov %vm16294_vm9 }
 0x202   :  { %16278 = vst [vmem:[#allocation286_spill] sm:$0xff] %v16277_v3  ;;  %v11337_v20 = vpop.permute.xlu1 %4966  ;;  %v11360_v52 = vmax.f32 %v612_v13, 0.0  ;;  %v744_v13 = vadd.s32 320, %v9088_v48 }
 0x203   :  { %16279 = vst [vmem:[#allocation287_spill] sm:$0xff] %v11337_v20  ;;  %5250 = vrot.lane.b32.xlu0 %v3682_v47, %s8862_s30  ;;  %v3170_v47 = vrot.slane %v11194_v11, 1  ;;  %v15555_v20 = vrot.slane %v11364_v22, 7 }
 0x204   :  { %v11348_v7 = vpop.permute.xlu0 %4970  ;;  %16283 = vst [vmem:[#allocation291_spill] sm:$0xff] %v11360_v52  ;;  %v15556_v58 = vrot.slane %v11360_v52, 7  ;;  %v1820_v42 = vand.u32 15, %v744_v13  ;;  %v16293_v13 = vrot.slane %v11113_v23, 1 }
 0x205   :  { %16280 = vst [vmem:[#allocation288_spill] sm:$0xff] %v11348_v7  ;;  %4742 = vrot.lane.b32.xlu2 %v11113_v23, %s8859_s19  ;;  %v11358_v34 = vsel %vm16271_vm0, %v3170_v47, %v3171_v62  ;;  %v11366_v7 = vpop.f32.mrf.mxu0  ;;  %vm16287_vm0 = vcmp.lt.s32.totalorder %v9088_v48, 1 }
 0x206   :  { %16282 = vst [vmem:[#allocation290_spill] sm:$0xff] %v11358_v34  ;;  %vm11391_vm15 = vcmp.ne.s32.totalorder %v1820_v42, 0 }
 0x207   :  { %v11354_v53 = vpop.permute.xlu2 %5230  ;;  %16284 = vst [vmem:[#allocation292_spill] sm:$0xff] %v11364_v22 }
 0x208   :  { %16281 = vst [vmem:[#allocation289_spill] sm:$0xff] %v11354_v53  ;;  %5458 = vrot.lane.b32.xlu1 %v9547_v33, %s8861_s25  ;;  %v3493_v53 = vsel %vm11333_vm6, %v11358_v34, 0.0  ;;  %v1799_v33 = vand.u32 15, %v741_v60  ;;  %v11389_v34 = vsel %vm16287_vm0, %v15556_v58, %v15555_v20  ;;  %v11405_v60 = vsel %vm16296_vm5, %v3171_v62, %v3172_v4  ;;  %v11414_v20 = vld [vmem:[%s15130_s2] ss:$0 sm:$0xff] }
 0x209   :  { %16288 = vst [vmem:[#allocation295_spill] sm:$0xff] %v11389_v34  ;;  %v546_v58 = vmul.f32 %v11414_v20, %v11266_v28  ;;  %v547_v4 = vmul.f32 %v11414_v20, %v431_v10  ;;  %v16298_v62 = vmov 0  ;;  %v3684_v28 = vsel %vm11144_vm4, %v11227_v35, 0.0 }
 0x20a   :  { %v11369_v0 = vpop.permute.xlu1 %4714  ;;  %16297 = vst [vmem:[#allocation299_spill] sm:$0xff] %v11405_v60  ;;  %v16306_v10 = vrot.slane %v11194_v11, 7  ;;  %vm16326_vm6 = vcmp.lt.s32.totalorder %v9088_v48, 7  ;;  %v3688_v15 = vsel %vm11319_vm13, %v11389_v34, 0.0  ;;  %vm16369_vm13 = vcmp.lt.s32.totalorder %v9088_v48, 7 }
 0x20b   :  { %16285 = vst [vmem:[#allocation293_spill] sm:$0xff] %v11369_v0  ;;  %4744 = vrot.lane.b32.xlu0 %v11194_v11, %s8859_s19  ;;  %v3174_v0 = vrot.slane %v11360_v52, 1  ;;  %vm16330_vm4 = vmmov %vm16326_vm6 }
 0x20c   :  { %v11377_v51 = vpop.permute.xlu0 %4718 }
 0x20d   :  { %16286 = vst [vmem:[#allocation294_spill] sm:$0xff] %v11377_v51  ;;  %5000 = vrot.lane.b32.xlu2 %v3493_v53, %s8860_s23  ;;  %v16289_v51 = vmov 0  ;;  %v11401_v53 = vsel %vm16294_vm9, %v16293_v13, %v3170_v47  ;;  %vm11421_vm9 = vcmp.ne.s32.totalorder %v1799_v33, 15  ;;  %v16301_v47 = vrot.slane %v11364_v22, 1 }
 0x20e   :  { %v16290_v51 = vsel %vm11391_vm15, 4294967295, %v16289_v51  ;;  %16295 = vst [vmem:[#allocation298_spill] sm:$0xff] %v11401_v53  ;;  %v16299_v62 = vsel %vm11421_vm9, 4294967295, %v16298_v62 }
 0x20f   :  { %16291 = vst [vmem:[#allocation296_spill] sm:$0xff] %v16290_v51  ;;  %v11395_v61 = vpop.permute.xlu2 %4980  ;;  %v11429_v13 = vsel %vm16296_vm5, %v3174_v0, %v16301_v47  ;;  %v11447_v47 = vld [vmem:[%s15131_s3] ss:$0 sm:$0xff]  ;;  %vm16313_vm5 = vmmov %vm16287_vm0  ;;  %s8863_s3 = smov 20  }
 0x210   :  { %16292 = vst [vmem:[#allocation297_spill] sm:$0xff] %v11395_v61  ;;  %4998 = vrot.lane.b32.xlu1 %v11401_v53, %s8860_s23  ;;  %v437_v61 = vpop.f32.mrf.mxu0  ;;  %v615_v33 = vadd.f32 %v11447_v47, %v547_v4  ;;  %v16311_v4 = vrot.slane %v11276_v25, 7 }
 0x211   :  { %16300 = vst [vmem:[#allocation300_spill] sm:$0xff] %v16299_v62  ;;  %v16337_v62 = vrot.slane %v11360_v52, 7 }
 0x212   :  { %16302 = vst [vmem:[#allocation301_spill] sm:$0xff] %v11429_v13  ;;  %v11431_v42 = vpop.permute.xlu1 %5222  ;;  %v11471_v21 = vmax.f32 %v615_v33, 0.0 }
 0x213   :  { %16303 = vst [vmem:[#allocation302_spill] sm:$0xff] %v11431_v42  ;;  %5002 = vrot.lane.b32.xlu0 %v11405_v60, %s8860_s23  ;;  %v614_v60 = vadd.f32 %v11447_v47, %v546_v58  ;;  %v16307_v42 = vrot.slane %v11113_v23, 7 }
 0x214   :  { %v11450_v53 = vpop.permute.xlu0 %5226  ;;  %16310 = vst [vmem:[#allocation307_spill] sm:$0xff] %v11471_v21 }
 0x215   :  { %16304 = vst [vmem:[#allocation303_spill] sm:$0xff] %v11450_v53  ;;  %5254 = vrot.lane.b32.xlu2 %v3684_v28, %s8862_s30  ;;  %v11465_v63 = vsel %vm16287_vm0, %v16307_v42, %v16306_v10  ;;  %v11467_v58 = vmax.f32 %v614_v60, 0.0  ;;  %v16312_v28 = vrot.slane %v11206_v57, 7  ;;  %v743_v53 = vadd.s32 312, %v9088_v48 }
 0x216   :  { %16308 = vst [vmem:[#allocation305_spill] sm:$0xff] %v11465_v63  ;;  %v746_v60 = vadd.s32 336, %v9088_v48  ;;  %v15572_v10 = vrot.slane %v11471_v21, 7 }
 0x217   :  { %v11457_v3 = vpop.permute.xlu2 %4728  ;;  %16309 = vst [vmem:[#allocation306_spill] sm:$0xff] %v11467_v58  ;;  %v15573_v33 = vrot.slane %v11467_v58, 7 }
 0x218   :  { %16305 = vst [vmem:[#allocation304_spill] sm:$0xff] %v11457_v3  ;;  %5252 = vrot.lane.b32.xlu1 %v11465_v63, %s8862_s30  ;;  %v11479_v3 = vsel %vm16313_vm5, %v16312_v28, %v16311_v4  ;;  %v1834_v63 = vand.u32 15, %v746_v60  ;;  %v440_v19 = vpop.f32.mrf.mxu0  ;;  %v1813_v4 = vand.u32 15, %v743_v53  ;;  %v549_v28 = vmul.f32 %v11414_v20, %v437_v61 }
 0x219   :  { %16314 = vst [vmem:[#allocation308_spill] sm:$0xff] %v11479_v3  ;;  %v16329_v61 = vrot.slane %v11272_v41, 1 }
 0x21a   :  { %v11482_v35 = vpop.permute.xlu1 %4972  ;;  %vm11502_vm5 = vcmp.ne.s32.totalorder %v1834_v63, 0  ;;  %v16322_v63 = vmov 0 }
 0x21b   :  { %16315 = vst [vmem:[#allocation309_spill] sm:$0xff] %v11482_v35  ;;  %5256 = vrot.lane.b32.xlu0 %v11479_v3, %s8862_s30  ;;  %v11500_v3 = vsel %vm16287_vm0, %v15573_v33, %v15572_v10  ;;  %v15578_v35 = vrot.slane %v11467_v58, 1  ;;  %v548_v10 = vmul.f32 %v11414_v20, %v11366_v7  ;;  %vm11517_vm0 = vcmp.ne.s32.totalorder %v1813_v4, 15 }
 0x21c   :  { %v11487_v42 = vpop.permute.xlu0 %4976  ;;  %16317 = vst [vmem:[#allocation311_spill] sm:$0xff] %v11500_v3  ;;  %v16323_v63 = vsel %vm11517_vm0, 4294967295, %v16322_v63  ;;  %v16325_v33 = vrot.slane %v11471_v21, 1  ;;  %v11537_v7 = vsel %vm16330_vm4, %v16329_v61, %v3174_v0  ;;  %vm16339_vm4 = vcmp.lt.s32.totalorder %v9088_v48, 1 }
 0x21d   :  { %16316 = vst [vmem:[#allocation310_spill] sm:$0xff] %v11487_v42  ;;  %4748 = vrot.lane.b32.xlu2 %v11276_v25, %s8859_s19  ;;  %v16318_v42 = vmov 0  ;;  %v616_v30 = vadd.f32 %v11447_v47, %v548_v10  ;;  %v745_v10 = vadd.s32 328, %v9088_v48 }
 0x21e   :  { %v16319_v42 = vsel %vm11502_vm5, 4294967295, %v16318_v42  ;;  %16324 = vst [vmem:[#allocation314_spill] sm:$0xff] %v16323_v63 }
 0x21f   :  { %16320 = vst [vmem:[#allocation312_spill] sm:$0xff] %v16319_v42  ;;  %v11506_v60 = vpop.permute.xlu2 %5236 }
 0x220   :  { %16321 = vst [vmem:[#allocation313_spill] sm:$0xff] %v11506_v60  ;;  %4746 = vrot.lane.b32.xlu1 %v11206_v57, %s8859_s19  ;;  %v11527_v60 = vsel %vm16326_vm6, %v15578_v35, %v16325_v33  ;;  %v443_v0 = vpop.f32.mrf.mxu0  ;;  %v3495_v33 = vsel %vm11421_vm9, %v11317_v27, 0.0  ;;  %v3497_v35 = vsel %vm11517_vm0, %v11429_v13, 0.0  ;;  %vm16342_vm6 = vmmov %vm16339_vm4  ;;  %vm16349_vm9 = vcmp.lt.s32.totalorder %v9088_v48, 7 }
 0x221   :  { %16327 = vst [vmem:[#allocation315_spill] sm:$0xff] %v11527_v60 }
 0x222   :  { %v11529_v53 = vpop.permute.xlu1 %4720  ;;  %16331 = vst [vmem:[#allocation317_spill] sm:$0xff] %v11537_v7 }
 0x223   :  { %16328 = vst [vmem:[#allocation316_spill] sm:$0xff] %v11529_v53  ;;  %4750 = vrot.lane.b32.xlu0 %v11272_v41, %s8859_s19  ;;  %v617_v53 = vadd.f32 %v11447_v47, %v549_v28  ;;  %v11565_v28 = vmax.f32 %v616_v30, 0.0 }
 0x224   :  { %v11549_v59 = vpop.permute.xlu0 %4724 }
 0x225   :  { %16332 = vst [vmem:[#allocation318_spill] sm:$0xff] %v11549_v59  ;;  %5006 = vrot.lane.b32.xlu2 %v11537_v7, %s8860_s23  ;;  %v11562_v4 = vmax.f32 %v617_v53, 0.0  ;;  %v16338_v59 = vrot.slane %v11272_v41, 7  ;;  %v15598_v30 = vrot.slane %v11565_v28, 7  ;;  %v3178_v12 = vrot.slane %v11565_v28, 1 }
 0x226   :  { %16335 = vst [vmem:[#allocation321_spill] sm:$0xff] %v11565_v28  ;;  %v16387_v51 = vrot.slane %v11565_v28, 7 }
 0x227   :  { %v11554_v61 = vpop.permute.xlu2 %4986  ;;  %16334 = vst [vmem:[#allocation320_spill] sm:$0xff] %v11562_v4  ;;  %v11578_v53 = vsel %vm16339_vm4, %v16338_v59, %v16337_v62  ;;  %v15597_v27 = vrot.slane %v11562_v4, 7  ;;  %v16344_v62 = vmov 0 }
 0x228   :  { %16333 = vst [vmem:[#allocation319_spill] sm:$0xff] %v11554_v61  ;;  %5004 = vrot.lane.b32.xlu1 %v3495_v33, %s8860_s23  ;;  %v748_v61 = vadd.s32 352, %v9088_v48 }
 0x229   :  { %16340 = vst [vmem:[#allocation323_spill] sm:$0xff] %v11578_v53  ;;  %v11594_v59 = vsel %vm16342_vm6, %v15598_v30, %v15597_v27  ;;  %v551_v30 = vmul.f32 %v11414_v20, %v443_v0 }
 0x22a   :  { %v11568_v7 = vpop.permute.xlu1 %5228  ;;  %16343 = vst [vmem:[#allocation325_spill] sm:$0xff] %v11594_v59 }
 0x22b   :  { %16336 = vst [vmem:[#allocation322_spill] sm:$0xff] %v11568_v7  ;;  %5008 = vrot.lane.b32.xlu0 %v3497_v35, %s8860_s23  ;;  %v1848_v7 = vand.u32 15, %v748_v61  ;;  %v1827_v35 = vand.u32 15, %v745_v10  ;;  %v3686_v61 = vsel %vm11243_vm11, %v11306_v24, 0.0  ;;  %v16348_v10 = vrot.slane %v11562_v4, 1  ;;  %vm16372_vm11 = vmmov %vm16369_vm13 }
 0x22c   :  { %v16351_v24 = vmov 0  ;;  %v619_v40 = vadd.f32 %v11447_v47, %v551_v30 }
 0x22d   :  { %v11580_v13 = vpop.permute.xlu0 %5232  ;;  %5260 = vrot.lane.b32.xlu2 %v11578_v53, %s8862_s30  ;;  %vm11596_vm4 = vcmp.ne.s32.totalorder %v1848_v7, 0  ;;  %v11609_v53 = vsel %vm16349_vm9, %v3178_v12, %v16348_v10  ;;  %v550_v7 = vmul.f32 %v11414_v20, %v440_v19  ;;  %vm11620_vm6 = vcmp.ne.s32.totalorder %v1827_v35, 15 }
 0x22e   :  { %16341 = vst [vmem:[#allocation324_spill] sm:$0xff] %v11580_v13  ;;  %v16345_v62 = vsel %vm11596_vm4, 4294967295, %v16344_v62  ;;  %v16352_v24 = vsel %vm11620_vm6, 4294967295, %v16351_v24  ;;  %v11648_v0 = vmax.f32 %v619_v40, 0.0  ;;  %v3499_v30 = vsel %vm11620_vm6, %v11527_v60, 0.0 }
 0x22f   :  { %16346 = vst [vmem:[#allocation326_spill] sm:$0xff] %v16345_v62  ;;  %v11600_v33 = vpop.permute.xlu2 %4734  ;;  %v618_v35 = vadd.f32 %v11447_v47, %v550_v7  ;;  %v750_v7 = vadd.s32 368, %v9088_v48  ;;  %vm16361_vm9 = vcmp.lt.s32.totalorder %v9088_v48, 1 }
 0x230   :  { %16347 = vst [vmem:[#allocation327_spill] sm:$0xff] %v11600_v33  ;;  %5258 = vrot.lane.b32.xlu1 %v3686_v61, %s8862_s30  ;;  %v446_v33 = vpop.f32.mrf.mxu0  ;;  %v747_v61 = vadd.s32 344, %v9088_v48  ;;  %v15617_v40 = vrot.slane %v11648_v0, 7 }
 0x231   :  { %16350 = vst [vmem:[#allocation328_spill] sm:$0xff] %v11609_v53  ;;  %v11644_v19 = vmax.f32 %v618_v35, 0.0 }
 0x232   :  { %16353 = vst [vmem:[#allocation329_spill] sm:$0xff] %v16352_v24  ;;  %v11624_v10 = vpop.permute.xlu1 %4978 }
 0x233   :  { %16354 = vst [vmem:[#allocation330_spill] sm:$0xff] %v11624_v10  ;;  %5262 = vrot.lane.b32.xlu0 %v3688_v15, %s8862_s30  ;;  %v16371_v10 = vrot.slane %v11471_v21, 1 }
 0x234   :  { %16357 = vst [vmem:[#allocation333_spill] sm:$0xff] %v11644_v19 }
 0x235   :  { %v11637_v27 = vpop.permute.xlu0 %4982  ;;  %4754 = vrot.lane.b32.xlu2 %v11364_v22, %s8859_s19  ;;  %16358 = vst [vmem:[#allocation334_spill] sm:$0xff] %v11648_v0 }
 0x236   :  { %16355 = vst [vmem:[#allocation331_spill] sm:$0xff] %v11637_v27  ;;  %v1862_v27 = vand.u32 15, %v750_v7  ;;  %v16367_v7 = vrot.slane %v11467_v58, 1 }
 0x237   :  { %v11642_v15 = vpop.permute.xlu2 %5242 }
 0x238   :  { %16356 = vst [vmem:[#allocation332_spill] sm:$0xff] %v11642_v15  ;;  %4752 = vrot.lane.b32.xlu1 %v11360_v52, %s8859_s19  ;;  %v449_v35 = vpop.f32.mrf.mxu0  ;;  %v15618_v15 = vrot.slane %v11644_v19, 7  ;;  %vm11673_vm0 = vcmp.ne.s32.totalorder %v1862_v27, 0  ;;  %v3180_v27 = vrot.slane %v11644_v19, 1 }
 0x23a   :  { %v11651_v63 = vpop.permute.xlu1 %4726  ;;  %v11671_v60 = vsel %vm16361_vm9, %v15618_v15, %v15617_v40  ;;  %v11691_v40 = vsel %vm16372_vm11, %v16371_v10, %v3178_v12  ;;  %v553_v10 = vmul.f32 %v11414_v20, %v449_v35  ;;  %v3690_v35 = vsel %vm11391_vm15, %v11500_v3, 0.0 }
 0x23b   :  { %16359 = vst [vmem:[#allocation335_spill] sm:$0xff] %v11651_v63  ;;  %4756 = vrot.lane.b32.xlu0 %v11467_v58, %s8859_s19  ;;  %v1841_v63 = vand.u32 15, %v747_v61  ;;  %v16368_v61 = vrot.slane %v11364_v22, 1  ;;  %vm15734_vm15 = vcmask 1043456  }
 0x23c   :  { %16362 = vst [vmem:[#allocation337_spill] sm:$0xff] %v11671_v60 }
 0x23d   :  { %v11659_v34 = vpop.permute.xlu0 %4730  ;;  %5012 = vrot.lane.b32.xlu2 %v3499_v30, %s8860_s23  ;;  %v11685_v30 = vsel %vm16369_vm13, %v16368_v61, %v16367_v7  ;;  %16373 = vst [vmem:[#allocation341_spill] sm:$0xff] %v11691_v40  ;;  %vm11700_vm9 = vcmp.ne.s32.totalorder %v1841_v63, 15  ;;  %v16374_v7 = vmov 0  ;;  %v16377_v61 = vrot.slane %v11648_v0, 1  ;;  %vm16378_vm13 = vmmov %vm16372_vm11 }
 0x23e   :  { %16360 = vst [vmem:[#allocation336_spill] sm:$0xff] %v11659_v34  ;;  %v16363_v34 = vmov 0  ;;  %v16375_v7 = vsel %vm11700_vm9, 4294967295, %v16374_v7  ;;  %v621_v63 = vadd.f32 %v11447_v47, %v553_v10  ;;  %vm16385_vm11 = vcmp.lt.s32.totalorder %v9088_v48, 1 }
 0x23f   :  { %v16364_v34 = vsel %vm11673_vm0, 4294967295, %v16363_v34  ;;  %v11677_v13 = vpop.permute.xlu2 %5454  ;;  %16370 = vst [vmem:[#allocation340_spill] sm:$0xff] %v11685_v30  ;;  %v11708_v12 = vsel %vm16378_vm13, %v3180_v27, %v16377_v61  ;;  %vm16389_vm13 = vmmov %vm16385_vm11 }
 0x240   :  { %16365 = vst [vmem:[#allocation338_spill] sm:$0xff] %v16364_v34  ;;  %5010 = vrot.lane.b32.xlu1 %v11685_v30, %s8860_s23  ;;  %v452_v30 = vpop.f32.mrf.mxu0  ;;  %v11754_v3 = vmax.f32 %v621_v63, 0.0 }
 0x241   :  { %16366 = vst [vmem:[#allocation339_spill] sm:$0xff] %v11677_v13  ;;  %v552_v13 = vmul.f32 %v11414_v20, %v446_v33  ;;  %v16383_v33 = vrot.slane %v11467_v58, 7 }
 0x242   :  { %16376 = vst [vmem:[#allocation342_spill] sm:$0xff] %v16375_v7  ;;  %v11711_v50 = vpop.permute.xlu1 %5234 }
 0x243   :  { %16379 = vst [vmem:[#allocation343_spill] sm:$0xff] %v11708_v12  ;;  %5014 = vrot.lane.b32.xlu0 %v11691_v40, %s8860_s23  ;;  %v620_v24 = vadd.f32 %v11447_v47, %v552_v13 }
 0x244   :  { %16380 = vst [vmem:[#allocation344_spill] sm:$0xff] %v11711_v50  ;;  %v16384_v50 = vrot.slane %v11364_v22, 7 }
 0x245   :  { %v11724_v15 = vpop.permute.xlu0 %5238  ;;  %5266 = vrot.lane.b32.xlu2 %v3690_v35, %s8862_s30  ;;  %v16388_v35 = vrot.slane %v11471_v21, 7  ;;  %v11752_v10 = vmax.f32 %v620_v24, 0.0  ;;  %16392 = vst [vmem:[#allocation350_spill] sm:$0xff] %v11754_v3  ;;  %v3183_v24 = vrot.slane %v11754_v3, 1 }
 0x246   :  { %16381 = vst [vmem:[#allocation345_spill] sm:$0xff] %v11724_v15  ;;  %v11740_v61 = vsel %vm16385_vm11, %v16384_v50, %v16383_v33  ;;  %v749_v50 = vadd.s32 360, %v9088_v48 }
 0x247   :  { %v11732_v40 = vpop.permute.xlu2 %4992  ;;  %16386 = vst [vmem:[#allocation347_spill] sm:$0xff] %v11740_v61  ;;  %v11750_v13 = vsel %vm16389_vm13, %v16388_v35, %v16387_v51  ;;  %v15644_v63 = vrot.slane %v11752_v10, 7  ;;  %vm16399_vm13 = vcmp.lt.s32.totalorder %v9088_v48, 7 }
 0x248   :  { %16382 = vst [vmem:[#allocation346_spill] sm:$0xff] %v11732_v40  ;;  %5264 = vrot.lane.b32.xlu1 %v11740_v61, %s8862_s30  ;;  %v15643_v61 = vrot.slane %v11754_v3, 7  ;;  %v1855_v51 = vand.u32 15, %v749_v50  ;;  %v455_v35 = vpop.f32.mrf.mxu0  ;;  %v554_v50 = vmul.f32 %v11414_v20, %v452_v30 }
 0x249   :  { %16390 = vst [vmem:[#allocation348_spill] sm:$0xff] %v11750_v13 }
 0x24a   :  { %16391 = vst [vmem:[#allocation349_spill] sm:$0xff] %v11752_v10  ;;  %v11756_v40 = vpop.permute.xlu1 %4984  ;;  %vm11793_vm6 = vcmp.ne.s32.totalorder %v1855_v51, 15  ;;  %v622_v51 = vadd.f32 %v11447_v47, %v554_v50  ;;  %v16413_v50 = vrot.slane %v11562_v4, 7 }
 0x24b   :  { %16393 = vst [vmem:[#allocation351_spill] sm:$0xff] %v11756_v40  ;;  %5268 = vrot.lane.b32.xlu0 %v11750_v13, %s8862_s30  ;;  %v3182_v13 = vrot.slane %v11752_v10, 1  ;;  %v555_v40 = vmul.f32 %v11414_v20, %v455_v35  ;;  %v16402_v54 = vsel %vm11793_vm6, 4294967295, %v16401_v54  ;;  %v3501_v20 = vsel %vm11700_vm9, %v11609_v53, 0.0 }
 0x24c   :  { %16403 = vst [vmem:[#allocation357_spill] sm:$0xff] %v16402_v54  ;;  %v3503_v35 = vsel %vm11793_vm6, %v11708_v12, 0.0  ;;  %v3692_v53 = vsel %vm11502_vm5, %v11594_v59, 0.0 }
 0x24d   :  { %v11761_v33 = vpop.permute.xlu0 %4988  ;;  %4760 = vrot.lane.b32.xlu2 %v11565_v28, %s8859_s19 }
 0x24e   :  { %16394 = vst [vmem:[#allocation352_spill] sm:$0xff] %v11761_v33  ;;  %v11779_v33 = vsel %vm16385_vm11, %v15644_v63, %v15643_v61  ;;  %vm16404_vm11 = vmmov %vm16399_vm13  ;;  %v623_v61 = vadd.f32 %v11447_v47, %v555_v40  ;;  %v16412_v40 = vrot.slane %v11644_v19, 7 }
 0x24f   :  { %v11768_v15 = vpop.permute.xlu2 %5460  ;;  %16396 = vst [vmem:[#allocation354_spill] sm:$0xff] %v11779_v33  ;;  %v11799_v30 = vsel %vm16404_vm11, %v3182_v13, %v3183_v24 }
 0x250   :  { %16395 = vst [vmem:[#allocation353_spill] sm:$0xff] %v11768_v15  ;;  %4758 = vrot.lane.b32.xlu1 %v11471_v21, %s8859_s19  ;;  %v16398_v15 = vrot.slane %v11562_v4, 1 }
 0x251   :  { %16405 = vst [vmem:[#allocation358_spill] sm:$0xff] %v11799_v30 }
 0x252   :  { %v11783_v1 = vpop.permute.xlu1 %4732  ;;  %v11791_v46 = vsel %vm16399_vm13, %v16398_v15, %v3180_v27  ;;  %v11825_v15 = vmax.f32 %v622_v51, 0.0  ;;  %vm16414_vm13 = vcmp.lt.s32.totalorder %v9088_v48, 1 }
 0x253   :  { %16397 = vst [vmem:[#allocation355_spill] sm:$0xff] %v11783_v1  ;;  %4762 = vrot.lane.b32.xlu0 %v11562_v4, %s8859_s19  ;;  %v11840_v7 = vsel %vm16414_vm13, %v16413_v50, %v16412_v40 }
 0x254   :  { %16400 = vst [vmem:[#allocation356_spill] sm:$0xff] %v11791_v46 }
 0x255   :  { %v11810_v27 = vpop.permute.xlu0 %4736  ;;  %5018 = vrot.lane.b32.xlu2 %v11791_v46, %s8860_s23  ;;  %16408 = vst [vmem:[#allocation361_spill] sm:$0xff] %v11825_v15 }
 0x256   :  { %16406 = vst [vmem:[#allocation359_spill] sm:$0xff] %v11810_v27  ;;  %v11827_v27 = vmax.f32 %v623_v61, 0.0  ;;  %v3184_v61 = vrot.slane %v11825_v15, 1 }
 0x257   :  { %v11816_v63 = vpop.permute.xlu2 %5248  ;;  %16415 = vst [vmem:[#allocation365_spill] sm:$0xff] %v11840_v7 }
 0x258   :  { %16407 = vst [vmem:[#allocation360_spill] sm:$0xff] %v11816_v63  ;;  %5016 = vrot.lane.b32.xlu1 %v3501_v20, %s8860_s23  ;;  %v2607_v20 = vrot.slane %v11825_v15, 7  ;;  %v3185_v51 = vrot.slane %v11827_v27, 1 }
 0x259   :  { %16409 = vst [vmem:[#allocation362_spill] sm:$0xff] %v11827_v27 }
 0x25a   :  { %v11829_v46 = vpop.permute.xlu1 %5240  ;;  %v11856_v40 = vsel %vm16404_vm11, %v3184_v61, %v3185_v51 }
 0x25b   :  { %16410 = vst [vmem:[#allocation363_spill] sm:$0xff] %v11829_v46  ;;  %5020 = vrot.lane.b32.xlu0 %v3503_v35, %s8860_s23  ;;  %v2608_v35 = vrot.slane %v11827_v27, 7  ;;  %v16542_v46 = vld [vmem:[#allocation39_spill] sm:$0xff] }
 0x25c   :  { %16417 = vst [vmem:[#allocation367_spill] sm:$0xff] %v11856_v40 }
 0x25d   :  { %v11832_v47 = vpop.permute.xlu0 %5244  ;;  %5272 = vrot.lane.b32.xlu2 %v11840_v7, %s8862_s30  ;;  %v11860_v50 = vsel %vm16414_vm13, %v2607_v20, %v2608_v35  ;;  %v3694_v7 = vsel %vm11596_vm4, %v11671_v60, 0.0  ;;  %vm16426_vm13 = vcmp.lt.s32.totalorder %v9088_v48, 7 }
 0x25e   :  { %16411 = vst [vmem:[#allocation364_spill] sm:$0xff] %v11832_v47  ;;  %vm16428_vm6 = vmmov %vm16426_vm13 }
 0x25f   :  { %v11848_v12 = vpop.permute.xlu2 %4742  ;;  %16418 = vst [vmem:[#allocation368_spill] sm:$0xff] %v11860_v50 }
 0x260   :  { %16416 = vst [vmem:[#allocation366_spill] sm:$0xff] %v11848_v12  ;;  %5270 = vrot.lane.b32.xlu1 %v3692_v53, %s8862_s30  ;;  %v751_v12 = vadd.s32 376, %v9088_v48 }
 0x262   :  { %v11866_v63 = vpop.permute.xlu1 %4990  ;;  %v1869_v62 = vand.u32 15, %v751_v12 }
 0x263   :  { %16419 = vst [vmem:[#allocation369_spill] sm:$0xff] %v11866_v63  ;;  %5274 = vrot.lane.b32.xlu0 %v3694_v7, %s8862_s30  ;;  %v16421_v7 = vmov 0  ;;  %v11907_v63 = vsel %vm16428_vm6, %v3183_v24, %v3184_v61  ;;  %v16433_v24 = vrot.slane %v11752_v10, 7  ;;  %v16434_v61 = vrot.slane %v11648_v0, 7 }
 0x264   :  { %vm11883_vm11 = vcmp.ne.s32.totalorder %v1869_v62, 15  ;;  %v16425_v62 = vrot.slane %v11648_v0, 1  ;;  %16429 = vst [vmem:[#allocation374_spill] sm:$0xff] %v11907_v63  ;;  %vm16435_vm6 = vcmp.lt.s32.totalorder %v9088_v48, 1 }
 0x265   :  { %v11875_v59 = vpop.permute.xlu0 %5450  ;;  %4766 = vrot.lane.b32.xlu2 %v11648_v0, %s8859_s19  ;;  %v16422_v7 = vsel %vm11883_vm11, 4294967295, %v16421_v7  ;;  %v3505_v42 = vsel %vm11883_vm11, %v11799_v30, 0.0  ;;  %v3696_v30 = vsel %vm11673_vm0, %v11779_v33, 0.0 }
 0x266   :  { %16423 = vst [vmem:[#allocation371_spill] sm:$0xff] %v16422_v7 }
 0x267   :  { %v11879_v60 = vpop.permute.xlu2 %5000 }
 0x268   :  { %16420 = vst [vmem:[#allocation370_spill] sm:$0xff] %v11879_v60  ;;  %4764 = vrot.lane.b32.xlu1 %v11644_v19, %s8859_s19  ;;  %v11903_v60 = vsel %vm16426_vm13, %v16425_v62, %v3182_v13  ;;  %v11929_v62 = vsel %vm16435_vm6, %v16434_v61, %v16433_v24  ;;  %vm16438_vm13 = vmmov %vm16435_vm6  ;;  %v753_v24 = vadd.s32 392, %v9088_v48  ;;  %vm16445_vm6 = vcmp.lt.s32.totalorder %v9088_v48, 7 }
 0x269   :  { %16427 = vst [vmem:[#allocation373_spill] sm:$0xff] %v11903_v60 }
 0x26a   :  { %v11887_v53 = vpop.permute.xlu1 %5452  ;;  %16436 = vst [vmem:[#allocation378_spill] sm:$0xff] %v11929_v62 }
 0x26b   :  { %4768 = vrot.lane.b32.xlu0 %v11752_v10, %s8859_s19 }
 0x26d   :  { %v11894_v54 = vpop.permute.xlu0 %5456  ;;  %5024 = vrot.lane.b32.xlu2 %v3505_v42, %s8860_s23 }
 0x26f   :  { %v11897_v12 = vpop.permute.xlu2 %5254 }
 0x270   :  { %16424 = vst [vmem:[#allocation372_spill] sm:$0xff] %v11897_v12  ;;  %5022 = vrot.lane.b32.xlu1 %v11903_v60, %s8860_s23  ;;  %v16444_v60 = vrot.slane %v9090_v49, 1  ;;  %v752_v12 = vadd.s32 384, %v9088_v48 }
 0x272   :  { %v11911_v7 = vpop.permute.xlu1 %5246 }
 0x273   :  { %16430 = vst [vmem:[#allocation375_spill] sm:$0xff] %v11911_v7  ;;  %5026 = vrot.lane.b32.xlu0 %v11907_v63, %s8860_s23  ;;  %v16437_v63 = vrot.slane %v11754_v3, 7 }
 0x275   :  { %v11915_v42 = vpop.permute.xlu0 %5250  ;;  %5278 = vrot.lane.b32.xlu2 %v3696_v30, %s8862_s30  ;;  %v11937_v34 = vsel %vm16438_vm13, %v16437_v63, %v2607_v20  ;;  %v1883_v63 = vand.u32 15, %v753_v24 }
 0x276   :  { %16431 = vst [vmem:[#allocation376_spill] sm:$0xff] %v11915_v42 }
 0x277   :  { %v11921_v13 = vpop.permute.xlu2 %4748  ;;  %16439 = vst [vmem:[#allocation379_spill] sm:$0xff] %v11937_v34  ;;  %vm11966_vm13 = vcmp.ne.s32.totalorder %v1883_v63, 15  ;;  %v16453_v63 = vrot.slane %v9090_v49, 7 }
 0x278   :  { %16432 = vst [vmem:[#allocation377_spill] sm:$0xff] %v11921_v13  ;;  %5276 = vrot.lane.b32.xlu1 %v11929_v62, %s8862_s30  ;;  %v3507_v24 = vsel %vm11966_vm13, %v11856_v40, 0.0  ;;  %v16456_v40 = vmov 0 }
 0x27a   :  { %v11939_v30 = vpop.permute.xlu1 %5458 }
 0x27b   :  { %5280 = vrot.lane.b32.xlu0 %v11937_v34, %s8862_s30 }
 0x27d   :  { %v11943_v13 = vpop.permute.xlu0 %4744  ;;  %4772 = vrot.lane.b32.xlu2 %v11825_v15, %s8859_s19 }
 0x27e   :  { %16440 = vst [vmem:[#allocation380_spill] sm:$0xff] %v11943_v13  ;;  %v11962_v13 = vsel %vm16445_vm6, %v3185_v51, %v16444_v60  ;;  %v1876_v60 = vand.u32 15, %v752_v12  ;;  %vm16454_vm6 = vcmp.lt.s32.totalorder %v9088_v48, 1  ;;  %v16584_v48 = vld [vmem:[#allocation191_spill] sm:$0xff] }
 0x27f   :  { %v11948_v61 = vpop.permute.xlu2 %5006  ;;  %16446 = vst [vmem:[#allocation384_spill] sm:$0xff] %v11962_v13  ;;  %v11987_v34 = vsel %vm16454_vm6, %v2608_v35, %v16453_v63 }
 0x280   :  { %16441 = vst [vmem:[#allocation381_spill] sm:$0xff] %v11948_v61  ;;  %4770 = vrot.lane.b32.xlu1 %v11754_v3, %s8859_s19  ;;  %v16447_v61 = vmov 0  ;;  %vm11991_vm11 = vcmp.ne.s32.totalorder %v1876_v60, 0 }
 0x281   :  { %v16448_v61 = vsel %vm11966_vm13, 4294967295, %v16447_v61  ;;  %16455 = vst [vmem:[#allocation389_spill] sm:$0xff] %v11987_v34  ;;  %v16457_v40 = vsel %vm11991_vm11, 4294967295, %v16456_v40  ;;  %v3698_v12 = vsel %vm11991_vm11, %v11860_v50, 0.0  ;;  %v16511_v50 = vld [vmem:[#allocation69_spill] sm:$0xff]  ;;  %vm15740_vm13 = vcmask 64512  }
 0x282   :  { %v11952_v62 = vpop.permute.xlu1 %4998  ;;  %16449 = vst [vmem:[#allocation385_spill] sm:$0xff] %v16448_v61  ;;  %vm15741_vm11 = vcmask 97280  }
 0x283   :  { %16442 = vst [vmem:[#allocation382_spill] sm:$0xff] %v11952_v62  ;;  %4774 = vrot.lane.b32.xlu0 %v11827_v27, %s8859_s19  ;;  %s8864_s19 = smov 24  }
 0x284   :  { %16458 = vst [vmem:[#allocation390_spill] sm:$0xff] %v16457_v40 }
 0x285   :  { %v11956_v20 = vpop.permute.xlu0 %5002  ;;  %5030 = vrot.lane.b32.xlu2 %v11962_v13, %s8860_s23 }
 0x286   :  { %16443 = vst [vmem:[#allocation383_spill] sm:$0xff] %v11956_v20 }
 0x287   :  { %v11971_v62 = vpop.permute.xlu2 %5260 }
 0x288   :  { %16450 = vst [vmem:[#allocation386_spill] sm:$0xff] %v11971_v62  ;;  %5028 = vrot.lane.b32.xlu1 %v3507_v24, %s8860_s23  ;;  %s8865_s23 = smov 32  }
 0x28a   :  { %v11977_v20 = vpop.permute.xlu1 %5252 }
 0x28b   :  { %16451 = vst [vmem:[#allocation387_spill] sm:$0xff] %v11977_v20  ;;  %5462 = vrot.lane.b32.xlu0 %v9674_v56, %s8861_s25  ;;  %v16516_v20 = vld [vmem:[#allocation54_spill] sm:$0xff] }
 0x28d   :  { %v11981_v51 = vpop.permute.xlu0 %5256  ;;  %5284 = vrot.lane.b32.xlu2 %v11987_v34, %s8862_s30 }
 0x28e   :  { %16452 = vst [vmem:[#allocation388_spill] sm:$0xff] %v11981_v51  ;;  %v16504_v51 = vld [vmem:[#allocation6_spill] sm:$0xff] }
 0x28f   :  { %v11995_v24 = vpop.permute.xlu2 %4754 }
 0x290   :  { %16459 = vst [vmem:[#allocation391_spill] sm:$0xff] %v11995_v24  ;;  %5282 = vrot.lane.b32.xlu1 %v3698_v12, %s8862_s30 }
 0x292   :  { %v12001_v62 = vpop.permute.xlu1 %4746 }
 0x293   :  { %16460 = vst [vmem:[#allocation392_spill] sm:$0xff] %v12001_v62  ;;  %5468 = vrot.lane.b32.xlu0 %v10096_v2, %s8861_s25 }
 0x295   :  { %v12005_v35 = vpop.permute.xlu0 %4750  ;;  %5466 = vrot.lane.b32.xlu2 %v9874_v36, %s8861_s25 }
 0x296   :  { %16461 = vst [vmem:[#allocation393_spill] sm:$0xff] %v12005_v35 }
 0x297   :  { %v12009_v60 = vpop.permute.xlu2 %5012 }
 0x298   :  { %16462 = vst [vmem:[#allocation394_spill] sm:$0xff] %v12009_v60  ;;  %5464 = vrot.lane.b32.xlu1 %v9872_v8, %s8861_s25 }
 0x29a   :  { %v12013_v63 = vpop.permute.xlu1 %5004 }
 0x29b   :  { %16463 = vst [vmem:[#allocation395_spill] sm:$0xff] %v12013_v63  ;;  %5474 = vrot.lane.b32.xlu0 %v10237_v17, %s8861_s25 }
 0x29d   :  { %v12017_v12 = vpop.permute.xlu0 %5008  ;;  %5472 = vrot.lane.b32.xlu2 %v10232_v6, %s8861_s25 }
 0x29e   :  { %16464 = vst [vmem:[#allocation396_spill] sm:$0xff] %v12017_v12 }
 0x29f   :  { %v12021_v24 = vpop.permute.xlu2 %5266 }
 0x2a0   :  { %16465 = vst [vmem:[#allocation397_spill] sm:$0xff] %v12021_v24  ;;  %5470 = vrot.lane.b32.xlu1 %v10108_v18, %s8861_s25 }
 0x2a2   :  { %v12025_v35 = vpop.permute.xlu1 %5258 }
 0x2a3   :  { %16466 = vst [vmem:[#allocation398_spill] sm:$0xff] %v12025_v35  ;;  %5480 = vrot.lane.b32.xlu0 %v10528_v29, %s8861_s25 }
 0x2a5   :  { %v12029_v60 = vpop.permute.xlu0 %5262  ;;  %5478 = vrot.lane.b32.xlu2 %v10403_v31, %s8861_s25 }
 0x2a6   :  { %16467 = vst [vmem:[#allocation399_spill] sm:$0xff] %v12029_v60 }
 0x2a7   :  { %v12033_v63 = vpop.permute.xlu2 %4760 }
 0x2a8   :  { %16468 = vst [vmem:[#allocation400_spill] sm:$0xff] %v12033_v63  ;;  %5476 = vrot.lane.b32.xlu1 %v10401_v44, %s8861_s25 }
 0x2aa   :  { %v12037_v12 = vpop.permute.xlu1 %4752 }
 0x2ab   :  { %16469 = vst [vmem:[#allocation401_spill] sm:$0xff] %v12037_v12  ;;  %5486 = vrot.lane.b32.xlu0 %v10619_v43, %s8861_s25 }
 0x2ad   :  { %v12041_v24 = vpop.permute.xlu0 %4756  ;;  %5484 = vrot.lane.b32.xlu2 %v10635_v39, %s8861_s25 }
 0x2ae   :  { %16470 = vst [vmem:[#allocation402_spill] sm:$0xff] %v12041_v24 }
 0x2af   :  { %v12045_v35 = vpop.permute.xlu2 %5018 }
 0x2b0   :  { %16471 = vst [vmem:[#allocation403_spill] sm:$0xff] %v12045_v35  ;;  %5482 = vrot.lane.b32.xlu1 %v10514_v37, %s8861_s25 }
 0x2b2   :  { %v12049_v60 = vpop.permute.xlu1 %5010 }
 0x2b3   :  { %16472 = vst [vmem:[#allocation404_spill] sm:$0xff] %v12049_v60  ;;  %5492 = vrot.lane.b32.xlu0 %v10838_v38, %s8861_s25 }
 0x2b5   :  { %v12053_v63 = vpop.permute.xlu0 %5014  ;;  %5490 = vrot.lane.b32.xlu2 %v10738_v14, %s8861_s25 }
 0x2b6   :  { %16473 = vst [vmem:[#allocation405_spill] sm:$0xff] %v12053_v63 }
 0x2b7   :  { %v12057_v12 = vpop.permute.xlu2 %5272 }
 0x2b8   :  { %16474 = vst [vmem:[#allocation406_spill] sm:$0xff] %v12057_v12  ;;  %5488 = vrot.lane.b32.xlu1 %v10736_v32, %s8861_s25 }
 0x2ba   :  { %v12061_v24 = vpop.permute.xlu1 %5264 }
 0x2bb   :  { %16475 = vst [vmem:[#allocation407_spill] sm:$0xff] %v12061_v24  ;;  %5498 = vrot.lane.b32.xlu0 %v10908_v26, %s8861_s25  ;;  %v16595_v26 = vld [vmem:[#allocation177_spill] sm:$0xff] }
 0x2bc   :  { %vm16596_vm9 = vnez %v16595_v26  ;;  %v16605_v26 = vld [vmem:[#allocation45_spill] sm:$0xff] }
 0x2bd   :  { %v12065_v35 = vpop.permute.xlu0 %5268  ;;  %5496 = vrot.lane.b32.xlu2 %v10923_v16, %s8861_s25 }
 0x2be   :  { %16476 = vst [vmem:[#allocation408_spill] sm:$0xff] %v12065_v35 }
 0x2bf   :  { %v12069_v60 = vpop.permute.xlu2 %4766 }
 0x2c0   :  { %16477 = vst [vmem:[#allocation409_spill] sm:$0xff] %v12069_v60  ;;  %5494 = vrot.lane.b32.xlu1 %v10826_v55, %s8861_s25 }
 0x2c2   :  { %v12073_v63 = vpop.permute.xlu1 %4758 }
 0x2c3   :  { %16478 = vst [vmem:[#allocation410_spill] sm:$0xff] %v12073_v63  ;;  %5504 = vrot.lane.b32.xlu0 %v11111_v5, %s8861_s25  ;;  %v16585_v5 = vsel %vm10664_vm14, %v16584_v48, 0.0 }
 0x2c5   :  { %v12077_v12 = vpop.permute.xlu0 %4762  ;;  %5502 = vrot.lane.b32.xlu2 %v11022_v9, %s8861_s25 }
 0x2c6   :  { %16479 = vst [vmem:[#allocation411_spill] sm:$0xff] %v12077_v12 }
 0x2c7   :  { %v12081_v24 = vpop.permute.xlu2 %5024 }
 0x2c8   :  { %16480 = vst [vmem:[#allocation412_spill] sm:$0xff] %v12081_v24  ;;  %5500 = vrot.lane.b32.xlu1 %v11026_v45, %s8861_s25  ;;  %v16594_v45 = vld [vmem:[#allocation12_spill] sm:$0xff] }
 0x2ca   :  { %v12085_v35 = vpop.permute.xlu1 %5016 }
 0x2cb   :  { %16481 = vst [vmem:[#allocation413_spill] sm:$0xff] %v12085_v35  ;;  %5510 = vrot.lane.b32.xlu0 %v11206_v57, %s8861_s25 }
 0x2cd   :  { %v12089_v60 = vpop.permute.xlu0 %5020  ;;  %5508 = vrot.lane.b32.xlu2 %v11194_v11, %s8861_s25 }
 0x2ce   :  { %16482 = vst [vmem:[#allocation414_spill] sm:$0xff] %v12089_v60 }
 0x2cf   :  { %v12093_v63 = vpop.permute.xlu2 %5278 }
 0x2d0   :  { %16483 = vst [vmem:[#allocation415_spill] sm:$0xff] %v12093_v63  ;;  %5506 = vrot.lane.b32.xlu1 %v11113_v23, %s8861_s25 }
 0x2d2   :  { %v12097_v12 = vpop.permute.xlu1 %5270 }
 0x2d3   :  { %16484 = vst [vmem:[#allocation416_spill] sm:$0xff] %v12097_v12  ;;  %5516 = vrot.lane.b32.xlu0 %v11360_v52, %s8861_s25  ;;  %v16543_v52 = vsel %vm9374_vm12, %v16542_v46, 0.0 }
 0x2d5   :  { %v12101_v24 = vpop.permute.xlu0 %5274  ;;  %5514 = vrot.lane.b32.xlu2 %v11272_v41, %s8861_s25 }
 0x2d6   :  { %16485 = vst [vmem:[#allocation417_spill] sm:$0xff] %v12101_v24 }
 0x2d7   :  { %v12105_v35 = vpop.permute.xlu2 %4772 }
 0x2d8   :  { %16486 = vst [vmem:[#allocation418_spill] sm:$0xff] %v12105_v35  ;;  %5512 = vrot.lane.b32.xlu1 %v11276_v25, %s8861_s25 }
 0x2da   :  { %v12109_v11 = vpop.permute.xlu1 %4764 }
 0x2db   :  { %16487 = vst [vmem:[#allocation419_spill] sm:$0xff] %v12109_v11  ;;  %5522 = vrot.lane.b32.xlu0 %v11471_v21, %s8861_s25  ;;  %v16517_v21 = vld [vmem:[#allocation135_spill] sm:$0xff] }
 0x2dd   :  { %v12113_v23 = vpop.permute.xlu0 %4768  ;;  %5520 = vrot.lane.b32.xlu2 %v11467_v58, %s8861_s25  ;;  %v16635_v58 = vld [vmem:[#allocation23_spill] sm:$0xff] }
 0x2de   :  { %16488 = vst [vmem:[#allocation420_spill] sm:$0xff] %v12113_v23 }
 0x2df   :  { %v12117_v63 = vpop.permute.xlu2 %5030 }
 0x2e0   :  { %16489 = vst [vmem:[#allocation421_spill] sm:$0xff] %v12117_v63  ;;  %5518 = vrot.lane.b32.xlu1 %v11364_v22, %s8861_s25  ;;  %v16534_v22 = vld [vmem:[#allocation30_spill] sm:$0xff] }
 0x2e2   :  { %v12121_v60 = vpop.permute.xlu1 %5022 }
 0x2e3   :  { %16490 = vst [vmem:[#allocation422_spill] sm:$0xff] %v12121_v60  ;;  %5528 = vrot.lane.b32.xlu0 %v11644_v19, %s8861_s25 }
 0x2e5   :  { %v12125_v24 = vpop.permute.xlu0 %5026  ;;  %5526 = vrot.lane.b32.xlu2 %v11562_v4, %s8861_s25  ;;  %v16508_v4 = vld [vmem:[#allocation35_spill] sm:$0xff] }
 0x2e6   :  { %16491 = vst [vmem:[#allocation423_spill] sm:$0xff] %v12125_v24 }
 0x2e7   :  { %v12129_v11 = vpop.permute.xlu2 %5284 }
 0x2e8   :  { %16492 = vst [vmem:[#allocation424_spill] sm:$0xff] %v12129_v11  ;;  %5524 = vrot.lane.b32.xlu1 %v11565_v28, %s8861_s25 }
 0x2ea   :  { %v12133_v23 = vpop.permute.xlu1 %5276 }
 0x2eb   :  { %16493 = vst [vmem:[#allocation425_spill] sm:$0xff] %v12133_v23  ;;  %5534 = vrot.lane.b32.xlu0 %v11754_v3, %s8861_s25 }
 0x2ed   :  { %v12137_v12 = vpop.permute.xlu0 %5280  ;;  %5532 = vrot.lane.b32.xlu2 %v11752_v10, %s8861_s25 }
 0x2ee   :  { %16494 = vst [vmem:[#allocation426_spill] sm:$0xff] %v12137_v12  ;;  %v16499_v12 = vld [vmem:[#allocation17_spill] sm:$0xff] }
 0x2ef   :  { %v12141_v60 = vpop.permute.xlu2 %5466 }
 0x2f0   :  { %16495 = vst [vmem:[#allocation427_spill] sm:$0xff] %v12141_v60  ;;  %5530 = vrot.lane.b32.xlu1 %v11648_v0, %s8861_s25  ;;  %v16502_v0 = vld [vmem:[#allocation16_spill] sm:$0xff] }
 0x2f2   :  { %v12145_v62 = vpop.permute.xlu1 %4770 }
 0x2f3   :  { %16496 = vst [vmem:[#allocation428_spill] sm:$0xff] %v12145_v62  ;;  %5540 = vrot.lane.b32.xlu0 %v9090_v49, %s8861_s25  ;;  %v16522_v62 = vld [vmem:[#allocation95_spill] sm:$0xff] }
 0x2f5   :  { %v12149_v19 = vpop.permute.xlu0 %4774  ;;  %5538 = vrot.lane.b32.xlu2 %v11827_v27, %s8861_s25  ;;  %v16505_v27 = vld [vmem:[#allocation50_spill] sm:$0xff] }
 0x2f6   :  { %16497 = vst [vmem:[#allocation429_spill] sm:$0xff] %v12149_v19  ;;  %v16510_v19 = vld [vmem:[#allocation34_spill] sm:$0xff] }
 0x2f7   :  { %v12153_v23 = vpop.permute.xlu2 %5472 }
 0x2f8   :  { %16498 = vst [vmem:[#allocation430_spill] sm:$0xff] %v12153_v23  ;;  %5536 = vrot.lane.b32.xlu1 %v11825_v15, %s8861_s25  ;;  %v16588_v23 = vld [vmem:[#allocation202_spill] sm:$0xff] }
 0x2fa   :  { %v12159_v3 = vpop.permute.xlu1 %5028 }
 0x2fb   :  { %5546 = vrot.lane.b32.xlu0 %v16499_v12, %s8861_s25  ;;  %16500 = vst [vmem:[#allocation431_spill] sm:$0xff] %v12159_v3  ;;  %v16514_v3 = vld [vmem:[#allocation68_spill] sm:$0xff] }
 0x2fd   :  { %v12161_v10 = vpop.permute.xlu0 %5462  ;;  %5544 = vrot.lane.b32.xlu2 %v16502_v0, %s8861_s25 }
 0x2fe   :  { %16501 = vst [vmem:[#allocation432_spill] sm:$0xff] %v12161_v10 }
 0x2ff   :  { %v12165_v49 = vpop.permute.xlu2 %5478 }
 0x300   :  { %16503 = vst [vmem:[#allocation433_spill] sm:$0xff] %v12165_v49  ;;  %5542 = vrot.lane.b32.xlu1 %v16504_v51, %s8861_s25  ;;  %v16564_v51 = vld [vmem:[#allocation141_spill] sm:$0xff] }
 0x301   :  { %v16565_v13 = vsel %vm10301_vm3, %v16564_v51, 0.0 }
 0x302   :  { %v12171_v34 = vpop.permute.xlu1 %5282 }
 0x303   :  { %5552 = vrot.lane.b32.xlu0 %v16505_v27, %s8861_s25  ;;  %16506 = vst [vmem:[#allocation434_spill] sm:$0xff] %v12171_v34 }
 0x305   :  { %v12173_v15 = vpop.permute.xlu0 %5468  ;;  %5550 = vrot.lane.b32.xlu2 %v16508_v4, %s8861_s25 }
 0x306   :  { %16507 = vst [vmem:[#allocation435_spill] sm:$0xff] %v12173_v15  ;;  %v4098_v15 = vsel %vm16596_vm9, %v16594_v45, 0.0 }
 0x307   :  { %v12177_v63 = vpop.permute.xlu2 %5484 }
 0x308   :  { %16509 = vst [vmem:[#allocation436_spill] sm:$0xff] %v12177_v63  ;;  %5548 = vrot.lane.b32.xlu1 %v16510_v19, %s8861_s25  ;;  %v16562_v63 = vld [vmem:[#allocation119_spill] sm:$0xff] }
 0x30a   :  { %v12183_v28 = vpop.permute.xlu1 %5464 }
 0x30b   :  { %5558 = vrot.lane.b32.xlu0 %v16511_v50, %s8861_s25  ;;  %16512 = vst [vmem:[#allocation437_spill] sm:$0xff] %v12183_v28  ;;  %v16520_v50 = vld [vmem:[#allocation97_spill] sm:$0xff] }
 0x30d   :  { %v12185_v11 = vpop.permute.xlu0 %5474  ;;  %5556 = vrot.lane.b32.xlu2 %v16514_v3, %s8861_s25  ;;  %v16523_v3 = vld [vmem:[#allocation9_spill] sm:$0xff] }
 0x30e   :  { %16513 = vst [vmem:[#allocation438_spill] sm:$0xff] %v12185_v11  ;;  %v16582_v11 = vld [vmem:[#allocation195_spill] sm:$0xff] }
 0x30f   :  { %v12189_v35 = vpop.permute.xlu2 %5490 }
 0x310   :  { %16515 = vst [vmem:[#allocation439_spill] sm:$0xff] %v12189_v35  ;;  %5554 = vrot.lane.b32.xlu1 %v16516_v20, %s8861_s25  ;;  %v16551_v35 = vld [vmem:[#allocation92_spill] sm:$0xff] }
 0x312   :  { %v12195_v42 = vpop.permute.xlu1 %5470 }
 0x313   :  { %5564 = vrot.lane.b32.xlu0 %v16517_v21, %s8861_s25  ;;  %16518 = vst [vmem:[#allocation440_spill] sm:$0xff] %v12195_v42  ;;  %v16526_v21 = vld [vmem:[#allocation169_spill] sm:$0xff] }
 0x315   :  { %v12197_v34 = vpop.permute.xlu0 %5480  ;;  %5562 = vrot.lane.b32.xlu2 %v16520_v50, %s8861_s25  ;;  %v16528_v50 = vld [vmem:[#allocation143_spill] sm:$0xff] }
 0x316   :  { %16519 = vst [vmem:[#allocation441_spill] sm:$0xff] %v12197_v34  ;;  %v16574_v34 = vld [vmem:[#allocation196_spill] sm:$0xff] }
 0x317   :  { %v12201_v24 = vpop.permute.xlu2 %5496 }
 0x318   :  { %16521 = vst [vmem:[#allocation442_spill] sm:$0xff] %v12201_v24  ;;  %5560 = vrot.lane.b32.xlu1 %v16522_v62, %s8861_s25  ;;  %v16530_v62 = vld [vmem:[#allocation25_spill] sm:$0xff]  ;;  %v16647_v24 = vld [vmem:[#allocation38_spill] sm:$0xff] }
 0x319   :  { %v16531_v7 = vsel %vm9243_vm8, %v16530_v62, 0.0 }
 0x31a   :  { %v12207_v20 = vpop.permute.xlu1 %5476 }
 0x31b   :  { %5698 = vrot.lane.b32.xlu0 %v16523_v3, %s8863_s3  ;;  %16524 = vst [vmem:[#allocation9_spill] sm:$0xff] %v12207_v20 }
 0x31d   :  { %v12209_v33 = vpop.permute.xlu0 %5486  ;;  %5568 = vrot.lane.b32.xlu2 %v16526_v21, %s8861_s25  ;;  %v16536_v21 = vld [vmem:[#allocation24_spill] sm:$0xff] }
 0x31e   :  { %16525 = vst [vmem:[#allocation443_spill] sm:$0xff] %v12209_v33  ;;  %v3843_v1 = vsel %vm9289_vm10, %v16536_v21, 0.0  ;;  %v16547_v21 = vld [vmem:[#allocation71_spill] sm:$0xff] }
 0x31f   :  { %v12213_v27 = vpop.permute.xlu2 %5502  ;;  %v16548_v12 = vsel %vm9725_vm7, %v16547_v21, 0.0 }
 0x320   :  { %16527 = vst [vmem:[#allocation444_spill] sm:$0xff] %v12213_v27  ;;  %5566 = vrot.lane.b32.xlu1 %v16528_v50, %s8861_s25  ;;  %v16538_v50 = vld [vmem:[#allocation67_spill] sm:$0xff]  ;;  %s8866_s25 = smov 28   ;;  %v16622_v27 = vld [vmem:[#allocation20_spill] sm:$0xff] }
 0x322   :  { %v12222_v4 = vpop.permute.xlu1 %5482 }
 0x323   :  { %5704 = vrot.lane.b32.xlu0 %v16531_v7, %s8863_s3  ;;  %16532 = vst [vmem:[#allocation21_spill] sm:$0xff] %v12222_v4  ;;  %v16568_v4 = vld [vmem:[#allocation163_spill] sm:$0xff] }
 0x325   :  { %v12224_v3 = vpop.permute.xlu0 %5492  ;;  %5702 = vrot.lane.b32.xlu2 %v16534_v22, %s8863_s3 }
 0x326   :  { %16533 = vst [vmem:[#allocation25_spill] sm:$0xff] %v12224_v3  ;;  %v16545_v3 = vld [vmem:[#allocation47_spill] sm:$0xff] }
 0x327   :  { %v12228_v47 = vpop.permute.xlu2 %5508 }
 0x328   :  { %16535 = vst [vmem:[#allocation30_spill] sm:$0xff] %v12228_v47  ;;  %5700 = vrot.lane.b32.xlu1 %v3843_v1, %s8863_s3  ;;  %v7179_v1 = vld [vmem:[%s15132_s4 + $0x10] sm:$0xff] }
 0x32a   :  { %v12236_v19 = vpop.permute.xlu1 %5488 }
 0x32b   :  { %5710 = vrot.lane.b32.xlu0 %v16538_v50, %s8863_s3  ;;  %16539 = vst [vmem:[#allocation24_spill] sm:$0xff] %v12236_v19  ;;  %v16556_v19 = vld [vmem:[#allocation139_spill] sm:$0xff] }
 0x32d   :  { %v12238_v7 = vpop.permute.xlu0 %5498  ;;  %5708 = vrot.lane.b32.xlu2 %v16543_v52, %s8863_s3  ;;  %v16658_v52 = vld [vmem:[#allocation98_spill] sm:$0xff] }
 0x32e   :  { %16540 = vst [vmem:[#allocation27_spill] sm:$0xff] %v12238_v7 }
 0x32f   :  { %v12245_v47 = vpop.permute.xlu2 %5514 }
 0x330   :  { %16544 = vst [vmem:[#allocation67_spill] sm:$0xff] %v12245_v47  ;;  %5706 = vrot.lane.b32.xlu1 %v16545_v3, %s8863_s3  ;;  %v16554_v47 = vld [vmem:[#allocation62_spill] sm:$0xff] }
 0x331   :  { %v16555_v25 = vsel %vm9550_vm2, %v16554_v47, 0.0 }
 0x332   :  { %v12254_v41 = vpop.permute.xlu1 %5494 }
 0x333   :  { %5716 = vrot.lane.b32.xlu0 %v16548_v12, %s8863_s3  ;;  %16549 = vst [vmem:[#allocation36_spill] sm:$0xff] %v12254_v41  ;;  %v16559_v41 = vld [vmem:[#allocation96_spill] sm:$0xff] }
 0x334   :  { %v3853_v61 = vsel %vm9966_vm1, %v16559_v41, 0.0 }
 0x335   :  { %v12256_v7 = vpop.permute.xlu0 %5504  ;;  %5714 = vrot.lane.b32.xlu2 %v16551_v35, %s8863_s3 }
 0x336   :  { %16550 = vst [vmem:[#allocation39_spill] sm:$0xff] %v12256_v7 }
 0x337   :  { %v12260_v0 = vpop.permute.xlu2 %5520 }
 0x338   :  { %16552 = vst [vmem:[#allocation47_spill] sm:$0xff] %v12260_v0  ;;  %5712 = vrot.lane.b32.xlu1 %v16555_v25, %s8863_s3 }
 0x33a   :  { %v12269_v33 = vpop.permute.xlu1 %5500 }
 0x33b   :  { %5722 = vrot.lane.b32.xlu0 %v16556_v19, %s8863_s3  ;;  %16557 = vst [vmem:[#allocation73_spill] sm:$0xff] %v12269_v33 }
 0x33d   :  { %v12271_v12 = vpop.permute.xlu0 %5510  ;;  %5720 = vrot.lane.b32.xlu2 %v3853_v61, %s8863_s3  ;;  %v16570_v61 = vld [vmem:[#allocation126_spill] sm:$0xff] }
 0x33e   :  { %16558 = vst [vmem:[#allocation71_spill] sm:$0xff] %v12271_v12  ;;  %vm16571_vm6 = vnez %v16570_v61 }
 0x33f   :  { %v12277_v0 = vpop.permute.xlu2 %5526 }
 0x340   :  { %16561 = vst [vmem:[#allocation92_spill] sm:$0xff] %v12277_v0  ;;  %5718 = vrot.lane.b32.xlu1 %v16562_v63, %s8863_s3  ;;  %v16572_v0 = vld [vmem:[#allocation124_spill] sm:$0xff] }
 0x341   :  { %v16573_v40 = vsel %vm16571_vm6, %v16572_v0, 0.0 }
 0x342   :  { %v12286_v33 = vpop.permute.xlu1 %5506 }
 0x343   :  { %5728 = vrot.lane.b32.xlu0 %v16565_v13, %s8863_s3  ;;  %16566 = vst [vmem:[#allocation53_spill] sm:$0xff] %v12286_v33  ;;  %v16579_v33 = vld [vmem:[#allocation165_spill] sm:$0xff] }
 0x345   :  { %v12288_v12 = vpop.permute.xlu0 %5516  ;;  %5726 = vrot.lane.b32.xlu2 %v16568_v4, %s8863_s3 }
 0x346   :  { %16567 = vst [vmem:[#allocation62_spill] sm:$0xff] %v12288_v12  ;;  %v16577_v12 = vld [vmem:[#allocation164_spill] sm:$0xff] }
 0x347   :  { %v12292_v57 = vpop.permute.xlu2 %5532  ;;  %vm16578_vm0 = vnez %v16577_v12 }
 0x348   :  { %16569 = vst [vmem:[#allocation139_spill] sm:$0xff] %v12292_v57  ;;  %5724 = vrot.lane.b32.xlu1 %v16573_v40, %s8863_s3  ;;  %v16580_v20 = vsel %vm16578_vm0, %v16579_v33, 0.0 }
 0x34a   :  { %v12301_v49 = vpop.permute.xlu1 %5512 }
 0x34b   :  { %5734 = vrot.lane.b32.xlu0 %v16574_v34, %s8863_s3  ;;  %16575 = vst [vmem:[#allocation96_spill] sm:$0xff] %v12301_v49 }
 0x34d   :  { %v12303_v13 = vpop.permute.xlu0 %5522  ;;  %5732 = vrot.lane.b32.xlu2 %v16580_v20, %s8863_s3  ;;  %v16590_v20 = vld [vmem:[#allocation178_spill] sm:$0xff] }
 0x34e   :  { %16576 = vst [vmem:[#allocation102_spill] sm:$0xff] %v12303_v13  ;;  %vm16591_vm4 = vnez %v16590_v20 }
 0x34f   :  { %v12310_v57 = vpop.permute.xlu2 %5538 }
 0x350   :  { %16581 = vst [vmem:[#allocation119_spill] sm:$0xff] %v12310_v57  ;;  %5730 = vrot.lane.b32.xlu1 %v16582_v11, %s8863_s3  ;;  %v16592_v57 = vld [vmem:[#allocation180_spill] sm:$0xff] }
 0x351   :  { %v16593_v42 = vsel %vm16591_vm4, %v16592_v57, 0.0 }
 0x352   :  { %v12319_v49 = vpop.permute.xlu1 %5518 }
 0x353   :  { %5740 = vrot.lane.b32.xlu0 %v16585_v5, %s8863_s3  ;;  %16586 = vst [vmem:[#allocation146_spill] sm:$0xff] %v12319_v49  ;;  %v16599_v49 = vld [vmem:[#allocation207_spill] sm:$0xff] }
 0x354   :  { %vm16600_vm5 = vnez %v16599_v49 }
 0x355   :  { %v12321_v13 = vpop.permute.xlu0 %5528  ;;  %5738 = vrot.lane.b32.xlu2 %v16588_v23, %s8863_s3 }
 0x356   :  { %16587 = vst [vmem:[#allocation141_spill] sm:$0xff] %v12321_v13 }
 0x357   :  { %v12325_v9 = vpop.permute.xlu2 %5544 }
 0x358   :  { %16589 = vst [vmem:[#allocation163_spill] sm:$0xff] %v12325_v9  ;;  %5736 = vrot.lane.b32.xlu1 %v16593_v42, %s8863_s3  ;;  %v16601_v9 = vld [vmem:[#allocation208_spill] sm:$0xff]  ;;  %v16604_v42 = vld [vmem:[#allocation233_spill] sm:$0xff] }
 0x359   :  { %v16602_v60 = vsel %vm16600_vm5, %v16601_v9, 0.0  ;;  %vm16691_vm5 = vcmask 64512  }
 0x35a   :  { %v12336_v5 = vpop.permute.xlu1 %5524 }
 0x35b   :  { %5954 = vrot.lane.b32.xlu0 %v4098_v15, %s8864_s19  ;;  %16597 = vst [vmem:[#allocation126_spill] sm:$0xff] %v12336_v5  ;;  %v16610_v5 = vld [vmem:[#allocation28_spill] sm:$0xff] }
 0x35d   :  { %v12338_v13 = vpop.permute.xlu0 %5534  ;;  %5744 = vrot.lane.b32.xlu2 %v16602_v60, %s8863_s3  ;;  %v16609_v60 = vld [vmem:[#allocation7_spill] sm:$0xff] }
 0x35e   :  { %16598 = vst [vmem:[#allocation124_spill] sm:$0xff] %v12338_v13 }
 0x35f   :  { %v12345_v28 = vpop.permute.xlu2 %5550 }
 0x360   :  { %16603 = vst [vmem:[#allocation196_spill] sm:$0xff] %v12345_v28  ;;  %5742 = vrot.lane.b32.xlu1 %v16604_v42, %s8863_s3  ;;  %v16611_v28 = vld [vmem:[#allocation29_spill] sm:$0xff] }
 0x361   :  { %vm16612_vm9 = vnez %v16611_v28 }
 0x362   :  { %v12351_v16 = vpop.permute.xlu1 %5530  ;;  %v4100_v10 = vsel %vm16612_vm9, %v16610_v5, 0.0 }
 0x363   :  { %5956 = vrot.lane.b32.xlu0 %v16605_v26, %s8864_s19  ;;  %16606 = vst [vmem:[#allocation164_spill] sm:$0xff] %v12351_v16 }
 0x365   :  { %v12353_v15 = vpop.permute.xlu0 %5540  ;;  %6466 = vrot.lane.b32.xlu2 %v16534_v22, %s8865_s23  ;;  %v16615_v22 = vsel %vm9289_vm10, %v16530_v62, 0.0  ;;  %v16623_v62 = vld [vmem:[#allocation11_spill] sm:$0xff] }
 0x366   :  { %16607 = vst [vmem:[#allocation165_spill] sm:$0xff] %v12353_v15  ;;  %v16618_v15 = vld [vmem:[#allocation55_spill] sm:$0xff]  ;;  %vm16624_vm10 = vnez %v16623_v62 }
 0x367   :  { %v12357_v13 = vpop.permute.xlu2 %5556 }
 0x368   :  { %16608 = vst [vmem:[#allocation195_spill] sm:$0xff] %v12357_v13  ;;  %6210 = vrot.lane.b32.xlu1 %v16609_v60, %s8866_s25  ;;  %v16617_v60 = vld [vmem:[#allocation15_spill] sm:$0xff] }
 0x36a   :  { %v12365_v55 = vpop.permute.xlu1 %5536 }
 0x36b   :  { %5958 = vrot.lane.b32.xlu0 %v4100_v10, %s8864_s19  ;;  %16613 = vst [vmem:[#allocation190_spill] sm:$0xff] %v12365_v55 }
 0x36d   :  { %v12367_v16 = vpop.permute.xlu0 %5546  ;;  %6468 = vrot.lane.b32.xlu2 %v16615_v22, %s8865_s23  ;;  %v16625_v22 = vld [vmem:[#allocation37_spill] sm:$0xff] }
 0x36e   :  { %16614 = vst [vmem:[#allocation191_spill] sm:$0xff] %v12367_v16 }
 0x36f   :  { %v12374_v13 = vpop.permute.xlu2 %5562 }
 0x370   :  { %16616 = vst [vmem:[#allocation202_spill] sm:$0xff] %v12374_v13  ;;  %6212 = vrot.lane.b32.xlu1 %v16617_v60, %s8866_s25  ;;  %v16626_v60 = vsel %vm16624_vm10, %v16625_v22, 0.0 }
 0x372   :  { %v12380_v38 = vpop.permute.xlu1 %5542 }
 0x373   :  { %5960 = vrot.lane.b32.xlu0 %v16618_v15, %s8864_s19  ;;  %16619 = vst [vmem:[#allocation178_spill] sm:$0xff] %v12380_v38 }
 0x375   :  { %v12382_v10 = vpop.permute.xlu0 %5552  ;;  %6470 = vrot.lane.b32.xlu2 %v16545_v3, %s8865_s23  ;;  %v16629_v3 = vsel %vm9243_vm8, %v16542_v46, 0.0  ;;  %v16634_v46 = vld [vmem:[#allocation33_spill] sm:$0xff]  ;;  %vm16636_vm8 = vnez %v16635_v58  ;;  %v16744_v58 = vld [vmem:[#allocation182_spill] sm:$0xff] }
 0x376   :  { %16620 = vst [vmem:[#allocation180_spill] sm:$0xff] %v12382_v10  ;;  %v16631_v10 = vld [vmem:[#allocation85_spill] sm:$0xff] }
 0x377   :  { %v12386_v55 = vpop.permute.xlu2 %5568 }
 0x378   :  { %16621 = vst [vmem:[#allocation12_spill] sm:$0xff] %v12386_v55  ;;  %6214 = vrot.lane.b32.xlu1 %v16622_v27, %s8866_s25  ;;  %v16630_v27 = vld [vmem:[#allocation31_spill] sm:$0xff] }
 0x37a   :  { %v12395_v13 = vpop.permute.xlu1 %5548 }
 0x37b   :  { %5962 = vrot.lane.b32.xlu0 %v16626_v60, %s8864_s19  ;;  %16627 = vst [vmem:[#allocation177_spill] sm:$0xff] %v12395_v13 }
 0x37d   :  { %v12397_v16 = vpop.permute.xlu0 %5558  ;;  %6472 = vrot.lane.b32.xlu2 %v16629_v3, %s8865_s23  ;;  %v16637_v3 = vld [vmem:[#allocation58_spill] sm:$0xff] }
 0x37e   :  { %16628 = vst [vmem:[#allocation208_spill] sm:$0xff] %v12397_v16 }
 0x37f   :  { %v12404_v55 = vpop.permute.xlu2 %5702 }
 0x380   :  { %6216 = vrot.lane.b32.xlu1 %v16630_v27, %s8866_s25  ;;  %v16638_v27 = vsel %vm16636_vm8, %v16637_v3, 0.0 }
 0x382   :  { %v12410_v38 = vpop.permute.xlu1 %5554 }
 0x383   :  { %5964 = vrot.lane.b32.xlu0 %v16631_v10, %s8864_s19  ;;  %16632 = vst [vmem:[#allocation233_spill] sm:$0xff] %v12410_v38  ;;  %v16643_v38 = vld [vmem:[#allocation111_spill] sm:$0xff] }
 0x385   :  { %v12412_v60 = vpop.permute.xlu0 %5564  ;;  %6474 = vrot.lane.b32.xlu2 %v16538_v50, %s8865_s23  ;;  %v16640_v50 = vsel %vm9374_vm12, %v16554_v47, 0.0  ;;  %v16646_v47 = vld [vmem:[#allocation52_spill] sm:$0xff]  ;;  %vm16648_vm12 = vnez %v16647_v24 }
 0x386   :  { %16633 = vst [vmem:[#allocation45_spill] sm:$0xff] %v12412_v60 }
 0x387   :  { %v12416_v16 = vpop.permute.xlu2 %5708 }
 0x388   :  { %6218 = vrot.lane.b32.xlu1 %v16634_v46, %s8866_s25  ;;  %v16642_v46 = vld [vmem:[#allocation51_spill] sm:$0xff] }
 0x38a   :  { %v12425_v13 = vpop.permute.xlu1 %5560 }
 0x38b   :  { %5966 = vrot.lane.b32.xlu0 %v16638_v27, %s8864_s19  ;;  %16639 = vst [vmem:[#allocation7_spill] sm:$0xff] %v12425_v13 }
 0x38d   :  { %v12427_v49 = vpop.permute.xlu0 %5698  ;;  %6476 = vrot.lane.b32.xlu2 %v16640_v50, %s8865_s23  ;;  %v16649_v50 = vld [vmem:[#allocation74_spill] sm:$0xff] }
 0x38f   :  { %v12434_v60 = vpop.permute.xlu2 %5714 }
 0x390   :  { %16641 = vst [vmem:[#allocation28_spill] sm:$0xff] %v12434_v60  ;;  %6220 = vrot.lane.b32.xlu1 %v16642_v46, %s8866_s25  ;;  %v16650_v46 = vsel %vm16648_vm12, %v16649_v50, 0.0 }
 0x392   :  { %v12440_v3 = vpop.permute.xlu1 %5566 }
 0x393   :  { %5968 = vrot.lane.b32.xlu0 %v16643_v38, %s8864_s19  ;;  %16644 = vst [vmem:[#allocation29_spill] sm:$0xff] %v12440_v3 }
 0x395   :  { %v12442_v27 = vpop.permute.xlu0 %5704  ;;  %6478 = vrot.lane.b32.xlu2 %v16551_v35, %s8865_s23  ;;  %v16651_v35 = vsel %vm9550_vm2, %v16547_v21, 0.0  ;;  %v16656_v21 = vld [vmem:[#allocation61_spill] sm:$0xff] }
 0x396   :  { %vm16657_vm2 = vnez %v16656_v21 }
 0x397   :  { %v12446_v13 = vpop.permute.xlu2 %5720 }
 0x398   :  { %16645 = vst [vmem:[#allocation15_spill] sm:$0xff] %v12446_v13  ;;  %6222 = vrot.lane.b32.xlu1 %v16646_v47, %s8866_s25  ;;  %v16653_v47 = vld [vmem:[#allocation65_spill] sm:$0xff]  ;;  %v16654_v13 = vld [vmem:[#allocation127_spill] sm:$0xff] }
 0x39a   :  { %v12455_v10 = vpop.permute.xlu1 %5700 }
 0x39b   :  { %5970 = vrot.lane.b32.xlu0 %v16650_v46, %s8864_s19 }
 0x39d   :  { %v12457_v38 = vpop.permute.xlu0 %5710  ;;  %6480 = vrot.lane.b32.xlu2 %v16651_v35, %s8865_s23  ;;  %v16659_v35 = vsel %vm16657_vm2, %v16658_v52, 0.0 }
 0x39f   :  { %v12464_v3 = vpop.permute.xlu2 %5726 }
 0x3a0   :  { %16652 = vst [vmem:[#allocation55_spill] sm:$0xff] %v12464_v3  ;;  %6224 = vrot.lane.b32.xlu1 %v16653_v47, %s8866_s25 }
 0x3a2   :  { %v12470_v50 = vpop.permute.xlu1 %5706 }
 0x3a3   :  { %5972 = vrot.lane.b32.xlu0 %v16654_v13, %s8864_s19 }
 0x3a5   :  { %v12472_v46 = vpop.permute.xlu0 %5716  ;;  %6482 = vrot.lane.b32.xlu2 %v16562_v63, %s8865_s23  ;;  %v16660_v63 = vsel %vm9725_vm7, %v16559_v41, 0.0 }
 0x3a7   :  { %v12476_v60 = vpop.permute.xlu2 %5732 }
 0x3a8   :  { %16655 = vst [vmem:[#allocation20_spill] sm:$0xff] %v12476_v60  ;;  %6226 = vrot.lane.b32.xlu1 %v9674_v56, %s8866_s25  ;;  %v16662_v56 = vld [vmem:[#allocation158_spill] sm:$0xff] }
 0x3aa   :  { %v12485_v47 = vpop.permute.xlu1 %5712 }
 0x3ab   :  { %5974 = vrot.lane.b32.xlu0 %v16659_v35, %s8864_s19  ;;  %v7181_v35 = vld [vmem:[%s15132_s4 + $0x20] sm:$0xf] }
 0x3ac   :  { %8589 = vmatpush.msk.msra.mxu1 %vm15734_vm15, %v7181_v35  ;;  %8721 = vmatpush.msk.msrb.mxu3 %vm15734_vm15, %v7181_v35  ;;  %v16666_v35 = vld [vmem:[#allocation148_spill] sm:$0xff]  ;;  %vm15739_vm15 = vcmask 31744  }
 0x3ad   :  { %v12487_v3 = vpop.permute.xlu0 %5722  ;;  %6484 = vrot.lane.b32.xlu2 %v16660_v63, %s8865_s23  ;;  %v16665_v63 = vld [vmem:[#allocation125_spill] sm:$0xff]  ;;  %vm16667_vm7 = vnez %v16666_v35 }
 0x3af   :  { %v12494_v60 = vpop.permute.xlu2 %5738 }
 0x3b0   :  { %16661 = vst [vmem:[#allocation11_spill] sm:$0xff] %v12494_v60  ;;  %6228 = vrot.lane.b32.xlu1 %v9872_v8, %s8866_s25  ;;  %v7180_v8 = vld [vmem:[%s15132_s4 + $0x18] sm:$0xff]  ;;  %v4110_v60 = vsel %vm16667_vm7, %v16665_v63, 0.0  ;;  %vm16686_vm7 = vcmask 31744  }
 0x3b1   :  { %7391 = vmatpush.msra.mxu1 %v7180_v8  ;;  %8722 = vmatpush.msrb.mxu3 %v7180_v8 }
 0x3b2   :  { %v12500_v52 = vpop.permute.xlu1 %5718 }
 0x3b3   :  { %5976 = vrot.lane.b32.xlu0 %v16662_v56, %s8864_s19  ;;  %7392 = vmatpush.msra.mxu1 %v7179_v1 }
 0x3b4   :  { %8723 = vmatpush.msrb.mxu3 %v7179_v1 }
 0x3b5   :  { %v12505_v13 = vpop.permute.xlu0 %5728  ;;  %6486 = vrot.lane.b32.xlu2 %v16556_v19, %s8865_s23  ;;  %v7178_v19 = vld [vmem:[%s15132_s4 + $0x8] sm:$0xff] }
 0x3b6   :  { %16663 = vst [vmem:[#allocation37_spill] sm:$0xff] %v12505_v13  ;;  %7393 = vmatpush.msra.mxu1 %v7178_v19  ;;  %8724 = vmatpush.msrb.mxu3 %v7178_v19  ;;  %v4557_v13 = vsel %vm9966_vm1, %v16572_v0, 0.0  ;;  %v16673_v0 = vld [vmem:[#allocation99_spill] sm:$0xff] }
 0x3b7   :  { %v12514_v41 = vpop.permute.xlu2 %5744  ;;  %vm16674_vm1 = vnez %v16673_v0  ;;  %v16683_v0 = vld [vmem:[#allocation274_spill] sm:$0xff] }
 0x3b8   :  { %16664 = vst [vmem:[#allocation31_spill] sm:$0xff] %v12514_v41  ;;  %6230 = vrot.lane.b32.xlu1 %v9874_v36, %s8866_s25  ;;  %v7177_v41 = vld [vmem:[%s15132_s4] sm:$0xff] }
 0x3b9   :  { %7394 = vmatpush.msra.mxu1 %v7177_v41  ;;  %8725 = vmatpush.msrb.mxu3 %v7177_v41 }
 0x3ba   :  { %v12528_v8 = vpop.permute.xlu1 %5724 }
 0x3bb   :  { %5978 = vrot.lane.b32.xlu0 %v4110_v60, %s8864_s19  ;;  %16668 = vst [vmem:[#allocation33_spill] sm:$0xff] %v12528_v8  ;;  %v16670_v60 = vld [vmem:[#allocation186_spill] sm:$0xff] }
 0x3bd   :  { %v12533_v36 = vpop.permute.xlu0 %5734  ;;  %6488 = vrot.lane.b32.xlu2 %v4557_v13, %s8865_s23  ;;  %v16675_v13 = vld [vmem:[#allocation142_spill] sm:$0xff] }
 0x3be   :  { %16669 = vst [vmem:[#allocation23_spill] sm:$0xff] %v12533_v36  ;;  %v16676_v41 = vsel %vm16674_vm1, %v16675_v13, 0.0  ;;  %vm16685_vm1 = vcmask 130048  }
 0x3bf   :  { %v6467_v1 = vpop.permute.xlu2 %6466 }
 0x3c0   :  { %6232 = vrot.lane.b32.xlu1 %v10096_v2, %s8866_s25 }
 0x3c2   :  { %v12543_v63 = vpop.permute.xlu1 %5730 }
 0x3c3   :  { %5980 = vrot.lane.b32.xlu0 %v16670_v60, %s8864_s19  ;;  %16671 = vst [vmem:[#allocation51_spill] sm:$0xff] %v12543_v63  ;;  %v16678_v60 = vld [vmem:[#allocation63_spill] sm:$0xff] }
 0x3c4   :  { %v8739_v63 = vunpack.i.l.bf16 %v16678_v60 }
 0x3c5   :  { %v12545_v19 = vpop.permute.xlu0 %5740  ;;  %6490 = vrot.lane.b32.xlu2 %v16568_v4, %s8865_s23  ;;  %v16679_v4 = vsel %vm16571_vm6, %v16564_v51, 0.0  ;;  %vm6982_vm6 = vcmask 195584  }
 0x3c6   :  { %16672 = vst [vmem:[#allocation52_spill] sm:$0xff] %v12545_v19 }
 0x3c7   :  { %v6469_v7 = vpop.permute.xlu2 %6468 }
 0x3c8   :  { %6234 = vrot.lane.b32.xlu1 %v10108_v18, %s8866_s25  ;;  %v16680_v18 = vld [vmem:[#allocation49_spill] sm:$0xff] }
 0x3c9   :  { %v8749_v56 = vunpack.i.l.bf16 %v16680_v18 }
 0x3ca   :  { %v12556_v2 = vpop.permute.xlu1 %5736 }
 0x3cb   :  { %5982 = vrot.lane.b32.xlu0 %v16676_v41, %s8864_s19  ;;  %16677 = vst [vmem:[#allocation38_spill] sm:$0xff] %v12556_v2  ;;  %v6659_v41 = vsel %vm15739_vm15, 0.0, %v8739_v63  ;;  %v16681_v2 = vld [vmem:[#allocation187_spill] sm:$0xff]  ;;  %v8750_v63 = vunpack.i.h.bf16 %v16680_v18  ;;  %vm6917_vm15 = vcmask 162816   ;;  %v16689_v18 = vld [vmem:[#allocation166_spill] sm:$0xff] }
 0x3cc   :  { %v6724_v51 = vsel %vm15740_vm13, %v6659_v41, %v8749_v56  ;;  %vm7047_vm13 = vcmask 228352  }
 0x3cd   :  { %v5955_v36 = vpop.permute.xlu0 %5954  ;;  %6492 = vrot.lane.b32.xlu2 %v16679_v4, %s8865_s23  ;;  %v8740_v4 = vunpack.i.h.bf16 %v16678_v60  ;;  %v6789_v8 = vsel %vm15741_vm11, %v6724_v51, %v16683_v0  ;;  %vm7112_vm11 = vcmask 261120   ;;  %v16687_v0 = vld [vmem:[#allocation128_spill] sm:$0xff] }
 0x3ce   :  { %vm16688_vm2 = vnez %v16687_v0 }
 0x3cf   :  { %v12564_v19 = vpop.permute.xlu2 %6470  ;;  %v6660_v56 = vsel %vm16686_vm7, 0.0, %v8740_v4  ;;  %v16690_v41 = vsel %vm16688_vm2, %v16689_v18, 0.0  ;;  %vm16694_vm7 = vcmask 97280  }
 0x3d0   :  { %6236 = vrot.lane.b32.xlu1 %v10232_v6, %s8866_s25 }
 0x3d2   :  { %v12572_v13 = vpop.permute.xlu1 %5742 }
 0x3d3   :  { %5984 = vrot.lane.b32.xlu0 %v16681_v2, %s8864_s19  ;;  %16682 = vst [vmem:[#allocation65_spill] sm:$0xff] %v12572_v13  ;;  %v16684_v13 = vld [vmem:[#allocation60_spill] sm:$0xff] }
 0x3d4   :  { %v6853_v2 = vsel %vm16685_vm1, %v6789_v8, %v16684_v13  ;;  %vm15742_vm1 = vcmask 293888  }
 0x3d5   :  { %v5957_v61 = vpop.permute.xlu0 %5956  ;;  %6494 = vrot.lane.b32.xlu2 %v16582_v11, %s8865_s23  ;;  %v6918_v60 = vsel %vm6917_vm15, %v6853_v2, %v12427_v49  ;;  %v16692_v49 = vsel %vm10301_vm3, %v16579_v33, 0.0  ;;  %vm16700_vm3 = vcmask 31744  }
 0x3d6   :  { %v6983_v11 = vsel %vm6982_vm6, %v6918_v60, %v5955_v36  ;;  %v16693_v36 = vld [vmem:[#allocation66_spill] sm:$0xff] }
 0x3d7   :  { %v12580_v6 = vpop.permute.xlu2 %6472 }
 0x3d8   :  { %6238 = vrot.lane.b32.xlu1 %v10237_v17, %s8866_s25  ;;  %v6725_v17 = vsel %vm16691_vm5, %v6660_v56, %v8750_v63  ;;  %v16696_v63 = vld [vmem:[#allocation84_spill] sm:$0xff]  ;;  %vm16697_vm5 = vcmask 130048  }
 0x3d9   :  { %v6790_v2 = vsel %vm16694_vm7, %v6725_v17, %v16693_v36 }
 0x3da   :  { %v6211_v51 = vpop.permute.xlu1 %6210  ;;  %v6854_v56 = vsel %vm16697_vm5, %v6790_v2, %v16696_v63  ;;  %v16703_v2 = vld [vmem:[#allocation109_spill] sm:$0xff] }
 0x3db   :  { %5986 = vrot.lane.b32.xlu0 %v16690_v41, %s8864_s19  ;;  %v7048_v8 = vsel %vm7047_vm13, %v6983_v11, %v6211_v51  ;;  %v16695_v41 = vld [vmem:[#allocation175_spill] sm:$0xff]  ;;  %v6919_v33 = vsel %vm6917_vm15, %v6854_v56, %v12455_v10 }
 0x3dc   :  { %v7113_v4 = vsel %vm7112_vm11, %v7048_v8, %v6467_v1  ;;  %v2883_v11 = vsel %vm16612_vm9, %v16695_v41, 0.0  ;;  %v6984_v25 = vsel %vm6982_vm6, %v6919_v33, %v5957_v61  ;;  %v16698_v1 = vld [vmem:[#allocation198_spill] sm:$0xff]  ;;  %v16699_v8 = vld [vmem:[#allocation79_spill] sm:$0xff]  ;;  %vm16702_vm9 = vcmask 64512   ;;  %v16704_v41 = vld [vmem:[#allocation100_spill] sm:$0xff] }
 0x3dd   :  { %v5959_v13 = vpop.permute.xlu0 %5958  ;;  %6496 = vrot.lane.b32.xlu2 %v16692_v49, %s8865_s23  ;;  %8590 = vmatmul.msk.f32.vlgmr.msra.gmra.mxu1 %vm15742_vm1, %v7113_v4  ;;  %v6661_v17 = vsel %vm16700_vm3, %v2883_v11, %v16699_v8  ;;  %v16701_v4 = vld [vmem:[#allocation88_spill] sm:$0xff]  ;;  %v16705_v56 = vld [vmem:[#allocation147_spill] sm:$0xff]  ;;  %v16710_v8 = vld [vmem:[#allocation5_spill] sm:$0xff] }
 0x3de   :  { %v6726_v49 = vsel %vm16702_vm9, %v6661_v17, %v16701_v4  ;;  %vm16706_vm3 = vnez %v16705_v56  ;;  %v16707_v33 = vld [vmem:[#allocation179_spill] sm:$0xff]  ;;  %vm16711_vm9 = vcmask 31744   ;;  %v16712_v4 = vld [vmem:[#allocation108_spill] sm:$0xff] }
 0x3df   :  { %v6475_v60 = vpop.permute.xlu2 %6474  ;;  %v6791_v10 = vsel %vm16694_vm7, %v6726_v49, %v16703_v2  ;;  %vm16713_vm7 = vcmask 64512   ;;  %v16716_v2 = vsel %vm16578_vm0, %v16592_v57, 0.0  ;;  %v16720_v57 = vld [vmem:[#allocation90_spill] sm:$0xff]  ;;  %vm16722_vm0 = vcmask 31744  }
 0x3e0   :  { %6240 = vrot.lane.b32.xlu1 %v10401_v44, %s8866_s25  ;;  %v6855_v11 = vsel %vm16697_vm5, %v6791_v10, %v16704_v41  ;;  %vm16715_vm5 = vcmask 97280   ;;  %v16717_v41 = vld [vmem:[#allocation86_spill] sm:$0xff] }
 0x3e1   :  { %v6920_v63 = vsel %vm6917_vm15, %v6855_v11, %v12404_v55 }
 0x3e2   :  { %v6213_v51 = vpop.permute.xlu1 %6212 }
 0x3e3   :  { %5988 = vrot.lane.b32.xlu0 %v16698_v1, %s8864_s19  ;;  %v7049_v28 = vsel %vm7047_vm13, %v6984_v25, %v6213_v51  ;;  %v16708_v25 = vsel %vm16706_vm3, %v16707_v33, 0.0  ;;  %v16709_v51 = vld [vmem:[#allocation87_spill] sm:$0xff] }
 0x3e4   :  { %v7114_v44 = vsel %vm7112_vm11, %v7049_v28, %v6469_v7  ;;  %v6985_v7 = vsel %vm6982_vm6, %v6920_v63, %v5959_v13  ;;  %v6662_v17 = vsel %vm16711_vm9, %v16710_v8, %v16709_v51  ;;  %v16714_v13 = vld [vmem:[#allocation121_spill] sm:$0xff]  ;;  %vm16718_vm9 = vcmask 130048  }
 0x3e5   :  { %v5961_v36 = vpop.permute.xlu0 %5960  ;;  %6498 = vrot.lane.b32.xlu2 %v16574_v34, %s8865_s23  ;;  %8591 = vmatmul.msk.f32.gmra.mxu1 %vm15742_vm1, %v7114_v44 }
 0x3e7   :  { %v6477_v61 = vpop.permute.xlu2 %6476 }
 0x3e8   :  { %6242 = vrot.lane.b32.xlu1 %v10403_v31, %s8866_s25  ;;  %v6727_v31 = vsel %vm16713_vm7, %v6662_v17, %v16712_v4  ;;  %v16724_v17 = vld [vmem:[#allocation114_spill] sm:$0xff]  ;;  %v16726_v4 = vld [vmem:[#allocation167_spill] sm:$0xff] }
 0x3e9   :  { %v6792_v44 = vsel %vm16715_vm5, %v6727_v31, %v16714_v13  ;;  %v16728_v31 = vld [vmem:[#allocation192_spill] sm:$0xff] }
 0x3ea   :  { %v6215_v34 = vpop.permute.xlu1 %6214  ;;  %v6856_v11 = vsel %vm16718_vm9, %v6792_v44, %v16717_v41  ;;  %v16730_v41 = vld [vmem:[#allocation82_spill] sm:$0xff] }
 0x3eb   :  { %5990 = vrot.lane.b32.xlu0 %v16708_v25, %s8864_s19  ;;  %v7050_v28 = vsel %vm7047_vm13, %v6985_v7, %v6215_v34  ;;  %v16719_v7 = vld [vmem:[#allocation225_spill] sm:$0xff]  ;;  %v16721_v25 = vsel %vm16624_vm10, %v16594_v45, 0.0  ;;  %vm16725_vm10 = vmmov %vm16718_vm9  ;;  %vm16727_vm9 = vnez %v16726_v4  ;;  %v16935_v4 = vld [vmem:[#allocation288_spill] sm:$0xff] }
 0x3ec   :  { %v7115_v55 = vsel %vm7112_vm11, %v7050_v28, %v12564_v19  ;;  %v6921_v19 = vsel %vm6917_vm15, %v6856_v11, %v12442_v27  ;;  %v6663_v34 = vsel %vm16722_vm0, %v16721_v25, %v16720_v57  ;;  %v16723_v27 = vld [vmem:[#allocation89_spill] sm:$0xff] }
 0x3ed   :  { %v5963_v49 = vpop.permute.xlu0 %5962  ;;  %6500 = vrot.lane.b32.xlu2 %v16716_v2, %s8865_s23  ;;  %8592 = vmatmul.msk.f32.gmra.mxu1 %vm15742_vm1, %v7115_v55  ;;  %v6986_v63 = vsel %vm6982_vm6, %v6921_v19, %v5961_v36  ;;  %v6728_v36 = vsel %vm16713_vm7, %v6663_v34, %v16723_v27  ;;  %v16729_v55 = vsel %vm16727_vm9, %v16728_v31, 0.0  ;;  %v16733_v19 = vld [vmem:[#allocation144_spill] sm:$0xff]  ;;  %v16740_v27 = vld [vmem:[#allocation161_spill] sm:$0xff] }
 0x3ee   :  { %v6793_v62 = vsel %vm16715_vm5, %v6728_v36, %v16724_v17 }
 0x3ef   :  { %v6479_v10 = vpop.permute.xlu2 %6478  ;;  %v6857_v28 = vsel %vm16725_vm10, %v6793_v62, %v11875_v59 }
 0x3f0   :  { %6244 = vrot.lane.b32.xlu1 %v10528_v29, %s8866_s25 }
 0x3f2   :  { %v6217_v12 = vpop.permute.xlu1 %6216 }
 0x3f3   :  { %5992 = vrot.lane.b32.xlu0 %v16719_v7, %s8864_s19  ;;  %v7051_v51 = vsel %vm7047_vm13, %v6986_v63, %v6217_v12 }
 0x3f4   :  { %v7116_v29 = vsel %vm7112_vm11, %v7051_v51, %v12580_v6  ;;  %v6922_v6 = vsel %vm6917_vm15, %v6857_v28, %v12470_v50  ;;  %v16731_v50 = vsel %vm16591_vm4, %v16584_v48, 0.0  ;;  %vm16737_vm4 = vmmov %vm16722_vm0  ;;  %v16746_v28 = vld [vmem:[#allocation204_spill] sm:$0xff] }
 0x3f5   :  { %v5965_v8 = vpop.permute.xlu0 %5964  ;;  %6502 = vrot.lane.b32.xlu2 %v16588_v23, %s8865_s23  ;;  %8593 = vmatmul.msk.f32.gmra.mxu1 %vm15742_vm1, %v7116_v29  ;;  %v6987_v23 = vsel %vm6982_vm6, %v6922_v6, %v5963_v49  ;;  %v16732_v49 = vld [vmem:[#allocation117_spill] sm:$0xff] }
 0x3f6   :  { %v16735_v29 = vld [vmem:[#allocation93_spill] sm:$0xff] }
 0x3f7   :  { %v6481_v45 = vpop.permute.xlu2 %6480 }
 0x3f8   :  { %6246 = vrot.lane.b32.xlu1 %v10514_v37, %s8866_s25  ;;  %v6664_v37 = vsel %vm16722_vm0, %v16605_v26, %v16730_v41  ;;  %v16734_v26 = vld [vmem:[#allocation227_spill] sm:$0xff]  ;;  %vm16739_vm0 = vmmov %vm16713_vm7 }
 0x3f9   :  { %v6729_v11 = vsel %vm16713_vm7, %v6664_v37, %v16732_v49  ;;  %vm16741_vm7 = vmmov %vm16715_vm5  ;;  %v16753_v37 = vld [vmem:[#allocation155_spill] sm:$0xff] }
 0x3fa   :  { %v6219_v13 = vpop.permute.xlu1 %6218  ;;  %v6794_v63 = vsel %vm16715_vm5, %v6729_v11, %v16733_v19  ;;  %vm16743_vm5 = vmmov %vm16725_vm10 }
 0x3fb   :  { %5994 = vrot.lane.b32.xlu0 %v16729_v55, %s8864_s19  ;;  %v7052_v44 = vsel %vm7047_vm13, %v6987_v23, %v6219_v13 }
 0x3fc   :  { %v7117_v59 = vsel %vm7112_vm11, %v7052_v44, %v6475_v60  ;;  %v6858_v60 = vsel %vm16725_vm10, %v6794_v63, %v11887_v53  ;;  %v16736_v53 = vsel %vm16636_vm8, %v16610_v5, 0.0  ;;  %vm16745_vm8 = vnez %v16744_v58  ;;  %vm16749_vm10 = vmmov %vm16737_vm4 }
 0x3fd   :  { %v5967_v2 = vpop.permute.xlu0 %5966  ;;  %6504 = vrot.lane.b32.xlu2 %v16731_v50, %s8865_s23  ;;  %8594 = vmatmul.msk.f32.gmra.mxu1 %vm15742_vm1, %v7117_v59  ;;  %v6923_v20 = vsel %vm6917_vm15, %v6858_v60, %v12416_v16  ;;  %v16738_v16 = vld [vmem:[#allocation134_spill] sm:$0xff]  ;;  %v16747_v6 = vsel %vm16745_vm8, %v16746_v28, 0.0 }
 0x3fe   :  { %v6988_v48 = vsel %vm6982_vm6, %v6923_v20, %v5965_v8  ;;  %v16748_v59 = vld [vmem:[#allocation122_spill] sm:$0xff]  ;;  %v16757_v20 = vld [vmem:[#allocation140_spill] sm:$0xff] }
 0x3ff   :  { %v6483_v12 = vpop.permute.xlu2 %6482 }
 0x400   :  { %6248 = vrot.lane.b32.xlu1 %v10635_v39, %s8866_s25  ;;  %v6665_v39 = vsel %vm16737_vm4, %v16736_v53, %v16735_v29  ;;  %vm16752_vm4 = vmmov %vm16739_vm0 }
 0x401   :  { %v6730_v8 = vsel %vm16739_vm0, %v6665_v39, %v16738_v16  ;;  %vm16754_vm0 = vmmov %vm16741_vm7 }
 0x402   :  { %v6221_v57 = vpop.permute.xlu1 %6220  ;;  %v6795_v36 = vsel %vm16741_vm7, %v6730_v8, %v16740_v27  ;;  %vm16755_vm7 = vmmov %vm16743_vm5  ;;  %v16767_v27 = vld [vmem:[#allocation133_spill] sm:$0xff] }
 0x403   :  { %5996 = vrot.lane.b32.xlu0 %v16734_v26, %s8864_s19  ;;  %v7053_v25 = vsel %vm7047_vm13, %v6988_v48, %v6221_v57  ;;  %v16761_v48 = vld [vmem:[#allocation157_spill] sm:$0xff] }
 0x404   :  { %v7118_v51 = vsel %vm7112_vm11, %v7053_v25, %v6477_v61  ;;  %v16742_v61 = vld [vmem:[#allocation339_spill] sm:$0xff]  ;;  %v16763_v25 = vld [vmem:[#allocation184_spill] sm:$0xff] }
 0x405   :  { %v5969_v34 = vpop.permute.xlu0 %5968  ;;  %6506 = vrot.lane.b32.xlu2 %v16604_v42, %s8865_s23  ;;  %8595 = vmatmul.msk.f32.gmra.mxu1 %vm15742_vm1, %v7118_v51  ;;  %v6859_v62 = vsel %vm16743_vm5, %v6795_v36, %v16742_v61  ;;  %vm16762_vm5 = vmmov %vm16752_vm4  ;;  %v16768_v36 = vld [vmem:[#allocation85_spill] sm:$0xff] }
 0x406   :  { %v6924_v5 = vsel %vm6917_vm15, %v6859_v62, %v12457_v38  ;;  %v16750_v38 = vsel %vm10664_vm14, %v16601_v9, 0.0  ;;  %vm16759_vm14 = vmmov %vm16749_vm10  ;;  %v16772_v61 = vld [vmem:[#allocation217_spill] sm:$0xff] }
 0x407   :  { %v6485_v17 = vpop.permute.xlu2 %6484  ;;  %v6989_v42 = vsel %vm6982_vm6, %v6924_v5, %v5967_v2  ;;  %v16751_v2 = vld [vmem:[#allocation123_spill] sm:$0xff]  ;;  %v16774_v5 = vld [vmem:[#allocation174_spill] sm:$0xff] }
 0x408   :  { %6250 = vrot.lane.b32.xlu1 %v10619_v43, %s8866_s25  ;;  %v6666_v43 = vsel %vm16749_vm10, %v16618_v15, %v16748_v59  ;;  %v16756_v15 = vld [vmem:[#allocation238_spill] sm:$0xff]  ;;  %vm16764_vm10 = vmmov %vm16754_vm0 }
 0x409   :  { %v6731_v41 = vsel %vm16752_vm4, %v6666_v43, %v16751_v2  ;;  %vm16765_vm4 = vmmov %vm16755_vm7 }
 0x40a   :  { %v6223_v23 = vpop.permute.xlu1 %6222  ;;  %v6796_v50 = vsel %vm16754_vm0, %v6731_v41, %v16753_v37 }
 0x40b   :  { %5998 = vrot.lane.b32.xlu0 %v16747_v6, %s8864_s19  ;;  %v7054_v55 = vsel %vm7047_vm13, %v6989_v42, %v6223_v23  ;;  %v16776_v6 = vld [vmem:[#allocation201_spill] sm:$0xff] }
 0x40c   :  { %v7119_v44 = vsel %vm7112_vm11, %v7054_v55, %v6479_v10  ;;  %v6860_v10 = vsel %vm16755_vm7, %v6796_v50, %v11894_v54  ;;  %v16758_v54 = vsel %vm16648_vm12, %v16625_v22, 0.0  ;;  %v16766_v22 = vld [vmem:[#allocation28_spill] sm:$0xff]  ;;  %vm16769_vm12 = vmmov %vm16759_vm14 }
 0x40d   :  { %v5971_v13 = vpop.permute.xlu0 %5970  ;;  %6508 = vrot.lane.b32.xlu2 %v16750_v38, %s8865_s23  ;;  %8596 = vmatmul.msk.f32.gmra.mxu1 %vm15742_vm1, %v7119_v44  ;;  %v6925_v40 = vsel %vm6917_vm15, %v6860_v10, %v12485_v47  ;;  %v16760_v47 = vld [vmem:[#allocation234_spill] sm:$0xff]  ;;  %vm16775_vm7 = vmmov %vm16762_vm5  ;;  %v16780_v44 = vld [vmem:[#allocation213_spill] sm:$0xff] }
 0x40e   :  { %v6990_v9 = vsel %vm6982_vm6, %v6925_v40, %v5969_v34  ;;  %v16781_v38 = vld [vmem:[#allocation244_spill] sm:$0xff]  ;;  %v16782_v10 = vld [vmem:[#allocation162_spill] sm:$0xff] }
 0x40f   :  { %v6487_v49 = vpop.permute.xlu2 %6486  ;;  %v16784_v40 = vld [vmem:[#allocation58_spill] sm:$0xff] }
 0x410   :  { %6252 = vrot.lane.b32.xlu1 %v10736_v32, %s8866_s25  ;;  %v6667_v32 = vsel %vm16759_vm14, %v16758_v54, %v16757_v20  ;;  %vm16777_vm14 = vmmov %vm16764_vm10 }
 0x411   :  { %v6732_v57 = vsel %vm16762_vm5, %v6667_v32, %v16761_v48  ;;  %vm16779_vm5 = vmmov %vm16765_vm4 }
 0x412   :  { %v6225_v11 = vpop.permute.xlu1 %6224  ;;  %v6797_v34 = vsel %vm16764_vm10, %v6732_v57, %v16763_v25  ;;  %vm16783_vm10 = vnez %v16656_v21  ;;  %v16794_v21 = vld [vmem:[#allocation193_spill] sm:$0xff] }
 0x413   :  { %6000 = vrot.lane.b32.xlu0 %v16756_v15, %s8864_s19  ;;  %v7055_v19 = vsel %vm7047_vm13, %v6990_v9, %v6225_v11  ;;  %v16785_v9 = vsel %vm16783_vm10, %v16784_v40, 0.0  ;;  %v16819_v40 = vld [vmem:[#allocation172_spill] sm:$0xff] }
 0x414   :  { %v7120_v60 = vsel %vm7112_vm11, %v7055_v19, %v6481_v45  ;;  %v6861_v45 = vsel %vm16765_vm4, %v6797_v34, %v11939_v30  ;;  %v6668_v30 = vsel %vm16769_vm12, %v16768_v36, %v16767_v27  ;;  %vm16786_vm4 = vmmov %vm16769_vm12  ;;  %v16788_v19 = vld [vmem:[#allocation168_spill] sm:$0xff]  ;;  %v16798_v34 = vld [vmem:[#allocation226_spill] sm:$0xff] }
 0x415   :  { %v5973_v63 = vpop.permute.xlu0 %5972  ;;  %6510 = vrot.lane.b32.xlu2 %v16760_v47, %s8865_s23  ;;  %8597 = vmatmul.msk.f32.gmra.mxu1 %vm15742_vm1, %v7120_v60  ;;  %v6926_v24 = vsel %vm6917_vm15, %v6861_v45, %v16766_v22  ;;  %v6733_v42 = vsel %vm16775_vm7, %v6668_v30, %v16774_v5  ;;  %v6669_v11 = vsel %vm16786_vm4, %v16785_v9, %v16782_v10  ;;  %vm16789_vm12 = vmmov %vm16775_vm7  ;;  %v16790_v60 = vld [vmem:[#allocation194_spill] sm:$0xff]  ;;  %v16802_v27 = vld [vmem:[#allocation264_spill] sm:$0xff] }
 0x416   :  { %v6991_v29 = vsel %vm6982_vm6, %v6926_v24, %v5971_v13  ;;  %v6798_v23 = vsel %vm16777_vm14, %v6733_v42, %v16776_v6  ;;  %vm16793_vm7 = vmmov %vm16779_vm5  ;;  %v16805_v36 = vld [vmem:[#allocation222_spill] sm:$0xff]  ;;  %v16812_v6 = vld [vmem:[#allocation15_spill] sm:$0xff] }
 0x417   :  { %v6489_v51 = vpop.permute.xlu2 %6488  ;;  %vm16804_vm10 = vmmov %vm16789_vm12 }
 0x418   :  { %6254 = vrot.lane.b32.xlu1 %v10738_v14, %s8866_s25  ;;  %v16770_v14 = vld [vmem:[#allocation207_spill] sm:$0xff] }
 0x419   :  { %vm16771_vm0 = vnez %v16770_v14 }
 0x41a   :  { %v6227_v53 = vpop.permute.xlu1 %6226  ;;  %v16773_v62 = vsel %vm16771_vm0, %v16772_v61, 0.0  ;;  %vm16791_vm0 = vmmov %vm16777_vm14  ;;  %vm16795_vm14 = vnez %v16794_v21  ;;  %v16992_v21 = vld [vmem:[#allocation277_spill] sm:$0xff] }
 0x41b   :  { %5746 = vrot.lane.b32.xlu0 %v16760_v47, %s8863_s3  ;;  %v7056_v39 = vsel %vm7047_vm13, %v6991_v29, %v6227_v53  ;;  %v16796_v47 = vld [vmem:[#allocation216_spill] sm:$0xff]  ;;  %v16799_v53 = vld [vmem:[#allocation183_spill] sm:$0xff] }
 0x41c   :  { %v7121_v8 = vsel %vm7112_vm11, %v7056_v39, %v6483_v12  ;;  %v16778_v12 = vld [vmem:[#allocation353_spill] sm:$0xff]  ;;  %v16797_v48 = vsel %vm16795_vm14, %v16796_v47, 0.0  ;;  %v16800_v39 = vld [vmem:[#allocation111_spill] sm:$0xff] }
 0x41d   :  { %v5975_v16 = vpop.permute.xlu0 %5974  ;;  %6512 = vrot.lane.b32.xlu2 %v16773_v62, %s8865_s23  ;;  %8598 = vmatmul.msk.f32.gmra.mxu1 %vm15742_vm1, %v7121_v8  ;;  %v6862_v13 = vsel %vm16779_vm5, %v6798_v23, %v16778_v12  ;;  %vm16801_vm5 = vmmov %vm16786_vm4  ;;  %v16807_v62 = vld [vmem:[#allocation437_spill] sm:$0xff] }
 0x41e   :  { %v6927_v59 = vsel %vm6917_vm15, %v6862_v13, %v12472_v46  ;;  %v16787_v46 = vld [vmem:[#allocation211_spill] sm:$0xff]  ;;  %v6670_v8 = vsel %vm16801_vm5, %v16800_v39, %v16799_v53  ;;  %vm16806_vm4 = vmmov %vm16791_vm0  ;;  %v16813_v13 = vld [vmem:[#allocation205_spill] sm:$0xff]  ;;  %vm16818_vm5 = vnez %v16666_v35 }
 0x41f   :  { %v6491_v55 = vpop.permute.xlu2 %6490  ;;  %v6992_v43 = vsel %vm6982_vm6, %v6927_v59, %v5973_v63  ;;  %v6734_v63 = vsel %vm16789_vm12, %v6669_v11, %v16788_v19  ;;  %vm16808_vm12 = vmmov %vm16793_vm7  ;;  %v16825_v35 = vld [vmem:[#allocation427_spill] sm:$0xff] }
 0x420   :  { %6256 = vrot.lane.b32.xlu1 %v16780_v44, %s8866_s25  ;;  %v6799_v20 = vsel %vm16791_vm0, %v6734_v63, %v16790_v60  ;;  %v16815_v44 = vld [vmem:[#allocation230_spill] sm:$0xff] }
 0x422   :  { %v6229_v2 = vpop.permute.xlu1 %6228 }
 0x423   :  { %6514 = vrot.lane.b32.xlu0 %v16781_v38, %s8865_s23  ;;  %v7057_v41 = vsel %vm7047_vm13, %v6992_v43, %v6229_v2 }
 0x424   :  { %v7122_v50 = vsel %vm7112_vm11, %v7057_v41, %v6485_v17  ;;  %v16792_v17 = vld [vmem:[#allocation432_spill] sm:$0xff]  ;;  %v16817_v41 = vld [vmem:[#allocation74_spill] sm:$0xff] }
 0x425   :  { %v5977_v37 = vpop.permute.xlu0 %5976  ;;  %6258 = vrot.lane.b32.xlu2 %v16787_v46, %s8866_s25  ;;  %8599 = vmatmul.msk.f32.gmra.mxu1 %vm15742_vm1, %v7122_v50  ;;  %v6863_v32 = vsel %vm16793_vm7, %v6799_v20, %v16792_v17  ;;  %vm16814_vm7 = vnez %v16813_v13  ;;  %v2893_v50 = vsel %vm16818_vm5, %v16817_v41, 0.0  ;;  %v16823_v46 = vld [vmem:[#allocation243_spill] sm:$0xff]  ;;  %vm16826_vm5 = vcmask 130048   ;;  %v16845_v41 = vld [vmem:[#allocation221_spill] sm:$0xff] }
 0x426   :  { %v6928_v57 = vsel %vm6917_vm15, %v6863_v32, %v12500_v52  ;;  %v16803_v52 = vld [vmem:[#allocation199_spill] sm:$0xff]  ;;  %v16816_v59 = vsel %vm16814_vm7, %v16815_v44, 0.0  ;;  %v16829_v32 = vld [vmem:[#allocation236_spill] sm:$0xff] }
 0x427   :  { %v6493_v54 = vpop.permute.xlu2 %6492  ;;  %v6993_v25 = vsel %vm6982_vm6, %v6928_v57, %v5975_v16  ;;  %v6735_v16 = vsel %vm16804_vm10, %v6670_v8, %v16803_v52  ;;  %vm16820_vm10 = vcmask 31744   ;;  %v16837_v8 = vld [vmem:[#allocation232_spill] sm:$0xff]  ;;  %v17018_v13 = vld [vmem:[#allocation331_spill] sm:$0xff] }
 0x428   :  { %6002 = vrot.lane.b32.xlu1 %v16797_v48, %s8864_s19  ;;  %v6800_v30 = vsel %vm16806_vm4, %v6735_v16, %v16805_v36  ;;  %v6671_v9 = vsel %vm16820_vm10, %v2893_v50, %v16819_v40  ;;  %vm16822_vm4 = vcmask 64512   ;;  %vm16830_vm10 = vnez %v16829_v32  ;;  %v16838_v36 = vld [vmem:[#allocation435_spill] sm:$0xff]  ;;  %v16860_v32 = vld [vmem:[#allocation240_spill] sm:$0xff] }
 0x429   :  { %v6864_v5 = vsel %vm16808_vm12, %v6800_v30, %v16807_v62  ;;  %vm16824_vm12 = vcmask 97280   ;;  %v16839_v62 = vld [vmem:[#allocation223_spill] sm:$0xff] }
 0x42a   :  { %v6231_v45 = vpop.permute.xlu1 %6230  ;;  %v6929_v23 = vsel %vm6917_vm15, %v6864_v5, %v16812_v6  ;;  %v16841_v5 = vld [vmem:[#allocation33_spill] sm:$0xff]  ;;  %v16843_v6 = vld [vmem:[#allocation248_spill] sm:$0xff]  ;;  %v16846_v50 = vld [vmem:[#allocation99_spill] sm:$0xff] }
 0x42b   :  { %6260 = vrot.lane.b32.xlu0 %v16798_v34, %s8866_s25  ;;  %v7058_v22 = vsel %vm7047_vm13, %v6993_v25, %v6231_v45  ;;  %v6994_v12 = vsel %vm6982_vm6, %v6929_v23, %v5977_v37  ;;  %v16821_v37 = vld [vmem:[#allocation214_spill] sm:$0xff]  ;;  %v16844_v23 = vsel %vm16830_vm10, %v16843_v6, 0.0 }
 0x42c   :  { %v7123_v29 = vsel %vm7112_vm11, %v7058_v22, %v6487_v49  ;;  %v16809_v49 = vld [vmem:[#allocation219_spill] sm:$0xff]  ;;  %v6736_v11 = vsel %vm16822_vm4, %v6671_v9, %v16821_v37 }
 0x42d   :  { %v5979_v24 = vpop.permute.xlu0 %5978  ;;  %6004 = vrot.lane.b32.xlu2 %v16802_v27, %s8864_s19  ;;  %8600 = vmatmul.msk.f32.gmra.mxu1 %vm15742_vm1, %v7123_v29  ;;  %vm16810_vm0 = vnez %v16809_v49  ;;  %v6801_v19 = vsel %vm16824_vm12, %v6736_v11, %v16823_v46  ;;  %v16832_v22 = vld [vmem:[#allocation203_spill] sm:$0xff]  ;;  %v16854_v46 = vld [vmem:[#allocation262_spill] sm:$0xff] }
 0x42e   :  { %v16811_v42 = vsel %vm16810_vm0, %v16772_v61, 0.0  ;;  %v6865_v60 = vsel %vm16826_vm5, %v6801_v19, %v16825_v35  ;;  %v16833_v29 = vld [vmem:[#allocation127_spill] sm:$0xff] }
 0x42f   :  { %v6495_v14 = vpop.permute.xlu2 %6494  ;;  %v16852_v37 = vld [vmem:[#allocation239_spill] sm:$0xff] }
 0x430   :  { %5748 = vrot.lane.b32.xlu1 %v16811_v42, %s8863_s3 }
 0x432   :  { %v6233_v43 = vpop.permute.xlu1 %6232 }
 0x433   :  { %6006 = vrot.lane.b32.xlu0 %v16816_v59, %s8864_s19  ;;  %v7059_v2 = vsel %vm7047_vm13, %v6994_v12, %v6233_v43 }
 0x434   :  { %v7124_v10 = vsel %vm7112_vm11, %v7059_v2, %v6489_v51  ;;  %v16827_v51 = vld [vmem:[#allocation235_spill] sm:$0xff] }
 0x435   :  { %v5981_v61 = vpop.permute.xlu0 %5980  ;;  %5750 = vrot.lane.b32.xlu2 %v16781_v38, %s8863_s3  ;;  %8601 = vmatmul.msk.f32.gmra.mxu1 %vm15742_vm1, %v7124_v10  ;;  %v16828_v20 = vsel %vm16810_vm0, %v16827_v51, 0.0  ;;  %v6930_v38 = vsel %vm6917_vm15, %v6865_v60, %v12487_v3  ;;  %v16831_v48 = vsel %vm16830_vm10, %v16827_v51, 0.0  ;;  %vm16834_vm0 = vcmask 31744   ;;  %v16835_v3 = vld [vmem:[#allocation271_spill] sm:$0xff]  ;;  %v16848_v10 = vld [vmem:[#allocation98_spill] sm:$0xff]  ;;  %v16858_v51 = vld [vmem:[#allocation265_spill] sm:$0xff] }
 0x436   :  { %v6995_v17 = vsel %vm6982_vm6, %v6930_v38, %v5979_v24  ;;  %v6672_v53 = vsel %vm16834_vm0, %v16833_v29, %v16832_v22  ;;  %v16836_v24 = vld [vmem:[#allocation206_spill] sm:$0xff]  ;;  %vm16840_vm0 = vcmask 1043456   ;;  %vm16853_vm10 = vcmask 64512   ;;  %v16861_v22 = vld [vmem:[#allocation212_spill] sm:$0xff] }
 0x437   :  { %v6497_v63 = vpop.permute.xlu2 %6496  ;;  %v6737_v39 = vsel %vm16822_vm4, %v6672_v53, %v16836_v24  ;;  %vm16842_vm4 = vmmov %vm16840_vm0  ;;  %v16862_v29 = vld [vmem:[#allocation158_spill] sm:$0xff]  ;;  %v16864_v24 = vld [vmem:[#allocation220_spill] sm:$0xff] }
 0x438   :  { %6516 = vrot.lane.b32.xlu1 %v16828_v20, %s8865_s23  ;;  %v6802_v52 = vsel %vm16824_vm12, %v6737_v39, %v16837_v8  ;;  %vm16847_vm12 = vnez %v16846_v50  ;;  %v16859_v20 = vld [vmem:[#allocation55_spill] sm:$0xff]  ;;  %v16866_v39 = vld [vmem:[#allocation246_spill] sm:$0xff] }
 0x439   :  { %v6866_v30 = vsel %vm16826_vm5, %v6802_v52, %v16838_v36  ;;  %v16849_v40 = vsel %vm16847_vm12, %v16848_v10, 0.0  ;;  %vm16850_vm5 = vcmask 31744  }
 0x43a   :  { %v6235_v57 = vpop.permute.xlu1 %6234  ;;  %v6931_v49 = vsel %vm6917_vm15, %v6866_v30, %v16841_v5  ;;  %v6673_v9 = vsel %vm16850_vm5, %v16849_v40, %v16845_v41  ;;  %vm16863_vm12 = vmmov %vm16850_vm5  ;;  %vm16865_vm5 = vnez %v16864_v24  ;;  %v16871_v5 = vld [vmem:[#allocation37_spill] sm:$0xff] }
 0x43b   :  { %5752 = vrot.lane.b32.xlu0 %v16831_v48, %s8863_s3  ;;  %v7060_v25 = vsel %vm7047_vm13, %v6995_v17, %v6235_v57  ;;  %v6996_v42 = vsel %vm6982_vm6, %v6931_v49, %v5981_v61  ;;  %v16851_v61 = vld [vmem:[#allocation242_spill] sm:$0xff]  ;;  %v6738_v11 = vsel %vm16853_vm10, %v6673_v9, %v16852_v37  ;;  %v6674_v53 = vsel %vm16863_vm12, %v16862_v29, %v16861_v22  ;;  %v16876_v9 = vld [vmem:[#allocation249_spill] sm:$0xff]  ;;  %v16881_v37 = vld [vmem:[#allocation252_spill] sm:$0xff] }
 0x43c   :  { %v7125_v45 = vsel %vm7112_vm11, %v7060_v25, %v6491_v55  ;;  %v7788_v55 = vld [vmem:[%s15135_s7] sm:$0xf]  ;;  %v16867_v8 = vsel %vm16865_vm5, %v16866_v39, 0.0 }
 0x43d   :  { %v5983_v34 = vpop.permute.xlu0 %5982  ;;  %6518 = vrot.lane.b32.xlu2 %v16835_v3, %s8865_s23  ;;  %8602 = vmatmul.msk.f32.gmra.mxu1 %vm15742_vm1, %v7125_v45 }
 0x43e   :  { %8654 = vmatpush.msk.msra.mxu2 %vm16840_vm0, %v7788_v55  ;;  %8726 = vmatpush.msk.msra.mxu3 %vm16842_vm4, %v7788_v55  ;;  %vm16855_vm0 = vcmask 97280   ;;  %vm16857_vm4 = vcmask 130048   ;;  %v16869_v55 = vld [vmem:[#allocation279_spill] sm:$0xff] }
 0x43f   :  { %v12913_v16 = vpop.permute.xlu2 %6498  ;;  %v6803_v19 = vsel %vm16855_vm0, %v6738_v11, %v16854_v46 }
 0x440   :  { %6262 = vrot.lane.b32.xlu1 %v16839_v62, %s8866_s25 }
 0x442   :  { %v6237_v12 = vpop.permute.xlu1 %6236 }
 0x443   :  { %6520 = vrot.lane.b32.xlu0 %v16844_v23, %s8865_s23  ;;  %v7061_v59 = vsel %vm7047_vm13, %v6996_v42, %v6237_v12  ;;  %v16872_v23 = vld [vmem:[#allocation281_spill] sm:$0xff] }
 0x444   :  { %v7126_v2 = vsel %vm7112_vm11, %v7061_v59, %v6493_v54  ;;  %v16856_v54 = vld [vmem:[#allocation440_spill] sm:$0xff]  ;;  %v16873_v59 = vld [vmem:[#allocation245_spill] sm:$0xff] }
 0x445   :  { %v5985_v43 = vpop.permute.xlu0 %5984  ;;  %6264 = vrot.lane.b32.xlu2 %v16851_v61, %s8866_s25  ;;  %8603 = vmatmul.msk.f32.gmra.mxu1 %vm15742_vm1, %v7126_v2  ;;  %v6867_v60 = vsel %vm16857_vm4, %v6803_v19, %v16856_v54  ;;  %v16874_v2 = vld [vmem:[#allocation125_spill] sm:$0xff] }
 0x446   :  { %v6932_v38 = vsel %vm6917_vm15, %v6867_v60, %v16859_v20  ;;  %v16875_v41 = vsel %vm16688_vm2, %v16874_v2, 0.0  ;;  %v16879_v61 = vld [vmem:[#allocation241_spill] sm:$0xff]  ;;  %vm16882_vm2 = vcmask 97280   ;;  %v16886_v60 = vld [vmem:[#allocation3_spill] sm:$0xff] }
 0x447   :  { %v12947_v35 = vpop.permute.xlu2 %6500  ;;  %v6997_v17 = vsel %vm6982_vm6, %v6932_v38, %v5983_v34  ;;  %v16868_v34 = vld [vmem:[#allocation254_spill] sm:$0xff]  ;;  %v6675_v50 = vsel %vm16863_vm12, %v16875_v41, %v16873_v59  ;;  %v16883_v19 = vld [vmem:[#allocation253_spill] sm:$0xff]  ;;  %vm16889_vm12 = vcmask 130048   ;;  %v16901_v41 = vld [vmem:[#allocation20_spill] sm:$0xff] }
 0x448   :  { %6008 = vrot.lane.b32.xlu1 %v16858_v51, %s8864_s19  ;;  %v6739_v52 = vsel %vm16853_vm10, %v6674_v53, %v16868_v34  ;;  %vm16877_vm10 = vnez %v16876_v9  ;;  %v16884_v54 = vrot.slane %v16883_v19, 1  ;;  %v16888_v38 = vld [vmem:[#allocation438_spill] sm:$0xff]  ;;  %v16900_v59 = vld [vmem:[#allocation9_spill] sm:$0xff] }
 0x449   :  { %v6804_v36 = vsel %vm16855_vm0, %v6739_v52, %v16869_v55  ;;  %vm16880_vm0 = vcmask 64512   ;;  %v16891_v52 = vld [vmem:[#allocation261_spill] sm:$0xff]  ;;  %v16892_v55 = vld [vmem:[#allocation186_spill] sm:$0xff] }
 0x44a   :  { %v6239_v48 = vpop.permute.xlu1 %6238  ;;  %v6740_v0 = vsel %vm16880_vm0, %v6675_v50, %v16879_v61  ;;  %vm16893_vm0 = vcmask 31744  }
 0x44b   :  { %6266 = vrot.lane.b32.xlu0 %v16860_v32, %s8866_s25  ;;  %v7062_v57 = vsel %vm7047_vm13, %v6997_v17, %v6239_v48  ;;  %v6805_v11 = vsel %vm16882_vm2, %v6740_v0, %v16881_v37  ;;  %v16890_v48 = vld [vmem:[#allocation51_spill] sm:$0xff]  ;;  %vm16897_vm2 = vcmask 64512  }
 0x44c   :  { %v7127_v45 = vsel %vm7112_vm11, %v7062_v57, %v6495_v14  ;;  %v16870_v14 = vld [vmem:[#allocation430_spill] sm:$0xff]  ;;  %v6869_v17 = vsel %vm16889_vm12, %v6805_v11, %v16888_v38  ;;  %v16907_v38 = vld [vmem:[#allocation287_spill] sm:$0xff] }
 0x44d   :  { %v5987_v25 = vpop.permute.xlu0 %5986  ;;  %6010 = vrot.lane.b32.xlu2 %v16867_v8, %s8864_s19  ;;  %8604 = vmatmul.msk.f32.gmra.mxu1 %vm15742_vm1, %v7127_v45  ;;  %v6868_v62 = vsel %vm16857_vm4, %v6804_v36, %v16870_v14  ;;  %vm16887_vm4 = vcmp.lt.s32.totalorder %v16886_v60, 7  ;;  %v6934_v57 = vsel %vm6917_vm15, %v6869_v17, %v16890_v48  ;;  %v6676_v36 = vsel %vm16893_vm0, %v16892_v55, %v16891_v52  ;;  %v16908_v48 = vld [vmem:[#allocation302_spill] sm:$0xff] }
 0x44e   :  { %v6933_v49 = vsel %vm6917_vm15, %v6868_v62, %v16871_v5  ;;  %v6999_v45 = vsel %vm6982_vm6, %v6934_v57, %v5987_v25  ;;  %v16894_v25 = vld [vmem:[#allocation260_spill] sm:$0xff] }
 0x44f   :  { %v12973_v30 = vpop.permute.xlu2 %6502  ;;  %v6998_v42 = vsel %vm6982_vm6, %v6933_v49, %v5985_v43  ;;  %v16878_v43 = vsel %vm16877_vm10, %v16843_v6, 0.0  ;;  %v13013_v6 = vld [vmem:[%s15133_s5] ss:$0 sm:$0xff]  ;;  %v16895_v62 = vsel %vm16877_vm10, %v16894_v25, 0.0  ;;  %v16896_v5 = vld [vmem:[#allocation268_spill] sm:$0xff]  ;;  %vm16902_vm10 = vmmov %vm16893_vm0 }
 0x450   :  { %5754 = vrot.lane.b32.xlu1 %v16835_v3, %s8863_s3  ;;  %v6741_v49 = vsel %vm16897_vm2, %v6676_v36, %v16896_v5  ;;  %v16916_v36 = vld [vmem:[#allocation272_spill] sm:$0xff] }
 0x452   :  { %v6241_v12 = vpop.permute.xlu1 %6240 }
 0x453   :  { %6012 = vrot.lane.b32.xlu0 %v16872_v23, %s8864_s19  ;;  %v7063_v10 = vsel %vm7047_vm13, %v6998_v42, %v6241_v12  ;;  %v16898_v42 = vld [vmem:[#allocation280_spill] sm:$0xff] }
 0x454   :  { %v7128_v3 = vsel %vm7112_vm11, %v7063_v10, %v6497_v63  ;;  %v16885_v63 = vrot.slane %v16860_v32, 1  ;;  %v13023_v32 = vld [vmem:[%s15134_s6] ss:$0 sm:$0xff] }
 0x455   :  { %v5989_v40 = vpop.permute.xlu0 %5988  ;;  %5756 = vrot.lane.b32.xlu2 %v16878_v43, %s8863_s3  ;;  %8605 = vmatmul.msk.f32.gmra.mxu1 %vm15742_vm1, %v7128_v3  ;;  %v16903_v3 = vmov 0.0  }
 0x456   :  { %v3234_v20 = vsel %vm16887_vm4, %v16885_v63, %v16884_v54  ;;  %vm16899_vm4 = vcmask 97280   ;;  %v16905_v54 = vld [vmem:[#allocation142_spill] sm:$0xff] }
 0x457   :  { %v13002_v46 = vpop.permute.xlu2 %6504  ;;  %v16906_v63 = vsel %vm16706_vm3, %v16905_v54, 0.0  ;;  %vm16910_vm3 = vmmov %vm16889_vm12  ;;  %v16927_v54 = vld [vmem:[#allocation38_spill] sm:$0xff] }
 0x458   :  { %6522 = vrot.lane.b32.xlu1 %v3234_v20, %s8865_s23 }
 0x45a   :  { %v6243_v22 = vpop.permute.xlu1 %6242  ;;  %v7396_v29 = vpop.f32.mrf.mxu1 }
 0x45b   :  { %5758 = vrot.lane.b32.xlu0 %v3234_v20, %s8863_s3  ;;  %v7064_v53 = vsel %vm7047_vm13, %v6999_v45, %v6243_v22  ;;  %v7592_v39 = vmul.f32 %v13013_v6, %v7396_v29  ;;  %v16909_v45 = vld [vmem:[#allocation433_spill] sm:$0xff]  ;;  %v16911_v29 = vld [vmem:[#allocation275_spill] sm:$0xff] }
 0x45c   :  { %v7129_v34 = vsel %vm7112_vm11, %v7064_v53, %v12913_v16  ;;  %v6806_v16 = vsel %vm16899_vm4, %v6741_v49, %v16898_v42  ;;  %v16912_v53 = vld [vmem:[#allocation187_spill] sm:$0xff] }
 0x45d   :  { %v5991_v8 = vpop.permute.xlu0 %5990  ;;  %v7660_v14 = vadd.f32 %v13023_v32, %v7592_v39  ;;  %6524 = vrot.lane.b32.xlu2 %v16895_v62, %s8865_s23  ;;  %8606 = vmatmul.msk.f32.gmra.mxu1 %vm15742_vm1, %v7129_v34  ;;  %v6870_v2 = vsel %vm16889_vm12, %v6806_v16, %v16900_v59  ;;  %vm16913_vm12 = vmmov %vm16893_vm0  ;;  %v16914_v34 = vld [vmem:[#allocation23_spill] sm:$0xff] }
 0x45e   :  { %v6935_v50 = vsel %vm6917_vm15, %v6870_v2, %v16901_v41  ;;  %v6678_v39 = vsel %vm16913_vm12, %v16912_v53, %v16911_v29 }
 0x45f   :  { %v13045_v23 = vpop.permute.xlu2 %6506  ;;  %v7724_v12 = vmax.f32 %v7660_v14, 0.0  ;;  %v7000_v10 = vsel %vm6982_vm6, %v6935_v50, %v5989_v40  ;;  %v16918_v14 = vld [vmem:[#allocation269_spill] sm:$0xff]  ;;  %v16921_v50 = vld [vmem:[#allocation298_spill] sm:$0xff] }
 0x460   :  { %6268 = vrot.lane.b32.xlu1 %v16883_v19, %s8866_s25  ;;  %v16904_v19 = vld [vmem:[#allocation247_spill] sm:$0xff] }
 0x461   :  { %8655 = vmatmul.msk.f32.vlgmr.msra.gmra.mxu2 %vm16902_vm10, %v7724_v12  ;;  %v6677_v40 = vsel %vm16893_vm0, %v16906_v63, %v16904_v19  ;;  %vm16915_vm10 = vmmov %vm16893_vm0  ;;  %vm16917_vm0 = vnez %v16916_v36  ;;  %v16920_v12 = vld [vmem:[#allocation257_spill] sm:$0xff]  ;;  %v16924_v19 = vld [vmem:[#allocation258_spill] sm:$0xff] }
 0x462   :  { %v6245_v9 = vpop.permute.xlu1 %6244  ;;  %v7399_v43 = vpop.f32.mrf.mxu1  ;;  %v6742_v17 = vsel %vm16897_vm2, %v6677_v40, %v16907_v38  ;;  %v16919_v62 = vsel %vm16917_vm0, %v16918_v14, 0.0  ;;  %v6743_v59 = vsel %vm16897_vm2, %v6678_v39, %v16920_v12  ;;  %vm16925_vm12 = vnez %v16924_v19  ;;  %v16928_v40 = vld [vmem:[#allocation10_spill] sm:$0xff]  ;;  %vm16933_vm2 = vmmov %vm16915_vm10 }
 0x463   :  { %8767 = vrot.lane.b32.xlu0 %v16903_v3, %s8865_s23  ;;  %v7065_v61 = vsel %vm7047_vm13, %v7000_v10, %v6245_v9  ;;  %v7593_v0 = vmul.f32 %v13013_v6, %v7399_v43  ;;  %v16922_v10 = vld [vmem:[#allocation270_spill] sm:$0xff] }
 0x464   :  { %v7130_v11 = vsel %vm7112_vm11, %v7065_v61, %v12947_v35  ;;  %v6807_v35 = vsel %vm16899_vm4, %v6742_v17, %v16908_v48  ;;  %v6808_v9 = vsel %vm16899_vm4, %v6743_v59, %v16922_v10  ;;  %vm16936_vm4 = vcmask 64512   ;;  %v16943_v59 = vld [vmem:[#allocation32_spill] sm:$0xff] }
 0x465   :  { %v5993_v37 = vpop.permute.xlu0 %5992  ;;  %v7661_v20 = vadd.f32 %v13023_v32, %v7593_v0  ;;  %8762 = vrot.lane.b32.xlu2 %v16903_v3, %s8866_s25  ;;  %8607 = vmatmul.msk.f32.gmra.mxu1 %vm15742_vm1, %v7130_v11  ;;  %v6871_v22 = vsel %vm16910_vm3, %v6807_v35, %v16909_v45  ;;  %v16923_v0 = vld [vmem:[#allocation441_spill] sm:$0xff] }
 0x466   :  { %v6936_v52 = vsel %vm6917_vm15, %v6871_v22, %v16914_v34  ;;  %v6872_v11 = vsel %vm16910_vm3, %v6808_v9, %v16923_v0  ;;  %v16934_v34 = vld [vmem:[#allocation266_spill] sm:$0xff]  ;;  %v737_v0 = vadd.s32 264, %v16886_v60 }
 0x467   :  { %v13075_v57 = vpop.permute.xlu2 %6508  ;;  %v7725_v56 = vmax.f32 %v7661_v20, 0.0  ;;  %v7001_v55 = vsel %vm6982_vm6, %v6936_v52, %v5991_v8  ;;  %v6937_v63 = vsel %vm6917_vm15, %v6872_v11, %v16927_v54  ;;  %v16929_v20 = vld [vmem:[#allocation390_spill] sm:$0xff]  ;;  %v16937_v52 = vld [vmem:[#allocation303_spill] sm:$0xff]  ;;  %v16947_v54 = vld [vmem:[#allocation309_spill] sm:$0xff] }
 0x468   :  { %8757 = vrot.lane.b32.xlu1 %v16903_v3, %s8864_s19  ;;  %vm16930_vm0 = vnez %v16929_v20  ;;  %v7002_v17 = vsel %vm6982_vm6, %v6937_v63, %v5993_v37  ;;  %v16944_v11 = vld [vmem:[#allocation263_spill] sm:$0xff] }
 0x469   :  { %8656 = vmatmul.msk.f32.gmra.mxu2 %vm16915_vm10, %v7725_v56  ;;  %v4146_v38 = vsel %vm16930_vm0, %v16928_v40, 0.0  ;;  %v16931_v56 = vld [vmem:[#allocation293_spill] sm:$0xff] }
 0x46a   :  { %v6247_v5 = vpop.permute.xlu1 %6246  ;;  %v7402_v49 = vpop.f32.mrf.mxu1 }
 0x46b   :  { %6018 = vrot.lane.b32.xlu0 %v16919_v62, %s8864_s19  ;;  %v7066_v42 = vsel %vm7047_vm13, %v7001_v55, %v6247_v5  ;;  %v7594_v16 = vmul.f32 %v13013_v6, %v7402_v49  ;;  %v16939_v5 = vld [vmem:[#allocation21_spill] sm:$0xff] }
 0x46c   :  { %v7131_v41 = vsel %vm7112_vm11, %v7066_v42, %v12973_v30  ;;  %v16926_v30 = vsel %vm16925_vm12, %v16894_v25, 0.0  ;;  %v16932_v25 = vsel %vm16727_vm9, %v16689_v18, 0.0  ;;  %vm16938_vm9 = vcmask 97280   ;;  %v16941_v42 = vld [vmem:[#allocation11_spill] sm:$0xff]  ;;  %vm16942_vm12 = vmmov %vm16933_vm2 }
 0x46d   :  { %v5995_v2 = vpop.permute.xlu0 %5994  ;;  %v7662_v8 = vadd.f32 %v13023_v32, %v7594_v16  ;;  %5762 = vrot.lane.b32.xlu2 %v16921_v50, %s8863_s3  ;;  %8608 = vmatmul.msk.f32.gmra.mxu1 %vm15742_vm1, %v7131_v41  ;;  %v6679_v45 = vsel %vm16933_vm2, %v16932_v25, %v16931_v56  ;;  %v1771_v25 = vand.u32 15, %v737_v0 }
 0x46e   :  { %v6744_v18 = vsel %vm16936_vm4, %v6679_v45, %v16935_v4  ;;  %v16954_v45 = vld [vmem:[#allocation294_spill] sm:$0xff]  ;;  %v16960_v4 = vld [vmem:[#allocation385_spill] sm:$0xff] }
 0x46f   :  { %v13105_v43 = vpop.permute.xlu2 %6510  ;;  %v7726_v61 = vmax.f32 %v7662_v8, 0.0  ;;  %v6809_v55 = vsel %vm16938_vm9, %v6744_v18, %v16937_v52 }
 0x470   :  { %5760 = vrot.lane.b32.xlu1 %v16926_v30, %s8863_s3  ;;  %v6873_v49 = vsel %vm16910_vm3, %v6809_v55, %v16939_v5  ;;  %v16946_v30 = vld [vmem:[#allocation6_spill] sm:$0xff]  ;;  %v16962_v5 = vld [vmem:[#allocation276_spill] sm:$0xff] }
 0x471   :  { %8657 = vmatmul.msk.f32.gmra.mxu2 %vm16915_vm10, %v7726_v61  ;;  %v6938_v16 = vsel %vm6917_vm15, %v6873_v49, %v16941_v42  ;;  %vm16945_vm10 = vmmov %vm16933_vm2 }
 0x472   :  { %v6249_v48 = vpop.permute.xlu1 %6248  ;;  %v7405_v35 = vpop.f32.mrf.mxu1  ;;  %v7003_v12 = vsel %vm6982_vm6, %v6938_v16, %v5995_v2  ;;  %v6680_v19 = vsel %vm16945_vm10, %v16698_v1, %v16944_v11  ;;  %vm16948_vm2 = vmmov %vm16936_vm4  ;;  %v16953_v1 = vld [vmem:[#allocation299_spill] sm:$0xff] }
 0x473   :  { %6050 = vrot.lane.b32.xlu0 %v4146_v38, %s8864_s19  ;;  %v7067_v22 = vsel %vm7047_vm13, %v7002_v17, %v6249_v48  ;;  %v7595_v29 = vmul.f32 %v13013_v6, %v7405_v35  ;;  %v6745_v63 = vsel %vm16948_vm2, %v6680_v19, %v16947_v54  ;;  %v16949_v38 = vld [vmem:[#allocation322_spill] sm:$0xff]  ;;  %vm16950_vm4 = vmmov %vm16938_vm9  ;;  %v16951_v35 = vld [vmem:[#allocation436_spill] sm:$0xff] }
 0x474   :  { %v7132_v39 = vsel %vm7112_vm11, %v7067_v22, %v13002_v46  ;;  %v16940_v46 = vld [vmem:[#allocation384_spill] sm:$0xff]  ;;  %v6810_v17 = vsel %vm16950_vm4, %v6745_v63, %v16949_v38  ;;  %vm16952_vm9 = vmmov %vm16910_vm3  ;;  %v16955_v22 = vsel %vm16745_vm8, %v16707_v33, 0.0  ;;  %v16967_v11 = vld [vmem:[#allocation443_spill] sm:$0xff] }
 0x475   :  { %v5997_v53 = vpop.permute.xlu0 %5996  ;;  %v7663_v37 = vadd.f32 %v13023_v32, %v7595_v29  ;;  %6274 = vrot.lane.b32.xlu2 %v16934_v34, %s8866_s25  ;;  %8609 = vmatmul.msk.f32.gmra.mxu1 %vm15742_vm1, %v7132_v39  ;;  %v6874_v56 = vsel %vm16952_vm9, %v6810_v17, %v16951_v35  ;;  %vm16956_vm3 = vmmov %vm16945_vm10  ;;  %v16957_v39 = vld [vmem:[#allocation52_spill] sm:$0xff]  ;;  %v16959_v34 = vld [vmem:[#allocation14_spill] sm:$0xff]  ;;  %vm16961_vm10 = vnez %v16960_v4 }
 0x476   :  { %v6681_v29 = vsel %vm16956_vm3, %v16955_v22, %v16954_v45  ;;  %v3891_v18 = vsel %vm16961_vm10, %v16959_v34, 0.0  ;;  %vm16963_vm8 = vmmov %vm16948_vm2  ;;  %vm2529_vm2 = vcmp.ne.s32.totalorder %v1771_v25, 15 }
 0x477   :  { %v13140_v36 = vpop.permute.xlu2 %6512  ;;  %v7727_v62 = vmax.f32 %v7663_v37, 0.0  ;;  %v6939_v37 = vsel %vm6917_vm15, %v6874_v56, %v16957_v39  ;;  %v6746_v49 = vsel %vm16963_vm8, %v6681_v29, %v16962_v5  ;;  %v16973_v39 = vld [vmem:[#allocation310_spill] sm:$0xff] }
 0x478   :  { %5794 = vrot.lane.b32.xlu1 %v16940_v46, %s8863_s3  ;;  %v7004_v52 = vsel %vm6982_vm6, %v6939_v37, %v5997_v53  ;;  %v16964_v53 = vld [vmem:[#allocation308_spill] sm:$0xff] }
 0x479   :  { %8658 = vmatmul.msk.f32.gmra.mxu2 %vm16942_vm12, %v7727_v62  ;;  %vm16958_vm12 = vmmov %vm16956_vm3 }
 0x47a   :  { %v6251_v41 = vpop.permute.xlu1 %6250  ;;  %v7408_v8 = vpop.f32.mrf.mxu1 }
 0x47b   :  { %6562 = vrot.lane.b32.xlu0 %v16943_v59, %s8865_s23  ;;  %v7068_v50 = vsel %vm7047_vm13, %v7003_v12, %v6251_v41  ;;  %v7596_v10 = vmul.f32 %v13013_v6, %v7408_v8  ;;  %v16965_v41 = vld [vmem:[#allocation289_spill] sm:$0xff] }
 0x47c   :  { %v7133_v61 = vsel %vm7112_vm11, %v7068_v50, %v13045_v23  ;;  %v6811_v8 = vsel %vm16950_vm4, %v6746_v49, %v16965_v41 }
 0x47d   :  { %v5999_v9 = vpop.permute.xlu0 %5998  ;;  %v7664_v2 = vadd.f32 %v13023_v32, %v7596_v10  ;;  %6306 = vrot.lane.b32.xlu2 %v16946_v30, %s8866_s25  ;;  %8610 = vmatmul.msk.f32.gmra.mxu1 %vm15742_vm1, %v7133_v61  ;;  %v16966_v10 = vld [vmem:[#allocation290_spill] sm:$0xff]  ;;  %v6875_v19 = vsel %vm16952_vm9, %v6811_v8, %v16967_v11  ;;  %v16969_v30 = vld [vmem:[#allocation284_spill] sm:$0xff] }
 0x47e   :  { %v3875_v61 = vsel %vm2529_vm2, %v16966_v10, 0.0  ;;  %v4579_v54 = vsel %vm2529_vm2, %v16969_v30, 0.0  ;;  %vm16975_vm2 = vmmov %vm16950_vm4 }
 0x47f   :  { %v13168_v23 = vpop.permute.xlu2 %6258  ;;  %v7728_v48 = vmax.f32 %v7664_v2, 0.0  ;;  %vm16977_vm4 = vmmov %vm16952_vm9 }
 0x480   :  { %6530 = vrot.lane.b32.xlu1 %v16953_v1, %s8865_s23  ;;  %vm16980_vm9 = vmmov %vm16956_vm3 }
 0x481   :  { %8659 = vmatmul.msk.f32.gmra.mxu2 %vm16958_vm12, %v7728_v48  ;;  %v16970_v48 = vld [vmem:[#allocation316_spill] sm:$0xff]  ;;  %vm16971_vm12 = vmmov %vm16956_vm3 }
 0x482   :  { %v6253_v55 = vpop.permute.xlu1 %6252  ;;  %v7411_v62 = vpop.f32.mrf.mxu1  ;;  %v6682_v35 = vsel %vm16971_vm12, %v16719_v7, %v16970_v48  ;;  %vm16985_vm12 = vmmov %vm16963_vm8  ;;  %v16989_v48 = vld [vmem:[#allocation439_spill] sm:$0xff] }
 0x483   :  { %5796 = vrot.lane.b32.xlu0 %v3891_v18, %s8863_s3  ;;  %v7069_v58 = vsel %vm7047_vm13, %v7004_v52, %v6253_v55  ;;  %v7597_v33 = vmul.f32 %v13013_v6, %v7411_v62  ;;  %v6747_v37 = vsel %vm16963_vm8, %v6682_v35, %v16973_v39  ;;  %v16974_v18 = vld [vmem:[#allocation324_spill] sm:$0xff]  ;;  %vm16990_vm8 = vmmov %vm16977_vm4  ;;  %v16993_v39 = vld [vmem:[#allocation318_spill] sm:$0xff] }
 0x484   :  { %v7134_v16 = vsel %vm7112_vm11, %v7069_v58, %v13075_v57  ;;  %v16968_v57 = vld [vmem:[#allocation65_spill] sm:$0xff]  ;;  %v6812_v7 = vsel %vm16975_vm2, %v6747_v37, %v16974_v18  ;;  %v16976_v62 = vld [vmem:[#allocation24_spill] sm:$0xff] }
 0x485   :  { %v6001_v42 = vpop.permute.xlu0 %6000  ;;  %v7665_v12 = vadd.f32 %v13023_v32, %v7597_v33  ;;  %6020 = vrot.lane.b32.xlu2 %v16964_v53, %s8864_s19  ;;  %8611 = vmatmul.msk.f32.gmra.mxu1 %vm15742_vm1, %v7134_v16  ;;  %v6940_v2 = vsel %vm6917_vm15, %v6875_v19, %v16968_v57  ;;  %v6876_v58 = vsel %vm16977_vm4, %v6812_v7, %v16976_v62  ;;  %v16979_v33 = vld [vmem:[#allocation31_spill] sm:$0xff]  ;;  %v16995_v62 = vld [vmem:[#allocation297_spill] sm:$0xff]  ;;  %vm16996_vm4 = vmmov %vm16985_vm12 }
 0x486   :  { %v7005_v63 = vsel %vm6982_vm6, %v6940_v2, %v5999_v9  ;;  %v16972_v9 = vld [vmem:[#allocation40_spill] sm:$0xff]  ;;  %v6941_v5 = vsel %vm6917_vm15, %v6876_v58, %v16979_v33  ;;  %v16984_v2 = vld [vmem:[#allocation330_spill] sm:$0xff] }
 0x487   :  { %v13200_v50 = vpop.permute.xlu2 %6004  ;;  %v7729_v0 = vmax.f32 %v7665_v12, 0.0  ;;  %v7006_v49 = vsel %vm6982_vm6, %v6941_v5, %v6001_v42  ;;  %v16983_v42 = vsel %vm16795_vm14, %v16728_v31, 0.0 }
 0x488   :  { %5764 = vrot.lane.b32.xlu1 %v3875_v61, %s8863_s3  ;;  %v16981_v61 = vld [vmem:[#allocation26_spill] sm:$0xff] }
 0x489   :  { %8660 = vmatmul.msk.f32.gmra.mxu2 %vm16956_vm3, %v7729_v0  ;;  %v4595_v0 = vsel %vm16961_vm10, %v16981_v61, 0.0  ;;  %vm16987_vm10 = vmmov %vm16975_vm2 }
 0x48a   :  { %v6255_v38 = vpop.permute.xlu1 %6254  ;;  %v7414_v17 = vpop.f32.mrf.mxu1  ;;  %vm16991_vm2 = vmmov %vm16956_vm3 }
 0x48b   :  { %6532 = vrot.lane.b32.xlu0 %v4579_v54, %s8865_s23  ;;  %v7070_v56 = vsel %vm7047_vm13, %v7005_v63, %v6255_v38  ;;  %v7598_v25 = vmul.f32 %v13013_v6, %v7414_v17  ;;  %v16988_v17 = vld [vmem:[#allocation16_spill] sm:$0xff]  ;;  %vm16994_vm14 = vmmov %vm16991_vm2 }
 0x48c   :  { %v7135_v22 = vsel %vm7112_vm11, %v7070_v56, %v13105_v43  ;;  %v16978_v43 = vld [vmem:[#allocation278_spill] sm:$0xff]  ;;  %v6684_v37 = vsel %vm16994_vm14, %v16734_v26, %v16993_v39  ;;  %v16997_v26 = vld [vmem:[#allocation259_spill] sm:$0xff]  ;;  %vm17014_vm14 = vmmov %vm16991_vm2 }
 0x48d   :  { %v5747_v45 = vpop.permute.xlu0 %5746  ;;  %v7666_v29 = vadd.f32 %v13023_v32, %v7598_v25  ;;  %6052 = vrot.lane.b32.xlu2 %v16972_v9, %s8864_s19  ;;  %8612 = vmatmul.msk.f32.gmra.mxu1 %vm15742_vm1, %v7135_v22  ;;  %v6749_v58 = vsel %vm16996_vm4, %v6684_v37, %v16995_v62  ;;  %v17015_v37 = vld [vmem:[#allocation286_spill] sm:$0xff] }
 0x48e   :  { %vm17016_vm4 = vnez %v17015_v37 }
 0x48f   :  { %v13227_v52 = vpop.permute.xlu2 %5750  ;;  %v7730_v55 = vmax.f32 %v7666_v29, 0.0 }
 0x490   :  { %6276 = vrot.lane.b32.xlu1 %v16978_v43, %s8866_s25 }
 0x491   :  { %8661 = vmatmul.msk.f32.gmra.mxu2 %vm16980_vm9, %v7730_v55  ;;  %vm16998_vm9 = vnez %v16997_v26 }
 0x492   :  { %v6257_v16 = vpop.permute.xlu1 %6256  ;;  %v7417_v12 = vpop.f32.mrf.mxu1 }
 0x493   :  { %5766 = vrot.lane.b32.xlu0 %v16953_v1, %s8863_s3  ;;  %v7071_v41 = vsel %vm7047_vm13, %v7006_v49, %v6257_v16  ;;  %v7599_v8 = vmul.f32 %v13013_v6, %v7417_v12  ;;  %v16982_v1 = vld [vmem:[#allocation283_spill] sm:$0xff]  ;;  %v17002_v49 = vld [vmem:[#allocation313_spill] sm:$0xff] }
 0x494   :  { %v7136_v11 = vsel %vm7112_vm11, %v7071_v41, %v13140_v36  ;;  %v6683_v57 = vsel %vm16956_vm3, %v16983_v42, %v16982_v1  ;;  %v16986_v36 = vld [vmem:[#allocation344_spill] sm:$0xff]  ;;  %vm17001_vm3 = vmmov %vm16991_vm2  ;;  %v17004_v16 = vld [vmem:[#allocation17_spill] sm:$0xff] }
 0x495   :  { %v6515_v10 = vpop.permute.xlu0 %6514  ;;  %v7667_v19 = vadd.f32 %v13023_v32, %v7599_v8  ;;  %6564 = vrot.lane.b32.xlu2 %v4595_v0, %s8865_s23  ;;  %8613 = vmatmul.msk.f32.gmra.mxu1 %vm15742_vm1, %v7136_v11  ;;  %v6748_v4 = vsel %vm16985_vm12, %v6683_v57, %v16984_v2  ;;  %vm17003_vm12 = vmmov %vm16987_vm10  ;;  %v17005_v8 = vld [vmem:[#allocation25_spill] sm:$0xff] }
 0x496   :  { %v6813_v38 = vsel %vm16987_vm10, %v6748_v4, %v16986_v36  ;;  %vm17006_vm10 = vmmov %vm16990_vm8  ;;  %v17007_v42 = vld [vmem:[#allocation317_spill] sm:$0xff]  ;;  %v17008_v4 = vld [vmem:[#allocation22_spill] sm:$0xff] }
 0x497   :  { %v13257_v54 = vpop.permute.xlu2 %6518  ;;  %v7731_v63 = vmax.f32 %v7667_v19, 0.0  ;;  %v6877_v35 = vsel %vm16990_vm8, %v6813_v38, %v16989_v48 }
 0x498   :  { %6308 = vrot.lane.b32.xlu1 %v16988_v17, %s8866_s25  ;;  %v6942_v31 = vsel %vm6917_vm15, %v6877_v35, %v5747_v45  ;;  %v17011_v17 = vld [vmem:[#allocation323_spill] sm:$0xff] }
 0x499   :  { %8662 = vmatmul.msk.f32.gmra.mxu2 %vm16991_vm2, %v7731_v63  ;;  %v17009_v63 = vld [vmem:[#allocation18_spill] sm:$0xff] }
 0x49a   :  { %v6003_v56 = vpop.permute.xlu1 %6002  ;;  %v7420_v25 = vpop.f32.mrf.mxu1  ;;  %vm17010_vm8 = vnez %v17009_v63  ;;  %v17184_v63 = vld [vmem:[#allocation429_spill] sm:$0xff] }
 0x49b   :  { %6278 = vrot.lane.b32.xlu0 %v16992_v21, %s8866_s25  ;;  %v7007_v22 = vsel %vm6982_vm6, %v6942_v31, %v6003_v56  ;;  %v7600_v29 = vmul.f32 %v13013_v6, %v7420_v25  ;;  %v4148_v36 = vsel %vm17010_vm8, %v17008_v4, 0.0  ;;  %v17012_v21 = vld [vmem:[#allocation335_spill] sm:$0xff] }
 0x49c   :  { %v7072_v18 = vsel %vm7047_vm13, %v7007_v22, %v13168_v23  ;;  %v16999_v23 = vld [vmem:[#allocation282_spill] sm:$0xff] }
 0x49d   :  { %v6261_v7 = vpop.permute.xlu0 %6260  ;;  %v7668_v55 = vadd.f32 %v13023_v32, %v7600_v29  ;;  %5798 = vrot.lane.b32.xlu2 %v16943_v59, %s8863_s3  ;;  %v7137_v45 = vsel %vm7112_vm11, %v7072_v18, %v6515_v10  ;;  %v17000_v5 = vsel %vm16998_vm9, %v16999_v23, 0.0  ;;  %v6814_v59 = vsel %vm17003_vm12, %v6749_v58, %v17002_v49  ;;  %v17022_v58 = vld [vmem:[#allocation36_spill] sm:$0xff] }
 0x49e   :  { %8614 = vmatmul.msk.f32.gmra.mxu1 %vm15742_vm1, %v7137_v45  ;;  %v6878_v10 = vsel %vm17006_vm10, %v6814_v59, %v17005_v8  ;;  %v17017_v18 = vsel %vm17016_vm4, %v16969_v30, 0.0  ;;  %v17026_v59 = vld [vmem:[#allocation48_spill] sm:$0xff] }
 0x49f   :  { %v13283_v43 = vpop.permute.xlu2 %6264  ;;  %v7732_v33 = vmax.f32 %v7668_v55, 0.0 }
 0x4a0   :  { %6022 = vrot.lane.b32.xlu1 %v17000_v5, %s8864_s19  ;;  %v17024_v5 = vld [vmem:[#allocation46_spill] sm:$0xff] }
 0x4a1   :  { %8663 = vmatmul.msk.f32.gmra.mxu2 %vm17001_vm3, %v7732_v33  ;;  %vm17019_vm3 = vcmask 64512  }
 0x4a2   :  { %v5749_v12 = vpop.permute.xlu1 %5748  ;;  %v7423_v41 = vpop.f32.mrf.mxu1 }
 0x4a3   :  { %6310 = vrot.lane.b32.xlu0 %v17004_v16, %s8866_s25  ;;  %v7601_v0 = vmul.f32 %v13013_v6, %v7423_v41  ;;  %v6943_v11 = vsel %vm6917_vm15, %v6878_v10, %v5749_v12 }
 0x4a4   :  { %v7008_v57 = vsel %vm6982_vm6, %v6943_v11, %v13200_v50  ;;  %v17013_v50 = vsel %vm16814_vm7, %v16746_v28, 0.0  ;;  %vm17021_vm7 = vmmov %vm17003_vm12 }
 0x4a5   :  { %v6007_v19 = vpop.permute.xlu0 %6006  ;;  %v7669_v1 = vadd.f32 %v13023_v32, %v7601_v0  ;;  %6534 = vrot.lane.b32.xlu2 %v17007_v42, %s8865_s23  ;;  %v7073_v35 = vsel %vm7047_vm13, %v7008_v57, %v6261_v7  ;;  %v6685_v56 = vsel %vm17014_vm14, %v17013_v50, %v17012_v21  ;;  %v17020_v7 = vld [vmem:[#allocation345_spill] sm:$0xff]  ;;  %vm17023_vm12 = vmmov %vm17006_vm10  ;;  %v17029_v57 = vld [vmem:[#allocation351_spill] sm:$0xff] }
 0x4a6   :  { %v6750_v28 = vsel %vm17019_vm3, %v6685_v56, %v17018_v13  ;;  %vm17025_vm10 = vmmov %vm16991_vm2  ;;  %v17036_v50 = vld [vmem:[#allocation442_spill] sm:$0xff] }
 0x4a7   :  { %v13304_v2 = vpop.permute.xlu2 %6010  ;;  %v7733_v38 = vmax.f32 %v7669_v1, 0.0  ;;  %v6815_v55 = vsel %vm17021_vm7, %v6750_v28, %v17020_v7  ;;  %vm17030_vm14 = vmmov %vm17019_vm3  ;;  %v17040_v28 = vld [vmem:[#allocation336_spill] sm:$0xff]  ;;  %v17041_v7 = vsel %vm16865_vm5, %v16796_v47, 0.0 }
 0x4a8   :  { %6054 = vrot.lane.b32.xlu1 %v4148_v36, %s8864_s19  ;;  %v6879_v33 = vsel %vm17023_vm12, %v6815_v55, %v17022_v58  ;;  %vm17032_vm3 = vmmov %vm17021_vm7  ;;  %v6687_v55 = vsel %vm16991_vm2, %v17041_v7, %v17040_v28  ;;  %v17060_v28 = vld [vmem:[#allocation41_spill] sm:$0xff] }
 0x4a9   :  { %8664 = vmatmul.msk.f32.gmra.mxu2 %vm16991_vm2, %v7733_v38  ;;  %v6944_v49 = vsel %vm6917_vm15, %v6879_v33, %v13227_v52  ;;  %v17027_v52 = vld [vmem:[#allocation291_spill] sm:$0xff]  ;;  %v17042_v33 = vld [vmem:[#allocation34_spill] sm:$0xff]  ;;  %vm17046_vm5 = vmmov %vm16991_vm2 }
 0x4aa   :  { %v6517_v48 = vpop.permute.xlu1 %6516  ;;  %v7426_v31 = vpop.f32.mrf.mxu1  ;;  %v7009_v30 = vsel %vm6982_vm6, %v6944_v49, %v6007_v19  ;;  %v17028_v19 = vld [vmem:[#allocation304_spill] sm:$0xff] }
 0x4ab   :  { %6024 = vrot.lane.b32.xlu0 %v17011_v17, %s8864_s19  ;;  %v7138_v25 = vsel %vm7112_vm11, %v7073_v35, %v6517_v48  ;;  %v7602_v22 = vmul.f32 %v13013_v6, %v7426_v31  ;;  %v6686_v1 = vsel %vm16991_vm2, %v16756_v15, %v17028_v19  ;;  %v17031_v35 = vld [vmem:[#allocation363_spill] sm:$0xff]  ;;  %v17033_v31 = vld [vmem:[#allocation13_spill] sm:$0xff] }
 0x4ac   :  { %8615 = vmatmul.msk.f32.gmra.mxu1 %vm15742_vm1, %v7138_v25  ;;  %v6751_v36 = vsel %vm17030_vm14, %v6686_v1, %v17029_v57  ;;  %vm17034_vm7 = vnez %v17033_v31  ;;  %v17038_v25 = vld [vmem:[#allocation42_spill] sm:$0xff] }
 0x4ad   :  { %v5753_v29 = vpop.permute.xlu0 %5752  ;;  %v7670_v39 = vadd.f32 %v13023_v32, %v7602_v22  ;;  %5768 = vrot.lane.b32.xlu2 %v17017_v18, %s8863_s3  ;;  %v17035_v21 = vsel %vm17034_vm7, %v16981_v61, 0.0  ;;  %v17039_v22 = vsel %vm17034_vm7, %v17038_v25, 0.0  ;;  %vm17049_vm7 = vmmov %vm17023_vm12 }
 0x4af   :  { %v13333_v45 = vpop.permute.xlu2 %5756  ;;  %v7734_v62 = vmax.f32 %v7670_v39, 0.0 }
 0x4b0   :  { %6566 = vrot.lane.b32.xlu1 %v17024_v5, %s8865_s23 }
 0x4b1   :  { %8665 = vmatmul.msk.f32.gmra.mxu2 %vm17025_vm10, %v7734_v62  ;;  %vm17037_vm10 = vmmov %vm16991_vm2 }
 0x4b2   :  { %v6263_v16 = vpop.permute.xlu1 %6262  ;;  %v7429_v12 = vpop.f32.mrf.mxu1 }
 0x4b3   :  { %6056 = vrot.lane.b32.xlu0 %v17026_v59, %s8864_s19  ;;  %v7074_v41 = vsel %vm7047_vm13, %v7009_v30, %v6263_v16  ;;  %v7603_v8 = vmul.f32 %v13013_v6, %v7429_v12  ;;  %v17043_v30 = vld [vmem:[#allocation319_spill] sm:$0xff] }
 0x4b4   :  { %v7139_v0 = vsel %vm7112_vm11, %v7074_v41, %v13257_v54  ;;  %v6816_v54 = vsel %vm17032_vm3, %v6751_v36, %v17031_v35  ;;  %v6752_v24 = vsel %vm17030_vm14, %v6687_v55, %v17043_v30  ;;  %v17047_v41 = vld [vmem:[#allocation332_spill] sm:$0xff]  ;;  %v17050_v36 = vld [vmem:[#allocation273_spill] sm:$0xff] }
 0x4b5   :  { %v6521_v10 = vpop.permute.xlu0 %6520  ;;  %v7671_v11 = vadd.f32 %v13023_v32, %v7603_v8  ;;  %6280 = vrot.lane.b32.xlu2 %v17027_v52, %s8866_s25  ;;  %8616 = vmatmul.msk.f32.gmra.mxu1 %vm15742_vm1, %v7139_v0  ;;  %v6880_v56 = vsel %vm17023_vm12, %v6816_v54, %v17036_v50  ;;  %v6817_v8 = vsel %vm17032_vm3, %v6752_v24, %v17047_v41  ;;  %vm17054_vm12 = vmmov %vm16991_vm2  ;;  %v17062_v55 = vld [vmem:[#allocation352_spill] sm:$0xff] }
 0x4b6   :  { %v6945_v15 = vsel %vm6917_vm15, %v6880_v56, %v5753_v29  ;;  %v17067_v24 = vld [vmem:[#allocation292_spill] sm:$0xff] }
 0x4b7   :  { %v13358_v38 = vpop.permute.xlu2 %6524  ;;  %v7735_v48 = vmax.f32 %v7671_v11, 0.0  ;;  %v17048_v11 = vld [vmem:[#allocation27_spill] sm:$0xff]  ;;  %v17069_v41 = vld [vmem:[#allocation300_spill] sm:$0xff] }
 0x4b8   :  { %5800 = vrot.lane.b32.xlu1 %v17035_v21, %s8863_s3  ;;  %v6881_v52 = vsel %vm17049_vm7, %v6817_v8, %v17048_v11  ;;  %v17055_v21 = vld [vmem:[#allocation340_spill] sm:$0xff] }
 0x4b9   :  { %8666 = vmatmul.msk.f32.gmra.mxu2 %vm17037_vm10, %v7735_v48  ;;  %v17052_v48 = vld [vmem:[#allocation295_spill] sm:$0xff]  ;;  %vm17057_vm10 = vmmov %vm16991_vm2 }
 0x4ba   :  { %v6009_v39 = vpop.permute.xlu1 %6008  ;;  %v7432_v18 = vpop.f32.mrf.mxu1 }
 0x4bb   :  { %6568 = vrot.lane.b32.xlu0 %v17039_v22, %s8865_s23  ;;  %v7010_v13 = vsel %vm6982_vm6, %v6945_v15, %v6009_v39  ;;  %v7604_v61 = vmul.f32 %v13013_v6, %v7432_v18  ;;  %v17056_v22 = vld [vmem:[#allocation355_spill] sm:$0xff] }
 0x4bc   :  { %v7075_v29 = vsel %vm7047_vm13, %v7010_v13, %v13283_v43  ;;  %v17044_v43 = vld [vmem:[#allocation301_spill] sm:$0xff]  ;;  %v6688_v39 = vsel %vm17057_vm10, %v16802_v27, %v17056_v22  ;;  %v17082_v22 = vld [vmem:[#allocation359_spill] sm:$0xff] }
 0x4bd   :  { %v6267_v62 = vpop.permute.xlu0 %6266  ;;  %v7672_v58 = vadd.f32 %v13023_v32, %v7604_v61  ;;  %6312 = vrot.lane.b32.xlu2 %v17042_v33, %s8866_s25  ;;  %v7140_v49 = vsel %vm7112_vm11, %v7075_v29, %v6521_v10  ;;  %v17045_v12 = vsel %vm17016_vm4, %v17044_v43, 0.0  ;;  %vm17051_vm4 = vnez %v17050_v36  ;;  %v17058_v61 = vld [vmem:[#allocation8_spill] sm:$0xff] }
 0x4be   :  { %8617 = vmatmul.msk.f32.gmra.mxu1 %vm15742_vm1, %v7140_v49  ;;  %v17053_v35 = vsel %vm17051_vm4, %v17052_v48, 0.0  ;;  %vm17059_vm2 = vnez %v17058_v61  ;;  %v6753_v29 = vsel %vm17030_vm14, %v6688_v39, %v17062_v55  ;;  %v17065_v49 = vld [vmem:[#allocation73_spill] sm:$0xff] }
 0x4bf   :  { %v13393_v16 = vpop.permute.xlu2 %8762  ;;  %v7736_v47 = vmax.f32 %v7672_v58, 0.0  ;;  %v17061_v7 = vsel %vm17059_vm2, %v17060_v28, 0.0 }
 0x4c0   :  { %6536 = vrot.lane.b32.xlu1 %v17045_v12, %s8865_s23 }
 0x4c1   :  { %8667 = vmatmul.msk.f32.gmra.mxu2 %vm17046_vm5, %v7736_v47  ;;  %vm17064_vm5 = vmmov %vm17032_vm3 }
 0x4c2   :  { %v5755_v10 = vpop.permute.xlu1 %5754  ;;  %v7435_v0 = vpop.f32.mrf.mxu1  ;;  %vm17066_vm3 = vmmov %vm17049_vm7 }
 0x4c3   :  { %5802 = vrot.lane.b32.xlu0 %v17024_v5, %s8863_s3  ;;  %v7605_v19 = vmul.f32 %v13013_v6, %v7435_v0  ;;  %v6946_v37 = vsel %vm6917_vm15, %v6881_v52, %v5755_v10  ;;  %vm17068_vm7 = vmmov %vm17057_vm10 }
 0x4c4   :  { %v7011_v5 = vsel %vm6982_vm6, %v6946_v37, %v13304_v2  ;;  %vm17077_vm14 = vmmov %vm17068_vm7 }
 0x4c5   :  { %v6013_v1 = vpop.permute.xlu0 %6012  ;;  %v7673_v57 = vadd.f32 %v13023_v32, %v7605_v19  ;;  %6026 = vrot.lane.b32.xlu2 %v17053_v35, %s8864_s19  ;;  %v7076_v56 = vsel %vm7047_vm13, %v7011_v5, %v6267_v62  ;;  %v17063_v62 = vld [vmem:[#allocation364_spill] sm:$0xff]  ;;  %v17073_v35 = vld [vmem:[#allocation327_spill] sm:$0xff] }
 0x4c6   :  { %v6818_v27 = vsel %vm17064_vm5, %v6753_v29, %v17063_v62  ;;  %v17074_v5 = vld [vmem:[#allocation231_spill] sm:$0xff]  ;;  %vm17080_vm5 = vcmask 64512   ;;  %v17087_v29 = vld [vmem:[#allocation444_spill] sm:$0xff] }
 0x4c7   :  { %v13417_v54 = vpop.permute.xlu2 %5762  ;;  %v7737_v31 = vmax.f32 %v7673_v57, 0.0  ;;  %v6882_v30 = vsel %vm17066_vm3, %v6818_v27, %v17065_v49  ;;  %vm17075_vm10 = vnez %v17074_v5  ;;  %vm17081_vm3 = vmmov %vm17068_vm7  ;;  %v17098_v5 = vld [vmem:[#allocation39_spill] sm:$0xff] }
 0x4c8   :  { %5770 = vrot.lane.b32.xlu1 %v17007_v42, %s8863_s3  ;;  %v6947_v47 = vsel %vm6917_vm15, %v6882_v30, %v13333_v45 }
 0x4c9   :  { %8668 = vmatmul.msk.f32.gmra.mxu2 %vm17054_vm12, %v7737_v31  ;;  %v7012_v12 = vsel %vm6982_vm6, %v6947_v47, %v6013_v1  ;;  %vm17070_vm12 = vnez %v17069_v41  ;;  %v17072_v1 = vld [vmem:[#allocation72_spill] sm:$0xff]  ;;  %v17076_v31 = vsel %vm17075_vm10, %v16815_v44, 0.0  ;;  %v17086_v44 = vld [vmem:[#allocation306_spill] sm:$0xff]  ;;  %vm17088_vm10 = vcmask 130048  }
 0x4ca   :  { %v6523_v50 = vpop.permute.xlu1 %6522  ;;  %v7438_v15 = vpop.f32.mrf.mxu1  ;;  %v17071_v8 = vsel %vm17070_vm12, %v17044_v43, 0.0  ;;  %v17110_v41 = vld [vmem:[#allocation80_spill] sm:$0xff] }
 0x4cb   :  { %6538 = vrot.lane.b32.xlu0 %v17055_v21, %s8865_s23  ;;  %v7141_v2 = vsel %vm7112_vm11, %v7076_v56, %v6523_v50  ;;  %v7606_v18 = vmul.f32 %v13013_v6, %v7438_v15  ;;  %v6689_v50 = vsel %vm17077_vm14, %v17076_v31, %v17073_v35  ;;  %v17078_v56 = vld [vmem:[#allocation35_spill] sm:$0xff]  ;;  %vm17093_vm14 = vmmov %vm17080_vm5 }
 0x4cc   :  { %8618 = vmatmul.msk.f32.gmra.mxu1 %vm15742_vm1, %v7141_v2  ;;  %v17084_v2 = vld [vmem:[#allocation375_spill] sm:$0xff] }
 0x4cd   :  { %v5759_v13 = vpop.permute.xlu0 %5758  ;;  %v7674_v42 = vadd.f32 %v13023_v32, %v7606_v18  ;;  %6058 = vrot.lane.b32.xlu2 %v17061_v7, %s8864_s19 }
 0x4cf   :  { %v13441_v58 = vpop.permute.xlu2 %6274  ;;  %v7738_v33 = vmax.f32 %v7674_v42, 0.0  ;;  %v8764_v42 = vunpack.i.l.bf16 %v13393_v16 }
 0x4d0   :  { %6282 = vrot.lane.b32.xlu1 %v17067_v24, %s8866_s25 }
 0x4d1   :  { %8669 = vmatmul.msk.f32.gmra.mxu2 %vm17068_vm7, %v7738_v33  ;;  %vm17083_vm7 = vmmov %vm17081_vm3 }
 0x4d2   :  { %v6269_v10 = vpop.permute.xlu1 %6268  ;;  %v7441_v0 = vpop.f32.mrf.mxu1  ;;  %v6690_v39 = vsel %vm17083_vm7, %v16858_v51, %v17082_v22  ;;  %v17100_v22 = vld [vmem:[#allocation76_spill] sm:$0xff] }
 0x4d3   :  { %5772 = vrot.lane.b32.xlu0 %v17071_v8, %s8863_s3  ;;  %v7077_v11 = vsel %vm7047_vm13, %v7012_v12, %v6269_v10  ;;  %v7607_v52 = vmul.f32 %v13013_v6, %v7441_v0  ;;  %v17089_v12 = vld [vmem:[#allocation44_spill] sm:$0xff]  ;;  %v17092_v10 = vld [vmem:[#allocation346_spill] sm:$0xff] }
 0x4d4   :  { %v7142_v45 = vsel %vm7112_vm11, %v7077_v11, %v13358_v38  ;;  %v17079_v38 = vld [vmem:[#allocation369_spill] sm:$0xff]  ;;  %v6755_v0 = vsel %vm17093_vm14, %v6690_v39, %v17092_v10  ;;  %v8744_v39 = vunpack.i.l.bf16 %v17100_v22  ;;  %vm17103_vm14 = vmmov %vm17083_vm7 }
 0x4d5   :  { %v8768_v19 = vpop.permute.xlu0 %8767  ;;  %v7675_v37 = vadd.f32 %v13023_v32, %v7607_v52  ;;  %6570 = vrot.lane.b32.xlu2 %v17072_v1, %s8865_s23  ;;  %8619 = vmatmul.msk.f32.gmra.mxu1 %vm15742_vm1, %v7142_v45  ;;  %v6754_v15 = vsel %vm17080_vm5, %v6689_v50, %v17079_v38  ;;  %vm17085_vm1 = vcmask 97280   ;;  %vm17095_vm5 = vcmask 293888  }
 0x4d6   :  { %v6819_v18 = vsel %vm17085_vm1, %v6754_v15, %v17084_v2  ;;  %v8769_v27 = vunpack.i.l.bf16 %v8768_v19  ;;  %vm17090_vm1 = vnez %v17089_v12  ;;  %v8765_v2 = vunpack.i.h.bf16 %v13393_v16 }
 0x4d7   :  { %v13464_v57 = vpop.permute.xlu2 %6306  ;;  %v7739_v43 = vmax.f32 %v7675_v37, 0.0  ;;  %v6883_v62 = vsel %vm17088_vm10, %v6819_v18, %v17087_v29  ;;  %v17091_v8 = vsel %vm17090_vm1, %v17038_v25, 0.0  ;;  %v17094_v37 = vld [vmem:[#allocation347_spill] sm:$0xff]  ;;  %v13513_v25 = vld [vmem:[%s15136_s8] ss:$0 sm:$0xff]  ;;  %v8770_v29 = vunpack.i.h.bf16 %v8768_v19 }
 0x4d8   :  { %6314 = vrot.lane.b32.xlu1 %v17078_v56, %s8866_s25  ;;  %v6948_v30 = vsel %vm6917_vm15, %v6883_v62, %v5759_v13  ;;  %v17099_v56 = vld [vmem:[#allocation50_spill] sm:$0xff] }
 0x4d9   :  { %8670 = vmatmul.msk.f32.gmra.mxu2 %vm17081_vm3, %v7739_v43  ;;  %v17096_v43 = vld [vmem:[#allocation360_spill] sm:$0xff]  ;;  %vm17097_vm3 = vcmask 97280   ;;  %v17106_v19 = vld [vmem:[#allocation70_spill] sm:$0xff] }
 0x4da   :  { %v8758_v7 = vpop.permute.xlu1 %8757  ;;  %v7444_v55 = vpop.f32.mrf.mxu1  ;;  %v6820_v35 = vsel %vm17097_vm3, %v6755_v0, %v17096_v43  ;;  %v8754_v10 = vunpack.i.l.bf16 %v17106_v19 }
 0x4db   :  { %6284 = vrot.lane.b32.xlu0 %v17086_v44, %s8866_s25  ;;  %v8759_v33 = vunpack.i.l.bf16 %v8758_v7  ;;  %v7608_v49 = vmul.f32 %v13013_v6, %v7444_v55  ;;  %v6884_v31 = vsel %vm17088_vm10, %v6820_v35, %v17098_v5  ;;  %v8760_v50 = vunpack.i.h.bf16 %v8758_v7  ;;  %v13526_v44 = vld [vmem:[%s15137_s9] ss:$0 sm:$0xff]  ;;  %v17108_v35 = vld [vmem:[#allocation423_spill] sm:$0xff] }
 0x4dc   :  { %v17101_v55 = vld [vmem:[#allocation354_spill] sm:$0xff] }
 0x4dd   :  { %v13489_v51 = vpop.permute.xlu0 %6018  ;;  %v7013_v24 = vsel %vm6982_vm6, %v6948_v30, %v8759_v33  ;;  %v7676_v47 = vadd.f32 %v13023_v32, %v7608_v49  ;;  %5804 = vrot.lane.b32.xlu2 %v17091_v8, %s8863_s3  ;;  %v2929_v7 = vsel %vm16930_vm0, %v17101_v55, 0.0  ;;  %v17102_v49 = vld [vmem:[#allocation428_spill] sm:$0xff]  ;;  %vm17107_vm0 = vmmov %vm17083_vm7 }
 0x4de   :  { %v7078_v11 = vsel %vm7047_vm13, %v7013_v24, %v8764_v42  ;;  %v6707_v16 = vsel %vm17103_vm14, %v2929_v7, %v17102_v49  ;;  %vm17116_vm14 = vcmask 130048  }
 0x4df   :  { %v13501_v52 = vpop.permute.xlu2 %6020  ;;  %v7143_v13 = vsel %vm7112_vm11, %v7078_v11, %v8769_v27  ;;  %v7740_v45 = vmax.f32 %v7676_v47, 0.0  ;;  %v17104_v47 = vld [vmem:[#allocation315_spill] sm:$0xff]  ;;  %v6691_v11 = vsel %vm17107_vm0, 0.0, %v8744_v39 }
 0x4e0   :  { %6028 = vrot.lane.b32.xlu1 %v17094_v37, %s8864_s19  ;;  %8620 = vmatmul.msk.f32.gmra.mxu1 %vm17095_vm5, %v7143_v13  ;;  %v17105_v8 = vsel %vm17070_vm12, %v17104_v47, 0.0  ;;  %vm17109_vm5 = vcmask 64512   ;;  %vm17111_vm12 = vcmask 293888   ;;  %v17115_v39 = vld [vmem:[#allocation119_spill] sm:$0xff] }
 0x4e1   :  { %8671 = vmatmul.msk.f32.gmra.mxu2 %vm17083_vm7, %v7740_v45  ;;  %v6772_v5 = vsel %vm17109_vm5, %v6707_v16, %v17108_v35  ;;  %vm17113_vm7 = vmmov %vm17107_vm0 }
 0x4e2   :  { %v5761_v38 = vpop.permute.xlu1 %5760  ;;  %v7447_v15 = vpop.f32.mrf.mxu1  ;;  %vm17114_vm10 = vmmov %vm17109_vm5 }
 0x4e3   :  { %6316 = vrot.lane.b32.xlu0 %v17099_v56, %s8866_s25  ;;  %v6949_v18 = vsel %vm6917_vm15, %v6884_v31, %v5761_v38  ;;  %v7609_v42 = vmul.f32 %v13013_v6, %v7447_v15  ;;  %v17112_v31 = vld [vmem:[#allocation434_spill] sm:$0xff]  ;;  %v6756_v15 = vsel %vm17114_vm10, %v6691_v11, %v8754_v10  ;;  %vm17122_vm5 = vmmov %vm17097_vm3  ;;  %vm17129_vm10 = vcmask 31744  }
 0x4e4   :  { %v7014_v62 = vsel %vm6982_vm6, %v6949_v18, %v8760_v50  ;;  %v8001_v33 = vpop.f32.mrf.mxu2  ;;  %v6837_v50 = vsel %vm17097_vm3, %v6772_v5, %v17112_v31  ;;  %v8786_v56 = vld [vmem:[%s15129_s0] sm:$0xff]  ;;  %v17117_v18 = vld [vmem:[#allocation285_spill] sm:$0xff] }
 0x4e5   :  { %v6051_v27 = vpop.permute.xlu0 %6050  ;;  %v7677_v30 = vadd.f32 %v13023_v32, %v7609_v42  ;;  %v8197_v24 = vmul.f32 %v13513_v25, %v8001_v33  ;;  %6540 = vrot.lane.b32.xlu2 %v17105_v8, %s8865_s23  ;;  %v7079_v20 = vsel %vm7047_vm13, %v7014_v62, %v8765_v2  ;;  %v6901_v2 = vsel %vm17116_vm14, %v6837_v50, %v17115_v39  ;;  %v17119_v42 = vld [vmem:[#allocation311_spill] sm:$0xff]  ;;  %v17121_v33 = vld [vmem:[#allocation376_spill] sm:$0xff]  ;;  %v17123_v8 = vld [vmem:[#allocation53_spill] sm:$0xff] }
 0x4e6   :  { %v7144_v0 = vsel %vm7112_vm11, %v7079_v20, %v8770_v29  ;;  %vm17118_vm0 = vnez %v17117_v18  ;;  %v6821_v49 = vsel %vm17122_vm5, %v6756_v15, %v17121_v33  ;;  %v17132_v39 = vld [vmem:[#allocation57_spill] sm:$0xff] }
 0x4e7   :  { %v8265_v13 = vadd.f32 %v13526_v44, %v8197_v24  ;;  %v13546_v45 = vpop.permute.xlu2 %6052  ;;  %v7741_v43 = vmax.f32 %v7677_v30, 0.0  ;;  %v17120_v7 = vsel %vm17118_vm0, %v17119_v42, 0.0 }
 0x4e8   :  { %6060 = vrot.lane.b32.xlu1 %v17110_v41, %s8864_s19  ;;  %8621 = vmatmul.msk.f32.gmra.mxu1 %vm17111_vm12, %v7144_v0  ;;  %vm17124_vm12 = vmmov %vm17116_vm14 }
 0x4e9   :  { %v8329_v38 = vadd.f32 %v8786_v56, %v8265_v13  ;;  %8672 = vmatmul.msk.f32.gmra.mxu2 %vm17113_vm7, %v7741_v43  ;;  %v6885_v20 = vsel %vm17124_vm12, %v6821_v49, %v17123_v8  ;;  %vm17125_vm3 = vmmov %vm17124_vm12  ;;  %vm17126_vm7 = vcmask 293888  }
 0x4ea   :  { %v5795_v29 = vpop.permute.xlu1 %5794  ;;  %v7450_v62 = vpop.f32.mrf.mxu1  ;;  %vm17135_vm5 = vmmov %vm17125_vm3 }
 0x4eb   :  { %6030 = vrot.lane.b32.xlu0 %v17120_v7, %s8864_s19  ;;  %v8393_v16 = vmax.f32 %v8329_v38, 0.0  ;;  %v6966_v30 = vsel %vm6917_vm15, %v6901_v2, %v5795_v29  ;;  %v7610_v24 = vmul.f32 %v13013_v6, %v7450_v62  ;;  %v17127_v38 = vld [vmem:[#allocation64_spill] sm:$0xff]  ;;  %vm17137_vm12 = vmmov %vm17129_vm10 }
 0x4ec   :  { %v7031_v10 = vsel %vm6982_vm6, %v6966_v30, %v6051_v27  ;;  %v8004_v11 = vpop.f32.mrf.mxu2  ;;  %v6950_v27 = vsel %vm6917_vm15, %v6885_v20, %v13417_v54  ;;  %v8787_v54 = vld [vmem:[%s15129_s0 + $0x8] sm:$0xff] }
 0x4ed   :  { %v6563_v0 = vpop.permute.xlu0 %6562  ;;  %8457 = vst.msk [vmem:[%s15138_s10] sm:$0xff] %vm17125_vm3, %v8393_v16  ;;  %v7678_v13 = vadd.f32 %v13023_v32, %v7610_v24  ;;  %v7096_v43 = vsel %vm7047_vm13, %v7031_v10, %v13464_v57  ;;  %v8198_v35 = vmul.f32 %v13513_v25, %v8004_v11  ;;  %5774 = vrot.lane.b32.xlu2 %v17055_v21, %s8863_s3  ;;  %v17128_v21 = vsel %vm17090_vm1, %v17127_v38, 0.0  ;;  %vm17134_vm1 = vmmov %vm17126_vm7  ;;  %v17136_v20 = vld [vmem:[#allocation307_spill] sm:$0xff] }
 0x4ee   :  { %v7161_v5 = vsel %vm7112_vm11, %v7096_v43, %v6563_v0  ;;  %v7015_v31 = vsel %vm6982_vm6, %v6950_v27, %v13489_v51  ;;  %v17130_v51 = vld [vmem:[#allocation19_spill] sm:$0xff]  ;;  %v8745_v24 = vunpack.i.h.bf16 %v17100_v22  ;;  %v8788_v43 = vld [vmem:[%s15129_s0 + $0x10] sm:$0xff]  ;;  %vm17138_vm3 = vmmov %vm17129_vm10 }
 0x4ef   :  { %v8266_v50 = vadd.f32 %v13526_v44, %v8198_v35  ;;  %8638 = vmatmul.msk.f32.vlgmr.msrb.gmra.mxu3 %vm17126_vm7, %v7161_v5  ;;  %v13591_v56 = vpop.permute.xlu2 %6564  ;;  %v7742_v57 = vmax.f32 %v7678_v13, 0.0  ;;  %vm17131_vm14 = vnez %v17130_v51  ;;  %v7080_v12 = vsel %vm7047_vm13, %v7015_v31, %v13441_v58  ;;  %v17139_v27 = vld [vmem:[#allocation94_spill] sm:$0xff] }
 0x4f0   :  { %6572 = vrot.lane.b32.xlu1 %v17128_v21, %s8865_s23  ;;  %v17133_v2 = vsel %vm17131_vm14, %v17132_v39, 0.0  ;;  %v8755_v13 = vunpack.i.h.bf16 %v17106_v19  ;;  %v6692_v22 = vsel %vm17137_vm12, 0.0, %v8745_v24  ;;  %vm17140_vm7 = vcmask 64512   ;;  %vm17150_vm12 = vmmov %vm17138_vm3 }
 0x4f1   :  { %v8330_v15 = vadd.f32 %v8787_v54, %v8266_v50  ;;  %8673 = vmatmul.msk.f32.gmra.mxu2 %vm17129_vm10, %v7742_v57  ;;  %v17141_v54 = vld [vmem:[#allocation387_spill] sm:$0xff]  ;;  %vm17142_vm10 = vcmask 97280  }
 0x4f2   :  { %v6531_v7 = vpop.permute.xlu1 %6530  ;;  %v7453_v29 = vpop.f32.mrf.mxu1  ;;  %v6757_v57 = vsel %vm17140_vm7, %v6692_v22, %v8755_v13  ;;  %v17151_v22 = vld [vmem:[#allocation431_spill] sm:$0xff] }
 0x4f3   :  { %6062 = vrot.lane.b32.xlu0 %v17133_v2, %s8864_s19  ;;  %v8394_v62 = vmax.f32 %v8330_v15, 0.0  ;;  %v7145_v33 = vsel %vm7112_vm11, %v7080_v12, %v6531_v7  ;;  %v7611_v49 = vmul.f32 %v13013_v6, %v7453_v29  ;;  %v6822_v15 = vsel %vm17142_vm10, %v6757_v57, %v17141_v54  ;;  %v17144_v12 = vld [vmem:[#allocation54_spill] sm:$0xff] }
 0x4f4   :  { %8622 = vmatmul.msk.f32.gmra.mxu1 %vm17134_vm1, %v7145_v33  ;;  %v8007_v30 = vpop.f32.mrf.mxu2  ;;  %vm17143_vm1 = vmmov %vm17135_vm5  ;;  %v17145_v29 = vld [vmem:[#allocation30_spill] sm:$0xff] }
 0x4f5   :  { %v5797_v16 = vpop.permute.xlu0 %5796  ;;  %8458 = vst.msk [vmem:[%s15138_s10 + $0x8] sm:$0xff] %vm17135_vm5, %v8394_v62  ;;  %v7679_v8 = vadd.f32 %v13023_v32, %v7611_v49  ;;  %v8199_v58 = vmul.f32 %v13513_v25, %v8007_v30  ;;  %6286 = vrot.lane.b32.xlu2 %v17136_v20, %s8866_s25  ;;  %vm17146_vm5 = vmmov %vm17143_vm1  ;;  %v17149_v20 = vld [vmem:[#allocation379_spill] sm:$0xff] }
 0x4f6   :  { %v6886_v62 = vsel %vm17146_vm5, %v6822_v15, %v17145_v29 }
 0x4f7   :  { %v8267_v10 = vadd.f32 %v13526_v44, %v8199_v58  ;;  %v13622_v0 = vpop.permute.xlu2 %5798  ;;  %v7743_v11 = vmax.f32 %v7679_v8, 0.0  ;;  %v17147_v8 = vld [vmem:[#allocation341_spill] sm:$0xff]  ;;  %v17148_v58 = vld [vmem:[#allocation418_spill] sm:$0xff] }
 0x4f8   :  { %5806 = vrot.lane.b32.xlu1 %v17072_v1, %s8863_s3 }
 0x4f9   :  { %v8331_v35 = vadd.f32 %v8788_v43, %v8267_v10  ;;  %8674 = vmatmul.msk.f32.gmra.mxu2 %vm17138_vm3, %v7743_v11  ;;  %v6708_v10 = vsel %vm17150_vm12, %v17149_v20, %v17148_v58  ;;  %v8789_v11 = vld [vmem:[%s15129_s0 + $0x18] sm:$0xff]  ;;  %vm17158_vm12 = vcmask 293888  }
 0x4fa   :  { %v5765_v5 = vpop.permute.xlu1 %5764  ;;  %v7456_v31 = vpop.f32.mrf.mxu1  ;;  %v6773_v43 = vsel %vm17140_vm7, %v6708_v10, %v17151_v22  ;;  %v8790_v22 = vld [vmem:[%s15129_s0 + $0x20] sm:$0xff] }
 0x4fb   :  { %6574 = vrot.lane.b32.xlu0 %v17139_v27, %s8865_s23  ;;  %v8395_v50 = vmax.f32 %v8331_v35, 0.0  ;;  %v7612_v19 = vmul.f32 %v13013_v6, %v7456_v31  ;;  %v6951_v33 = vsel %vm6917_vm15, %v6886_v62, %v5765_v5  ;;  %v17152_v35 = vld [vmem:[#allocation56_spill] sm:$0xff] }
 0x4fc   :  { %v8010_v21 = vpop.f32.mrf.mxu2  ;;  %vm17153_vm10 = vnez %v17152_v35  ;;  %v17157_v62 = vld [vmem:[#allocation348_spill] sm:$0xff]  ;;  %v17188_v35 = vld [vmem:[#allocation421_spill] sm:$0xff] }
 0x4fd   :  { %v6533_v1 = vpop.permute.xlu0 %6532  ;;  %8459 = vst.msk [vmem:[%s15138_s10 + $0x10] sm:$0xff] %vm17143_vm1, %v8395_v50  ;;  %v7680_v2 = vadd.f32 %v13023_v32, %v7612_v19  ;;  %v8200_v7 = vmul.f32 %v13513_v25, %v8010_v21  ;;  %6318 = vrot.lane.b32.xlu2 %v17144_v12, %s8866_s25  ;;  %v17154_v5 = vsel %vm17153_vm10, %v17127_v38, 0.0  ;;  %v7016_v50 = vsel %vm6982_vm6, %v6951_v33, %v13501_v52  ;;  %v17155_v12 = vld [vmem:[#allocation424_spill] sm:$0xff]  ;;  %v17159_v33 = vld [vmem:[#allocation165_spill] sm:$0xff] }
 0x4fe   :  { %vm17156_vm1 = vcmask 97280  }
 0x4ff   :  { %v8268_v49 = vadd.f32 %v13526_v44, %v8200_v7  ;;  %v13650_v30 = vpop.permute.xlu2 %6534  ;;  %v7744_v24 = vmax.f32 %v7680_v2, 0.0  ;;  %v6838_v29 = vsel %vm17156_vm1, %v6773_v43, %v17155_v12  ;;  %vm17164_vm1 = vcmask 31744  }
 0x500   :  { %6542 = vrot.lane.b32.xlu1 %v17147_v8, %s8865_s23 }
 0x501   :  { %v8332_v13 = vadd.f32 %v8789_v11, %v8268_v49  ;;  %8675 = vmatmul.msk.f32.gmra.mxu2 %vm17138_vm3, %v7744_v24  ;;  %vm17160_vm3 = vmmov %vm17146_vm5  ;;  %v17161_v11 = vld [vmem:[#allocation314_spill] sm:$0xff] }
 0x502   :  { %v6277_v31 = vpop.permute.xlu1 %6276  ;;  %v7459_v19 = vpop.f32.mrf.mxu1  ;;  %vm17162_vm7 = vnez %v17161_v11  ;;  %v17175_v11 = vld [vmem:[#allocation372_spill] sm:$0xff] }
 0x503   :  { %5808 = vrot.lane.b32.xlu0 %v17154_v5, %s8863_s3  ;;  %v8396_v57 = vmax.f32 %v8332_v13, 0.0  ;;  %v7081_v21 = vsel %vm7047_vm13, %v7016_v50, %v6277_v31  ;;  %v7613_v54 = vmul.f32 %v13013_v6, %v7459_v19  ;;  %v17163_v13 = vsel %vm17162_vm7, %v17104_v47, 0.0 }
 0x504   :  { %v8013_v2 = vpop.f32.mrf.mxu2  ;;  %v7146_v7 = vsel %vm7112_vm11, %v7081_v21, %v6533_v1  ;;  %v6902_v1 = vsel %vm17160_vm3, %v6838_v29, %v17159_v33  ;;  %v17171_v33 = vld [vmem:[#allocation382_spill] sm:$0xff] }
 0x505   :  { %v5767_v15 = vpop.permute.xlu0 %5766  ;;  %8460 = vst.msk [vmem:[%s15138_s10 + $0x18] sm:$0xff] %vm17146_vm5, %v8396_v57  ;;  %v7681_v52 = vadd.f32 %v13023_v32, %v7613_v54  ;;  %v8201_v38 = vmul.f32 %v13513_v25, %v8013_v2  ;;  %6032 = vrot.lane.b32.xlu2 %v17157_v62, %s8864_s19  ;;  %8623 = vmatmul.msk.f32.gmra.mxu1 %vm17158_vm12, %v7146_v7  ;;  %v17167_v54 = vld [vmem:[#allocation366_spill] sm:$0xff]  ;;  %v17168_v2 = vld [vmem:[#allocation256_spill] sm:$0xff]  ;;  %vm17170_vm5 = vmmov %vm17164_vm1  ;;  %vm17172_vm12 = vcmask 64512  }
 0x506   :  { %v6967_v49 = vsel %vm6917_vm15, %v6902_v1, %v5797_v16  ;;  %v17165_v16 = vld [vmem:[#allocation328_spill] sm:$0xff]  ;;  %v17169_v7 = vsel %vm16998_vm9, %v17168_v2, 0.0  ;;  %vm17174_vm9 = vcmask 293888  }
 0x507   :  { %v8269_v24 = vadd.f32 %v13526_v44, %v8201_v38  ;;  %v13688_v58 = vpop.permute.xlu2 %5768  ;;  %v7745_v10 = vmax.f32 %v7681_v52, 0.0  ;;  %v17166_v5 = vsel %vm17162_vm7, %v17165_v16, 0.0  ;;  %v7032_v50 = vsel %vm6982_vm6, %v6967_v49, %v13546_v45  ;;  %v17173_v49 = vld [vmem:[#allocation104_spill] sm:$0xff] }
 0x508   :  { %5776 = vrot.lane.b32.xlu1 %v17163_v13, %s8863_s3  ;;  %v6693_v12 = vsel %vm17170_vm5, %v17169_v7, %v17167_v54  ;;  %vm17176_vm7 = vcmask 97280  }
 0x509   :  { %v8333_v43 = vadd.f32 %v8790_v22, %v8269_v24  ;;  %8676 = vmatmul.msk.f32.gmra.mxu2 %vm17164_vm1, %v7745_v10  ;;  %v6758_v45 = vsel %vm17172_vm12, %v6693_v12, %v17171_v33  ;;  %v17177_v22 = vld [vmem:[#allocation321_spill] sm:$0xff]  ;;  %vm17179_vm1 = vmmov %vm17160_vm3 }
 0x50a   :  { %v6309_v31 = vpop.permute.xlu1 %6308  ;;  %v7462_v19 = vpop.f32.mrf.mxu1  ;;  %v6823_v13 = vsel %vm17176_vm7, %v6758_v45, %v17175_v11  ;;  %vm17181_vm12 = vmmov %vm17179_vm1 }
 0x50b   :  { %6544 = vrot.lane.b32.xlu0 %v17166_v5, %s8865_s23  ;;  %v8397_v47 = vmax.f32 %v8333_v43, 0.0  ;;  %v7097_v57 = vsel %vm7047_vm13, %v7032_v50, %v6309_v31  ;;  %v7614_v21 = vmul.f32 %v13013_v6, %v7462_v19  ;;  %v17178_v43 = vld [vmem:[#allocation71_spill] sm:$0xff] }
 0x50c   :  { %v8016_v52 = vpop.f32.mrf.mxu2  ;;  %v7162_v38 = vsel %vm7112_vm11, %v7097_v57, %v13591_v56  ;;  %v6887_v5 = vsel %vm17179_vm1, %v6823_v13, %v17178_v43  ;;  %v8791_v31 = vld [vmem:[%s15129_s0 + $0x28] sm:$0xff] }
 0x50d   :  { %v6279_v29 = vpop.permute.xlu0 %6278  ;;  %8461 = vst.msk [vmem:[%s15138_s10 + $0x20] sm:$0xff] %vm17160_vm3, %v8397_v47  ;;  %v7682_v1 = vadd.f32 %v13023_v32, %v7614_v21  ;;  %v8202_v26 = vmul.f32 %v13513_v25, %v8016_v52  ;;  %6064 = vrot.lane.b32.xlu2 %v17173_v49, %s8864_s19  ;;  %8639 = vmatmul.msk.f32.gmra.mxu3 %vm17174_vm9, %v7162_v38  ;;  %v17180_v38 = vld [vmem:[#allocation368_spill] sm:$0xff]  ;;  %vm17186_vm3 = vmmov %vm17174_vm9  ;;  %vm17189_vm9 = vcmask 64512  }
 0x50e   :  { %v6952_v19 = vsel %vm6917_vm15, %v6887_v5, %v5767_v15  ;;  %v2931_v33 = vsel %vm17010_vm8, %v17180_v38, 0.0  ;;  %vm17185_vm8 = vmmov %vm17170_vm5 }
 0x50f   :  { %v8270_v24 = vadd.f32 %v13526_v44, %v8202_v26  ;;  %v13728_v56 = vpop.permute.xlu2 %6280  ;;  %v7746_v10 = vmax.f32 %v7682_v1, 0.0  ;;  %v6709_v1 = vsel %vm17185_vm8, %v2931_v33, %v17184_v63 }
 0x510   :  { %6288 = vrot.lane.b32.xlu1 %v17177_v22, %s8866_s25  ;;  %v6774_v11 = vsel %vm17189_vm9, %v6709_v1, %v17188_v35  ;;  %v17191_v22 = vld [vmem:[#allocation320_spill] sm:$0xff]  ;;  %v17199_v35 = vld [vmem:[#allocation69_spill] sm:$0xff]  ;;  %vm17203_vm9 = vcmask 293888  }
 0x511   :  { %v8334_v50 = vadd.f32 %v8791_v31, %v8270_v24  ;;  %8677 = vmatmul.msk.f32.gmra.mxu2 %vm17170_vm5, %v7746_v10  ;;  %v17187_v10 = vld [vmem:[#allocation68_spill] sm:$0xff] }
 0x512   :  { %v6023_v47 = vpop.permute.xlu1 %6022  ;;  %v7465_v57 = vpop.f32.mrf.mxu1 }
 0x513   :  { %5778 = vrot.lane.b32.xlu0 %v17147_v8, %s8863_s3  ;;  %v8398_v21 = vmax.f32 %v8334_v50, 0.0  ;;  %v7017_v54 = vsel %vm6982_vm6, %v6952_v19, %v6023_v47  ;;  %v7615_v2 = vmul.f32 %v13013_v6, %v7465_v57  ;;  %v17182_v6 = vld [vmem:[#allocation77_spill] sm:$0xff]  ;;  %v13783_v47 = vld [vmem:[%s15133_s5] ss:$0 sm:$0xff] }
 0x514   :  { %v7082_v7 = vsel %vm7047_vm13, %v7017_v54, %v6279_v29  ;;  %v8019_v52 = vpop.f32.mrf.mxu2  ;;  %v17183_v29 = vsel %vm17153_vm10, %v17182_v6, 0.0  ;;  %vm17190_vm10 = vmmov %vm17170_vm5  ;;  %v17192_v50 = vld [vmem:[#allocation101_spill] sm:$0xff] }
 0x515   :  { %v6311_v12 = vpop.permute.xlu0 %6310  ;;  %8462 = vst.msk [vmem:[%s15138_s10 + $0x28] sm:$0xff] %vm17181_vm12, %v8398_v21  ;;  %v7683_v8 = vadd.f32 %v13023_v32, %v7615_v2  ;;  %v8203_v15 = vmul.f32 %v13513_v25, %v8019_v52  ;;  %6576 = vrot.lane.b32.xlu2 %v17183_v29, %s8865_s23  ;;  %v7147_v45 = vsel %vm7112_vm11, %v7082_v7, %v13650_v30  ;;  %v8792_v30 = vld [vmem:[%s15129_s0 + $0x30] sm:$0xff]  ;;  %v17193_v2 = vld [vmem:[#allocation178_spill] sm:$0xff]  ;;  %vm17194_vm5 = vmmov %vm17179_vm1 }
 0x516   :  { %8624 = vmatmul.msk.f32.gmra.mxu1 %vm17186_vm3, %v7147_v45  ;;  %v6839_v19 = vsel %vm17176_vm7, %v6774_v11, %v17192_v50  ;;  %vm17202_vm3 = vmmov %vm17185_vm8  ;;  %vm17207_vm7 = vcmask 64512  }
 0x517   :  { %v8271_v26 = vadd.f32 %v13526_v44, %v8203_v15  ;;  %v13766_v24 = vpop.permute.xlu2 %6312  ;;  %v7747_v32 = vmax.f32 %v7683_v8, 0.0  ;;  %v6903_v7 = vsel %vm17179_vm1, %v6839_v19, %v17193_v2  ;;  %v13800_v8 = vld [vmem:[%s15134_s6] ss:$0 sm:$0xff] }
 0x518   :  { %6320 = vrot.lane.b32.xlu1 %v17187_v10, %s8866_s25  ;;  %v6968_v33 = vsel %vm6917_vm15, %v6903_v7, %v13622_v0  ;;  %v8795_v0 = vld [vmem:[%s15129_s0 + $0x38] sm:$0xff] }
 0x519   :  { %v8335_v13 = vadd.f32 %v8792_v30, %v8271_v26  ;;  %8678 = vmatmul.msk.f32.gmra.mxu2 %vm17190_vm10, %v7747_v32  ;;  %v17195_v26 = vld [vmem:[#allocation296_spill] sm:$0xff]  ;;  %vm17204_vm10 = vmmov %vm17179_vm1 }
 0x51a   :  { %v6055_v43 = vpop.permute.xlu1 %6054  ;;  %vm17196_vm12 = vnez %v17195_v26  ;;  %vm17210_vm1 = vmmov %vm17202_vm3  ;;  %v14300_v26 = vld [vmem:[%s15136_s8] ss:$0 sm:$0xff] }
 0x51b   :  { %6290 = vrot.lane.b32.xlu0 %v17191_v22, %s8866_s25  ;;  %v8399_v5 = vmax.f32 %v8335_v13, 0.0  ;;  %v7468_v31 = vpop.f32.mrf.mxu1  ;;  %v7033_v29 = vsel %vm6982_vm6, %v6968_v33, %v6055_v43  ;;  %v17200_v13 = vld [vmem:[#allocation83_spill] sm:$0xff]  ;;  %v17201_v22 = vld [vmem:[#allocation389_spill] sm:$0xff]  ;;  %v17208_v33 = vld [vmem:[#allocation380_spill] sm:$0xff] }
 0x51c   :  { %v7616_v57 = vmul.f32 %v13783_v47, %v7468_v31  ;;  %v8022_v54 = vpop.f32.mrf.mxu2  ;;  %v7098_v30 = vsel %vm7047_vm13, %v7033_v29, %v6311_v12  ;;  %v6710_v43 = vsel %vm17202_vm3, %v17201_v22, %v17200_v13  ;;  %v17205_v12 = vld [vmem:[#allocation356_spill] sm:$0xff]  ;;  %v17217_v13 = vld [vmem:[#allocation163_spill] sm:$0xff]  ;;  %vm17218_vm3 = vmmov %vm17204_vm10 }
 0x51d   :  { %v6025_v21 = vpop.permute.xlu0 %6024  ;;  %8463 = vst.msk [vmem:[%s15138_s10 + $0x30] sm:$0xff] %vm17194_vm5, %v8399_v5  ;;  %v8204_v52 = vmul.f32 %v13513_v25, %v8022_v54  ;;  %5810 = vrot.lane.b32.xlu2 %v17139_v27, %s8863_s3  ;;  %v17197_v27 = vld [vmem:[#allocation325_spill] sm:$0xff]  ;;  %v17206_v54 = vld [vmem:[#allocation91_spill] sm:$0xff] }
 0x51e   :  { %v7684_v15 = vadd.f32 %v13800_v8, %v7616_v57  ;;  %v17198_v32 = vsel %vm17196_vm12, %v17197_v27, 0.0  ;;  %v6775_v2 = vsel %vm17207_vm7, %v6710_v43, %v17206_v54 }
 0x51f   :  { %v8272_v45 = vadd.f32 %v13526_v44, %v8204_v52  ;;  %v13805_v63 = vpop.permute.xlu2 %6026 }
 0x520   :  { %v7748_v1 = vmax.f32 %v7684_v15, 0.0  ;;  %6034 = vrot.lane.b32.xlu1 %v17198_v32, %s8864_s19  ;;  %v17209_v15 = vld [vmem:[#allocation305_spill] sm:$0xff] }
 0x521   :  { %v8336_v10 = vadd.f32 %v8795_v0, %v8272_v45  ;;  %v6694_v29 = vsel %vm17210_vm1, %v17209_v15, %v17208_v33  ;;  %v17211_v45 = vld [vmem:[#allocation43_spill] sm:$0xff]  ;;  %v17215_v0 = vld [vmem:[#allocation116_spill] sm:$0xff]  ;;  %vm17226_vm1 = vmmov %vm17218_vm3 }
 0x522   :  { %v6567_v11 = vpop.permute.xlu1 %6566  ;;  %8679 = vmatmul.msk.f32.gmra.mxu2 %vm17185_vm8, %v7748_v1  ;;  %vm17212_vm5 = vnez %v17211_v45  ;;  %v17213_v1 = vld [vmem:[#allocation78_spill] sm:$0xff]  ;;  %vm17216_vm8 = vcmask 97280   ;;  %v17222_v15 = vld [vmem:[#allocation388_spill] sm:$0xff] }
 0x523   :  { %6322 = vrot.lane.b32.xlu0 %v17199_v35, %s8866_s25  ;;  %v8400_v5 = vmax.f32 %v8336_v10, 0.0  ;;  %v7163_v31 = vsel %vm7112_vm11, %v7098_v30, %v6567_v11  ;;  %v17214_v32 = vsel %vm17212_vm5, %v17213_v1, 0.0  ;;  %v6840_v10 = vsel %vm17216_vm8, %v6775_v2, %v17215_v0  ;;  %v8796_v35 = vld [vmem:[%s15129_s0 + $0x40] sm:$0xff] }
 0x524   :  { %8640 = vmatmul.msk.f32.gmra.mxu3 %vm17203_vm9, %v7163_v31  ;;  %v8025_v19 = vpop.f32.mrf.mxu2  ;;  %v6904_v43 = vsel %vm17218_vm3, %v6840_v10, %v17217_v13  ;;  %v17219_v31 = vld [vmem:[#allocation365_spill] sm:$0xff]  ;;  %vm17221_vm9 = vmmov %vm17207_vm7  ;;  %v17387_v45 = vld [vmem:[#allocation138_spill] sm:$0xff] }
 0x525   :  { %v6057_v50 = vpop.permute.xlu0 %6056  ;;  %8464 = vst.msk [vmem:[%s15138_s10 + $0x38] sm:$0xff] %vm17204_vm10, %v8400_v5  ;;  %v8205_v57 = vmul.f32 %v13513_v25, %v8025_v19  ;;  %6546 = vrot.lane.b32.xlu2 %v17205_v12, %s8865_s23  ;;  %vm17223_vm10 = vmmov %vm17216_vm8 }
 0x526   :  { %vm17225_vm7 = vmmov %vm17218_vm3  ;;  %vm17230_vm3 = vcmask 293888  }
 0x527   :  { %v8273_v7 = vadd.f32 %v13526_v44, %v8205_v57  ;;  %v13834_v52 = vpop.permute.xlu2 %6058  ;;  %v17220_v57 = vld [vmem:[#allocation370_spill] sm:$0xff] }
 0x528   :  { %6066 = vrot.lane.b32.xlu1 %v17214_v32, %s8864_s19  ;;  %v6759_v54 = vsel %vm17221_vm9, %v6694_v29, %v17220_v57  ;;  %vm17232_vm9 = vcmask 31744  }
 0x529   :  { %v8337_v11 = vadd.f32 %v8796_v35, %v8273_v7  ;;  %v7471_v30 = vpop.f32.mrf.mxu1  ;;  %v6824_v32 = vsel %vm17223_vm10, %v6759_v54, %v17222_v15  ;;  %v17233_v15 = vld [vmem:[#allocation120_spill] sm:$0xff]  ;;  %vm17234_vm10 = vmmov %vm17230_vm3 }
 0x52a   :  { %v7617_v5 = vmul.f32 %v13783_v47, %v7471_v30  ;;  %v5801_v19 = vpop.permute.xlu1 %5800  ;;  %v17224_v30 = vld [vmem:[#allocation96_spill] sm:$0xff] }
 0x52b   :  { %6036 = vrot.lane.b32.xlu0 %v17219_v31, %s8864_s19  ;;  %v8401_v33 = vmax.f32 %v8337_v11, 0.0  ;;  %v6969_v2 = vsel %vm6917_vm15, %v6904_v43, %v5801_v19  ;;  %v6888_v13 = vsel %vm17225_vm7, %v6824_v32, %v17224_v30  ;;  %v17227_v11 = vld [vmem:[#allocation329_spill] sm:$0xff]  ;;  %vm17235_vm7 = vmmov %vm17226_vm1 }
 0x52c   :  { %v7685_v7 = vadd.f32 %v13800_v8, %v7617_v5  ;;  %v7034_v0 = vsel %vm6982_vm6, %v6969_v2, %v6057_v50  ;;  %v8028_v35 = vpop.f32.mrf.mxu2  ;;  %vm17228_vm8 = vnez %v17227_v11  ;;  %v6953_v5 = vsel %vm6917_vm15, %v6888_v13, %v13688_v58  ;;  %v8797_v58 = vld [vmem:[%s15129_s0 + $0x48] sm:$0xff] }
 0x52d   :  { %v6569_v10 = vpop.permute.xlu0 %6568  ;;  %8465 = vst.msk [vmem:[%s15138_s10 + $0x40] sm:$0xff] %vm17226_vm1, %v8401_v33  ;;  %v8206_v29 = vmul.f32 %v13513_v25, %v8028_v35  ;;  %v17229_v43 = vsel %vm17228_vm8, %v17165_v16, 0.0  ;;  %v7099_v50 = vsel %vm7047_vm13, %v7034_v0, %v13766_v24  ;;  %v7018_v54 = vsel %vm6982_vm6, %v6953_v5, %v6025_v21  ;;  %v17231_v16 = vld [vmem:[#allocation115_spill] sm:$0xff] }
 0x52e   :  { %5780 = vrot.lane.b32.xlu2 %v17229_v43, %s8863_s3  ;;  %v7749_v19 = vmax.f32 %v7685_v7, 0.0  ;;  %v7164_v57 = vsel %vm7112_vm11, %v7099_v50, %v6569_v10  ;;  %v7083_v32 = vsel %vm7047_vm13, %v7018_v54, %v13728_v56  ;;  %v17236_v56 = vld [vmem:[#allocation333_spill] sm:$0xff] }
 0x52f   :  { %v8274_v33 = vadd.f32 %v13526_v44, %v8206_v29  ;;  %v13880_v2 = vpop.permute.xlu2 %6570  ;;  %8641 = vmatmul.msk.f32.gmra.mxu3 %vm17230_vm3, %v7164_v57  ;;  %v17237_v57 = vld [vmem:[#allocation81_spill] sm:$0xff]  ;;  %vm17241_vm3 = vmmov %vm17232_vm9 }
 0x530   :  { %6578 = vrot.lane.b32.xlu1 %v17231_v16, %s8865_s23  ;;  %8680 = vmatmul.msk.f32.gmra.mxu2 %vm17232_vm9, %v7749_v19  ;;  %vm17238_vm1 = vnez %v17237_v57  ;;  %vm17242_vm9 = vmmov %vm17241_vm3  ;;  %v17248_v57 = vld [vmem:[#allocation95_spill] sm:$0xff] }
 0x531   :  { %v8338_v24 = vadd.f32 %v8797_v58, %v8274_v33  ;;  %v3899_v54 = vsel %vm17238_vm1, %v17182_v6, 0.0  ;;  %v17239_v33 = vld [vmem:[#allocation392_spill] sm:$0xff]  ;;  %v17240_v58 = vsel %vm17051_vm4, %v16918_v14, 0.0  ;;  %vm17245_vm4 = vcmask 64512  }
 0x532   :  { %v6537_v21 = vpop.permute.xlu1 %6536  ;;  %v7474_v7 = vpop.f32.mrf.mxu1 }
 0x533   :  { %6068 = vrot.lane.b32.xlu0 %v17233_v15, %s8864_s19  ;;  %v8402_v0 = vmax.f32 %v8338_v24, 0.0  ;;  %v7148_v10 = vsel %vm7112_vm11, %v7083_v32, %v6537_v21  ;;  %v7618_v35 = vmul.f32 %v13783_v47, %v7474_v7  ;;  %v6695_v24 = vsel %vm17241_vm3, %v17240_v58, %v17239_v33  ;;  %v8798_v21 = vld [vmem:[%s15129_s0 + $0x50] sm:$0xff]  ;;  %v17243_v7 = vld [vmem:[#allocation131_spill] sm:$0xff] }
 0x534   :  { %8625 = vmatmul.msk.f32.gmra.mxu1 %vm17234_vm10, %v7148_v10  ;;  %v8031_v13 = vpop.f32.mrf.mxu2  ;;  %v4603_v6 = vsel %vm17238_vm1, %v17243_v7, 0.0  ;;  %vm17247_vm10 = vcmask 97280   ;;  %vm17250_vm1 = vmmov %vm17235_vm7 }
 0x535   :  { %v5803_v30 = vpop.permute.xlu0 %5802  ;;  %8466 = vst.msk [vmem:[%s15138_s10 + $0x48] sm:$0xff] %vm17235_vm7, %v8402_v0  ;;  %v7686_v29 = vadd.f32 %v13800_v8, %v7618_v35  ;;  %v8207_v43 = vmul.f32 %v13513_v25, %v8031_v13  ;;  %v17244_v35 = vld [vmem:[#allocation383_spill] sm:$0xff] }
 0x536   :  { %6292 = vrot.lane.b32.xlu2 %v17236_v56, %s8866_s25  ;;  %v6760_v14 = vsel %vm17245_vm4, %v6695_v24, %v17244_v35  ;;  %v17246_v56 = vld [vmem:[#allocation398_spill] sm:$0xff]  ;;  %v17253_v35 = vld [vmem:[#allocation75_spill] sm:$0xff] }
 0x537   :  { %v7750_v50 = vmax.f32 %v7686_v29, 0.0  ;;  %v8275_v5 = vadd.f32 %v13526_v44, %v8207_v43  ;;  %v13905_v19 = vpop.permute.xlu2 %5804 }
 0x538   :  { %5812 = vrot.lane.b32.xlu1 %v3899_v54, %s8863_s3  ;;  %v17249_v54 = vld [vmem:[#allocation67_spill] sm:$0xff] }
 0x539   :  { %v8339_v32 = vadd.f32 %v8798_v21, %v8275_v5  ;;  %8681 = vmatmul.msk.f32.gmra.mxu2 %vm17242_vm9, %v7750_v50  ;;  %v6825_v5 = vsel %vm17247_vm10, %v6760_v14, %v17246_v56  ;;  %v17254_v14 = vsel %vm17059_vm2, %v16928_v40, 0.0  ;;  %v17255_v56 = vld [vmem:[#allocation112_spill] sm:$0xff]  ;;  %vm17256_vm9 = vmmov %vm17245_vm4 }
 0x53a   :  { %v5771_v0 = vpop.permute.xlu1 %5770  ;;  %v6889_v33 = vsel %vm17250_vm1, %v6825_v5, %v17249_v54  ;;  %vm17259_vm2 = vmmov %vm17247_vm10 }
 0x53b   :  { %6580 = vrot.lane.b32.xlu0 %v4603_v6, %s8865_s23  ;;  %v8403_v10 = vmax.f32 %v8339_v32, 0.0  ;;  %v7477_v36 = vpop.f32.mrf.mxu1  ;;  %v6954_v24 = vsel %vm6917_vm15, %v6889_v33, %v5771_v0  ;;  %v8799_v0 = vld [vmem:[%s15129_s0 + $0x58] sm:$0xff]  ;;  %vm17260_vm4 = vmmov %vm17250_vm1 }
 0x53c   :  { %v7619_v13 = vmul.f32 %v13783_v47, %v7477_v36  ;;  %v8034_v43 = vpop.f32.mrf.mxu2 }
 0x53d   :  { %v6539_v29 = vpop.permute.xlu0 %6538  ;;  %8467 = vst.msk [vmem:[%s15138_s10 + $0x50] sm:$0xff] %vm17235_vm7, %v8403_v10  ;;  %v8208_v50 = vmul.f32 %v13513_v25, %v8034_v43  ;;  %v17251_v10 = vld [vmem:[#allocation343_spill] sm:$0xff]  ;;  %vm17265_vm7 = vcmask 293888  }
 0x53e   :  { %6324 = vrot.lane.b32.xlu2 %v17248_v57, %s8866_s25  ;;  %v7687_v58 = vadd.f32 %v13800_v8, %v7619_v13  ;;  %v17252_v36 = vsel %vm17228_vm8, %v17251_v10, 0.0  ;;  %v6711_v13 = vsel %vm17241_vm3, %v17254_v14, %v17253_v35  ;;  %vm17257_vm8 = vmmov %vm17241_vm3 }
 0x53f   :  { %v8276_v21 = vadd.f32 %v13526_v44, %v8208_v50  ;;  %v13942_v32 = vpop.permute.xlu2 %6540  ;;  %v6776_v5 = vsel %vm17256_vm9, %v6711_v13, %v17255_v56  ;;  %v7019_v50 = vsel %vm6982_vm6, %v6954_v24, %v13805_v63  ;;  %v17261_v63 = vld [vmem:[#allocation312_spill] sm:$0xff]  ;;  %v17263_v24 = vld [vmem:[#allocation337_spill] sm:$0xff] }
 0x540   :  { %v7751_v6 = vmax.f32 %v7687_v58, 0.0  ;;  %6548 = vrot.lane.b32.xlu1 %v17252_v36, %s8865_s23  ;;  %v17258_v58 = vld [vmem:[#allocation110_spill] sm:$0xff]  ;;  %vm17262_vm10 = vnez %v17261_v63  ;;  %v17266_v36 = vld [vmem:[#allocation191_spill] sm:$0xff] }
 0x541   :  { %v8340_v43 = vadd.f32 %v8799_v0, %v8276_v21  ;;  %v6841_v21 = vsel %vm17259_vm2, %v6776_v5, %v17258_v58  ;;  %v8800_v0 = vld [vmem:[%s15129_s0 + $0x60] sm:$0xff] }
 0x542   :  { %v6283_v11 = vpop.permute.xlu1 %6282  ;;  %8682 = vmatmul.msk.f32.gmra.mxu2 %vm17257_vm8, %v7751_v6  ;;  %v17264_v6 = vsel %vm17262_vm10, %v17263_v24, 0.0  ;;  %vm17270_vm8 = vmmov %vm17250_vm1 }
 0x543   :  { %5814 = vrot.lane.b32.xlu0 %v17231_v16, %s8863_s3  ;;  %v8404_v40 = vmax.f32 %v8340_v43, 0.0  ;;  %v7084_v61 = vsel %vm7047_vm13, %v7019_v50, %v6283_v11  ;;  %v17267_v11 = vld [vmem:[#allocation373_spill] sm:$0xff] }
 0x544   :  { %v8037_v54 = vpop.f32.mrf.mxu2  ;;  %v7149_v33 = vsel %vm7112_vm11, %v7084_v61, %v6539_v29  ;;  %v6905_v29 = vsel %vm17250_vm1, %v6841_v21, %v17266_v36  ;;  %vm17279_vm1 = vmmov %vm17241_vm3 }
 0x545   :  { %v5773_v57 = vpop.permute.xlu0 %5772  ;;  %8468 = vst.msk [vmem:[%s15138_s10 + $0x58] sm:$0xff] %vm17260_vm4, %v8404_v40  ;;  %v8209_v16 = vmul.f32 %v13513_v25, %v8037_v54  ;;  %8626 = vmatmul.msk.f32.gmra.mxu1 %vm17265_vm7, %v7149_v33  ;;  %v6970_v35 = vsel %vm6917_vm15, %v6905_v29, %v5803_v30  ;;  %v17268_v54 = vld [vmem:[#allocation377_spill] sm:$0xff]  ;;  %v17271_v29 = vld [vmem:[#allocation59_spill] sm:$0xff]  ;;  %vm17275_vm4 = vmmov %vm17265_vm7  ;;  %vm17277_vm7 = vcmask 97280  }
 0x546   :  { %6038 = vrot.lane.b32.xlu2 %v17264_v6, %s8864_s19  ;;  %v7035_v30 = vsel %vm6982_vm6, %v6970_v35, %v13834_v52  ;;  %v17269_v6 = vld [vmem:[#allocation395_spill] sm:$0xff]  ;;  %vm17272_vm2 = vnez %v17271_v29 }
 0x547   :  { %v8277_v14 = vadd.f32 %v13526_v44, %v8209_v16  ;;  %v13984_v13 = vpop.permute.xlu2 %5774 }
 0x548   :  { %5782 = vrot.lane.b32.xlu1 %v17205_v12, %s8863_s3  ;;  %v6696_v12 = vsel %vm17241_vm3, %v16964_v53, %v17268_v54  ;;  %v17273_v53 = vld [vmem:[#allocation105_spill] sm:$0xff]  ;;  %vm17281_vm3 = vmmov %vm17270_vm8 }
 0x549   :  { %v8341_v43 = vadd.f32 %v8800_v0, %v8277_v14  ;;  %v7480_v56 = vpop.f32.mrf.mxu1  ;;  %v6761_v36 = vsel %vm17256_vm9, %v6696_v12, %v17269_v6  ;;  %v17274_v35 = vsel %vm17272_vm2, %v17273_v53, 0.0  ;;  %v17282_v12 = vld [vmem:[#allocation342_spill] sm:$0xff] }
 0x54a   :  { %v7620_v5 = vmul.f32 %v13783_v47, %v7480_v56  ;;  %v6315_v50 = vpop.permute.xlu1 %6314  ;;  %vm17283_vm9 = vnez %v17282_v12 }
 0x54b   :  { %6550 = vrot.lane.b32.xlu0 %v17267_v11, %s8865_s23  ;;  %v8405_v40 = vmax.f32 %v8341_v43, 0.0  ;;  %v7100_v61 = vsel %vm7047_vm13, %v7035_v30, %v6315_v50  ;;  %v17276_v43 = vld [vmem:[#allocation386_spill] sm:$0xff] }
 0x54c   :  { %v7688_v33 = vadd.f32 %v13800_v8, %v7620_v5  ;;  %v8040_v21 = vpop.f32.mrf.mxu2  ;;  %v7165_v16 = vsel %vm7112_vm11, %v7100_v61, %v13880_v2  ;;  %v6826_v56 = vsel %vm17277_vm7, %v6761_v36, %v17276_v43  ;;  %v17278_v5 = vld [vmem:[#allocation334_spill] sm:$0xff]  ;;  %vm17288_vm7 = vmmov %vm17279_vm1 }
 0x54d   :  { %v6285_v58 = vpop.permute.xlu0 %6284  ;;  %8469 = vst.msk [vmem:[%s15138_s10 + $0x60] sm:$0xff] %vm17270_vm8, %v8405_v40  ;;  %v8210_v52 = vmul.f32 %v13513_v25, %v8040_v21  ;;  %8642 = vmatmul.msk.f32.gmra.mxu3 %vm17275_vm4, %v7165_v16  ;;  %v17280_v50 = vld [vmem:[#allocation62_spill] sm:$0xff]  ;;  %v8801_v40 = vld [vmem:[%s15129_s0 + $0x68] sm:$0xff]  ;;  %vm17285_vm8 = vmmov %vm17281_vm3 }
 0x54e   :  { %6070 = vrot.lane.b32.xlu2 %v17274_v35, %s8864_s19  ;;  %v7752_v14 = vmax.f32 %v7688_v33, 0.0  ;;  %v6890_v30 = vsel %vm17281_vm3, %v6826_v56, %v17280_v50  ;;  %v17284_v33 = vsel %vm17283_vm9, %v17251_v10, 0.0  ;;  %vm17292_vm3 = vcmask 64512  }
 0x54f   :  { %v8278_v2 = vadd.f32 %v13526_v44, %v8210_v52  ;;  %v14017_v0 = vpop.permute.xlu2 %6286  ;;  %v6955_v54 = vsel %vm6917_vm15, %v6890_v30, %v5773_v57  ;;  %v17287_v30 = vld [vmem:[#allocation113_spill] sm:$0xff] }
 0x550   :  { %6294 = vrot.lane.b32.xlu1 %v17278_v5, %s8866_s25  ;;  %8683 = vmatmul.msk.f32.gmra.mxu2 %vm17279_vm1, %v7752_v14 }
 0x551   :  { %v8342_v61 = vadd.f32 %v8801_v40, %v8278_v2  ;;  %v17286_v2 = vld [vmem:[#allocation145_spill] sm:$0xff]  ;;  %v6712_v40 = vsel %vm17288_vm7, %v16972_v9, %v17287_v30  ;;  %vm17298_vm7 = vcmask 130048  }
 0x552   :  { %v6029_v21 = vpop.permute.xlu1 %6028  ;;  %v7483_v16 = vpop.f32.mrf.mxu1 }
 0x553   :  { %5784 = vrot.lane.b32.xlu0 %v17284_v33, %s8863_s3  ;;  %v8406_v6 = vmax.f32 %v8342_v61, 0.0  ;;  %v7020_v36 = vsel %vm6982_vm6, %v6955_v54, %v6029_v21  ;;  %v7621_v52 = vmul.f32 %v13783_v47, %v7483_v16  ;;  %v17289_v61 = vld [vmem:[#allocation97_spill] sm:$0xff]  ;;  %v8802_v54 = vld [vmem:[%s15129_s0 + $0x70] sm:$0xff]  ;;  %v17291_v16 = vld [vmem:[#allocation103_spill] sm:$0xff] }
 0x554   :  { %v7085_v35 = vsel %vm7047_vm13, %v7020_v36, %v6285_v58  ;;  %v8043_v43 = vpop.f32.mrf.mxu2 }
 0x555   :  { %v6317_v14 = vpop.permute.xlu0 %6316  ;;  %8470 = vst.msk [vmem:[%s15138_s10 + $0x68] sm:$0xff] %vm17285_vm8, %v8406_v6  ;;  %v7689_v57 = vadd.f32 %v13800_v8, %v7621_v52  ;;  %v8211_v10 = vmul.f32 %v13513_v25, %v8043_v43  ;;  %v7150_v56 = vsel %vm7112_vm11, %v7085_v35, %v13942_v32  ;;  %v17290_v32 = vld [vmem:[#allocation349_spill] sm:$0xff]  ;;  %v6777_v6 = vsel %vm17292_vm3, %v6712_v40, %v17291_v16  ;;  %v17293_v52 = vld [vmem:[#allocation136_spill] sm:$0xff]  ;;  %v17300_v16 = vld [vmem:[#allocation378_spill] sm:$0xff] }
 0x556   :  { %6582 = vrot.lane.b32.xlu2 %v17286_v2, %s8865_s23  ;;  %8627 = vmatmul.msk.f32.gmra.mxu1 %vm17275_vm4, %v7150_v56  ;;  %vm17294_vm8 = vcmask 97280   ;;  %v17297_v56 = vld [vmem:[#allocation177_spill] sm:$0xff]  ;;  %vm17302_vm3 = vcmask 293888  }
 0x557   :  { %v7753_v58 = vmax.f32 %v7689_v57, 0.0  ;;  %v8279_v5 = vadd.f32 %v13526_v44, %v8211_v10  ;;  %v14050_v50 = vpop.permute.xlu2 %6318  ;;  %v6842_v9 = vsel %vm17294_vm8, %v6777_v6, %v17293_v52  ;;  %v17295_v57 = vld [vmem:[#allocation107_spill] sm:$0xff]  ;;  %v8803_v6 = vld [vmem:[%s15129_s0 + $0x78] sm:$0xff]  ;;  %vm17303_vm8 = vcmask 31744  }
 0x558   :  { %6326 = vrot.lane.b32.xlu1 %v17289_v61, %s8866_s25  ;;  %vm17296_vm4 = vnez %v17295_v57 }
 0x559   :  { %v8343_v33 = vadd.f32 %v8802_v54, %v8279_v5  ;;  %8684 = vmatmul.msk.f32.gmra.mxu2 %vm17279_vm1, %v7753_v58  ;;  %v3901_v10 = vsel %vm17296_vm4, %v17243_v7, 0.0  ;;  %v6906_v58 = vsel %vm17298_vm7, %v6842_v9, %v17297_v56  ;;  %vm17299_vm1 = vmmov %vm17298_vm7 }
 0x55a   :  { %v6061_v21 = vpop.permute.xlu1 %6060  ;;  %v6971_v40 = vsel %vm6917_vm15, %v6906_v58, %v13905_v19  ;;  %v17301_v19 = vld [vmem:[#allocation135_spill] sm:$0xff]  ;;  %vm17306_vm7 = vmmov %vm17303_vm8 }
 0x55b   :  { %6296 = vrot.lane.b32.xlu0 %v17290_v32, %s8866_s25  ;;  %v8407_v36 = vmax.f32 %v8343_v33, 0.0  ;;  %v7036_v7 = vsel %vm6982_vm6, %v6971_v40, %v6061_v21 }
 0x55c   :  { %v8046_v43 = vpop.f32.mrf.mxu2  ;;  %v7101_v21 = vsel %vm7047_vm13, %v7036_v7, %v6317_v14 }
 0x55d   :  { %v6031_v35 = vpop.permute.xlu0 %6030  ;;  %8471 = vst.msk [vmem:[%s15138_s10 + $0x70] sm:$0xff] %vm17299_vm1, %v8407_v36  ;;  %v8212_v5 = vmul.f32 %v13513_v25, %v8046_v43  ;;  %v7486_v30 = vpop.f32.mrf.mxu1 }
 0x55e   :  { %5816 = vrot.lane.b32.xlu2 %v3901_v10, %s8863_s3  ;;  %v7622_v61 = vmul.f32 %v13783_v47, %v7486_v30  ;;  %v17305_v30 = vsel %vm17131_vm14, %v17008_v4, 0.0  ;;  %vm17310_vm14 = vcmask 64512  }
 0x55f   :  { %v8280_v54 = vadd.f32 %v13526_v44, %v8212_v5  ;;  %v14083_v33 = vpop.permute.xlu2 %6032  ;;  %v17304_v5 = vld [vmem:[#allocation129_spill] sm:$0xff] }
 0x560   :  { %v7690_v32 = vadd.f32 %v13800_v8, %v7622_v61  ;;  %6040 = vrot.lane.b32.xlu1 %v17300_v16, %s8864_s19  ;;  %v6713_v40 = vsel %vm17306_vm7, %v17305_v30, %v17304_v5  ;;  %v17307_v61 = vld [vmem:[#allocation358_spill] sm:$0xff]  ;;  %v17317_v30 = vld [vmem:[#allocation196_spill] sm:$0xff] }
 0x561   :  { %v8344_v36 = vadd.f32 %v8803_v6, %v8280_v54  ;;  %v17308_v7 = vsel %vm17283_vm9, %v17307_v61, 0.0  ;;  %v17309_v6 = vld [vmem:[#allocation130_spill] sm:$0xff]  ;;  %vm17316_vm9 = vcmask 97280  }
 0x562   :  { %v7754_v52 = vmax.f32 %v7690_v32, 0.0  ;;  %v6573_v9 = vpop.permute.xlu1 %6572 }
 0x563   :  { %6328 = vrot.lane.b32.xlu0 %v17301_v19, %s8866_s25  ;;  %v8408_v43 = vmax.f32 %v8344_v36, 0.0  ;;  %v7166_v10 = vsel %vm7112_vm11, %v7101_v21, %v6573_v9  ;;  %v6778_v36 = vsel %vm17310_vm14, %v6713_v40, %v17309_v6  ;;  %v17312_v19 = vsel %vm17118_vm0, %v16999_v23, 0.0  ;;  %v17314_v21 = vld [vmem:[#allocation152_spill] sm:$0xff]  ;;  %v17319_v23 = vld [vmem:[#allocation326_spill] sm:$0xff] }
 0x564   :  { %8643 = vmatmul.msk.f32.gmra.mxu3 %vm17302_vm3, %v7166_v10  ;;  %v8049_v58 = vpop.f32.mrf.mxu2  ;;  %8685 = vmatmul.msk.f32.gmra.mxu2 %vm17303_vm8, %v7754_v52  ;;  %v17311_v52 = vld [vmem:[#allocation393_spill] sm:$0xff]  ;;  %vm17313_vm3 = vmmov %vm17306_vm7  ;;  %vm17320_vm0 = vnez %v17319_v23 }
 0x565   :  { %v6063_v56 = vpop.permute.xlu0 %6062  ;;  %8472 = vst.msk [vmem:[%s15138_s10 + $0x78] sm:$0xff] %vm17299_vm1, %v8408_v43  ;;  %v8213_v14 = vmul.f32 %v13513_v25, %v8049_v58  ;;  %v7489_v54 = vpop.f32.mrf.mxu1  ;;  %v6697_v12 = vsel %vm17313_vm3, %v17312_v19, %v17311_v52  ;;  %v17315_v43 = vld [vmem:[#allocation156_spill] sm:$0xff]  ;;  %v8804_v58 = vld [vmem:[%s15129_s0 + $0x80] sm:$0xff]  ;;  %vm17318_vm8 = vmmov %vm17299_vm1 }
 0x566   :  { %6552 = vrot.lane.b32.xlu2 %v17308_v7, %s8865_s23  ;;  %v7623_v51 = vmul.f32 %v13783_v47, %v7489_v54  ;;  %v6843_v10 = vsel %vm17316_vm9, %v6778_v36, %v17315_v43  ;;  %v17322_v54 = vld [vmem:[#allocation381_spill] sm:$0xff]  ;;  %vm17323_vm7 = vmmov %vm17310_vm14  ;;  %v17324_v52 = vld [vmem:[#allocation399_spill] sm:$0xff] }
 0x567   :  { %v8281_v4 = vadd.f32 %v13526_v44, %v8213_v14  ;;  %v14115_v32 = vpop.permute.xlu2 %6064  ;;  %v6907_v18 = vsel %vm17318_vm8, %v6843_v10, %v17317_v30  ;;  %v17321_v14 = vsel %vm17320_vm0, %v17101_v55, 0.0  ;;  %vm17325_vm1 = vmmov %vm17316_vm9  ;;  %v17327_v10 = vld [vmem:[#allocation146_spill] sm:$0xff] }
 0x568   :  { %v7691_v9 = vadd.f32 %v13800_v8, %v7623_v51  ;;  %6072 = vrot.lane.b32.xlu1 %v17314_v21, %s8864_s19  ;;  %v6762_v51 = vsel %vm17323_vm7, %v6697_v12, %v17322_v54  ;;  %vm17326_vm14 = vmmov %vm17313_vm3  ;;  %v17332_v54 = vld [vmem:[#allocation159_spill] sm:$0xff] }
 0x569   :  { %v8345_v5 = vadd.f32 %v8804_v58, %v8281_v4  ;;  %v6827_v4 = vsel %vm17325_vm1, %v6762_v51, %v17324_v52  ;;  %vm17328_vm3 = vmmov %vm17318_vm8  ;;  %vm17330_vm8 = vcmask 293888  }
 0x56a   :  { %v7755_v40 = vmax.f32 %v7691_v9, 0.0  ;;  %v5807_v7 = vpop.permute.xlu1 %5806  ;;  %v6891_v55 = vsel %vm17328_vm3, %v6827_v4, %v17327_v10  ;;  %vm17329_vm9 = vmmov %vm17328_vm3 }
 0x56b   :  { %6042 = vrot.lane.b32.xlu0 %v17321_v14, %s8864_s19  ;;  %v8409_v6 = vmax.f32 %v8345_v5, 0.0  ;;  %v6972_v36 = vsel %vm6917_vm15, %v6907_v18, %v5807_v7  ;;  %v6956_v58 = vsel %vm6917_vm15, %v6891_v55, %v13984_v13  ;;  %v17331_v14 = vld [vmem:[#allocation153_spill] sm:$0xff]  ;;  %v8805_v13 = vld [vmem:[%s15129_s0 + $0x88] sm:$0xff]  ;;  %vm17336_vm1 = vmmov %vm17328_vm3 }
 0x56c   :  { %v7037_v19 = vsel %vm6982_vm6, %v6972_v36, %v6063_v56  ;;  %v8052_v9 = vpop.f32.mrf.mxu2  ;;  %8686 = vmatmul.msk.f32.gmra.mxu2 %vm17326_vm14, %v7755_v40  ;;  %v7021_v30 = vsel %vm6982_vm6, %v6956_v58, %v6031_v35  ;;  %v17333_v35 = vld [vmem:[#allocation137_spill] sm:$0xff]  ;;  %v17337_v55 = vld [vmem:[#allocation350_spill] sm:$0xff]  ;;  %vm17340_vm3 = vmmov %vm17326_vm14 }
 0x56d   :  { %v6575_v43 = vpop.permute.xlu0 %6574  ;;  %8473 = vst.msk [vmem:[%s15138_s10 + $0x80] sm:$0xff] %vm17329_vm9, %v8409_v6  ;;  %v8214_v12 = vmul.f32 %v13513_v25, %v8052_v9  ;;  %v7102_v56 = vsel %vm7047_vm13, %v7037_v19, %v14050_v50  ;;  %vm17334_vm7 = vnez %v17333_v35  ;;  %v7086_v57 = vsel %vm7047_vm13, %v7021_v30, %v14017_v0  ;;  %v17338_v58 = vld [vmem:[#allocation169_spill] sm:$0xff] }
 0x56e   :  { %5786 = vrot.lane.b32.xlu2 %v17267_v11, %s8863_s3  ;;  %v7167_v5 = vsel %vm7112_vm11, %v7102_v56, %v6575_v43  ;;  %v4605_v11 = vsel %vm17296_vm4, %v17331_v14, 0.0  ;;  %v4158_v51 = vsel %vm17334_vm7, %v17332_v54, 0.0  ;;  %vm17335_vm4 = vmmov %vm17330_vm8  ;;  %v17339_v30 = vld [vmem:[#allocation401_spill] sm:$0xff]  ;;  %vm17343_vm9 = vcmp.lt.s32.totalorder %v16886_v60, 7 }
 0x56f   :  { %v8282_v18 = vadd.f32 %v13526_v44, %v8214_v12  ;;  %v14163_v40 = vpop.permute.xlu2 %6576  ;;  %8644 = vmatmul.msk.f32.gmra.mxu3 %vm17330_vm8, %v7167_v5  ;;  %v3200_v5 = vrot.slane %v17338_v58, 1  ;;  %vm17345_vm8 = vcmask 64512  }
 0x570   :  { %6584 = vrot.lane.b32.xlu1 %v4605_v11, %s8865_s23  ;;  %v8806_v11 = vld [vmem:[%s15129_s0 + $0x90] sm:$0xff] }
 0x571   :  { %v8346_v50 = vadd.f32 %v8805_v13, %v8282_v18  ;;  %v7492_v7 = vpop.f32.mrf.mxu1  ;;  %v6698_v18 = vsel %vm17340_vm3, %v17011_v17, %v17339_v30  ;;  %v17350_v30 = vld [vmem:[#allocation374_spill] sm:$0xff] }
 0x572   :  { %v7624_v6 = vmul.f32 %v13783_v47, %v7492_v7  ;;  %v6543_v36 = vpop.permute.xlu1 %6542 }
 0x573   :  { %6074 = vrot.lane.b32.xlu0 %v4158_v51, %s8864_s19  ;;  %v8410_v52 = vmax.f32 %v8346_v50, 0.0  ;;  %v7151_v4 = vsel %vm7112_vm11, %v7086_v57, %v6543_v36  ;;  %v17341_v50 = vld [vmem:[#allocation143_spill] sm:$0xff] }
 0x574   :  { %v7692_v19 = vadd.f32 %v13800_v8, %v7624_v6  ;;  %8628 = vmatmul.msk.f32.gmra.mxu1 %vm17335_vm4, %v7151_v4  ;;  %v8055_v9 = vpop.f32.mrf.mxu2  ;;  %v17342_v7 = vrot.slane %v17341_v50, 1  ;;  %v17344_v6 = vld [vmem:[#allocation396_spill] sm:$0xff]  ;;  %vm17347_vm4 = vcmask 97280  }
 0x575   :  { %v5809_v43 = vpop.permute.xlu0 %5808  ;;  %8474 = vst.msk [vmem:[%s15138_s10 + $0x88] sm:$0xff] %vm17336_vm1, %v8410_v52  ;;  %v8215_v10 = vmul.f32 %v13513_v25, %v8055_v9  ;;  %v6763_v17 = vsel %vm17345_vm8, %v6698_v18, %v17344_v6  ;;  %v17346_v52 = vld [vmem:[#allocation407_spill] sm:$0xff]  ;;  %v17351_v18 = vld [vmem:[#allocation118_spill] sm:$0xff] }
 0x576   :  { %6298 = vrot.lane.b32.xlu2 %v17337_v55, %s8866_s25  ;;  %v7756_v0 = vmax.f32 %v7692_v19, 0.0  ;;  %v14209_v54 = vsel %vm17343_vm9, %v17342_v7, %v3200_v5  ;;  %v6828_v4 = vsel %vm17347_vm4, %v6763_v17, %v17346_v52  ;;  %v17348_v9 = vld [vmem:[#allocation47_spill] sm:$0xff]  ;;  %v17352_v7 = vld [vmem:[#allocation132_spill] sm:$0xff] }
 0x577   :  { %v8283_v12 = vadd.f32 %v13526_v44, %v8215_v10  ;;  %v14191_v56 = vpop.permute.xlu2 %5810  ;;  %vm17353_vm9 = vnez %v17352_v7  ;;  %v14348_v7 = vld [vmem:[%s15137_s9] ss:$0 sm:$0xff] }
 0x578   :  { %5818 = vrot.lane.b32.xlu1 %v17286_v2, %s8863_s3  ;;  %8687 = vmatmul.msk.f32.gmra.mxu2 %vm17326_vm14, %v7756_v0  ;;  %vm17349_vm14 = vmmov %vm17336_vm1 }
 0x579   :  { %v8347_v13 = vadd.f32 %v8806_v11, %v8283_v12  ;;  %v6892_v10 = vsel %vm17349_vm14, %v6828_v4, %v17348_v9  ;;  %v6714_v11 = vsel %vm17340_vm3, %v17026_v59, %v17351_v18  ;;  %vm17356_vm14 = vcmask 293888   ;;  %vm17358_vm3 = vmmov %vm17336_vm1 }
 0x57a   :  { %v5777_v2 = vpop.permute.xlu1 %5776 }
 0x57b   :  { %6586 = vrot.lane.b32.xlu0 %v14209_v54, %s8865_s23  ;;  %v8411_v51 = vmax.f32 %v8347_v13, 0.0  ;;  %v6957_v55 = vsel %vm6917_vm15, %v6892_v10, %v5777_v2  ;;  %v8807_v13 = vld [vmem:[%s15129_s0 + $0x98] sm:$0xff]  ;;  %v3903_v2 = vsel %vm17353_vm9, %v17331_v14, 0.0 }
 0x57c   :  { %v8058_v57 = vpop.f32.mrf.mxu2  ;;  %v17355_v14 = vld [vmem:[#allocation149_spill] sm:$0xff] }
 0x57d   :  { %v6545_v36 = vpop.permute.xlu0 %6544  ;;  %8475 = vst.msk [vmem:[%s15138_s10 + $0x90] sm:$0xff] %vm17336_vm1, %v8411_v51  ;;  %v8216_v19 = vmul.f32 %v13513_v25, %v8058_v57  ;;  %v17354_v51 = vld [vmem:[#allocation150_spill] sm:$0xff]  ;;  %v7022_v57 = vsel %vm6982_vm6, %v6957_v55, %v14083_v33 }
 0x57e   :  { %6330 = vrot.lane.b32.xlu2 %v17341_v50, %s8866_s25  ;;  %v6779_v6 = vsel %vm17345_vm8, %v6714_v11, %v17354_v51  ;;  %v17357_v11 = vld [vmem:[#allocation180_spill] sm:$0xff] }
 0x57f   :  { %v8284_v0 = vadd.f32 %v13526_v44, %v8216_v19  ;;  %v14228_v12 = vpop.permute.xlu2 %6546  ;;  %v6844_v18 = vsel %vm17347_vm4, %v6779_v6, %v17355_v14  ;;  %v17359_v6 = vld [vmem:[#allocation357_spill] sm:$0xff]  ;;  %vm17362_vm4 = vcmask 31744  }
 0x580   :  { %6554 = vrot.lane.b32.xlu1 %v17350_v30, %s8865_s23  ;;  %vm17360_vm8 = vnez %v17359_v6  ;;  %v17375_v6 = vld [vmem:[#allocation102_spill] sm:$0xff] }
 0x581   :  { %v8348_v50 = vadd.f32 %v8807_v13, %v8284_v0 }
 0x582   :  { %v6289_v17 = vpop.permute.xlu1 %6288  ;;  %v7495_v52 = vpop.f32.mrf.mxu1 }
 0x583   :  { %5820 = vrot.lane.b32.xlu0 %v3903_v2, %s8863_s3  ;;  %v8412_v59 = vmax.f32 %v8348_v50, 0.0  ;;  %v7087_v4 = vsel %vm7047_vm13, %v7022_v57, %v6289_v17  ;;  %v7625_v19 = vmul.f32 %v13783_v47, %v7495_v52 }
 0x584   :  { %v8061_v10 = vpop.f32.mrf.mxu2  ;;  %v7152_v0 = vsel %vm7112_vm11, %v7087_v4, %v6545_v36  ;;  %v6908_v36 = vsel %vm17358_vm3, %v6844_v18, %v17357_v11 }
 0x585   :  { %v5779_v9 = vpop.permute.xlu0 %5778  ;;  %8476 = vst.msk [vmem:[%s15138_s10 + $0x98] sm:$0xff] %vm17336_vm1, %v8412_v59  ;;  %v7693_v33 = vadd.f32 %v13800_v8, %v7625_v19  ;;  %v8217_v55 = vmul.f32 %v13513_v25, %v8061_v10  ;;  %8629 = vmatmul.msk.f32.gmra.mxu1 %vm17356_vm14, %v7152_v0  ;;  %v6973_v13 = vsel %vm6917_vm15, %v6908_v36, %v5809_v43  ;;  %v17361_v25 = vsel %vm17360_vm8, %v17307_v61, 0.0  ;;  %v17363_v43 = vld [vmem:[#allocation367_spill] sm:$0xff]  ;;  %vm17367_vm1 = vmmov %vm17362_vm4 }
 0x586   :  { %6044 = vrot.lane.b32.xlu2 %v17149_v20, %s8864_s19  ;;  %v8808_v20 = vld [vmem:[%s15129_s0 + $0xa0] sm:$0xff]  ;;  %v17364_v57 = vsel %vm17360_vm8, %v17363_v43, 0.0  ;;  %v7038_v59 = vsel %vm6982_vm6, %v6973_v13, %v14115_v32  ;;  %v17365_v19 = vld [vmem:[#allocation391_spill] sm:$0xff]  ;;  %v17366_v10 = vsel %vm17196_vm12, %v17052_v48, 0.0  ;;  %vm17369_vm14 = vcmask 64512   ;;  %v17370_v32 = vld [vmem:[#allocation173_spill] sm:$0xff] }
 0x587   :  { %v7757_v50 = vmax.f32 %v7693_v33, 0.0  ;;  %v8285_v2 = vadd.f32 %v13526_v44, %v8217_v55  ;;  %v6699_v0 = vsel %vm17367_vm1, %v17366_v10, %v17365_v19  ;;  %v17368_v55 = vld [vmem:[#allocation404_spill] sm:$0xff]  ;;  %vm17371_vm12 = vcmask 293888   ;;  %v17372_v13 = vld [vmem:[#allocation397_spill] sm:$0xff] }
 0x588   :  { %v14264_v51 = vpop.permute.xlu2 %5780  ;;  %5788 = vrot.lane.b32.xlu1 %v17361_v25, %s8863_s3  ;;  %v6764_v11 = vsel %vm17369_vm14, %v6699_v0, %v17368_v55  ;;  %vm17373_vm8 = vcmask 97280   ;;  %vm17379_vm1 = vcmp.lt.s32.totalorder %v16886_v60, 7  ;;  %vm17380_vm14 = vmmov %vm17358_vm3 }
 0x589   :  { %v8349_v17 = vadd.f32 %v8808_v20, %v8285_v2  ;;  %8688 = vmatmul.msk.f32.gmra.mxu2 %vm17362_vm4, %v7757_v50  ;;  %v6829_v50 = vsel %vm17373_vm8, %v6764_v11, %v17372_v13  ;;  %v17374_v2 = vld [vmem:[#allocation361_spill] sm:$0xff]  ;;  %vm17376_vm4 = vmmov %vm17358_vm3  ;;  %v8810_v20 = vld [vmem:[%s15129_s0 + $0xa8] sm:$0xff]  ;;  %vm17388_vm8 = vcmask 64512  }
 0x58a   :  { %v6321_v52 = vpop.permute.xlu1 %6320  ;;  %v6893_v25 = vsel %vm17376_vm4, %v6829_v50, %v17375_v6  ;;  %v8812_v13 = vld [vmem:[%s15129_s0 + $0xb0] sm:$0xff] }
 0x58b   :  { %6556 = vrot.lane.b32.xlu0 %v17364_v57, %s8865_s23  ;;  %v8413_v4 = vmax.f32 %v8349_v17, 0.0  ;;  %v7103_v61 = vsel %vm7047_vm13, %v7038_v59, %v6321_v52  ;;  %v17377_v57 = vld [vmem:[#allocation2_spill] sm:$0xff]  ;;  %v6958_v59 = vsel %vm6917_vm15, %v6893_v25, %v5779_v9 }
 0x58c   :  { %v8064_v18 = vpop.f32.mrf.mxu2  ;;  %v7168_v33 = vsel %vm7112_vm11, %v7103_v61, %v14163_v40  ;;  %v17378_v52 = vrot.slane %v17377_v57, 1 }
 0x58d   :  { %v6291_v14 = vpop.permute.xlu0 %6290  ;;  %8477 = vst.msk [vmem:[%s15138_s10 + $0xa0] sm:$0xff] %vm17358_vm3, %v8413_v4  ;;  %v8218_v48 = vmul.f32 %v14300_v26, %v8064_v18  ;;  %8645 = vmatmul.msk.f32.gmra.mxu3 %vm17371_vm12, %v7168_v33  ;;  %vm17381_vm3 = vmmov %vm17371_vm12 }
 0x58e   :  { %6076 = vrot.lane.b32.xlu2 %v17370_v32, %s8864_s19  ;;  %v17383_v32 = vsel %vm17212_vm5, %v17060_v28, 0.0  ;;  %vm17390_vm5 = vcmask 97280  }
 0x58f   :  { %v8286_v40 = vadd.f32 %v13526_v44, %v8218_v48  ;;  %v14324_v44 = vsel %vm17379_vm1, %v3200_v5, %v17378_v52  ;;  %v17382_v48 = vld [vmem:[#allocation151_spill] sm:$0xff]  ;;  %v17391_v52 = vld [vmem:[#allocation233_spill] sm:$0xff]  ;;  %vm17392_vm1 = vmmov %vm17376_vm4 }
 0x590   :  { %v14307_v36 = vpop.permute.xlu2 %6292  ;;  %6300 = vrot.lane.b32.xlu1 %v17374_v2, %s8866_s25  ;;  %v4607_v60 = vsel %vm17353_vm9, %v14324_v44, 0.0  ;;  %vm17384_vm9 = vcmask 31744   ;;  %v17385_v2 = vld [vmem:[#allocation362_spill] sm:$0xff] }
 0x591   :  { %v8350_v17 = vadd.f32 %v8810_v20, %v8286_v40  ;;  %v6715_v40 = vsel %vm17384_vm9, %v17383_v32, %v17382_v48  ;;  %vm17386_vm12 = vmmov %vm17384_vm9  ;;  %v17389_v20 = vld [vmem:[#allocation176_spill] sm:$0xff]  ;;  %v17396_v48 = vld [vmem:[#allocation170_spill] sm:$0xff] }
 0x592   :  { %v6035_v4 = vpop.permute.xlu1 %6034  ;;  %v6780_v28 = vsel %vm17388_vm8, %v6715_v40, %v17387_v45  ;;  %v17403_v45 = vld [vmem:[#allocation195_spill] sm:$0xff] }
 0x593   :  { %5790 = vrot.lane.b32.xlu0 %v17350_v30, %s8863_s3  ;;  %v8414_v61 = vmax.f32 %v8350_v17, 0.0  ;;  %v7023_v19 = vsel %vm6982_vm6, %v6958_v59, %v6035_v4  ;;  %v7498_v10 = vpop.f32.mrf.mxu1  ;;  %v6845_v17 = vsel %vm17390_vm5, %v6780_v28, %v17389_v20  ;;  %vm17400_vm5 = vmmov %vm17384_vm9 }
 0x594   :  { %v7088_v0 = vsel %vm7047_vm13, %v7023_v19, %v6291_v14  ;;  %v7626_v18 = vmul.f32 %v13783_v47, %v7498_v10  ;;  %v8067_v55 = vpop.f32.mrf.mxu2  ;;  %v6909_v59 = vsel %vm17376_vm4, %v6845_v17, %v17391_v52  ;;  %vm17402_vm4 = vcmask 97280  }
 0x595   :  { %v6323_v33 = vpop.permute.xlu0 %6322  ;;  %8478 = vst.msk [vmem:[%s15138_s10 + $0xa8] sm:$0xff] %vm17380_vm14, %v8414_v61  ;;  %v8219_v5 = vmul.f32 %v14300_v26, %v8067_v55  ;;  %v7153_v30 = vsel %vm7112_vm11, %v7088_v0, %v14228_v12  ;;  %v6974_v61 = vsel %vm6917_vm15, %v6909_v59, %v14191_v56  ;;  %v17406_v59 = vld [vmem:[#allocation408_spill] sm:$0xff] }
 0x596   :  { %6588 = vrot.lane.b32.xlu2 %v4607_v60, %s8865_s23  ;;  %v7694_v9 = vadd.f32 %v13800_v8, %v7626_v18  ;;  %8630 = vmatmul.msk.f32.gmra.mxu1 %vm17381_vm3, %v7153_v30  ;;  %v17393_v18 = vld [vmem:[#allocation338_spill] sm:$0xff]  ;;  %v8813_v60 = vld [vmem:[%s15129_s0 + $0xb8] sm:$0xff] }
 0x597   :  { %v8287_v14 = vadd.f32 %v14348_v7, %v8219_v5  ;;  %vm17394_vm14 = vnez %v17393_v18 }
 0x598   :  { %v6325_v11 = vpop.permute.xlu2 %6324  ;;  %v7758_v12 = vmax.f32 %v7694_v9, 0.0  ;;  %6332 = vrot.lane.b32.xlu1 %v17338_v58, %s8866_s25  ;;  %v17395_v55 = vsel %vm17394_vm14, %v17180_v38, 0.0  ;;  %v6716_v38 = vsel %vm17384_vm9, %v17110_v41, %v17396_v48  ;;  %vm17407_vm9 = vmmov %vm17402_vm4 }
 0x599   :  { %v8351_v50 = vadd.f32 %v8812_v13, %v8287_v14 }
 0x59a   :  { %v6067_v6 = vpop.permute.xlu1 %6066  ;;  %8689 = vmatmul.msk.f32.gmra.mxu2 %vm17386_vm12, %v7758_v12  ;;  %vm17397_vm12 = vmmov %vm17392_vm1  ;;  %v17398_v12 = vld [vmem:[#allocation171_spill] sm:$0xff] }
 0x59b   :  { %6302 = vrot.lane.b32.xlu0 %v17385_v2, %s8866_s25  ;;  %v8415_v25 = vmax.f32 %v8351_v50, 0.0  ;;  %v7039_v19 = vsel %vm6982_vm6, %v6974_v61, %v6067_v6  ;;  %v6781_v13 = vsel %vm17388_vm8, %v6716_v38, %v17398_v12  ;;  %v17399_v50 = vld [vmem:[#allocation402_spill] sm:$0xff]  ;;  %v17401_v6 = vld [vmem:[#allocation197_spill] sm:$0xff] }
 0x59c   :  { %v8070_v58 = vpop.f32.mrf.mxu2  ;;  %v7104_v5 = vsel %vm7047_vm13, %v7039_v19, %v6323_v33  ;;  %v6700_v41 = vsel %vm17400_vm5, %v17094_v37, %v17399_v50  ;;  %v17404_v37 = vld [vmem:[#allocation394_spill] sm:$0xff]  ;;  %vm17412_vm5 = vmmov %vm17392_vm1 }
 0x59d   :  { %v6037_v57 = vpop.permute.xlu0 %6036  ;;  %8479 = vst.msk [vmem:[%s15138_s10 + $0xb0] sm:$0xff] %vm17392_vm1, %v8415_v25  ;;  %v8220_v4 = vmul.f32 %v14300_v26, %v8070_v58  ;;  %v8814_v25 = vld [vmem:[%s15129_s0 + $0xc0] sm:$0xff] }
 0x59e   :  { %5822 = vrot.lane.b32.xlu2 %v14209_v54, %s8863_s3 }
 0x59f   :  { %v8288_v10 = vadd.f32 %v14348_v7, %v8220_v4 }
 0x5a0   :  { %v14382_v0 = vpop.permute.xlu2 %6038  ;;  %6046 = vrot.lane.b32.xlu1 %v17395_v55, %s8864_s19  ;;  %v17408_v55 = vld [vmem:[#allocation371_spill] sm:$0xff] }
 0x5a1   :  { %v8352_v54 = vadd.f32 %v8813_v60, %v8288_v10 }
 0x5a2   :  { %v6579_v56 = vpop.permute.xlu1 %6578 }
 0x5a3   :  { %6334 = vrot.lane.b32.xlu0 %v16903_v3, %s8866_s25  ;;  %v8416_v30 = vmax.f32 %v8352_v54, 0.0  ;;  %v7169_v9 = vsel %vm7112_vm11, %v7104_v5, %v6579_v56  ;;  %v17410_v54 = vld [vmem:[#allocation126_spill] sm:$0xff] }
 0x5a4   :  { %8646 = vmatmul.msk.f32.gmra.mxu3 %vm17381_vm3, %v7169_v9  ;;  %vm17405_vm3 = vmmov %vm17388_vm8 }
 0x5a5   :  { %v6069_v14 = vpop.permute.xlu0 %6068  ;;  %8480 = vst.msk [vmem:[%s15138_s10 + $0xb8] sm:$0xff] %vm17397_vm12, %v8416_v30  ;;  %v8073_v32 = vpop.f32.mrf.mxu2  ;;  %v6765_v58 = vsel %vm17405_vm3, %v6700_v41, %v17404_v37  ;;  %vm17409_vm12 = vnez %v17408_v55  ;;  %vm17411_vm8 = vmmov %vm17392_vm1 }
 0x5a6   :  { %6558 = vrot.lane.b32.xlu2 %v16940_v46, %s8865_s23  ;;  %v8221_v33 = vmul.f32 %v14300_v26, %v8073_v32  ;;  %v6846_v46 = vsel %vm17402_vm4, %v6781_v13, %v17401_v6  ;;  %v6830_v4 = vsel %vm17407_vm9, %v6765_v58, %v17406_v59  ;;  %v3889_v60 = vsel %vm17409_vm12, %v17363_v43, 0.0  ;;  %v17422_v58 = vld [vmem:[#allocation405_spill] sm:$0xff] }
 0x5a7   :  { %v6910_v28 = vsel %vm17392_vm1, %v6846_v46, %v17403_v45  ;;  %v6894_v56 = vsel %vm17411_vm8, %v6830_v4, %v17410_v54  ;;  %vm17413_vm4 = vcmask 293888   ;;  %v8815_v46 = vld [vmem:[%s15129_s0 + $0xc8] sm:$0xff]  ;;  %vm17418_vm9 = vcmask 31744   ;;  %v17424_v4 = vld [vmem:[#allocation416_spill] sm:$0xff] }
 0x5a8   :  { %v14407_v40 = vpop.permute.xlu2 %6070  ;;  %v8289_v2 = vadd.f32 %v14348_v7, %v8221_v33  ;;  %8772 = vrot.lane.b32.xlu1 %v16903_v3, %s8864_s19  ;;  %v6959_v5 = vsel %vm6917_vm15, %v6894_v56, %v14264_v51  ;;  %v4593_v51 = vsel %vm17409_vm12, %v16959_v34, 0.0  ;;  %vm17414_vm1 = vmmov %vm17413_vm4  ;;  %v17415_v34 = vld [vmem:[#allocation4_spill] sm:$0xff]  ;;  %vm17423_vm8 = vcmask 64512  }
 0x5a9   :  { %v7024_v9 = vsel %vm6982_vm6, %v6959_v5, %v6037_v57  ;;  %vm17421_vm12 = vmmov %vm17418_vm9  ;;  %v17428_v54 = vld [vmem:[#allocation160_spill] sm:$0xff]  ;;  %v17429_v56 = vsel %vm17272_vm2, %v17132_v39, 0.0 }
 0x5aa   :  { %v8353_v20 = vadd.f32 %v8814_v25, %v8289_v2  ;;  %v5813_v17 = vpop.permute.xlu1 %5812  ;;  %v7089_v38 = vsel %vm7047_vm13, %v7024_v9, %v14307_v36  ;;  %v17416_v36 = vld [vmem:[#allocation154_spill] sm:$0xff]  ;;  %v17420_v25 = vsel %vm17262_vm10, %v17119_v42, 0.0  ;;  %v17426_v42 = vld [vmem:[#allocation92_spill] sm:$0xff]  ;;  %vm17427_vm10 = vmmov %vm17412_vm5 }
 0x5ab   :  { %6048 = vrot.lane.b32.xlu0 %v17201_v22, %s8864_s19  ;;  %v6975_v52 = vsel %vm6917_vm15, %v6910_v28, %v5813_v17  ;;  %vm17417_vm3 = vnez %v17416_v36  ;;  %v17419_v28 = vld [vmem:[#allocation410_spill] sm:$0xff]  ;;  %v8816_v5 = vld [vmem:[%s15129_s0 + $0xd0] sm:$0xff] }
 0x5ac   :  { %v8417_v61 = vmax.f32 %v8353_v20, 0.0  ;;  %v7040_v19 = vsel %vm6982_vm6, %v6975_v52, %v6069_v14  ;;  %v3905_v6 = vsel %vm17417_vm3, %v14324_v44, 0.0  ;;  %v6701_v20 = vsel %vm17421_vm12, %v17420_v25, %v17419_v28  ;;  %v17431_v9 = vld [vmem:[#allocation188_spill] sm:$0xff]  ;;  %vm17432_vm3 = vmmov %vm17423_vm8  ;;  %v8817_v28 = vld [vmem:[%s15129_s0 + $0xd8] sm:$0xff] }
 0x5ad   :  { %v6581_v10 = vpop.permute.xlu0 %6580  ;;  %v7105_v22 = vsel %vm7047_vm13, %v7040_v19, %v6325_v11  ;;  %v6766_v44 = vsel %vm17423_vm8, %v6701_v20, %v17422_v58  ;;  %vm17436_vm12 = vcmask 293888   ;;  %vm17438_vm8 = vmmov %vm17412_vm5  ;;  %v17440_v58 = vld [vmem:[#allocation400_spill] sm:$0xff] }
 0x5ae   :  { %5792 = vrot.lane.b32.xlu2 %v3889_v60, %s8863_s3  ;;  %8481 = vst.msk [vmem:[%s15138_s10 + $0xc0] sm:$0xff] %vm17412_vm5, %v8417_v61  ;;  %v7170_v30 = vsel %vm7112_vm11, %v7105_v22, %v6581_v10 }
 0x5af   :  { %8647 = vmatmul.msk.f32.gmra.mxu3 %vm17413_vm4, %v7170_v30  ;;  %vm17425_vm4 = vcmask 97280  }
 0x5b0   :  { %v14447_v43 = vpop.permute.xlu2 %6582  ;;  %6590 = vrot.lane.b32.xlu1 %v16903_v3, %s8865_s23  ;;  %v6831_v61 = vsel %vm17425_vm4, %v6766_v44, %v17424_v4  ;;  %vm17434_vm2 = vmmov %vm17425_vm4  ;;  %v17442_v4 = vld [vmem:[#allocation413_spill] sm:$0xff] }
 0x5b1   :  { %v7501_v11 = vpop.f32.mrf.mxu1  ;;  %v6895_v19 = vsel %vm17427_vm10, %v6831_v61, %v17426_v42  ;;  %vm17443_vm10 = vmmov %vm17432_vm3  ;;  %v17447_v42 = vld [vmem:[#allocation141_spill] sm:$0xff] }
 0x5b2   :  { %v7627_v14 = vmul.f32 %v13783_v47, %v7501_v11  ;;  %v6549_v48 = vpop.permute.xlu1 %6548 }
 0x5b3   :  { %6560 = vrot.lane.b32.xlu0 %v4593_v51, %s8865_s23  ;;  %v7154_v57 = vsel %vm7112_vm11, %v7089_v38, %v6549_v48  ;;  %v8076_v32 = vpop.f32.mrf.mxu2 }
 0x5b4   :  { %v7695_v33 = vadd.f32 %v13800_v8, %v7627_v14  ;;  %v8222_v12 = vmul.f32 %v14300_v26, %v8076_v32  ;;  %8631 = vmatmul.msk.f32.gmra.mxu1 %vm17414_vm1, %v7154_v57  ;;  %vm17430_vm1 = vmmov %vm17418_vm9  ;;  %v17433_v32 = vld [vmem:[#allocation185_spill] sm:$0xff] }
 0x5b5   :  { %v5815_v13 = vpop.permute.xlu0 %5814  ;;  %v6717_v22 = vsel %vm17430_vm1, %v17429_v56, %v17428_v54  ;;  %vm17441_vm4 = vmmov %vm17430_vm1 }
 0x5b6   :  { %6304 = vrot.lane.b32.xlu2 %v17415_v34, %s8866_s25  ;;  %v7759_v50 = vmax.f32 %v7695_v33, 0.0  ;;  %v8290_v41 = vadd.f32 %v14348_v7, %v8222_v12  ;;  %v6782_v11 = vsel %vm17432_vm3, %v6717_v22, %v17431_v9  ;;  %v17437_v34 = vld [vmem:[#allocation208_spill] sm:$0xff]  ;;  %vm17445_vm3 = vmmov %vm17438_vm8 }
 0x5b7   :  { %v6847_v33 = vsel %vm17434_vm2, %v6782_v11, %v17433_v32  ;;  %v17455_v32 = vld [vmem:[#allocation215_spill] sm:$0xff] }
 0x5b8   :  { %v14466_v2 = vpop.permute.xlu2 %5816  ;;  %v8354_v45 = vadd.f32 %v8815_v46, %v8290_v41  ;;  %5824 = vrot.lane.b32.xlu1 %v3905_v6, %s8863_s3  ;;  %8690 = vmatmul.msk.f32.gmra.mxu2 %vm17418_vm9, %v7759_v50  ;;  %vm17435_vm9 = vmmov %vm17412_vm5  ;;  %v6911_v50 = vsel %vm17438_vm8, %v6847_v33, %v17437_v34 }
 0x5b9   :  { %v6976_v36 = vsel %vm6917_vm15, %v6911_v50, %v5815_v13  ;;  %v6702_v13 = vsel %vm17441_vm4, %v17157_v62, %v17440_v58  ;;  %vm17451_vm8 = vmmov %vm17441_vm4 }
 0x5ba   :  { %v8418_v17 = vmax.f32 %v8354_v45, 0.0  ;;  %v5783_v37 = vpop.permute.xlu1 %5782  ;;  %v6767_v61 = vsel %vm17443_vm10, %v6702_v13, %v17442_v4  ;;  %v2941_v13 = vsel %vm17334_vm7, %v17213_v1, 0.0  ;;  %v17464_v4 = vld [vmem:[#allocation210_spill] sm:$0xff]  ;;  %v17467_v1 = vsel %vm17320_vm0, %v17197_v27, 0.0  ;;  %v17475_v27 = vld [vmem:[#allocation417_spill] sm:$0xff] }
 0x5bb   :  { %v6960_v10 = vsel %vm6917_vm15, %v6895_v19, %v5783_v37 }
 0x5bc   :  { %8482 = vst.msk [vmem:[%s15138_s10 + $0xc8] sm:$0xff] %vm17412_vm5, %v8418_v17  ;;  %v8079_v59 = vpop.f32.mrf.mxu2  ;;  %v7025_v14 = vsel %vm6982_vm6, %v6960_v10, %v14382_v0  ;;  %vm17439_vm5 = vmmov %vm17430_vm1  ;;  %v7041_v17 = vsel %vm6982_vm6, %v6976_v36, %v14407_v40  ;;  %v17446_v40 = vld [vmem:[#allocation406_spill] sm:$0xff] }
 0x5bd   :  { %v6551_v52 = vpop.permute.xlu0 %6550  ;;  %v8223_v63 = vmul.f32 %v14300_v26, %v8079_v59  ;;  %vm17444_vm1 = vmmov %vm17436_vm12 }
 0x5be   :  { %6592 = vrot.lane.b32.xlu2 %v16903_v3, %s8865_s23 }
 0x5bf   :  { %v8291_v55 = vadd.f32 %v14348_v7, %v8223_v63  ;;  %v6832_v63 = vsel %vm17434_vm2, %v6767_v61, %v17446_v40  ;;  %v17466_v40 = vld [vmem:[#allocation411_spill] sm:$0xff] }
 0x5c0   :  { %v6553_v60 = vpop.permute.xlu2 %6552  ;;  %6336 = vrot.lane.b32.xlu1 %v16903_v3, %s8866_s25 }
 0x5c1   :  { %v8355_v30 = vadd.f32 %v8816_v5, %v8291_v55 }
 0x5c2   :  { %v6295_v51 = vpop.permute.xlu1 %6294  ;;  %v7504_v3 = vpop.f32.mrf.mxu1 }
 0x5c3   :  { %v8419_v48 = vmax.f32 %v8355_v30, 0.0  ;;  %v7090_v29 = vsel %vm7047_vm13, %v7025_v14, %v6295_v51  ;;  %v7628_v39 = vmul.f32 %v13783_v47, %v7504_v3  ;;  %v17450_v3 = vld [vmem:[#allocation189_spill] sm:$0xff] }
 0x5c4   :  { %v7155_v57 = vsel %vm7112_vm11, %v7090_v29, %v6551_v52 }
 0x5c5   :  { %v5785_v38 = vpop.permute.xlu0 %5784  ;;  %8483 = vst.msk [vmem:[%s15138_s10 + $0xd0] sm:$0xff] %vm17435_vm9, %v8419_v48  ;;  %v7696_v12 = vadd.f32 %v13800_v8, %v7628_v39  ;;  %8632 = vmatmul.msk.f32.gmra.mxu1 %vm17436_vm12, %v7155_v57  ;;  %v8082_v0 = vpop.f32.mrf.mxu2  ;;  %vm17448_vm9 = vmmov %vm17445_vm3  ;;  %v6718_v48 = vsel %vm17451_vm8, %v17173_v49, %v17450_v3  ;;  %v8820_v3 = vld [vmem:[%s15129_s0 + $0xf0] sm:$0xff] }
 0x5c6   :  { %v8224_v41 = vmul.f32 %v14300_v26, %v8082_v0  ;;  %v6896_v62 = vsel %vm17448_vm9, %v6832_v63, %v17447_v42  ;;  %vm17449_vm12 = vmmov %vm17444_vm1  ;;  %v17458_v0 = vld [vmem:[#allocation7_spill] sm:$0xff]  ;;  %v17469_v42 = vld [vmem:[#allocation237_spill] sm:$0xff] }
 0x5c7   :  { %v7760_v6 = vmax.f32 %v7696_v12, 0.0  ;;  %v6961_v19 = vsel %vm6917_vm15, %v6896_v62, %v5785_v38 }
 0x5c8   :  { %v8292_v46 = vadd.f32 %v14348_v7, %v8224_v41  ;;  %v14528_v45 = vpop.permute.xlu2 %5786 }
 0x5c9   :  { %8691 = vmatmul.msk.f32.gmra.mxu2 %vm17439_vm5, %v7760_v6  ;;  %vm17452_vm5 = vmmov %vm17441_vm4 }
 0x5ca   :  { %v8356_v25 = vadd.f32 %v8817_v28, %v8292_v46  ;;  %v6327_v20 = vpop.permute.xlu1 %6326  ;;  %vm17454_vm4 = vmmov %vm17443_vm10  ;;  %v8819_v28 = vld [vmem:[%s15129_s0 + $0xe8] sm:$0xff] }
 0x5cb   :  { %v7106_v37 = vsel %vm7047_vm13, %v7041_v17, %v6327_v20  ;;  %vm17456_vm10 = vmmov %vm17434_vm2 }
 0x5cc   :  { %v8420_v44 = vmax.f32 %v8356_v25, 0.0  ;;  %v7171_v59 = vsel %vm7112_vm11, %v7106_v37, %v14447_v43  ;;  %vm17460_vm2 = vmmov %vm17449_vm12 }
 0x5cd   :  { %v6297_v52 = vpop.permute.xlu0 %6296  ;;  %8648 = vmatmul.msk.f32.gmra.mxu3 %vm17444_vm1, %v7171_v59  ;;  %vm17457_vm1 = vmmov %vm17445_vm3 }
 0x5ce   :  { %8484 = vst.msk [vmem:[%s15138_s10 + $0xd8] sm:$0xff] %vm17445_vm3, %v8420_v44  ;;  %vm17459_vm3 = vmmov %vm17457_vm1  ;;  %v17461_v44 = vld [vmem:[#allocation209_spill] sm:$0xff] }
 0x5cf   :  { %vm17462_vm9 = vmmov %vm17452_vm5 }
 0x5d0   :  { %v14554_v10 = vpop.permute.xlu2 %6298  ;;  %vm17465_vm8 = vmmov %vm17454_vm4 }
 0x5d1   :  { %vm17468_vm7 = vmmov %vm17452_vm5 }
 0x5d2   :  { %v6041_v43 = vpop.permute.xlu1 %6040  ;;  %v6703_v35 = vsel %vm17468_vm7, %v17467_v1, %v17466_v40  ;;  %v17489_v1 = vld [vmem:[#allocation139_spill] sm:$0xff] }
 0x5d3   :  { %v7026_v55 = vsel %vm6982_vm6, %v6961_v19, %v6041_v43  ;;  %v7507_v54 = vpop.f32.mrf.mxu1  ;;  %v8085_v56 = vpop.f32.mrf.mxu2  ;;  %v17471_v43 = vld [vmem:[#allocation202_spill] sm:$0xff] }
 0x5d4   :  { %v7091_v22 = vsel %vm7047_vm13, %v7026_v55, %v6297_v52  ;;  %v7629_v5 = vmul.f32 %v13783_v47, %v7507_v54  ;;  %v8225_v30 = vmul.f32 %v14300_v26, %v8085_v56  ;;  %v8818_v47 = vld [vmem:[%s15129_s0 + $0xe0] sm:$0xff]  ;;  %v6719_v52 = vsel %vm17462_vm9, %v2941_v13, %v17461_v44  ;;  %v17473_v56 = vld [vmem:[#allocation403_spill] sm:$0xff] }
 0x5d5   :  { %v6329_v9 = vpop.permute.xlu0 %6328  ;;  %v7156_v11 = vsel %vm7112_vm11, %v7091_v22, %v6553_v60  ;;  %v17453_v60 = vld [vmem:[#allocation181_spill] sm:$0xff]  ;;  %v6784_v61 = vsel %vm17465_vm8, %v6719_v52, %v17464_v4 }
 0x5d6   :  { %v7697_v51 = vadd.f32 %v13800_v8, %v7629_v5  ;;  %v8293_v14 = vadd.f32 %v14348_v7, %v8225_v30  ;;  %8633 = vmatmul.msk.f32.gmra.mxu1 %vm17449_vm12, %v7156_v11  ;;  %v6783_v8 = vsel %vm17454_vm4, %v6718_v48, %v17453_v60  ;;  %vm17463_vm12 = vmmov %vm17457_vm1 }
 0x5d7   :  { %v6848_v33 = vsel %vm17456_vm10, %v6783_v8, %v17455_v32  ;;  %vm17472_vm4 = vmmov %vm17457_vm1 }
 0x5d8   :  { %v7761_v29 = vmax.f32 %v7697_v51, 0.0  ;;  %v8357_v39 = vadd.f32 %v8818_v47, %v8293_v14  ;;  %v6912_v34 = vsel %vm17459_vm3, %v6848_v33, %v17458_v0  ;;  %v6331_v50 = vpop.permute.xlu2 %6330  ;;  %v17477_v51 = vld [vmem:[#allocation164_spill] sm:$0xff]  ;;  %vm17478_vm3 = vmmov %vm17460_vm2 }
 0x5d9   :  { %v6977_v36 = vsel %vm6917_vm15, %v6912_v34, %v14466_v2  ;;  %vm17480_vm9 = vmmov %vm17478_vm3 }
 0x5da   :  { %v8421_v38 = vmax.f32 %v8357_v39, 0.0  ;;  %v6073_v57 = vpop.permute.xlu1 %6072  ;;  %8692 = vmatmul.msk.f32.gmra.mxu2 %vm17452_vm5, %v7761_v29  ;;  %vm17470_vm5 = vmmov %vm17456_vm10 }
 0x5db   :  { %v7042_v6 = vsel %vm6982_vm6, %v6977_v36, %v6073_v57  ;;  %v6849_v62 = vsel %vm17470_vm5, %v6784_v61, %v17469_v42  ;;  %vm17474_vm10 = vmmov %vm17465_vm8  ;;  %v17487_v61 = vld [vmem:[#allocation425_spill] sm:$0xff]  ;;  %v8824_v42 = vld [vmem:[%s15129_s0 + $0x100] sm:$0xff] }
 0x5dc   :  { %8485 = vst.msk [vmem:[%s15138_s10 + $0xe0] sm:$0xff] %vm17457_vm1, %v8421_v38  ;;  %v8088_v12 = vpop.f32.mrf.mxu2  ;;  %v7107_v17 = vsel %vm7047_vm13, %v7042_v6, %v6329_v9  ;;  %v6913_v55 = vsel %vm17472_vm4, %v6849_v62, %v17471_v43  ;;  %v6768_v22 = vsel %vm17474_vm10, %v6703_v35, %v17473_v56  ;;  %vm17476_vm0 = vmmov %vm17470_vm5 }
 0x5dd   :  { %v6043_v49 = vpop.permute.xlu0 %6042  ;;  %v8226_v41 = vmul.f32 %v14300_v26, %v8088_v12  ;;  %v6833_v30 = vsel %vm17476_vm0, %v6768_v22, %v17475_v27  ;;  %vm17483_vm8 = vmmov %vm17468_vm7 }
 0x5de   :  { %v6897_v14 = vsel %vm17457_vm1, %v6833_v30, %v17477_v51  ;;  %vm17486_vm5 = vmmov %vm17474_vm10 }
 0x5df   :  { %v8294_v46 = vadd.f32 %v14348_v7, %v8226_v41  ;;  %v6962_v47 = vsel %vm6917_vm15, %v6897_v14, %v14528_v45  ;;  %v14640_v45 = vld [vmem:[%s15133_s5] ss:$0 sm:$0xff]  ;;  %vm17488_vm4 = vmmov %vm17476_vm0 }
 0x5e0   :  { %v6045_v59 = vpop.permute.xlu2 %6044  ;;  %v7027_v38 = vsel %vm6982_vm6, %v6962_v47, %v6043_v49  ;;  %v14650_v41 = vld [vmem:[%s15134_s6] ss:$0 sm:$0xff]  ;;  %vm17490_vm10 = vmmov %vm17457_vm1 }
 0x5e1   :  { %v8358_v25 = vadd.f32 %v8819_v28, %v8294_v46  ;;  %v7092_v0 = vsel %vm7047_vm13, %v7027_v38, %v14554_v10  ;;  %v8823_v46 = vld [vmem:[%s15129_s0 + $0xf8] sm:$0xff]  ;;  %vm17492_vm0 = vmmov %vm17483_vm8 }
 0x5e2   :  { %v6585_v20 = vpop.permute.xlu1 %6584 }
 0x5e3   :  { %v8422_v37 = vmax.f32 %v8358_v25, 0.0  ;;  %v7172_v58 = vsel %vm7112_vm11, %v7107_v17, %v6585_v20  ;;  %v17482_v20 = vld [vmem:[#allocation419_spill] sm:$0xff] }
 0x5e4   :  { %8649 = vmatmul.msk.f32.gmra.mxu3 %vm17460_vm2, %v7172_v58  ;;  %vm17479_vm2 = vmmov %vm17457_vm1  ;;  %v6704_v17 = vsel %vm17483_vm8, %v17219_v31, %v17482_v20 }
 0x5e5   :  { %v6075_v2 = vpop.permute.xlu0 %6074  ;;  %8486 = vst.msk [vmem:[%s15138_s10 + $0xe8] sm:$0xff] %vm17463_vm12, %v8422_v37  ;;  %vm17481_vm12 = vmmov %vm17468_vm7 }
 0x5e6   :  { %vm17484_vm7 = vmmov %vm17457_vm1 }
 0x5e7   :  { %v8091_v63 = vpop.f32.mrf.mxu2  ;;  %vm17494_vm1 = vmmov %vm17486_vm5 }
 0x5e8   :  { %v8227_v19 = vmul.f32 %v14300_v26, %v8091_v63  ;;  %v6077_v8 = vpop.permute.xlu2 %6076  ;;  %vm17500_vm8 = vmmov %vm17492_vm0 }
 0x5ea   :  { %v5819_v54 = vpop.permute.xlu1 %5818  ;;  %v8295_v5 = vadd.f32 %v14348_v7, %v8227_v19  ;;  %v17491_v19 = vld [vmem:[#allocation200_spill] sm:$0xff] }
 0x5eb   :  { %v6978_v23 = vsel %vm6917_vm15, %v6913_v55, %v5819_v54  ;;  %v6720_v43 = vsel %vm17492_vm0, %v17233_v15, %v17491_v19  ;;  %v17493_v55 = vld [vmem:[#allocation228_spill] sm:$0xff] }
 0x5ec   :  { %v7043_v9 = vsel %vm6982_vm6, %v6978_v23, %v6075_v2  ;;  %v8359_v48 = vadd.f32 %v8820_v3, %v8295_v5  ;;  %v17485_v2 = vld [vmem:[#allocation414_spill] sm:$0xff]  ;;  %v6785_v54 = vsel %vm17494_vm1, %v6720_v43, %v17493_v55 }
 0x5ed   :  { %v6587_v11 = vpop.permute.xlu0 %6586  ;;  %v7108_v29 = vsel %vm7047_vm13, %v7043_v9, %v6331_v50  ;;  %v6769_v44 = vsel %vm17486_vm5, %v6704_v17, %v17485_v2  ;;  %vm17505_vm5 = vmmov %vm17494_vm1  ;;  %v17521_v55 = vld [vmem:[#allocation218_spill] sm:$0xff] }
 0x5ee   :  { %v7173_v39 = vsel %vm7112_vm11, %v7108_v29, %v6587_v11  ;;  %v8423_v57 = vmax.f32 %v8359_v48, 0.0  ;;  %v6834_v40 = vsel %vm17488_vm4, %v6769_v44, %v17487_v61  ;;  %v17496_v11 = vld [vmem:[#allocation224_spill] sm:$0xff] }
 0x5ef   :  { %8650 = vmatmul.msk.f32.gmra.mxu3 %vm17478_vm3, %v7173_v39  ;;  %v8094_v60 = vpop.f32.mrf.mxu2  ;;  %v6898_v31 = vsel %vm17490_vm10, %v6834_v40, %v17489_v1  ;;  %vm17495_vm3 = vmmov %vm17479_vm2  ;;  %v17513_v40 = vld [vmem:[#allocation229_spill] sm:$0xff]  ;;  %v17514_v1 = vld [vmem:[#allocation106_spill] sm:$0xff] }
 0x5f0   :  { %8487 = vst.msk [vmem:[%s15138_s10 + $0xf0] sm:$0xff] %vm17479_vm2, %v8423_v57  ;;  %v8228_v32 = vmul.f32 %v14300_v26, %v8094_v60  ;;  %v6589_v58 = vpop.permute.xlu2 %6588  ;;  %vm17497_vm2 = vmmov %vm17488_vm4  ;;  %v17501_v60 = vld [vmem:[#allocation409_spill] sm:$0xff] }
 0x5f1   :  { %v7510_v33 = vpop.f32.mrf.mxu1  ;;  %v6850_v51 = vsel %vm17497_vm2, %v6785_v54, %v17496_v11  ;;  %vm17506_vm4 = vmmov %vm17480_vm9  ;;  %v17528_v11 = vld [vmem:[#allocation426_spill] sm:$0xff] }
 0x5f2   :  { %v7630_v49 = vmul.f32 %v14640_v45, %v7510_v33  ;;  %v6555_v12 = vpop.permute.xlu1 %6554  ;;  %v8296_v34 = vadd.f32 %v14348_v7, %v8228_v32  ;;  %v17502_v32 = vsel %vm17394_vm14, %v17263_v24, 0.0  ;;  %vm17508_vm10 = vmmov %vm17497_vm2  ;;  %v17509_v24 = vld [vmem:[#allocation124_spill] sm:$0xff] }
 0x5f3   :  { %v7157_v50 = vsel %vm7112_vm11, %v7092_v0, %v6555_v12  ;;  %vm17510_vm14 = vmmov %vm17495_vm3 }
 0x5f4   :  { %v7698_v36 = vadd.f32 %v14650_v41, %v7630_v49  ;;  %8634 = vmatmul.msk.f32.gmra.mxu1 %vm17480_vm9, %v7157_v50  ;;  %v8360_v28 = vadd.f32 %v8823_v46, %v8296_v34  ;;  %v17504_v34 = vld [vmem:[#allocation422_spill] sm:$0xff]  ;;  %v17507_v46 = vld [vmem:[#allocation415_spill] sm:$0xff]  ;;  %vm17512_vm1 = vmmov %vm17506_vm4 }
 0x5f5   :  { %v5821_v6 = vpop.permute.xlu0 %5820 }
 0x5f6   :  { %v7762_v10 = vmax.f32 %v7698_v36, 0.0  ;;  %v8424_v25 = vmax.f32 %v8360_v28, 0.0 }
 0x5f8   :  { %8693 = vmatmul.msk.f32.gmra.mxu2 %vm17481_vm12, %v7762_v10  ;;  %8488 = vst.msk [vmem:[%s15138_s10 + $0xf8] sm:$0xff] %vm17484_vm7, %v8424_v25  ;;  %v5823_v14 = vpop.permute.xlu2 %5822  ;;  %vm17499_vm12 = vmmov %vm17495_vm3  ;;  %v8825_v10 = vld [vmem:[%s15129_s0 + $0x108] sm:$0xff] }
 0x5f9   :  { %vm17503_vm7 = vmmov %vm17492_vm0 }
 0x5fa   :  { %v5789_v37 = vpop.permute.xlu1 %5788  ;;  %v6705_v33 = vsel %vm17503_vm7, %v17502_v32, %v17501_v60  ;;  %vm17511_vm0 = vmmov %vm17495_vm3 }
 0x5fb   :  { %v8097_v13 = vpop.f32.mrf.mxu2  ;;  %v6963_v63 = vsel %vm6917_vm15, %v6898_v31, %v5789_v37  ;;  %v6770_v50 = vsel %vm17505_vm5, %v6705_v33, %v17504_v34  ;;  %vm17517_vm2 = vmmov %vm17503_vm7 }
 0x5fc   :  { %v8229_v52 = vmul.f32 %v14300_v26, %v8097_v13  ;;  %v7028_v5 = vsel %vm6982_vm6, %v6963_v63, %v6045_v59  ;;  %v17498_v59 = vld [vmem:[#allocation45_spill] sm:$0xff]  ;;  %v6835_v18 = vsel %vm17508_vm10, %v6770_v50, %v17507_v46  ;;  %vm17524_vm7 = vmmov %vm17508_vm10 }
 0x5fd   :  { %v6557_v4 = vpop.permute.xlu0 %6556  ;;  %v6914_v48 = vsel %vm17499_vm12, %v6850_v51, %v17498_v59  ;;  %v6899_v28 = vsel %vm17510_vm14, %v6835_v18, %v17509_v24  ;;  %vm17520_vm12 = vmmov %vm17517_vm2  ;;  %v17530_v59 = vld [vmem:[#allocation190_spill] sm:$0xff]  ;;  %v17536_v18 = vld [vmem:[#allocation251_spill] sm:$0xff] }
 0x5fe   :  { %v8297_v35 = vadd.f32 %v14348_v7, %v8229_v52  ;;  %v6979_v29 = vsel %vm6917_vm15, %v6914_v48, %v5821_v6  ;;  %vm17529_vm10 = vmmov %vm17524_vm7 }
 0x5ff   :  { %v7044_v38 = vsel %vm6982_vm6, %v6979_v29, %v6077_v8  ;;  %vm17531_vm14 = vmmov %vm17511_vm0 }
 0x600   :  { %v8361_v62 = vadd.f32 %v8824_v42, %v8297_v35  ;;  %v6559_v8 = vpop.permute.xlu2 %6558 }
 0x602   :  { %v8425_v56 = vmax.f32 %v8361_v62, 0.0  ;;  %v6301_v22 = vpop.permute.xlu1 %6300  ;;  %v7513_v23 = vpop.f32.mrf.mxu1  ;;  %v17518_v62 = vld [vmem:[#allocation420_spill] sm:$0xff] }
 0x603   :  { %v7093_v27 = vsel %vm7047_vm13, %v7028_v5, %v6301_v22  ;;  %v7631_v30 = vmul.f32 %v14640_v45, %v7513_v23  ;;  %v17523_v22 = vld [vmem:[#allocation255_spill] sm:$0xff] }
 0x604   :  { %8489 = vst.msk [vmem:[%s15138_s10 + $0x100] sm:$0xff] %vm17495_vm3, %v8425_v56  ;;  %v7158_v15 = vsel %vm7112_vm11, %v7093_v27, %v6557_v4  ;;  %vm17515_vm3 = vnez %v17514_v1 }
 0x605   :  { %v5791_v9 = vpop.permute.xlu0 %5790  ;;  %v7699_v3 = vadd.f32 %v14650_v41, %v7631_v30  ;;  %8635 = vmatmul.msk.f32.gmra.mxu1 %vm17480_vm9, %v7158_v15  ;;  %v17516_v31 = vsel %vm17515_vm3, %v17273_v53, 0.0  ;;  %vm17519_vm9 = vmmov %vm17517_vm2  ;;  %v17525_v53 = vld [vmem:[#allocation412_spill] sm:$0xff]  ;;  %v17526_v30 = vld [vmem:[#allocation29_spill] sm:$0xff] }
 0x606   :  { %v6964_v20 = vsel %vm6917_vm15, %v6899_v28, %v5791_v9  ;;  %v6721_v35 = vsel %vm17517_vm2, %v17516_v31, %v17513_v40  ;;  %v6706_v19 = vsel %vm17519_vm9, %v17300_v16, %v17518_v62  ;;  %vm17537_vm9 = vmmov %vm17505_vm5  ;;  %v17538_v28 = vld [vmem:[#allocation267_spill] sm:$0xff] }
 0x607   :  { %v7763_v47 = vmax.f32 %v7699_v3, 0.0  ;;  %v6771_v27 = vsel %vm17505_vm5, %v6706_v19, %v17525_v53 }
 0x608   :  { %v5793_v42 = vpop.permute.xlu2 %5792  ;;  %v6836_v16 = vsel %vm17529_vm10, %v6771_v27, %v17528_v11 }
 0x609   :  { %8694 = vmatmul.msk.f32.gmra.mxu2 %vm17500_vm8, %v7763_v47  ;;  %vm17522_vm8 = vmmov %vm17505_vm5  ;;  %v6900_v48 = vsel %vm17531_vm14, %v6836_v16, %v17530_v59 }
 0x60a   :  { %v6333_v39 = vpop.permute.xlu1 %6332  ;;  %v6786_v54 = vsel %vm17522_vm8, %v6721_v35, %v17521_v55  ;;  %v6965_v47 = vsel %vm6917_vm15, %v6900_v48, %v5793_v42  ;;  %vm17547_vm5 = vmmov %vm17517_vm2 }
 0x60b   :  { %v7109_v57 = vsel %vm7047_vm13, %v7044_v38, %v6333_v39  ;;  %v6851_v5 = vsel %vm17524_vm7, %v6786_v54, %v17523_v22  ;;  %v8827_v22 = vld [vmem:[%s15129_s0 + $0x118] sm:$0xff]  ;;  %vm17550_vm14 = vmmov %vm17517_vm2 }
 0x60c   :  { %v8100_v12 = vpop.f32.mrf.mxu2  ;;  %v7174_v0 = vsel %vm7112_vm11, %v7109_v57, %v6589_v58  ;;  %v8826_v57 = vld [vmem:[%s15129_s0 + $0x110] sm:$0xff] }
 0x60d   :  { %v6303_v49 = vpop.permute.xlu0 %6302  ;;  %v8230_v36 = vmul.f32 %v14300_v26, %v8100_v12  ;;  %8651 = vmatmul.msk.f32.gmra.mxu3 %vm17506_vm4, %v7174_v0  ;;  %vm17527_vm4 = vmmov %vm17511_vm0 }
 0x60e   :  { %v6915_v9 = vsel %vm17527_vm4, %v6851_v5, %v17526_v30 }
 0x60f   :  { %v8298_v6 = vadd.f32 %v14348_v7, %v8230_v36  ;;  %v6980_v51 = vsel %vm6917_vm15, %v6915_v9, %v5823_v14  ;;  %v14771_v36 = vpop.f32.mrf.mxu3 }
 0x610   :  { %v6305_v33 = vpop.permute.xlu2 %6304 }
 0x611   :  { %v8362_v25 = vadd.f32 %v8825_v10, %v8298_v6 }
 0x612   :  { %v6047_v17 = vpop.permute.xlu1 %6046 }
 0x613   :  { %v8426_v37 = vmax.f32 %v8362_v25, 0.0  ;;  %v7029_v58 = vsel %vm6982_vm6, %v6964_v20, %v6047_v17  ;;  %v7516_v13 = vpop.f32.mrf.mxu1  ;;  %v17540_v25 = vld [vmem:[#allocation12_spill] sm:$0xff] }
 0x614   :  { %v7094_v2 = vsel %vm7047_vm13, %v7029_v58, %v6303_v49  ;;  %v7632_v44 = vmul.f32 %v14640_v45, %v7516_v13 }
 0x615   :  { %v6335_v52 = vpop.permute.xlu0 %6334  ;;  %8490 = vst.msk [vmem:[%s15138_s10 + $0x108] sm:$0xff] %vm17511_vm0, %v8426_v37  ;;  %v7159_v4 = vsel %vm7112_vm11, %v7094_v2, %v6559_v8  ;;  %vm17532_vm0 = vmmov %vm17512_vm1  ;;  %v17535_v8 = vld [vmem:[#allocation250_spill] sm:$0xff] }
 0x616   :  { %v7700_v61 = vadd.f32 %v14650_v41, %v7632_v44  ;;  %8636 = vmatmul.msk.f32.gmra.mxu1 %vm17512_vm1, %v7159_v4  ;;  %vm17533_vm1 = vmmov %vm17527_vm4  ;;  %v6722_v6 = vsel %vm17517_vm2, %v17314_v21, %v17535_v8 }
 0x617   :  { %vm17534_vm3 = vmmov %vm17532_vm0  ;;  %v6787_v24 = vsel %vm17537_vm9, %v6722_v6, %v17536_v18  ;;  %v7543_v37 = vpop.f32.mrf.mxu3 }
 0x618   :  { %v7764_v63 = vmax.f32 %v7700_v61, 0.0  ;;  %vm17541_vm8 = vmmov %vm17533_vm1  ;;  %v6593_v2 = vpop.permute.xlu2 %6592  ;;  %v7641_v4 = vmul.f32 %v14640_v45, %v7543_v37 }
 0x619   :  { %vm17548_vm4 = vmmov %vm17517_vm2 }
 0x61a   :  { %v8773_v43 = vpop.permute.xlu1 %8772  ;;  %8695 = vmatmul.msk.f32.gmra.mxu2 %vm17520_vm12, %v7764_v63  ;;  %vm17539_vm12 = vmmov %vm17524_vm7  ;;  %v7709_v35 = vadd.f32 %v14650_v41, %v7641_v4 }
 0x61b   :  { %v8774_v56 = vunpack.i.l.bf16 %v8773_v43  ;;  %v6852_v10 = vsel %vm17539_vm12, %v6787_v24, %v17538_v28  ;;  %v8775_v58 = vunpack.i.h.bf16 %v8773_v43  ;;  %vm17542_vm7 = vmmov %vm17532_vm0 }
 0x61c   :  { %v6916_v20 = vsel %vm17541_vm8, %v6852_v10, %v17540_v25  ;;  %v7773_v42 = vmax.f32 %v7709_v35, 0.0  ;;  %vm17549_vm10 = vmmov %vm17533_vm1 }
 0x61d   :  { %v6049_v23 = vpop.permute.xlu0 %6048  ;;  %v8103_v15 = vpop.f32.mrf.mxu2  ;;  %v7045_v29 = vsel %vm6982_vm6, %v6980_v51, %v8774_v56 }
 0x61e   :  { %v8231_v3 = vmul.f32 %v14300_v26, %v8103_v15  ;;  %v7030_v38 = vsel %vm6982_vm6, %v6965_v47, %v6049_v23  ;;  %v7110_v14 = vsel %vm7047_vm13, %v7045_v29, %v6335_v52 }
 0x61f   :  { %v7095_v34 = vsel %vm7047_vm13, %v7030_v38, %v6305_v33  ;;  %v7546_v63 = vpop.f32.mrf.mxu3 }
 0x620   :  { %v8299_v39 = vadd.f32 %v14348_v7, %v8231_v3  ;;  %v7642_v62 = vmul.f32 %v14640_v45, %v7546_v63 }
 0x622   :  { %v8363_v60 = vadd.f32 %v8826_v57, %v8299_v39  ;;  %v6591_v32 = vpop.permute.xlu1 %6590  ;;  %v7710_v54 = vadd.f32 %v14650_v41, %v7642_v62  ;;  %v8828_v57 = vld [vmem:[%s15129_s0 + $0x120] sm:$0xff] }
 0x623   :  { %v7175_v49 = vsel %vm7112_vm11, %v7110_v14, %v6591_v32 }
 0x624   :  { %v8427_v12 = vmax.f32 %v8363_v60, 0.0  ;;  %8652 = vmatmul.msk.f32.gmra.mxu3 %vm17532_vm0, %v7175_v49  ;;  %v7774_v27 = vmax.f32 %v7710_v54, 0.0  ;;  %vm17551_vm0 = vmmov %vm17517_vm2 }
 0x625   :  { %v6561_v0 = vpop.permute.xlu0 %6560  ;;  %vm17555_vm9 = vmmov %vm17551_vm0 }
 0x626   :  { %v7160_v50 = vsel %vm7112_vm11, %v7095_v34, %v6561_v0  ;;  %8491 = vst.msk [vmem:[%s15138_s10 + $0x110] sm:$0xff] %vm17533_vm1, %v8427_v12  ;;  %vm17556_vm12 = vmmov %vm17551_vm0 }
 0x627   :  { %8637 = vmatmul.msk.f32.gmra.mxu1 %vm17534_vm3, %v7160_v50  ;;  %v7549_v56 = vpop.f32.mrf.mxu3  ;;  %vm17553_vm3 = vmmov %vm17551_vm0 }
 0x628   :  { %v7643_v30 = vmul.f32 %v14640_v45, %v7549_v56 }
 0x62a   :  { %v5825_v46 = vpop.permute.xlu1 %5824  ;;  %v7711_v11 = vadd.f32 %v14650_v41, %v7643_v30 }
 0x62b   :  { %v6981_v17 = vsel %vm6917_vm15, %v6916_v20, %v5825_v46  ;;  %vm17543_vm15 = vmmov %vm17517_vm2  ;;  %v8829_v20 = vld [vmem:[%s15129_s0 + $0x128] sm:$0xff] }
 0x62c   :  { %v7046_v21 = vsel %vm6982_vm6, %v6981_v17, %v8775_v58  ;;  %vm17544_vm6 = vmmov %vm17517_vm2  ;;  %v7775_v3 = vmax.f32 %v7711_v11, 0.0 }
 0x62f   :  { %v7552_v51 = vpop.f32.mrf.mxu3 }
 0x630   :  { %v7644_v59 = vmul.f32 %v14640_v45, %v7552_v51 }
 0x631   :  { %v7519_v13 = vpop.f32.mrf.mxu1 }
 0x632   :  { %v7633_v44 = vmul.f32 %v14640_v45, %v7519_v13  ;;  %v6337_v52 = vpop.permute.xlu1 %6336  ;;  %v7712_v47 = vadd.f32 %v14650_v41, %v7644_v59 }
 0x633   :  { %v7111_v61 = vsel %vm7047_vm13, %v7046_v21, %v6337_v52  ;;  %vm17546_vm13 = vmmov %vm17517_vm2 }
 0x634   :  { %v7701_v40 = vadd.f32 %v14650_v41, %v7633_v44  ;;  %v7176_v1 = vsel %vm7112_vm11, %v7111_v61, %v6593_v2  ;;  %vm17545_vm11 = vmmov %vm17533_vm1  ;;  %v7776_v32 = vmax.f32 %v7712_v47, 0.0 }
 0x635   :  { %8653 = vmatmul.msk.f32.gmra.mxu3 %vm17542_vm7, %v7176_v1  ;;  %vm17552_vm1 = vmmov %vm17551_vm0 }
 0x636   :  { %v7765_v31 = vmax.f32 %v7701_v40, 0.0  ;;  %vm17554_vm2 = vmmov %vm17541_vm8 }
 0x637   :  { %v7555_v38 = vpop.f32.mrf.mxu3  ;;  %vm17557_vm8 = vmmov %vm17551_vm0 }
 0x638   :  { %8696 = vmatmul.msk.f32.gmra.mxu2 %vm17543_vm15, %v7765_v31  ;;  %v7645_v14 = vmul.f32 %v14640_v45, %v7555_v38  ;;  %vm17558_vm7 = vmmov %vm17551_vm0 }
 0x639   :  { %vm17559_vm15 = vmmov %vm17554_vm2 }
 0x63a   :  { %v7713_v34 = vadd.f32 %v14650_v41, %v7645_v14  ;;  %v8831_v14 = vld [vmem:[%s15129_s0 + $0x138] sm:$0xff] }
 0x63b   :  { %v8106_v19 = vpop.f32.mrf.mxu2 }
 0x63c   :  { %v8232_v43 = vmul.f32 %v14300_v26, %v8106_v19  ;;  %v7777_v6 = vmax.f32 %v7713_v34, 0.0 }
 0x63d   :  { %8704 = vmatmul.msk.f32.vlgmr.msra.gmra.mxu3 %vm17544_vm6, %v7773_v42  ;;  %vm17560_vm6 = vmmov %vm17551_vm0 }
 0x63e   :  { %v8300_v55 = vadd.f32 %v14348_v7, %v8232_v43 }
 0x63f   :  { %v7558_v50 = vpop.f32.mrf.mxu3 }
 0x640   :  { %v8364_v5 = vadd.f32 %v8827_v22, %v8300_v55  ;;  %v7646_v46 = vmul.f32 %v14640_v45, %v7558_v50 }
 0x642   :  { %v8428_v23 = vmax.f32 %v8364_v5, 0.0  ;;  %v7522_v53 = vpop.f32.mrf.mxu1  ;;  %v7714_v28 = vadd.f32 %v14650_v41, %v7646_v46 }
 0x643   :  { %v7634_v9 = vmul.f32 %v14640_v45, %v7522_v53  ;;  %v8830_v53 = vld [vmem:[%s15129_s0 + $0x130] sm:$0xff] }
 0x644   :  { %8492 = vst.msk [vmem:[%s15138_s10 + $0x118] sm:$0xff] %vm17545_vm11, %v8428_v23  ;;  %v7778_v37 = vmax.f32 %v7714_v28, 0.0  ;;  %vm17561_vm11 = vmmov %vm17551_vm0 }
 0x645   :  { %v7702_v15 = vadd.f32 %v14650_v41, %v7634_v9  ;;  %8705 = vmatmul.msk.f32.gmra.mxu3 %vm17546_vm13, %v7774_v27  ;;  %vm17562_vm13 = vmmov %vm17551_vm0 }
 0x647   :  { %v7766_v16 = vmax.f32 %v7702_v15, 0.0  ;;  %v7561_v10 = vpop.f32.mrf.mxu3 }
 0x648   :  { %v7647_v58 = vmul.f32 %v14640_v45, %v7561_v10 }
 0x649   :  { %8697 = vmatmul.msk.f32.gmra.mxu2 %vm17547_vm5, %v7766_v16  ;;  %vm17563_vm5 = vmmov %vm17554_vm2 }
 0x64a   :  { %v7715_v2 = vadd.f32 %v14650_v41, %v7647_v58 }
 0x64c   :  { %v8109_v48 = vpop.f32.mrf.mxu2  ;;  %v7779_v52 = vmax.f32 %v7715_v2, 0.0 }
 0x64d   :  { %v8233_v29 = vmul.f32 %v14300_v26, %v8109_v48  ;;  %8706 = vmatmul.msk.f32.gmra.mxu3 %vm17548_vm4, %v7775_v3  ;;  %vm17564_vm4 = vmmov %vm17551_vm0 }
 0x64f   :  { %v8301_v39 = vadd.f32 %v14348_v7, %v8233_v29  ;;  %v7564_v44 = vpop.f32.mrf.mxu3 }
 0x650   :  { %v7648_v21 = vmul.f32 %v14640_v45, %v7564_v44  ;;  %v7640_v44 = vmul.f32 %v14640_v45, %v14771_v36 }
 0x651   :  { %v8365_v60 = vadd.f32 %v8828_v57, %v8301_v39 }
 0x652   :  { %v7716_v4 = vadd.f32 %v14650_v41, %v7648_v21 }
 0x653   :  { %v8429_v33 = vmax.f32 %v8365_v60, 0.0  ;;  %v7525_v49 = vpop.f32.mrf.mxu1 }
 0x654   :  { %v7635_v12 = vmul.f32 %v14640_v45, %v7525_v49  ;;  %v7780_v31 = vmax.f32 %v7716_v4, 0.0 }
 0x655   :  { %8493 = vst.msk [vmem:[%s15138_s10 + $0x120] sm:$0xff] %vm17549_vm10, %v8429_v33  ;;  %8707 = vmatmul.msk.f32.gmra.mxu3 %vm17550_vm14, %v7776_v32  ;;  %vm17565_vm10 = vmmov %vm17551_vm0 }
 0x656   :  { %v7703_v0 = vadd.f32 %v14650_v41, %v7635_v12  ;;  %vm17566_vm14 = vmmov %vm17551_vm0 }
 0x657   :  { %v7567_v61 = vpop.f32.mrf.mxu3 }
 0x658   :  { %v7767_v8 = vmax.f32 %v7703_v0, 0.0  ;;  %v7649_v35 = vmul.f32 %v14640_v45, %v7567_v61  ;;  %v7708_v61 = vadd.f32 %v14650_v41, %v7640_v44  ;;  %v8843_v44 = vld [vmem:[%s15129_s0 + $0x1b0] sm:$0xff] }
 0x65a   :  { %8698 = vmatmul.msk.f32.gmra.mxu2 %vm17551_vm0, %v7767_v8  ;;  %v7717_v62 = vadd.f32 %v14650_v41, %v7649_v35  ;;  %vm17567_vm0 = vmmov %vm17554_vm2 }
 0x65c   :  { %v7781_v43 = vmax.f32 %v7717_v62, 0.0 }
 0x65d   :  { %v8112_v18 = vpop.f32.mrf.mxu2  ;;  %8708 = vmatmul.msk.f32.gmra.mxu3 %vm17552_vm1, %v7777_v6 }
 0x65e   :  { %v8234_v24 = vmul.f32 %v14300_v26, %v8112_v18 }
 0x65f   :  { %v7570_v19 = vpop.f32.mrf.mxu3 }
 0x660   :  { %v8302_v25 = vadd.f32 %v14348_v7, %v8234_v24  ;;  %v7650_v55 = vmul.f32 %v14640_v45, %v7570_v19 }
 0x662   :  { %v8366_v17 = vadd.f32 %v8829_v20, %v8302_v25  ;;  %v7718_v5 = vadd.f32 %v14650_v41, %v7650_v55  ;;  %v8832_v25 = vld [vmem:[%s15129_s0 + $0x140] sm:$0xff] }
 0x664   :  { %v8430_v13 = vmax.f32 %v8366_v17, 0.0  ;;  %v7782_v15 = vmax.f32 %v7718_v5, 0.0 }
 0x665   :  { %8709 = vmatmul.msk.f32.gmra.mxu3 %vm17553_vm3, %v7778_v37  ;;  %vm17568_vm3 = vmmov %vm17552_vm1 }
 0x666   :  { %8494 = vst.msk [vmem:[%s15138_s10 + $0x128] sm:$0xff] %vm17554_vm2, %v8430_v13  ;;  %vm17569_vm2 = vmmov %vm17552_vm1 }
 0x667   :  { %v7573_v23 = vpop.f32.mrf.mxu3 }
 0x668   :  { %v7651_v11 = vmul.f32 %v14640_v45, %v7573_v23 }
 0x66a   :  { %v7719_v3 = vadd.f32 %v14650_v41, %v7651_v11 }
 0x66c   :  { %v7783_v29 = vmax.f32 %v7719_v3, 0.0 }
 0x66d   :  { %8710 = vmatmul.msk.f32.gmra.mxu3 %vm17555_vm9, %v7779_v52  ;;  %vm17570_vm9 = vmmov %vm17552_vm1 }
 0x671   :  { %v7528_v40 = vpop.f32.mrf.mxu1 }
 0x672   :  { %v7636_v1 = vmul.f32 %v14640_v45, %v7528_v40  ;;  %v7576_v48 = vpop.f32.mrf.mxu3 }
 0x673   :  { %v7652_v47 = vmul.f32 %v14640_v45, %v7576_v48 }
 0x674   :  { %v7704_v63 = vadd.f32 %v14650_v41, %v7636_v1  ;;  %v7772_v1 = vmax.f32 %v7708_v61, 0.0 }
 0x675   :  { %8711 = vmatmul.msk.f32.gmra.mxu3 %vm17556_vm12, %v7780_v31  ;;  %v7720_v57 = vadd.f32 %v14650_v41, %v7652_v47  ;;  %vm17571_vm12 = vmmov %vm17567_vm0 }
 0x676   :  { %v7768_v42 = vmax.f32 %v7704_v63, 0.0 }
 0x677   :  { %v7784_v49 = vmax.f32 %v7720_v57, 0.0  ;;  %v8838_v57 = vld [vmem:[%s15129_s0 + $0x198] sm:$0xff] }
 0x678   :  { %8699 = vmatmul.msk.f32.gmra.mxu2 %vm17557_vm8, %v7768_v42  ;;  %vm17572_vm8 = vmmov %vm17567_vm0 }
 0x67b   :  { %v8115_v54 = vpop.f32.mrf.mxu2 }
 0x67c   :  { %v8235_v56 = vmul.f32 %v14300_v26, %v8115_v54 }
 0x67d   :  { %8712 = vmatmul.msk.f32.gmra.mxu3 %vm17558_vm7, %v7781_v43  ;;  %v8833_v43 = vld [vmem:[%s15129_s0 + $0x148] sm:$0xff]  ;;  %vm17573_vm7 = vmmov %vm17567_vm0 }
 0x67e   :  { %v8303_v22 = vadd.f32 %v14348_v7, %v8235_v56 }
 0x680   :  { %v8367_v27 = vadd.f32 %v8830_v53, %v8303_v22 }
 0x682   :  { %v8431_v30 = vmax.f32 %v8367_v27, 0.0  ;;  %v7531_v9 = vpop.f32.mrf.mxu1 }
 0x683   :  { %v7637_v16 = vmul.f32 %v14640_v45, %v7531_v9 }
 0x684   :  { %8495 = vst.msk [vmem:[%s15138_s10 + $0x130] sm:$0xff] %vm17559_vm15, %v8431_v30  ;;  %vm17574_vm15 = vmmov %vm17567_vm0 }
 0x685   :  { %v7705_v51 = vadd.f32 %v14650_v41, %v7637_v16  ;;  %8713 = vmatmul.msk.f32.gmra.mxu3 %vm17560_vm6, %v7782_v15  ;;  %v8835_v15 = vld [vmem:[%s15129_s0 + $0x190] sm:$0xff]  ;;  %v14937_v16 = vld [vmem:[%s15136_s8] ss:$0 sm:$0xff]  ;;  %vm17575_vm6 = vmmov %vm17567_vm0 }
 0x687   :  { %v7769_v59 = vmax.f32 %v7705_v51, 0.0 }
 0x689   :  { %8700 = vmatmul.msk.f32.gmra.mxu2 %vm17561_vm11, %v7769_v59  ;;  %vm17576_vm11 = vmmov %vm17567_vm0 }
 0x68c   :  { %v8118_v39 = vpop.f32.mrf.mxu2 }
 0x68d   :  { %v8236_v38 = vmul.f32 %v14300_v26, %v8118_v39  ;;  %8714 = vmatmul.msk.f32.gmra.mxu3 %vm17562_vm13, %v7783_v29  ;;  %vm17577_vm13 = vmmov %vm17567_vm0 }
 0x68f   :  { %v8304_v60 = vadd.f32 %v14348_v7, %v8236_v38 }
 0x690   :  { %v7579_v32 = vpop.f32.mrf.mxu3 }
 0x691   :  { %v8368_v33 = vadd.f32 %v8831_v14, %v8304_v60  ;;  %v7653_v0 = vmul.f32 %v14640_v45, %v7579_v32 }
 0x693   :  { %v8432_v12 = vmax.f32 %v8368_v33, 0.0  ;;  %v7534_v34 = vpop.f32.mrf.mxu1  ;;  %v7721_v6 = vadd.f32 %v14650_v41, %v7653_v0 }
 0x694   :  { %v7638_v50 = vmul.f32 %v14640_v45, %v7534_v34 }
 0x695   :  { %8496 = vst.msk [vmem:[%s15138_s10 + $0x138] sm:$0xff] %vm17563_vm5, %v8432_v12  ;;  %8715 = vmatmul.msk.f32.gmra.mxu3 %vm17564_vm4, %v7784_v49  ;;  %v7785_v18 = vmax.f32 %v7721_v6, 0.0  ;;  %v8839_v12 = vld [vmem:[%s15129_s0 + $0x1a0] sm:$0xff]  ;;  %vm17578_vm5 = vmmov %vm17567_vm0 }
 0x696   :  { %v7706_v8 = vadd.f32 %v14650_v41, %v7638_v50  ;;  %vm17579_vm4 = vmmov %vm17567_vm0 }
 0x698   :  { %v7770_v46 = vmax.f32 %v7706_v8, 0.0 }
 0x69a   :  { %8701 = vmatmul.msk.f32.gmra.mxu2 %vm17565_vm10, %v7770_v46  ;;  %vm17580_vm10 = vmmov %vm17567_vm0 }
 0x69d   :  { %v8121_v24 = vpop.f32.mrf.mxu2  ;;  %8716 = vmatmul.msk.f32.gmra.mxu3 %vm17566_vm14, %v7785_v18  ;;  %vm17581_vm14 = vmmov %vm17567_vm0 }
 0x69e   :  { %v8237_v28 = vmul.f32 %v14300_v26, %v8121_v24  ;;  %v8840_v24 = vld [vmem:[%s15129_s0 + $0x158] sm:$0xff] }
 0x6a0   :  { %v8305_v10 = vadd.f32 %v14348_v7, %v8237_v28 }
 0x6a2   :  { %v8369_v20 = vadd.f32 %v8832_v25, %v8305_v10  ;;  %v14979_v10 = vld [vmem:[%s15137_s9] ss:$0 sm:$0xff] }
 0x6a4   :  { %v7537_v17 = vpop.f32.mrf.mxu1  ;;  %v8433_v37 = vmax.f32 %v8369_v20, 0.0  ;;  %v8842_v20 = vld [vmem:[%s15129_s0 + $0x1a8] sm:$0xff] }
 0x6a5   :  { %v7639_v58 = vmul.f32 %v14640_v45, %v7537_v17 }
 0x6a6   :  { %8497 = vst.msk [vmem:[%s15138_s10 + $0x140] sm:$0xff] %vm17567_vm0, %v8433_v37 }
 0x6a7   :  { %v7707_v13 = vadd.f32 %v14650_v41, %v7639_v58  ;;  %v7582_v2 = vpop.f32.mrf.mxu3 }
 0x6a8   :  { %v7654_v21 = vmul.f32 %v14640_v45, %v7582_v2 }
 0x6a9   :  { %v7771_v52 = vmax.f32 %v7707_v13, 0.0 }
 0x6aa   :  { %v7722_v4 = vadd.f32 %v14650_v41, %v7654_v21 }
 0x6ab   :  { %8702 = vmatmul.msk.f32.gmra.mxu2 %vm17552_vm1, %v7771_v52  ;;  %vm17582_vm1 = vmmov %vm17567_vm0 }
 0x6ac   :  { %v7786_v40 = vmax.f32 %v7722_v4, 0.0 }
 0x6ae   :  { %8717 = vmatmul.msk.f32.gmra.mxu3 %vm17568_vm3, %v7786_v40  ;;  %vm17583_vm3 = vmmov %vm17567_vm0 }
 0x6b3   :  { %8703 = vmatmul.msk.f32.gmra.mxu2 %vm17569_vm2, %v7772_v1  ;;  %v8844_v1 = vld [vmem:[%s15129_s0 + $0x1b8] sm:$0xff]  ;;  %vm17584_vm2 = vmmov %vm17567_vm0 }
 0x6b8   :  { %v7585_v31 = vpop.f32.mrf.mxu3 }
 0x6b9   :  { %v7655_v35 = vmul.f32 %v14640_v45, %v7585_v31 }
 0x6bb   :  { %v7723_v36 = vadd.f32 %v14650_v41, %v7655_v35  ;;  %v8124_v63 = vpop.f32.mrf.mxu2  ;;  %v8834_v41 = vld [vmem:[%s15129_s0 + $0x188] sm:$0xff] }
 0x6bc   :  { %v8238_v42 = vmul.f32 %v14300_v26, %v8124_v63 }
 0x6bd   :  { %v7787_v62 = vmax.f32 %v7723_v36, 0.0 }
 0x6be   :  { %v8306_v19 = vadd.f32 %v14348_v7, %v8238_v42 }
 0x6bf   :  { %8718 = vmatmul.msk.f32.gmra.mxu3 %vm17570_vm9, %v7787_v62  ;;  %vm17585_vm9 = vmmov %vm17567_vm0 }
 0x6c0   :  { %v8370_v55 = vadd.f32 %v8833_v43, %v8306_v19  ;;  %v8148_v54 = vpop.f32.mrf.mxu3  ;;  %v8845_v43 = vld [vmem:[%s15129_s0 + $0x1c0] sm:$0xff] }
 0x6c1   :  { %v8246_v56 = vmul.f32 %v14300_v26, %v8148_v54 }
 0x6c2   :  { %v8434_v22 = vmax.f32 %v8370_v55, 0.0 }
 0x6c3   :  { %v8314_v45 = vadd.f32 %v14348_v7, %v8246_v56 }
 0x6c4   :  { %8498 = vst.msk [vmem:[%s15138_s10 + $0x148] sm:$0xff] %vm17571_vm12, %v8434_v22  ;;  %v8846_v22 = vld [vmem:[%s15129_s0 + $0x160] sm:$0xff]  ;;  %vm17586_vm12 = vmmov %vm17567_vm0 }
 0x6c5   :  { %v8378_v5 = vadd.f32 %v8834_v41, %v8314_v45 }
 0x6c7   :  { %v8442_v23 = vmax.f32 %v8378_v5, 0.0 }
 0x6c8   :  { %v8151_v53 = vpop.f32.mrf.mxu3 }
 0x6c9   :  { %8506 = vst.msk [vmem:[%s15138_s10 + $0x188] sm:$0xff] %vm17572_vm8, %v8442_v23  ;;  %v8247_v27 = vmul.f32 %v14300_v26, %v8151_v53  ;;  %v8837_v26 = vld [vmem:[%s15129_s0 + $0x150] sm:$0xff]  ;;  %vm17587_vm8 = vmmov %vm17567_vm0 }
 0x6cb   :  { %v8315_v30 = vadd.f32 %v14348_v7, %v8247_v27  ;;  %v8847_v27 = vld [vmem:[%s15129_s0 + $0x1c8] sm:$0xff] }
 0x6cc   :  { %v8127_v9 = vpop.f32.mrf.mxu2 }
 0x6cd   :  { %v8379_v11 = vadd.f32 %v8835_v15, %v8315_v30  ;;  %v8239_v51 = vmul.f32 %v14937_v16, %v8127_v9 }
 0x6cf   :  { %v8443_v3 = vmax.f32 %v8379_v11, 0.0  ;;  %v8307_v59 = vadd.f32 %v14348_v7, %v8239_v51 }
 0x6d0   :  { %v8154_v48 = vpop.f32.mrf.mxu3 }
 0x6d1   :  { %8507 = vst.msk [vmem:[%s15138_s10 + $0x190] sm:$0xff] %vm17573_vm7, %v8443_v3  ;;  %v8371_v29 = vadd.f32 %v8837_v26, %v8307_v59  ;;  %v8248_v47 = vmul.f32 %v14937_v16, %v8154_v48  ;;  %v8848_v59 = vld [vmem:[%s15129_s0 + $0x1d0] sm:$0xff]  ;;  %vm17588_vm7 = vmmov %vm17567_vm0 }
 0x6d3   :  { %v8435_v39 = vmax.f32 %v8371_v29, 0.0  ;;  %v8316_v38 = vadd.f32 %v14348_v7, %v8248_v47 }
 0x6d5   :  { %8499 = vst.msk [vmem:[%s15138_s10 + $0x150] sm:$0xff] %vm17574_vm15, %v8435_v39  ;;  %v8380_v60 = vadd.f32 %v8838_v57, %v8316_v38  ;;  %v8849_v38 = vld [vmem:[%s15129_s0 + $0x168] sm:$0xff]  ;;  %vm17589_vm15 = vmmov %vm17567_vm0 }
 0x6d7   :  { %v8444_v32 = vmax.f32 %v8380_v60, 0.0 }
 0x6d8   :  { %v8157_v14 = vpop.f32.mrf.mxu3 }
 0x6d9   :  { %8508 = vst.msk [vmem:[%s15138_s10 + $0x198] sm:$0xff] %vm17575_vm6, %v8444_v32  ;;  %v8249_v33 = vmul.f32 %v14937_v16, %v8157_v14  ;;  %vm17590_vm6 = vmmov %vm17567_vm0 }
 0x6db   :  { %v8317_v49 = vadd.f32 %v14348_v7, %v8249_v33  ;;  %v8850_v33 = vld [vmem:[%s15129_s0 + $0x1d8] sm:$0xff] }
 0x6dd   :  { %v8381_v0 = vadd.f32 %v8839_v12, %v8317_v49  ;;  %v8130_v34 = vpop.f32.mrf.mxu2 }
 0x6de   :  { %v8240_v50 = vmul.f32 %v14937_v16, %v8130_v34 }
 0x6df   :  { %v8445_v8 = vmax.f32 %v8381_v0, 0.0 }
 0x6e0   :  { %v8308_v6 = vadd.f32 %v14348_v7, %v8240_v50  ;;  %v8160_v46 = vpop.f32.mrf.mxu3 }
 0x6e1   :  { %8509 = vst.msk [vmem:[%s15138_s10 + $0x1a0] sm:$0xff] %vm17576_vm11, %v8445_v8  ;;  %v8250_v18 = vmul.f32 %v14937_v16, %v8160_v46  ;;  %v8851_v8 = vld [vmem:[%s15129_s0 + $0x1e0] sm:$0xff]  ;;  %vm17591_vm11 = vmmov %vm17567_vm0 }
 0x6e2   :  { %v8372_v28 = vadd.f32 %v8840_v24, %v8308_v6 }
 0x6e3   :  { %v8318_v7 = vadd.f32 %v14979_v10, %v8250_v18 }
 0x6e4   :  { %v8436_v25 = vmax.f32 %v8372_v28, 0.0 }
 0x6e5   :  { %v8382_v17 = vadd.f32 %v8842_v20, %v8318_v7  ;;  %v8852_v20 = vld [vmem:[%s15129_s0 + $0x170] sm:$0xff] }
 0x6e6   :  { %8500 = vst.msk [vmem:[%s15138_s10 + $0x158] sm:$0xff] %vm17577_vm13, %v8436_v25  ;;  %vm17592_vm13 = vmmov %vm17567_vm0 }
 0x6e7   :  { %v8446_v37 = vmax.f32 %v8382_v17, 0.0 }
 0x6e8   :  { %v8163_v58 = vpop.f32.mrf.mxu3 }
 0x6e9   :  { %8510 = vst.msk [vmem:[%s15138_s10 + $0x1a8] sm:$0xff] %vm17578_vm5, %v8446_v37  ;;  %v8251_v13 = vmul.f32 %v14937_v16, %v8163_v58 }
 0x6eb   :  { %v8319_v2 = vadd.f32 %v14979_v10, %v8251_v13  ;;  %v8853_v13 = vld [vmem:[%s15129_s0 + $0x1e8] sm:$0xff] }
 0x6ed   :  { %v8383_v52 = vadd.f32 %v8843_v44, %v8319_v2 }
 0x6ef   :  { %v8447_v21 = vmax.f32 %v8383_v52, 0.0 }
 0x6f0   :  { %v8166_v4 = vpop.f32.mrf.mxu3 }
 0x6f1   :  { %8511 = vst.msk [vmem:[%s15138_s10 + $0x1b0] sm:$0xff] %vm17579_vm4, %v8447_v21  ;;  %v8252_v61 = vmul.f32 %v14937_v16, %v8166_v4 }
 0x6f3   :  { %v8320_v40 = vadd.f32 %v14979_v10, %v8252_v61 }
 0x6f5   :  { %v8384_v31 = vadd.f32 %v8844_v1, %v8320_v40  ;;  %v8854_v40 = vld [vmem:[%s15129_s0 + $0x178] sm:$0xff] }
 0x6f7   :  { %v8448_v35 = vmax.f32 %v8384_v31, 0.0 }
 0x6f8   :  { %v8169_v36 = vpop.f32.mrf.mxu3 }
 0x6f9   :  { %8512 = vst.msk [vmem:[%s15138_s10 + $0x1b8] sm:$0xff] %vm17580_vm10, %v8448_v35  ;;  %v8253_v63 = vmul.f32 %v14937_v16, %v8169_v36 }
 0x6fb   :  { %v8321_v42 = vadd.f32 %v14979_v10, %v8253_v63  ;;  %v8133_v62 = vpop.f32.mrf.mxu2 }
 0x6fc   :  { %v8241_v19 = vmul.f32 %v14937_v16, %v8133_v62 }
 0x6fd   :  { %v8385_v55 = vadd.f32 %v8845_v43, %v8321_v42  ;;  %v8855_v42 = vld [vmem:[%s15129_s0 + $0x1f0] sm:$0xff] }
 0x6fe   :  { %v8309_v54 = vadd.f32 %v14979_v10, %v8241_v19 }
 0x6ff   :  { %v8449_v56 = vmax.f32 %v8385_v55, 0.0 }
 0x700   :  { %v8373_v45 = vadd.f32 %v8846_v22, %v8309_v54  ;;  %v8172_v41 = vpop.f32.mrf.mxu3  ;;  %v8856_v54 = vld [vmem:[%s15129_s0 + $0x180] sm:$0xff] }
 0x701   :  { %8513 = vst.msk [vmem:[%s15138_s10 + $0x1c0] sm:$0xff] %vm17581_vm14, %v8449_v56  ;;  %v8254_v5 = vmul.f32 %v14937_v16, %v8172_v41 }
 0x702   :  { %v8437_v23 = vmax.f32 %v8373_v45, 0.0 }
 0x703   :  { %v8322_v53 = vadd.f32 %v14979_v10, %v8254_v5 }
 0x704   :  { %8501 = vst.msk [vmem:[%s15138_s10 + $0x160] sm:$0xff] %vm17567_vm0, %v8437_v23  ;;  %v8857_v23 = vld [vmem:[%s15129_s0 + $0x1f8] sm:$0xff] }
 0x705   :  { %v8386_v30 = vadd.f32 %v8847_v27, %v8322_v53 }
 0x707   :  { %v8450_v9 = vmax.f32 %v8386_v30, 0.0 }
 0x708   :  { %v8175_v15 = vpop.f32.mrf.mxu3 }
 0x709   :  { %8514 = vst.msk [vmem:[%s15138_s10 + $0x1c8] sm:$0xff] %vm17582_vm1, %v8450_v9  ;;  %v8255_v11 = vmul.f32 %v14937_v16, %v8175_v15 }
 0x70b   :  { %v8323_v51 = vadd.f32 %v14979_v10, %v8255_v11 }
 0x70c   :  { %v8136_v3 = vpop.f32.mrf.mxu2 }
 0x70d   :  { %v8387_v48 = vadd.f32 %v8848_v59, %v8323_v51  ;;  %v8242_v26 = vmul.f32 %v14937_v16, %v8136_v3 }
 0x70f   :  { %v8451_v29 = vmax.f32 %v8387_v48, 0.0  ;;  %v8310_v47 = vadd.f32 %v14979_v10, %v8242_v26 }
 0x710   :  { %v8178_v39 = vpop.f32.mrf.mxu3 }
 0x711   :  { %8515 = vst.msk [vmem:[%s15138_s10 + $0x1d0] sm:$0xff] %vm17583_vm3, %v8451_v29  ;;  %v8374_v57 = vadd.f32 %v8849_v38, %v8310_v47  ;;  %v8256_v60 = vmul.f32 %v14937_v16, %v8178_v39 }
 0x713   :  { %v8438_v32 = vmax.f32 %v8374_v57, 0.0  ;;  %v8324_v14 = vadd.f32 %v14979_v10, %v8256_v60 }
 0x715   :  { %8502 = vst.msk [vmem:[%s15138_s10 + $0x168] sm:$0xff] %vm17584_vm2, %v8438_v32  ;;  %v8388_v49 = vadd.f32 %v8850_v33, %v8324_v14 }
 0x717   :  { %v8452_v12 = vmax.f32 %v8388_v49, 0.0 }
 0x718   :  { %v8181_v0 = vpop.f32.mrf.mxu3 }
 0x719   :  { %8516 = vst.msk [vmem:[%s15138_s10 + $0x1d8] sm:$0xff] %vm17585_vm9, %v8452_v12  ;;  %v8257_v34 = vmul.f32 %v14937_v16, %v8181_v0 }
 0x71b   :  { %v8325_v50 = vadd.f32 %v14979_v10, %v8257_v34 }
 0x71d   :  { %v8389_v6 = vadd.f32 %v8851_v8, %v8325_v50  ;;  %v8139_v46 = vpop.f32.mrf.mxu2 }
 0x71e   :  { %v8243_v18 = vmul.f32 %v14937_v16, %v8139_v46 }
 0x71f   :  { %v8453_v24 = vmax.f32 %v8389_v6, 0.0 }
 0x720   :  { %v8311_v28 = vadd.f32 %v14979_v10, %v8243_v18  ;;  %v8184_v7 = vpop.f32.mrf.mxu3 }
 0x721   :  { %8517 = vst.msk [vmem:[%s15138_s10 + $0x1e0] sm:$0xff] %vm17586_vm12, %v8453_v24  ;;  %v8258_v25 = vmul.f32 %v14937_v16, %v8184_v7 }
 0x722   :  { %v8375_v17 = vadd.f32 %v8852_v20, %v8311_v28 }
 0x723   :  { %v8326_v37 = vadd.f32 %v14979_v10, %v8258_v25 }
 0x724   :  { %v8439_v58 = vmax.f32 %v8375_v17, 0.0 }
 0x725   :  { %v8390_v2 = vadd.f32 %v8853_v13, %v8326_v37 }
 0x726   :  { %8503 = vst.msk [vmem:[%s15138_s10 + $0x170] sm:$0xff] %vm17587_vm8, %v8439_v58 }
 0x727   :  { %v8454_v44 = vmax.f32 %v8390_v2, 0.0 }
 0x729   :  { %8518 = vst.msk [vmem:[%s15138_s10 + $0x1e8] sm:$0xff] %vm17588_vm7, %v8454_v44 }
 0x72e   :  { %v8142_v52 = vpop.f32.mrf.mxu2 }
 0x72f   :  { %v8244_v21 = vmul.f32 %v14937_v16, %v8142_v52 }
 0x731   :  { %v8312_v4 = vadd.f32 %v14979_v10, %v8244_v21  ;;  %v8187_v61 = vpop.f32.mrf.mxu3 }
 0x732   :  { %v8259_v31 = vmul.f32 %v14937_v16, %v8187_v61 }
 0x733   :  { %v8376_v1 = vadd.f32 %v8854_v40, %v8312_v4 }
 0x734   :  { %v8327_v36 = vadd.f32 %v14979_v10, %v8259_v31 }
 0x735   :  { %v8440_v35 = vmax.f32 %v8376_v1, 0.0 }
 0x736   :  { %v8145_v63 = vpop.f32.mrf.mxu2  ;;  %v8391_v62 = vadd.f32 %v8855_v42, %v8327_v36 }
 0x737   :  { %8504 = vst.msk [vmem:[%s15138_s10 + $0x178] sm:$0xff] %vm17589_vm15, %v8440_v35  ;;  %v8245_v19 = vmul.f32 %v14937_v16, %v8145_v63 }
 0x738   :  { %v8455_v43 = vmax.f32 %v8391_v62, 0.0 }
 0x739   :  { %v8313_v55 = vadd.f32 %v14979_v10, %v8245_v19 }
 0x73a   :  { %8519 = vst.msk [vmem:[%s15138_s10 + $0x1f0] sm:$0xff] %vm17590_vm6, %v8455_v43 }
 0x73b   :  { %v8377_v56 = vadd.f32 %v8856_v54, %v8313_v55 }
 0x73d   :  { %v8441_v22 = vmax.f32 %v8377_v56, 0.0 }
 0x73f   :  { %8505 = vst.msk [vmem:[%s15138_s10 + $0x180] sm:$0xff] %vm17591_vm11, %v8441_v22 }
 0x742   :  { %v8190_v45 = vpop.f32.mrf.mxu3 }
 0x743   :  { %v8260_v41 = vmul.f32 %v14937_v16, %v8190_v45 }
 0x745   :  { %v8328_v5 = vadd.f32 %v14979_v10, %v8260_v41 }
 0x747   :  { %v8392_v53 = vadd.f32 %v8857_v23, %v8328_v5 }
 0x749   :  { %v8456_v27 = vmax.f32 %v8392_v53, 0.0 }
 0x74b   :  { %8520 = vst.msk [vmem:[%s15138_s10 + $0x1f8] sm:$0xff] %vm17592_vm13, %v8456_v27 }

</bundles_post_ra>
